<compile_context>
chip_gen: v5e
topology: v5e:2x2
jax: 0.10.0
libtpu: 0.0.40
codegen_flags: <defaults>
</compile_context>

<pallas_src>
import functools

import numpy as np
import jax
import jax.numpy as jnp
from jax.experimental import pallas as pl
from jax.experimental.pallas import tpu as pltpu

_EPS = 1e-5  # torch.nn.InstanceNorm2d default eps


# --------------------------------------------------------------------------------------
# in-kernel helpers
# --------------------------------------------------------------------------------------
def _gelu_exact(x):
    # torch.nn.GELU() default (approximate='none'): 0.5*x*(1+erf(x/sqrt(2))).
    # erf via Abramowitz & Stegun 7.1.26 polynomial; the reciprocal and exp run on the EUP.
    a1, a2, a3, a4, a5 = 0.254829592, -0.284496736, 1.421413741, -1.453152027, 1.061405429
    p = 0.3275911
    z = x * 0.7071067811865476
    az = jnp.abs(z)
    t = pl.reciprocal(1.0 + p * az, approx=True)
    poly = ((((a5 * t + a4) * t + a3) * t + a2) * t + a1) * t
    erf_abs = 1.0 - poly * jnp.exp(-az * az)
    erf = jnp.where(z < 0.0, -erf_abs, erf_abs)
    return 0.5 * x * (1.0 + erf)


def _fused_resconv_kernel(x_ref, m_ref, s_ref, q_ref, g_ref, b_ref, out_ref, *, nblocks):
    """Whole ResConvPure2D forward for one batch sample, all intermediates VMEM-resident.

    x_ref  : (1, H, W*C)            f32   lane-dense activation, lanes = (x, c)
    m_ref  : (nconv, W*C, 3*W*C)    bf16  per-conv [M_dy0 | M_dy1 | M_dy2] band matrices
    s_ref  : (2, H, H)              f32   H-direction replicate-shift matrices (dy=0, dy=2)
    q_ref  : (W*C, W*C)             f32   channel-group averaging projector (incl. 1/(H*W))
    g_ref  : (nconv, 1, W*C)        f32   gamma broadcast to lanes
    b_ref  : (nconv, 1, W*C)        f32   beta broadcast to lanes
    out_ref: (1, H, W*C)            f32
    """
    wc = q_ref.shape[0]
    a = x_ref[0]                       # (H, W*C) f32, fully lane-dense (128 live lanes)
    q = q_ref[...]
    s0 = s_ref[0]                      # dy = 0 (row y-1, clamped)
    s2 = s_ref[1]                      # dy = 2 (row y+1, clamped)

    def conv_in(v, idx):
        # 3x3 replicate-padded conv (bias=False) + InstanceNorm2d(affine), conv #idx.
        # conv = S_0 @ (v @ M_0) + (v @ M_1) + S_2 @ (v @ M_2); bf16 operands, f32 accum.
        big = jnp.dot(v.astype(jnp.bfloat16), m_ref[idx],
                      preferred_element_type=jnp.float32)          # (H, 3*W*C)
        acc = (big[:, wc:2 * wc]                                   # dy=1, S_1 = identity
               + jnp.dot(s0, big[:, 0:wc], preferred_element_type=jnp.float32)
               + jnp.dot(s2, big[:, 2 * wc:3 * wc], preferred_element_type=jnp.float32))
        # InstanceNorm2d: per-(sample, channel) stats over H*W, biased variance.
        # Single pass: var = E[x^2] - mean^2 (fine at this tolerance; slightly less stable).
        colsum = jnp.sum(acc, axis=0, keepdims=True)               # (1, W*C)
        sqsum = jnp.sum(acc * acc, axis=0, keepdims=True)
        mean_l = jnp.dot(colsum, q, preferred_element_type=jnp.float32)   # per-channel mean,
        msq_l = jnp.dot(sqsum, q, preferred_element_type=jnp.float32)     # broadcast to lanes
        var_l = msq_l - mean_l * mean_l
        scale = g_ref[idx] * jax.lax.rsqrt(var_l + _EPS)           # gamma folded into scale
        shift = b_ref[idx] - mean_l * scale
        return acc * scale + shift

    for blk in range(nblocks):
        # residual is `a` itself (channels already zero-padded to Cout in the wrapper,
        # which is exactly the PyTorch x_init), so no zeros tensor is ever materialized.
        h = _gelu_exact(conv_in(a, 2 * blk))                       # conv1 / IN1 / GELU
        y = conv_in(h, 2 * blk + 1)                                # conv2 / IN2
        a = _gelu_exact(a + y)                                     # + residual, GELU
    out_ref[0] = a


# --------------------------------------------------------------------------------------
# wrapper: parameter preprocessing (host/XLA side, trace-time constants via numpy)
# --------------------------------------------------------------------------------------
def _prepare_operands(block_params, H, W):
    Cout = block_params[0]["w1"].shape[-1]

    # T[dx, x_in, x] = 1 iff x_in == clamp(x + dx - 1)  (folds W-direction replicate pad)
    T = np.zeros((3, W, W), np.float32)
    for dx in range(3):
        for x in range(W):
            T[dx, min(max(x + dx - 1, 0), W - 1), x] = 1.0
    # S[k, y, y'] = 1 iff y' == clamp(y + dy - 1), dy in (0, 2)  (H-direction replicate pad)
    S = np.zeros((2, H, H), np.float32)
    for k, dy in enumerate((0, 2)):
        for y in range(H):
            S[k, y, min(max(y + dy - 1, 0), H - 1)] = 1.0
    # Q: averages each channel over its W lane-group and all rows, re-broadcast to lanes.
    Q = np.kron(np.ones((W, W), np.float32), np.eye(Cout, dtype=np.float32)) / float(H * W)

    def conv_mat(w):  # w: (3, 3, cin, Cout) HWIO
        ci = w.shape[2]
        if ci < Cout:  # zero-pad input channels (matches zero-padded residual input)
            w = jnp.pad(w, ((0, 0), (0, 0), (0, Cout - ci), (0, 0)))
        m = jnp.einsum("dab,ydco->yacbo", T, w)          # (3_dy, W, C, W, Cout)
        m = m.reshape(3, W * Cout, W * Cout)
        return jnp.concatenate([m[0], m[1], m[2]], axis=1)   # (W*C, 3*W*C)

    m_all = jnp.stack([conv_mat(p[k]) for p in block_params
                       for k in ("w1", "w2")]).astype(jnp.bfloat16)
    g_all = jnp.stack([jnp.tile(p[k].reshape(-1), W).reshape(1, W * Cout)
                       for p in block_params for k in ("g1", "g2")]).astype(jnp.float32)
    b_all = jnp.stack([jnp.tile(p[k].reshape(-1), W).reshape(1, W * Cout)
                       for p in block_params for k in ("b1", "b2")]).astype(jnp.float32)
    return m_all, jnp.asarray(S), jnp.asarray(Q), g_all, b_all


def res_conv_pure_2d_forward(x, block_params):
    """x: (N, H, W, Cin) f32.  Whole network in one pallas_call, grid parallel over N."""
    N, H, W, Cin = x.shape
    Cout = block_params[0]["w1"].shape[-1]
    if Cin < Cout:  # == PyTorch x_init channel zero-pad of the first block
        x = jnp.pad(x, ((0, 0), (0, 0), (0, 0), (0, Cout - Cin)))
    x_lanes = x.reshape(N, H, W * Cout)                    # lane-dense: lanes = (x, c)

    m_all, s_mats, q_mat, g_all, b_all = _prepare_operands(block_params, H, W)
    nblocks = len(block_params)
    nconv = 2 * nblocks
    WC = W * Cout

    out = pl.pallas_call(
        functools.partial(_fused_resconv_kernel, nblocks=nblocks),
        out_shape=jax.ShapeDtypeStruct((N, H, WC), jnp.float32),
        grid=(N,),
        in_specs=[
            pl.BlockSpec((1, H, WC), lambda n: (n, 0, 0)),
            pl.BlockSpec((nconv, WC, 3 * WC), lambda n: (0, 0, 0)),
            pl.BlockSpec((2, H, H), lambda n: (0, 0, 0)),
            pl.BlockSpec((WC, WC), lambda n: (0, 0)),
            pl.BlockSpec((nconv, 1, WC), lambda n: (0, 0, 0)),
            pl.BlockSpec((nconv, 1, WC), lambda n: (0, 0, 0)),
        ],
        out_specs=pl.BlockSpec((1, H, WC), lambda n: (n, 0, 0)),
        compiler_params=pltpu.CompilerParams(
            dimension_semantics=("parallel",),   # keep batch axis parallel for v7x megacore
        ),
    )(x_lanes, m_all, s_mats, q_mat, g_all, b_all)
    return out.reshape(N, H, W, Cout)
    # TODO(synk): downsample=True (AvgPool2d residual + reflect-pad stride-2 conv),
    # bottleneck_factor>1 (1x1 convs + grouped 3x3 + third norm) and squeeze_excitation
    # branches are not exercised by this synthetic config and are not implemented.


def init_block_params(key, cin, cout):
    k1, k2, k3, k4, k5, k6 = jax.random.split(key, 6)
    return {
        "w1": 0.1 * jax.random.normal(k1, (3, 3, cin, cout), jnp.float32),
        "g1": 1.0 + 0.1 * jax.random.normal(k2, (1, cout), jnp.float32),
        "b1": 0.1 * jax.random.normal(k3, (1, cout), jnp.float32),
        "w2": 0.1 * jax.random.normal(k4, (3, 3, cout, cout), jnp.float32),
        "g2": 1.0 + 0.1 * jax.random.normal(k5, (1, cout), jnp.float32),
        "b2": 0.1 * jax.random.normal(k6, (1, cout), jnp.float32),
    }


# --------------------------- pure-JAX reference (sanity check) -------------------------
def _ref_conv(x, w):
    xp = jnp.pad(x, ((0, 0), (1, 1), (1, 1), (0, 0)), mode="edge")
    return jax.lax.conv_general_dilated(
        xp, w, (1, 1), "VALID", dimension_numbers=("NHWC", "HWIO", "NHWC"))


def _ref_inorm(x, g, b):
    m = jnp.mean(x, axis=(1, 2), keepdims=True)
    v = jnp.mean((x - m) ** 2, axis=(1, 2), keepdims=True)
    return (x - m) * jax.lax.rsqrt(v + _EPS) * g.reshape(1, 1, 1, -1) + b.reshape(1, 1, 1, -1)


def _ref_block(x, p):
    N, H, W, Cin = x.shape
    Cout = p["w1"].shape[-1]
    x_init = jnp.pad(x, ((0, 0), (0, 0), (0, 0), (0, Cout - Cin))) if Cin < Cout else x
    h = jax.nn.gelu(_ref_inorm(_ref_conv(x, p["w1"]), p["g1"], p["b1"]), approximate=False)
    y = _ref_inorm(_ref_conv(h, p["w2"]), p["g2"], p["b2"])
    return jax.nn.gelu(x_init + y, approximate=False)


def _ref_forward(x, block_params):
    for p in block_params:
        x = _ref_block(x, p)
    return x


if __name__ == "__main__":
    # Small config: in_channels=4, out_channels=8, blocks=2, N=2, H=W=16
    N, H, W = 2, 16, 16
    in_channels, out_channels, blocks = 4, 8, 2

    key = jax.random.PRNGKey(0)
    kx, kp = jax.random.split(key)
    x = jax.random.normal(kx, (N, H, W, in_channels), jnp.float32)

    pkeys = jax.random.split(kp, blocks)
    block_params = [init_block_params(pkeys[0], in_channels, out_channels)]
    for k in range(1, blocks):
        block_params.append(init_block_params(pkeys[k], out_channels, out_channels))

    fwd = jax.jit(res_conv_pure_2d_forward)
    out = jax.block_until_ready(fwd(x, block_params))
    ref = jax.block_until_ready(_ref_forward(x, block_params))

    assert out.shape == (N, H, W, out_channels)
    assert bool(jnp.all(jnp.isfinite(out)))
    # bf16 conv operands (f32 accumulation) -> compare with a mixed abs/rel criterion.
    err = float(jnp.max(jnp.abs(out - ref) / (1.0 + jnp.abs(ref))))
    assert err < 3e-2, err
    print("KERNEL_OK")
</pallas_src>

<mosaic_0001>
module attributes {stable_mosaic.version = 11 : i64} {
  func.func @_fused_resconv_kernel(%arg0: i32, %arg1: memref<1x16x128xf32, #tpu.memory_space<vmem>>, %arg2: memref<4x128x384xbf16, #tpu.memory_space<vmem>>, %arg3: memref<2x16x16xf32, #tpu.memory_space<vmem>>, %arg4: memref<128x128xf32, #tpu.memory_space<vmem>>, %arg5: memref<4x1x128xf32, #tpu.memory_space<vmem>>, %arg6: memref<4x1x128xf32, #tpu.memory_space<vmem>>, %arg7: memref<1x16x128xf32, #tpu.memory_space<vmem>>) attributes {dimension_semantics = [#tpu.dimension_semantics<parallel>], iteration_bounds = array<i64: 2>, scalar_prefetch = 0 : i64, scratch_operands = 0 : i64, tpu.core_type = #tpu.core_type<tc>, window_params = [{transform_indices = @transform_0, window_bounds = array<i64: 1, 16, 128>}, {pipeline_mode = #tpu.pipeline_mode<synchronous>, transform_indices = @transform_1, window_bounds = array<i64: 4, 128, 384>}, {pipeline_mode = #tpu.pipeline_mode<synchronous>, transform_indices = @transform_2, window_bounds = array<i64: 2, 16, 16>}, {pipeline_mode = #tpu.pipeline_mode<synchronous>, transform_indices = @transform_3, window_bounds = array<i64: 128, 128>}, {pipeline_mode = #tpu.pipeline_mode<synchronous>, transform_indices = @transform_4, window_bounds = array<i64: 4, 1, 128>}, {pipeline_mode = #tpu.pipeline_mode<synchronous>, transform_indices = @transform_5, window_bounds = array<i64: 4, 1, 128>}, {transform_indices = @transform_6, window_bounds = array<i64: 1, 16, 128>}]} {
    %c0 = arith.constant 0 : index
    %c0_0 = arith.constant 0 : index
    %c0_1 = arith.constant 0 : index
    %0 = vector.load %arg1[%c0, %c0_0, %c0_1] : memref<1x16x128xf32, #tpu.memory_space<vmem>>, vector<1x16x128xf32>
    %1 = vector.shape_cast %0 : vector<1x16x128xf32> to vector<16x128xf32>
    %c0_2 = arith.constant 0 : index
    %c0_3 = arith.constant 0 : index
    %2 = vector.load %arg4[%c0_2, %c0_3] : memref<128x128xf32, #tpu.memory_space<vmem>>, vector<128x128xf32>
    %c0_4 = arith.constant 0 : index
    %c0_5 = arith.constant 0 : index
    %c0_6 = arith.constant 0 : index
    %3 = vector.load %arg3[%c0_4, %c0_5, %c0_6] : memref<2x16x16xf32, #tpu.memory_space<vmem>>, vector<1x16x16xf32>
    %4 = vector.shape_cast %3 : vector<1x16x16xf32> to vector<16x16xf32>
    %c1 = arith.constant 1 : index
    %c0_7 = arith.constant 0 : index
    %c0_8 = arith.constant 0 : index
    %5 = vector.load %arg3[%c1, %c0_7, %c0_8] : memref<2x16x16xf32, #tpu.memory_space<vmem>>, vector<1x16x16xf32>
    %6 = vector.shape_cast %5 : vector<1x16x16xf32> to vector<16x16xf32>
    %7 = arith.truncf %1 : vector<16x128xf32> to vector<16x128xbf16>
    %c0_9 = arith.constant 0 : index
    %c0_10 = arith.constant 0 : index
    %c0_11 = arith.constant 0 : index
    %8 = vector.load %arg2[%c0_9, %c0_10, %c0_11] : memref<4x128x384xbf16, #tpu.memory_space<vmem>>, vector<1x128x384xbf16>
    %9 = vector.shape_cast %8 : vector<1x128x384xbf16> to vector<128x384xbf16>
    %cst = arith.constant dense<0.000000e+00> : vector<16x384xf32>
    %10 = tpu.matmul %7, %9, %cst {dimension_numbers = #tpu.dot_dimension_numbers<[1], [0], [0], [1], [0, 0, 1, 1], [], []>} : vector<16x128xbf16>, vector<128x384xbf16>, vector<16x384xf32> -> vector<16x384xf32>
    %11 = vector.extract_strided_slice %10 {offsets = [0, 128], sizes = [16, 128], strides = [1, 1]} : vector<16x384xf32> to vector<16x128xf32>
    %12 = vector.extract_strided_slice %10 {offsets = [0, 0], sizes = [16, 128], strides = [1, 1]} : vector<16x384xf32> to vector<16x128xf32>
    %cst_12 = arith.constant dense<0.000000e+00> : vector<16x128xf32>
    %13 = tpu.matmul %4, %12, %cst_12 {dimension_numbers = #tpu.dot_dimension_numbers<[1], [0], [0], [1], [0, 0, 1, 1], [], []>} : vector<16x16xf32>, vector<16x128xf32>, vector<16x128xf32> -> vector<16x128xf32>
    %14 = arith.addf %11, %13 : vector<16x128xf32>
    %15 = vector.extract_strided_slice %10 {offsets = [0, 256], sizes = [16, 128], strides = [1, 1]} : vector<16x384xf32> to vector<16x128xf32>
    %cst_13 = arith.constant dense<0.000000e+00> : vector<16x128xf32>
    %16 = tpu.matmul %6, %15, %cst_13 {dimension_numbers = #tpu.dot_dimension_numbers<[1], [0], [0], [1], [0, 0, 1, 1], [], []>} : vector<16x16xf32>, vector<16x128xf32>, vector<16x128xf32> -> vector<16x128xf32>
    %17 = arith.addf %14, %16 : vector<16x128xf32>
    %cst_14 = arith.constant dense<0.000000e+00> : vector<128xf32>
    %18 = vector.multi_reduction <add>, %17, %cst_14 [0] : vector<16x128xf32> to vector<128xf32>
    %19 = vector.shape_cast %18 : vector<128xf32> to vector<1x128xf32>
    %20 = arith.mulf %17, %17 : vector<16x128xf32>
    %cst_15 = arith.constant dense<0.000000e+00> : vector<128xf32>
    %21 = vector.multi_reduction <add>, %20, %cst_15 [0] : vector<16x128xf32> to vector<128xf32>
    %22 = vector.shape_cast %21 : vector<128xf32> to vector<1x128xf32>
    %cst_16 = arith.constant dense<0.000000e+00> : vector<1x128xf32>
    %23 = tpu.matmul %19, %2, %cst_16 {dimension_numbers = #tpu.dot_dimension_numbers<[1], [0], [0], [1], [0, 0, 1, 1], [], []>} : vector<1x128xf32>, vector<128x128xf32>, vector<1x128xf32> -> vector<1x128xf32>
    %cst_17 = arith.constant dense<0.000000e+00> : vector<1x128xf32>
    %24 = tpu.matmul %22, %2, %cst_17 {dimension_numbers = #tpu.dot_dimension_numbers<[1], [0], [0], [1], [0, 0, 1, 1], [], []>} : vector<1x128xf32>, vector<128x128xf32>, vector<1x128xf32> -> vector<1x128xf32>
    %25 = arith.mulf %23, %23 : vector<1x128xf32>
    %26 = arith.subf %24, %25 : vector<1x128xf32>
    %c0_18 = arith.constant 0 : index
    %c0_19 = arith.constant 0 : index
    %c0_20 = arith.constant 0 : index
    %27 = vector.load %arg5[%c0_18, %c0_19, %c0_20] : memref<4x1x128xf32, #tpu.memory_space<vmem>>, vector<1x1x128xf32>
    %28 = vector.shape_cast %27 : vector<1x1x128xf32> to vector<1x128xf32>
    %cst_21 = arith.constant 9.99999974E-6 : f32
    %29 = vector.broadcast %cst_21 : f32 to vector<1x128xf32>
    %30 = arith.addf %26, %29 : vector<1x128xf32>
    %31 = math.rsqrt %30 : vector<1x128xf32>
    %32 = arith.mulf %28, %31 : vector<1x128xf32>
    %c0_22 = arith.constant 0 : index
    %c0_23 = arith.constant 0 : index
    %c0_24 = arith.constant 0 : index
    %33 = vector.load %arg6[%c0_22, %c0_23, %c0_24] : memref<4x1x128xf32, #tpu.memory_space<vmem>>, vector<1x1x128xf32>
    %34 = vector.shape_cast %33 : vector<1x1x128xf32> to vector<1x128xf32>
    %35 = arith.mulf %23, %32 : vector<1x128xf32>
    %36 = arith.subf %34, %35 : vector<1x128xf32>
    %37 = vector.broadcast %32 : vector<1x128xf32> to vector<16x128xf32>
    %38 = arith.mulf %17, %37 : vector<16x128xf32>
    %39 = vector.broadcast %36 : vector<1x128xf32> to vector<16x128xf32>
    %40 = arith.addf %38, %39 : vector<16x128xf32>
    %cst_25 = arith.constant 0.707106769 : f32
    %41 = vector.broadcast %cst_25 : f32 to vector<16x128xf32>
    %42 = arith.mulf %40, %41 : vector<16x128xf32>
    %43 = math.absf %42 : vector<16x128xf32>
    %cst_26 = arith.constant 0.327591091 : f32
    %44 = vector.broadcast %cst_26 : f32 to vector<16x128xf32>
    %45 = arith.mulf %44, %43 : vector<16x128xf32>
    %cst_27 = arith.constant 1.000000e+00 : f32
    %46 = vector.broadcast %cst_27 : f32 to vector<16x128xf32>
    %47 = arith.addf %46, %45 : vector<16x128xf32>
    %48 = tpu.reciprocal %47 {approx = true} : vector<16x128xf32> -> vector<16x128xf32>
    %cst_28 = arith.constant 1.06140542 : f32
    %49 = vector.broadcast %cst_28 : f32 to vector<16x128xf32>
    %50 = arith.mulf %49, %48 : vector<16x128xf32>
    %cst_29 = arith.constant -1.45315206 : f32
    %51 = vector.broadcast %cst_29 : f32 to vector<16x128xf32>
    %52 = arith.addf %50, %51 : vector<16x128xf32>
    %53 = arith.mulf %52, %48 : vector<16x128xf32>
    %cst_30 = arith.constant 1.42141378 : f32
    %54 = vector.broadcast %cst_30 : f32 to vector<16x128xf32>
    %55 = arith.addf %53, %54 : vector<16x128xf32>
    %56 = arith.mulf %55, %48 : vector<16x128xf32>
    %cst_31 = arith.constant -0.284496725 : f32
    %57 = vector.broadcast %cst_31 : f32 to vector<16x128xf32>
    %58 = arith.addf %56, %57 : vector<16x128xf32>
    %59 = arith.mulf %58, %48 : vector<16x128xf32>
    %cst_32 = arith.constant 0.254829586 : f32
    %60 = vector.broadcast %cst_32 : f32 to vector<16x128xf32>
    %61 = arith.addf %59, %60 : vector<16x128xf32>
    %62 = arith.mulf %61, %48 : vector<16x128xf32>
    %cst_33 = arith.constant 0.000000e+00 : f32
    %63 = vector.broadcast %cst_33 : f32 to vector<16x128xf32>
    %64 = arith.subf %63, %43 : vector<16x128xf32>
    %65 = arith.mulf %64, %43 : vector<16x128xf32>
    %66 = math.exp %65 : vector<16x128xf32>
    %67 = arith.mulf %62, %66 : vector<16x128xf32>
    %cst_34 = arith.constant 1.000000e+00 : f32
    %68 = vector.broadcast %cst_34 : f32 to vector<16x128xf32>
    %69 = arith.subf %68, %67 : vector<16x128xf32>
    %cst_35 = arith.constant 0.000000e+00 : f32
    %70 = vector.broadcast %cst_35 : f32 to vector<16x128xf32>
    %71 = arith.cmpf olt, %42, %70 : vector<16x128xf32>
    %cst_36 = arith.constant 0.000000e+00 : f32
    %72 = vector.broadcast %cst_36 : f32 to vector<16x128xf32>
    %73 = arith.subf %72, %69 : vector<16x128xf32>
    %74 = arith.select %71, %73, %69 : vector<16x128xi1>, vector<16x128xf32>
    %cst_37 = arith.constant 5.000000e-01 : f32
    %75 = vector.broadcast %cst_37 : f32 to vector<16x128xf32>
    %76 = arith.mulf %75, %40 : vector<16x128xf32>
    %cst_38 = arith.constant 1.000000e+00 : f32
    %77 = vector.broadcast %cst_38 : f32 to vector<16x128xf32>
    %78 = arith.addf %77, %74 : vector<16x128xf32>
    %79 = arith.mulf %76, %78 : vector<16x128xf32>
    %80 = arith.truncf %79 : vector<16x128xf32> to vector<16x128xbf16>
    %c1_39 = arith.constant 1 : index
    %c0_40 = arith.constant 0 : index
    %c0_41 = arith.constant 0 : index
    %81 = vector.load %arg2[%c1_39, %c0_40, %c0_41] : memref<4x128x384xbf16, #tpu.memory_space<vmem>>, vector<1x128x384xbf16>
    %82 = vector.shape_cast %81 : vector<1x128x384xbf16> to vector<128x384xbf16>
    %cst_42 = arith.constant dense<0.000000e+00> : vector<16x384xf32>
    %83 = tpu.matmul %80, %82, %cst_42 {dimension_numbers = #tpu.dot_dimension_numbers<[1], [0], [0], [1], [0, 0, 1, 1], [], []>} : vector<16x128xbf16>, vector<128x384xbf16>, vector<16x384xf32> -> vector<16x384xf32>
    %84 = vector.extract_strided_slice %83 {offsets = [0, 128], sizes = [16, 128], strides = [1, 1]} : vector<16x384xf32> to vector<16x128xf32>
    %85 = vector.extract_strided_slice %83 {offsets = [0, 0], sizes = [16, 128], strides = [1, 1]} : vector<16x384xf32> to vector<16x128xf32>
    %cst_43 = arith.constant dense<0.000000e+00> : vector<16x128xf32>
    %86 = tpu.matmul %4, %85, %cst_43 {dimension_numbers = #tpu.dot_dimension_numbers<[1], [0], [0], [1], [0, 0, 1, 1], [], []>} : vector<16x16xf32>, vector<16x128xf32>, vector<16x128xf32> -> vector<16x128xf32>
    %87 = arith.addf %84, %86 : vector<16x128xf32>
    %88 = vector.extract_strided_slice %83 {offsets = [0, 256], sizes = [16, 128], strides = [1, 1]} : vector<16x384xf32> to vector<16x128xf32>
    %cst_44 = arith.constant dense<0.000000e+00> : vector<16x128xf32>
    %89 = tpu.matmul %6, %88, %cst_44 {dimension_numbers = #tpu.dot_dimension_numbers<[1], [0], [0], [1], [0, 0, 1, 1], [], []>} : vector<16x16xf32>, vector<16x128xf32>, vector<16x128xf32> -> vector<16x128xf32>
    %90 = arith.addf %87, %89 : vector<16x128xf32>
    %cst_45 = arith.constant dense<0.000000e+00> : vector<128xf32>
    %91 = vector.multi_reduction <add>, %90, %cst_45 [0] : vector<16x128xf32> to vector<128xf32>
    %92 = vector.shape_cast %91 : vector<128xf32> to vector<1x128xf32>
    %93 = arith.mulf %90, %90 : vector<16x128xf32>
    %cst_46 = arith.constant dense<0.000000e+00> : vector<128xf32>
    %94 = vector.multi_reduction <add>, %93, %cst_46 [0] : vector<16x128xf32> to vector<128xf32>
    %95 = vector.shape_cast %94 : vector<128xf32> to vector<1x128xf32>
    %cst_47 = arith.constant dense<0.000000e+00> : vector<1x128xf32>
    %96 = tpu.matmul %92, %2, %cst_47 {dimension_numbers = #tpu.dot_dimension_numbers<[1], [0], [0], [1], [0, 0, 1, 1], [], []>} : vector<1x128xf32>, vector<128x128xf32>, vector<1x128xf32> -> vector<1x128xf32>
    %cst_48 = arith.constant dense<0.000000e+00> : vector<1x128xf32>
    %97 = tpu.matmul %95, %2, %cst_48 {dimension_numbers = #tpu.dot_dimension_numbers<[1], [0], [0], [1], [0, 0, 1, 1], [], []>} : vector<1x128xf32>, vector<128x128xf32>, vector<1x128xf32> -> vector<1x128xf32>
    %98 = arith.mulf %96, %96 : vector<1x128xf32>
    %99 = arith.subf %97, %98 : vector<1x128xf32>
    %c1_49 = arith.constant 1 : index
    %c0_50 = arith.constant 0 : index
    %c0_51 = arith.constant 0 : index
    %100 = vector.load %arg5[%c1_49, %c0_50, %c0_51] : memref<4x1x128xf32, #tpu.memory_space<vmem>>, vector<1x1x128xf32>
    %101 = vector.shape_cast %100 : vector<1x1x128xf32> to vector<1x128xf32>
    %cst_52 = arith.constant 9.99999974E-6 : f32
    %102 = vector.broadcast %cst_52 : f32 to vector<1x128xf32>
    %103 = arith.addf %99, %102 : vector<1x128xf32>
    %104 = math.rsqrt %103 : vector<1x128xf32>
    %105 = arith.mulf %101, %104 : vector<1x128xf32>
    %c1_53 = arith.constant 1 : index
    %c0_54 = arith.constant 0 : index
    %c0_55 = arith.constant 0 : index
    %106 = vector.load %arg6[%c1_53, %c0_54, %c0_55] : memref<4x1x128xf32, #tpu.memory_space<vmem>>, vector<1x1x128xf32>
    %107 = vector.shape_cast %106 : vector<1x1x128xf32> to vector<1x128xf32>
    %108 = arith.mulf %96, %105 : vector<1x128xf32>
    %109 = arith.subf %107, %108 : vector<1x128xf32>
    %110 = vector.broadcast %105 : vector<1x128xf32> to vector<16x128xf32>
    %111 = arith.mulf %90, %110 : vector<16x128xf32>
    %112 = vector.broadcast %109 : vector<1x128xf32> to vector<16x128xf32>
    %113 = arith.addf %111, %112 : vector<16x128xf32>
    %114 = arith.addf %1, %113 : vector<16x128xf32>
    %cst_56 = arith.constant 0.707106769 : f32
    %115 = vector.broadcast %cst_56 : f32 to vector<16x128xf32>
    %116 = arith.mulf %114, %115 : vector<16x128xf32>
    %117 = math.absf %116 : vector<16x128xf32>
    %cst_57 = arith.constant 0.327591091 : f32
    %118 = vector.broadcast %cst_57 : f32 to vector<16x128xf32>
    %119 = arith.mulf %118, %117 : vector<16x128xf32>
    %cst_58 = arith.constant 1.000000e+00 : f32
    %120 = vector.broadcast %cst_58 : f32 to vector<16x128xf32>
    %121 = arith.addf %120, %119 : vector<16x128xf32>
    %122 = tpu.reciprocal %121 {approx = true} : vector<16x128xf32> -> vector<16x128xf32>
    %cst_59 = arith.constant 1.06140542 : f32
    %123 = vector.broadcast %cst_59 : f32 to vector<16x128xf32>
    %124 = arith.mulf %123, %122 : vector<16x128xf32>
    %cst_60 = arith.constant -1.45315206 : f32
    %125 = vector.broadcast %cst_60 : f32 to vector<16x128xf32>
    %126 = arith.addf %124, %125 : vector<16x128xf32>
    %127 = arith.mulf %126, %122 : vector<16x128xf32>
    %cst_61 = arith.constant 1.42141378 : f32
    %128 = vector.broadcast %cst_61 : f32 to vector<16x128xf32>
    %129 = arith.addf %127, %128 : vector<16x128xf32>
    %130 = arith.mulf %129, %122 : vector<16x128xf32>
    %cst_62 = arith.constant -0.284496725 : f32
    %131 = vector.broadcast %cst_62 : f32 to vector<16x128xf32>
    %132 = arith.addf %130, %131 : vector<16x128xf32>
    %133 = arith.mulf %132, %122 : vector<16x128xf32>
    %cst_63 = arith.constant 0.254829586 : f32
    %134 = vector.broadcast %cst_63 : f32 to vector<16x128xf32>
    %135 = arith.addf %133, %134 : vector<16x128xf32>
    %136 = arith.mulf %135, %122 : vector<16x128xf32>
    %cst_64 = arith.constant 0.000000e+00 : f32
    %137 = vector.broadcast %cst_64 : f32 to vector<16x128xf32>
    %138 = arith.subf %137, %117 : vector<16x128xf32>
    %139 = arith.mulf %138, %117 : vector<16x128xf32>
    %140 = math.exp %139 : vector<16x128xf32>
    %141 = arith.mulf %136, %140 : vector<16x128xf32>
    %cst_65 = arith.constant 1.000000e+00 : f32
    %142 = vector.broadcast %cst_65 : f32 to vector<16x128xf32>
    %143 = arith.subf %142, %141 : vector<16x128xf32>
    %cst_66 = arith.constant 0.000000e+00 : f32
    %144 = vector.broadcast %cst_66 : f32 to vector<16x128xf32>
    %145 = arith.cmpf olt, %116, %144 : vector<16x128xf32>
    %cst_67 = arith.constant 0.000000e+00 : f32
    %146 = vector.broadcast %cst_67 : f32 to vector<16x128xf32>
    %147 = arith.subf %146, %143 : vector<16x128xf32>
    %148 = arith.select %145, %147, %143 : vector<16x128xi1>, vector<16x128xf32>
    %cst_68 = arith.constant 5.000000e-01 : f32
    %149 = vector.broadcast %cst_68 : f32 to vector<16x128xf32>
    %150 = arith.mulf %149, %114 : vector<16x128xf32>
    %cst_69 = arith.constant 1.000000e+00 : f32
    %151 = vector.broadcast %cst_69 : f32 to vector<16x128xf32>
    %152 = arith.addf %151, %148 : vector<16x128xf32>
    %153 = arith.mulf %150, %152 : vector<16x128xf32>
    %154 = arith.truncf %153 : vector<16x128xf32> to vector<16x128xbf16>
    %c2 = arith.constant 2 : index
    %c0_70 = arith.constant 0 : index
    %c0_71 = arith.constant 0 : index
    %155 = vector.load %arg2[%c2, %c0_70, %c0_71] : memref<4x128x384xbf16, #tpu.memory_space<vmem>>, vector<1x128x384xbf16>
    %156 = vector.shape_cast %155 : vector<1x128x384xbf16> to vector<128x384xbf16>
    %cst_72 = arith.constant dense<0.000000e+00> : vector<16x384xf32>
    %157 = tpu.matmul %154, %156, %cst_72 {dimension_numbers = #tpu.dot_dimension_numbers<[1], [0], [0], [1], [0, 0, 1, 1], [], []>} : vector<16x128xbf16>, vector<128x384xbf16>, vector<16x384xf32> -> vector<16x384xf32>
    %158 = vector.extract_strided_slice %157 {offsets = [0, 128], sizes = [16, 128], strides = [1, 1]} : vector<16x384xf32> to vector<16x128xf32>
    %159 = vector.extract_strided_slice %157 {offsets = [0, 0], sizes = [16, 128], strides = [1, 1]} : vector<16x384xf32> to vector<16x128xf32>
    %cst_73 = arith.constant dense<0.000000e+00> : vector<16x128xf32>
    %160 = tpu.matmul %4, %159, %cst_73 {dimension_numbers = #tpu.dot_dimension_numbers<[1], [0], [0], [1], [0, 0, 1, 1], [], []>} : vector<16x16xf32>, vector<16x128xf32>, vector<16x128xf32> -> vector<16x128xf32>
    %161 = arith.addf %158, %160 : vector<16x128xf32>
    %162 = vector.extract_strided_slice %157 {offsets = [0, 256], sizes = [16, 128], strides = [1, 1]} : vector<16x384xf32> to vector<16x128xf32>
    %cst_74 = arith.constant dense<0.000000e+00> : vector<16x128xf32>
    %163 = tpu.matmul %6, %162, %cst_74 {dimension_numbers = #tpu.dot_dimension_numbers<[1], [0], [0], [1], [0, 0, 1, 1], [], []>} : vector<16x16xf32>, vector<16x128xf32>, vector<16x128xf32> -> vector<16x128xf32>
    %164 = arith.addf %161, %163 : vector<16x128xf32>
    %cst_75 = arith.constant dense<0.000000e+00> : vector<128xf32>
    %165 = vector.multi_reduction <add>, %164, %cst_75 [0] : vector<16x128xf32> to vector<128xf32>
    %166 = vector.shape_cast %165 : vector<128xf32> to vector<1x128xf32>
    %167 = arith.mulf %164, %164 : vector<16x128xf32>
    %cst_76 = arith.constant dense<0.000000e+00> : vector<128xf32>
    %168 = vector.multi_reduction <add>, %167, %cst_76 [0] : vector<16x128xf32> to vector<128xf32>
    %169 = vector.shape_cast %168 : vector<128xf32> to vector<1x128xf32>
    %cst_77 = arith.constant dense<0.000000e+00> : vector<1x128xf32>
    %170 = tpu.matmul %166, %2, %cst_77 {dimension_numbers = #tpu.dot_dimension_numbers<[1], [0], [0], [1], [0, 0, 1, 1], [], []>} : vector<1x128xf32>, vector<128x128xf32>, vector<1x128xf32> -> vector<1x128xf32>
    %cst_78 = arith.constant dense<0.000000e+00> : vector<1x128xf32>
    %171 = tpu.matmul %169, %2, %cst_78 {dimension_numbers = #tpu.dot_dimension_numbers<[1], [0], [0], [1], [0, 0, 1, 1], [], []>} : vector<1x128xf32>, vector<128x128xf32>, vector<1x128xf32> -> vector<1x128xf32>
    %172 = arith.mulf %170, %170 : vector<1x128xf32>
    %173 = arith.subf %171, %172 : vector<1x128xf32>
    %c2_79 = arith.constant 2 : index
    %c0_80 = arith.constant 0 : index
    %c0_81 = arith.constant 0 : index
    %174 = vector.load %arg5[%c2_79, %c0_80, %c0_81] : memref<4x1x128xf32, #tpu.memory_space<vmem>>, vector<1x1x128xf32>
    %175 = vector.shape_cast %174 : vector<1x1x128xf32> to vector<1x128xf32>
    %cst_82 = arith.constant 9.99999974E-6 : f32
    %176 = vector.broadcast %cst_82 : f32 to vector<1x128xf32>
    %177 = arith.addf %173, %176 : vector<1x128xf32>
    %178 = math.rsqrt %177 : vector<1x128xf32>
    %179 = arith.mulf %175, %178 : vector<1x128xf32>
    %c2_83 = arith.constant 2 : index
    %c0_84 = arith.constant 0 : index
    %c0_85 = arith.constant 0 : index
    %180 = vector.load %arg6[%c2_83, %c0_84, %c0_85] : memref<4x1x128xf32, #tpu.memory_space<vmem>>, vector<1x1x128xf32>
    %181 = vector.shape_cast %180 : vector<1x1x128xf32> to vector<1x128xf32>
    %182 = arith.mulf %170, %179 : vector<1x128xf32>
    %183 = arith.subf %181, %182 : vector<1x128xf32>
    %184 = vector.broadcast %179 : vector<1x128xf32> to vector<16x128xf32>
    %185 = arith.mulf %164, %184 : vector<16x128xf32>
    %186 = vector.broadcast %183 : vector<1x128xf32> to vector<16x128xf32>
    %187 = arith.addf %185, %186 : vector<16x128xf32>
    %cst_86 = arith.constant 0.707106769 : f32
    %188 = vector.broadcast %cst_86 : f32 to vector<16x128xf32>
    %189 = arith.mulf %187, %188 : vector<16x128xf32>
    %190 = math.absf %189 : vector<16x128xf32>
    %cst_87 = arith.constant 0.327591091 : f32
    %191 = vector.broadcast %cst_87 : f32 to vector<16x128xf32>
    %192 = arith.mulf %191, %190 : vector<16x128xf32>
    %cst_88 = arith.constant 1.000000e+00 : f32
    %193 = vector.broadcast %cst_88 : f32 to vector<16x128xf32>
    %194 = arith.addf %193, %192 : vector<16x128xf32>
    %195 = tpu.reciprocal %194 {approx = true} : vector<16x128xf32> -> vector<16x128xf32>
    %cst_89 = arith.constant 1.06140542 : f32
    %196 = vector.broadcast %cst_89 : f32 to vector<16x128xf32>
    %197 = arith.mulf %196, %195 : vector<16x128xf32>
    %cst_90 = arith.constant -1.45315206 : f32
    %198 = vector.broadcast %cst_90 : f32 to vector<16x128xf32>
    %199 = arith.addf %197, %198 : vector<16x128xf32>
    %200 = arith.mulf %199, %195 : vector<16x128xf32>
    %cst_91 = arith.constant 1.42141378 : f32
    %201 = vector.broadcast %cst_91 : f32 to vector<16x128xf32>
    %202 = arith.addf %200, %201 : vector<16x128xf32>
    %203 = arith.mulf %202, %195 : vector<16x128xf32>
    %cst_92 = arith.constant -0.284496725 : f32
    %204 = vector.broadcast %cst_92 : f32 to vector<16x128xf32>
    %205 = arith.addf %203, %204 : vector<16x128xf32>
    %206 = arith.mulf %205, %195 : vector<16x128xf32>
    %cst_93 = arith.constant 0.254829586 : f32
    %207 = vector.broadcast %cst_93 : f32 to vector<16x128xf32>
    %208 = arith.addf %206, %207 : vector<16x128xf32>
    %209 = arith.mulf %208, %195 : vector<16x128xf32>
    %cst_94 = arith.constant 0.000000e+00 : f32
    %210 = vector.broadcast %cst_94 : f32 to vector<16x128xf32>
    %211 = arith.subf %210, %190 : vector<16x128xf32>
    %212 = arith.mulf %211, %190 : vector<16x128xf32>
    %213 = math.exp %212 : vector<16x128xf32>
    %214 = arith.mulf %209, %213 : vector<16x128xf32>
    %cst_95 = arith.constant 1.000000e+00 : f32
    %215 = vector.broadcast %cst_95 : f32 to vector<16x128xf32>
    %216 = arith.subf %215, %214 : vector<16x128xf32>
    %cst_96 = arith.constant 0.000000e+00 : f32
    %217 = vector.broadcast %cst_96 : f32 to vector<16x128xf32>
    %218 = arith.cmpf olt, %189, %217 : vector<16x128xf32>
    %cst_97 = arith.constant 0.000000e+00 : f32
    %219 = vector.broadcast %cst_97 : f32 to vector<16x128xf32>
    %220 = arith.subf %219, %216 : vector<16x128xf32>
    %221 = arith.select %218, %220, %216 : vector<16x128xi1>, vector<16x128xf32>
    %cst_98 = arith.constant 5.000000e-01 : f32
    %222 = vector.broadcast %cst_98 : f32 to vector<16x128xf32>
    %223 = arith.mulf %222, %187 : vector<16x128xf32>
    %cst_99 = arith.constant 1.000000e+00 : f32
    %224 = vector.broadcast %cst_99 : f32 to vector<16x128xf32>
    %225 = arith.addf %224, %221 : vector<16x128xf32>
    %226 = arith.mulf %223, %225 : vector<16x128xf32>
    %227 = arith.truncf %226 : vector<16x128xf32> to vector<16x128xbf16>
    %c3 = arith.constant 3 : index
    %c0_100 = arith.constant 0 : index
    %c0_101 = arith.constant 0 : index
    %228 = vector.load %arg2[%c3, %c0_100, %c0_101] : memref<4x128x384xbf16, #tpu.memory_space<vmem>>, vector<1x128x384xbf16>
    %229 = vector.shape_cast %228 : vector<1x128x384xbf16> to vector<128x384xbf16>
    %cst_102 = arith.constant dense<0.000000e+00> : vector<16x384xf32>
    %230 = tpu.matmul %227, %229, %cst_102 {dimension_numbers = #tpu.dot_dimension_numbers<[1], [0], [0], [1], [0, 0, 1, 1], [], []>} : vector<16x128xbf16>, vector<128x384xbf16>, vector<16x384xf32> -> vector<16x384xf32>
    %231 = vector.extract_strided_slice %230 {offsets = [0, 128], sizes = [16, 128], strides = [1, 1]} : vector<16x384xf32> to vector<16x128xf32>
    %232 = vector.extract_strided_slice %230 {offsets = [0, 0], sizes = [16, 128], strides = [1, 1]} : vector<16x384xf32> to vector<16x128xf32>
    %cst_103 = arith.constant dense<0.000000e+00> : vector<16x128xf32>
    %233 = tpu.matmul %4, %232, %cst_103 {dimension_numbers = #tpu.dot_dimension_numbers<[1], [0], [0], [1], [0, 0, 1, 1], [], []>} : vector<16x16xf32>, vector<16x128xf32>, vector<16x128xf32> -> vector<16x128xf32>
    %234 = arith.addf %231, %233 : vector<16x128xf32>
    %235 = vector.extract_strided_slice %230 {offsets = [0, 256], sizes = [16, 128], strides = [1, 1]} : vector<16x384xf32> to vector<16x128xf32>
    %cst_104 = arith.constant dense<0.000000e+00> : vector<16x128xf32>
    %236 = tpu.matmul %6, %235, %cst_104 {dimension_numbers = #tpu.dot_dimension_numbers<[1], [0], [0], [1], [0, 0, 1, 1], [], []>} : vector<16x16xf32>, vector<16x128xf32>, vector<16x128xf32> -> vector<16x128xf32>
    %237 = arith.addf %234, %236 : vector<16x128xf32>
    %cst_105 = arith.constant dense<0.000000e+00> : vector<128xf32>
    %238 = vector.multi_reduction <add>, %237, %cst_105 [0] : vector<16x128xf32> to vector<128xf32>
    %239 = vector.shape_cast %238 : vector<128xf32> to vector<1x128xf32>
    %240 = arith.mulf %237, %237 : vector<16x128xf32>
    %cst_106 = arith.constant dense<0.000000e+00> : vector<128xf32>
    %241 = vector.multi_reduction <add>, %240, %cst_106 [0] : vector<16x128xf32> to vector<128xf32>
    %242 = vector.shape_cast %241 : vector<128xf32> to vector<1x128xf32>
    %cst_107 = arith.constant dense<0.000000e+00> : vector<1x128xf32>
    %243 = tpu.matmul %239, %2, %cst_107 {dimension_numbers = #tpu.dot_dimension_numbers<[1], [0], [0], [1], [0, 0, 1, 1], [], []>} : vector<1x128xf32>, vector<128x128xf32>, vector<1x128xf32> -> vector<1x128xf32>
    %cst_108 = arith.constant dense<0.000000e+00> : vector<1x128xf32>
    %244 = tpu.matmul %242, %2, %cst_108 {dimension_numbers = #tpu.dot_dimension_numbers<[1], [0], [0], [1], [0, 0, 1, 1], [], []>} : vector<1x128xf32>, vector<128x128xf32>, vector<1x128xf32> -> vector<1x128xf32>
    %245 = arith.mulf %243, %243 : vector<1x128xf32>
    %246 = arith.subf %244, %245 : vector<1x128xf32>
    %c3_109 = arith.constant 3 : index
    %c0_110 = arith.constant 0 : index
    %c0_111 = arith.constant 0 : index
    %247 = vector.load %arg5[%c3_109, %c0_110, %c0_111] : memref<4x1x128xf32, #tpu.memory_space<vmem>>, vector<1x1x128xf32>
    %248 = vector.shape_cast %247 : vector<1x1x128xf32> to vector<1x128xf32>
    %cst_112 = arith.constant 9.99999974E-6 : f32
    %249 = vector.broadcast %cst_112 : f32 to vector<1x128xf32>
    %250 = arith.addf %246, %249 : vector<1x128xf32>
    %251 = math.rsqrt %250 : vector<1x128xf32>
    %252 = arith.mulf %248, %251 : vector<1x128xf32>
    %c3_113 = arith.constant 3 : index
    %c0_114 = arith.constant 0 : index
    %c0_115 = arith.constant 0 : index
    %253 = vector.load %arg6[%c3_113, %c0_114, %c0_115] : memref<4x1x128xf32, #tpu.memory_space<vmem>>, vector<1x1x128xf32>
    %254 = vector.shape_cast %253 : vector<1x1x128xf32> to vector<1x128xf32>
    %255 = arith.mulf %243, %252 : vector<1x128xf32>
    %256 = arith.subf %254, %255 : vector<1x128xf32>
    %257 = vector.broadcast %252 : vector<1x128xf32> to vector<16x128xf32>
    %258 = arith.mulf %237, %257 : vector<16x128xf32>
    %259 = vector.broadcast %256 : vector<1x128xf32> to vector<16x128xf32>
    %260 = arith.addf %258, %259 : vector<16x128xf32>
    %261 = arith.addf %153, %260 : vector<16x128xf32>
    %cst_116 = arith.constant 0.707106769 : f32
    %262 = vector.broadcast %cst_116 : f32 to vector<16x128xf32>
    %263 = arith.mulf %261, %262 : vector<16x128xf32>
    %264 = math.absf %263 : vector<16x128xf32>
    %cst_117 = arith.constant 0.327591091 : f32
    %265 = vector.broadcast %cst_117 : f32 to vector<16x128xf32>
    %266 = arith.mulf %265, %264 : vector<16x128xf32>
    %cst_118 = arith.constant 1.000000e+00 : f32
    %267 = vector.broadcast %cst_118 : f32 to vector<16x128xf32>
    %268 = arith.addf %267, %266 : vector<16x128xf32>
    %269 = tpu.reciprocal %268 {approx = true} : vector<16x128xf32> -> vector<16x128xf32>
    %cst_119 = arith.constant 1.06140542 : f32
    %270 = vector.broadcast %cst_119 : f32 to vector<16x128xf32>
    %271 = arith.mulf %270, %269 : vector<16x128xf32>
    %cst_120 = arith.constant -1.45315206 : f32
    %272 = vector.broadcast %cst_120 : f32 to vector<16x128xf32>
    %273 = arith.addf %271, %272 : vector<16x128xf32>
    %274 = arith.mulf %273, %269 : vector<16x128xf32>
    %cst_121 = arith.constant 1.42141378 : f32
    %275 = vector.broadcast %cst_121 : f32 to vector<16x128xf32>
    %276 = arith.addf %274, %275 : vector<16x128xf32>
    %277 = arith.mulf %276, %269 : vector<16x128xf32>
    %cst_122 = arith.constant -0.284496725 : f32
    %278 = vector.broadcast %cst_122 : f32 to vector<16x128xf32>
    %279 = arith.addf %277, %278 : vector<16x128xf32>
    %280 = arith.mulf %279, %269 : vector<16x128xf32>
    %cst_123 = arith.constant 0.254829586 : f32
    %281 = vector.broadcast %cst_123 : f32 to vector<16x128xf32>
    %282 = arith.addf %280, %281 : vector<16x128xf32>
    %283 = arith.mulf %282, %269 : vector<16x128xf32>
    %cst_124 = arith.constant 0.000000e+00 : f32
    %284 = vector.broadcast %cst_124 : f32 to vector<16x128xf32>
    %285 = arith.subf %284, %264 : vector<16x128xf32>
    %286 = arith.mulf %285, %264 : vector<16x128xf32>
    %287 = math.exp %286 : vector<16x128xf32>
    %288 = arith.mulf %283, %287 : vector<16x128xf32>
    %cst_125 = arith.constant 1.000000e+00 : f32
    %289 = vector.broadcast %cst_125 : f32 to vector<16x128xf32>
    %290 = arith.subf %289, %288 : vector<16x128xf32>
    %cst_126 = arith.constant 0.000000e+00 : f32
    %291 = vector.broadcast %cst_126 : f32 to vector<16x128xf32>
    %292 = arith.cmpf olt, %263, %291 : vector<16x128xf32>
    %cst_127 = arith.constant 0.000000e+00 : f32
    %293 = vector.broadcast %cst_127 : f32 to vector<16x128xf32>
    %294 = arith.subf %293, %290 : vector<16x128xf32>
    %295 = arith.select %292, %294, %290 : vector<16x128xi1>, vector<16x128xf32>
    %cst_128 = arith.constant 5.000000e-01 : f32
    %296 = vector.broadcast %cst_128 : f32 to vector<16x128xf32>
    %297 = arith.mulf %296, %261 : vector<16x128xf32>
    %cst_129 = arith.constant 1.000000e+00 : f32
    %298 = vector.broadcast %cst_129 : f32 to vector<16x128xf32>
    %299 = arith.addf %298, %295 : vector<16x128xf32>
    %300 = arith.mulf %297, %299 : vector<16x128xf32>
    %c0_130 = arith.constant 0 : index
    %c0_131 = arith.constant 0 : index
    %c0_132 = arith.constant 0 : index
    %301 = vector.load %arg7[%c0_130, %c0_131, %c0_132] : memref<1x16x128xf32, #tpu.memory_space<vmem>>, vector<1x16x128xf32>
    %302 = vector.shape_cast %301 : vector<1x16x128xf32> to vector<16x128xf32>
    %303 = vector.shape_cast %300 : vector<16x128xf32> to vector<1x16x128xf32>
    tpu.vector_store %arg7[%c0_130, %c0_131, %c0_132], %303 {strides = array<i32>} : memref<1x16x128xf32, #tpu.memory_space<vmem>>, vector<1x16x128xf32>,
    return
  }
  func.func @transform_0(%arg0: i32) -> (i32, i32, i32) {
    %c0_i32 = arith.constant 0 : i32
    %c0_i32_0 = arith.constant 0 : i32
    %c0_i32_1 = arith.constant 0 : i32
    return %arg0, %c0_i32, %c0_i32_0 : i32, i32, i32
  }
  func.func @transform_1(%arg0: i32) -> (i32, i32, i32) {
    %c0_i32 = arith.constant 0 : i32
    %c0_i32_0 = arith.constant 0 : i32
    %c0_i32_1 = arith.constant 0 : i32
    %c0_i32_2 = arith.constant 0 : i32
    return %c0_i32, %c0_i32_0, %c0_i32_1 : i32, i32, i32
  }
  func.func @transform_2(%arg0: i32) -> (i32, i32, i32) {
    %c0_i32 = arith.constant 0 : i32
    %c0_i32_0 = arith.constant 0 : i32
    %c0_i32_1 = arith.constant 0 : i32
    %c0_i32_2 = arith.constant 0 : i32
    return %c0_i32, %c0_i32_0, %c0_i32_1 : i32, i32, i32
  }
  func.func @transform_3(%arg0: i32) -> (i32, i32) {
    %c0_i32 = arith.constant 0 : i32
    %c0_i32_0 = arith.constant 0 : i32
    %c0_i32_1 = arith.constant 0 : i32
    return %c0_i32, %c0_i32_0 : i32, i32
  }
  func.func @transform_4(%arg0: i32) -> (i32, i32, i32) {
    %c0_i32 = arith.constant 0 : i32
    %c0_i32_0 = arith.constant 0 : i32
    %c0_i32_1 = arith.constant 0 : i32
    %c0_i32_2 = arith.constant 0 : i32
    return %c0_i32, %c0_i32_0, %c0_i32_1 : i32, i32, i32
  }
  func.func @transform_5(%arg0: i32) -> (i32, i32, i32) {
    %c0_i32 = arith.constant 0 : i32
    %c0_i32_0 = arith.constant 0 : i32
    %c0_i32_1 = arith.constant 0 : i32
    %c0_i32_2 = arith.constant 0 : i32
    return %c0_i32, %c0_i32_0, %c0_i32_1 : i32, i32, i32
  }
  func.func @transform_6(%arg0: i32) -> (i32, i32, i32) {
    %c0_i32 = arith.constant 0 : i32
    %c0_i32_0 = arith.constant 0 : i32
    %c0_i32_1 = arith.constant 0 : i32
    return %arg0, %c0_i32, %c0_i32_0 : i32, i32, i32
  }
}

</mosaic_0001>

<bundles_post_ra>
// kernel: squeeze.11
= control target key start
LH: loop header
LB: loop body
LE: loop exit
PB: predicated region body
PF: predicated region fallthrough
CT: control target
= control target key end

     0   :  { %s15157_s0 = inlined_call_operand.vmem [shape: bf16[1,16,8,16,8], index: 0, kind: input, shape index: {}]   ;;  %s15158_s1 = inlined_call_operand.vmem [shape: bf16[128,128], index: 1, kind: output, shape index: {}]  }
   0x1   :  { %15170 = sst [smem:[#allocation131_spill]] %s15157_s0 }
   0x2   :  { %15171 = sst [smem:[#allocation132_spill]] %s15158_s1 }
   0x3   :  { %v10700_v0 = vld [vmem:[%s15157_s0 + $0x138] sm:$0xff]   ;;  %v11472_v1 = vld [vmem:[%s15157_s0 + $0x130] sm:$0xff]   ;;  %v11477_v2 = vld [vmem:[%s15157_s0 + $0x128] sm:$0xff]   ;;  %s4196_s9 = smov 3  ;;  %s4199_s10 = smov 12  ;;  %vm3846_vm0 = vcmask 1043458  }
   0x4   :  { %v10415_v3 = vunpack.c.h.bf16 %v10700_v0  ;;  %v10419_v4 = vunpack.c.h.bf16 %v11472_v1  ;;  %v11483_v5 = vld [vmem:[%s15157_s0 + $0x120] sm:$0xff]   ;;  %v11488_v6 = vld [vmem:[%s15157_s0 + $0x118] sm:$0xff]   ;;  %v11493_v7 = vld [vmem:[%s15157_s0 + $0x110] sm:$0xff]   ;;  %v10423_v8 = vunpack.c.h.bf16 %v11477_v2  ;;  %v10414_v32 = vunpack.c.l.bf16 %v10700_v0  ;;  %s4204_s11 = smov 48  ;;  %s4209_s12 = smov 192 }
   0x5   :  { %v10427_v9 = vunpack.c.h.bf16 %v11483_v5  ;;  %v11500_v10 = vld [vmem:[%s15157_s0 + $0x108] sm:$0xff]   ;;  %v10431_v11 = vunpack.c.h.bf16 %v11488_v6  ;;  %v11506_v12 = vld [vmem:[%s15157_s0 + $0x100] sm:$0xff]   ;;  %v10435_v13 = vunpack.c.h.bf16 %v11493_v7  ;;  %v11512_v14 = vld [vmem:[%s15157_s0 + $0x38] sm:$0xff]   ;;  %v10418_v33 = vunpack.c.l.bf16 %v11472_v1  ;;  %s4174_s13 = smov 3  ;;  %s4177_s14 = smov 12 }
   0x6   :  { %2658 = vst [vmem:[#allocation1 + $0x278] sm:$0xff] %v10415_v3  ;;  %v10439_v15 = vunpack.c.h.bf16 %v11500_v10  ;;  %v11518_v16 = vld [vmem:[%s15157_s0 + $0x30] sm:$0xff]   ;;  %v10443_v17 = vunpack.c.h.bf16 %v11506_v12  ;;  %v11524_v18 = vld [vmem:[%s15157_s0 + $0x28] sm:$0xff]   ;;  %v10543_v19 = vunpack.c.h.bf16 %v11512_v14  ;;  %v11530_v20 = vld [vmem:[%s15157_s0 + $0x20] sm:$0xff]   ;;  %v10422_v34 = vunpack.c.l.bf16 %v11477_v2  ;;  %s4182_s15 = smov 48  ;;  %s4187_s16 = smov 192 }
   0x7   :  { %2688 = vst [vmem:[#allocation1 + $0x268] sm:$0xff] %v10419_v4  ;;  %v10547_v21 = vunpack.c.h.bf16 %v11518_v16  ;;  %v11536_v22 = vld [vmem:[%s15157_s0 + $0x18] sm:$0xff]   ;;  %v10551_v23 = vunpack.c.h.bf16 %v11524_v18  ;;  %v11542_v24 = vld [vmem:[%s15157_s0 + $0x10] sm:$0xff]   ;;  %v10555_v25 = vunpack.c.h.bf16 %v11530_v20  ;;  %v11548_v26 = vld [vmem:[%s15157_s0 + $0x8] sm:$0xff]   ;;  %v10426_v37 = vunpack.c.l.bf16 %v11483_v5  ;;  %s15159_s21 = smov 120   ;;  %s11676_s22 = smov 3 }
   0x8   :  { %2718 = vst [vmem:[#allocation1 + $0x258] sm:$0xff] %v10423_v8  ;;  %v10559_v27 = vunpack.c.h.bf16 %v11536_v22  ;;  %v11554_v28 = vld [vmem:[%s15157_s0] sm:$0xff]   ;;  %v10563_v29 = vunpack.c.h.bf16 %v11542_v24  ;;  %v10567_v30 = vunpack.c.h.bf16 %v11548_v26  ;;  %v10430_v38 = vunpack.c.l.bf16 %v11488_v6  ;;  %v11581_v61 = vld [vmem:[%s15157_s0 + $0x178] sm:$0xff]   ;;  %v11587_v63 = vld [vmem:[%s15157_s0 + $0x170] sm:$0xff]   ;;  %s11678_s23 = smov 12  ;;  %s4288_s24 = smov 3 }
   0x9   :  { %2748 = vst [vmem:[#allocation1 + $0x248] sm:$0xff] %v10427_v9  ;;  %v10571_v31 = vunpack.c.h.bf16 %v11554_v28  ;;  %v10434_v39 = vunpack.c.l.bf16 %v11493_v7  ;;  %vm3850_vm1 = vcmask 1045508   ;;  %v10438_v42 = vunpack.c.l.bf16 %v11500_v10  ;;  %v11594_v1 = vld [vmem:[%s15157_s0 + $0x168] sm:$0xff]   ;;  %v11600_v3 = vld [vmem:[%s15157_s0 + $0x160] sm:$0xff]   ;;  %v11606_v5 = vld [vmem:[%s15157_s0 + $0x158] sm:$0xff]   ;;  %s4291_s25 = smov 12 }
   0xa   :  { %2778 = vst [vmem:[#allocation1 + $0x238] sm:$0xff] %v10431_v11  ;;  %v10442_v43 = vunpack.c.l.bf16 %v11506_v12  ;;  %vm3854_vm2 = vcmask 1047558   ;;  %v10542_v46 = vunpack.c.l.bf16 %v11512_v14  ;;  %v10546_v47 = vunpack.c.l.bf16 %v11518_v16  ;;  %v11612_v7 = vld [vmem:[%s15157_s0 + $0x150] sm:$0xff]   ;;  %v11618_v9 = vld [vmem:[%s15157_s0 + $0x148] sm:$0xff]   ;;  %v11624_v11 = vld [vmem:[%s15157_s0 + $0x140] sm:$0xff]   ;;  %s11681_s26 = smov 48 }
   0xb   :  { %2808 = vst [vmem:[#allocation1 + $0x228] sm:$0xff] %v10435_v13  ;;  %v10550_v51 = vunpack.c.l.bf16 %v11524_v18  ;;  %v10554_v55 = vunpack.c.l.bf16 %v11530_v20  ;;  %v10558_v57 = vunpack.c.l.bf16 %v11536_v22  ;;  %v10562_v59 = vunpack.c.l.bf16 %v11542_v24  ;;  %v11630_v13 = vld [vmem:[%s15157_s0 + $0x78] sm:$0xff]   ;;  %s11683_s27 = smov 192  ;;  %s4296_s28 = smov 48 }
   0xc   :  { %2838 = vst [vmem:[#allocation1 + $0x218] sm:$0xff] %v10439_v15  ;;  %v10566_v62 = vunpack.c.l.bf16 %v11548_v26  ;;  %v10570_v0 = vunpack.c.l.bf16 %v11554_v28  ;;  %v10383_v2 = vunpack.c.h.bf16 %v11581_v61  ;;  %v10387_v4 = vunpack.c.h.bf16 %v11587_v63  ;;  %v11636_v15 = vld [vmem:[%s15157_s0 + $0x70] sm:$0xff]   ;;  %s4301_s29 = smov 192  ;;  %s11688_s30 = smov 3 }
   0xd   :  { %2868 = vst [vmem:[#allocation1 + $0x208] sm:$0xff] %v10443_v17  ;;  %v10391_v6 = vunpack.c.h.bf16 %v11594_v1  ;;  %v10395_v8 = vunpack.c.h.bf16 %v11600_v3  ;;  %v10399_v10 = vunpack.c.h.bf16 %v11606_v5  ;;  %v10403_v12 = vunpack.c.h.bf16 %v11612_v7  ;;  %v11642_v17 = vld [vmem:[%s15157_s0 + $0x68] sm:$0xff]   ;;  %s11691_s2 = smov 12  ;;  %s11693_s3 = smov 48 }
   0xe   :  { %3618 = vst [vmem:[#allocation1 + $0x78] sm:$0xff] %v10543_v19  ;;  %v10407_v14 = vunpack.c.h.bf16 %v11618_v9  ;;  %v10411_v16 = vunpack.c.h.bf16 %v11624_v11  ;;  %v10511_v18 = vunpack.c.h.bf16 %v11630_v13  ;;  %v11648_v19 = vld [vmem:[%s15157_s0 + $0x60] sm:$0xff]   ;;  %v10515_v20 = vunpack.c.h.bf16 %v11636_v15  ;;  %s11696_s4 = smov 192  ;;  %s11698_s5 = smov 3 }
   0xf   :  { %3648 = vst [vmem:[#allocation1 + $0x68] sm:$0xff] %v10547_v21  ;;  %v11654_v21 = vld [vmem:[%s15157_s0 + $0x58] sm:$0xff]   ;;  %v10519_v22 = vunpack.c.h.bf16 %v11642_v17  ;;  %v10523_v24 = vunpack.c.h.bf16 %v11648_v19  ;;  %s11702_s6 = smov 12  ;;  %s11704_s7 = smov 48  ;;  %vm3856_vm3 = vcmask 64512   ;;  %vm4193_vm4 = vcmask 1048512  }
  0x10   :  { %3678 = vst [vmem:[#allocation1 + $0x58] sm:$0xff] %v10551_v23  ;;  %v11660_v23 = vld [vmem:[%s15157_s0 + $0x50] sm:$0xff]   ;;  %v10527_v26 = vunpack.c.h.bf16 %v11654_v21  ;;  %s11706_s8 = smov 192  ;;  %s11736_s17 = smov 3  ;;  %vm4560_vm5 = vcmask 982912   ;;  %vm4927_vm6 = vcmask 917312  }
  0x11   :  { %3708 = vst [vmem:[#allocation1 + $0x48] sm:$0xff] %v10555_v25  ;;  %v11666_v25 = vld [vmem:[%s15157_s0 + $0x48] sm:$0xff]   ;;  %v10531_v28 = vunpack.c.h.bf16 %v11660_v23  ;;  %s11740_s18 = smov 12  ;;  %s11742_s19 = smov 48  ;;  %vm5294_vm7 = vcmask 851712   ;;  %vm5661_vm8 = vcmask 786112  }
  0x12   :  { %3738 = vst [vmem:[#allocation1 + $0x38] sm:$0xff] %v10559_v27  ;;  %v11672_v27 = vld [vmem:[%s15157_s0 + $0x40] sm:$0xff]   ;;  %s11746_s20 = smov 192  ;;  %s11785_s1 = smov 12  ;;  %vm6028_vm9 = vcmask 720512   ;;  %vm6395_vm10 = vcmask 654912  }
  0x13   :  { %3768 = vst [vmem:[#allocation1 + $0x28] sm:$0xff] %v10563_v29  ;;  %v10535_v29 = vunpack.c.h.bf16 %v11666_v25  ;;  %15177 = sst [smem:[#allocation7_spill]] %s11785_s1  ;;  %s11834_s1 = smov 192  ;;  %vm6762_vm11 = vcmask 589312   ;;  %vm7129_vm12 = vcmask 523712   ;;  %vm7496_vm13 = vcmask 458112  }
  0x14   :  { %3798 = vst [vmem:[#allocation1 + $0x18] sm:$0xff] %v10567_v30  ;;  %v4197_v35 = vld [vmem:[#allocation1 + $0x20f] ss:$16 sm:%s4196_s9]   ;;  %v10539_v30 = vunpack.c.h.bf16 %v11672_v27  ;;  %s11708_s9 = smov 3  ;;  %15188 = sst [smem:[#allocation18_spill]] %s11834_s1  ;;  %vm7863_vm14 = vcmask 392512  }
  0x15   :  { %v4200_v36 = vld [vmem:[#allocation1 + $0x20f] ss:$16 sm:%s4199_s10]   ;;  %3828 = vst [vmem:[#allocation1 + $0x8] sm:$0xff] %v10571_v31  ;;  %v10382_v31 = vunpack.c.l.bf16 %v11581_v61  ;;  %s11711_s10 = smov 12  ;;  %v10534_v61 = vunpack.c.l.bf16 %v11666_v25  ;;  %s11848_s1 = smov 192  ;;  %vm8230_vm15 = vcmask 326912  }
  0x16   :  { %2673 = vst [vmem:[#allocation1 + $0x270] sm:$0xff] %v10414_v32  ;;  %v4202_v40 = vsel %vm3846_vm0, %v4200_v36, %v4197_v35  ;;  %v4205_v41 = vld [vmem:[#allocation1 + $0x20f] ss:$16 sm:%s4204_s11]   ;;  %v10386_v32 = vunpack.c.l.bf16 %v11587_v63  ;;  %v10394_v36 = vunpack.c.l.bf16 %v11600_v3  ;;  %s11713_s11 = smov 48  ;;  %v10538_v63 = vunpack.c.l.bf16 %v11672_v27  ;;  %15191 = sst [smem:[#allocation21_spill]] %s11848_s1 }
  0x17   :  { %2703 = vst [vmem:[#allocation1 + $0x260] sm:$0xff] %v10418_v33  ;;  %v4207_v44 = vsel %vm3850_vm1, %v4205_v41, %v4202_v40  ;;  %v4210_v45 = vld [vmem:[#allocation1 + $0x20f] ss:$16 sm:%s4209_s12]   ;;  %v10390_v33 = vunpack.c.l.bf16 %v11594_v1  ;;  %v10406_v41 = vunpack.c.l.bf16 %v11618_v9  ;;  %s11717_s12 = smov 192  ;;  %s11855_s1 = smov 12 }
  0x18   :  { %2733 = vst [vmem:[#allocation1 + $0x250] sm:$0xff] %v10422_v34  ;;  %v4212_v54 = vsel %vm3854_vm2, %v4210_v45, %v4207_v44  ;;  %v10510_v45 = vunpack.c.l.bf16 %v11630_v13  ;;  %15193 = sst [smem:[#allocation23_spill]] %s11855_s1  ;;  %s11862_s1 = smov 192 }
  0x19   :  { %2763 = vst [vmem:[#allocation1 + $0x240] sm:$0xff] %v10426_v37  ;;  %v10398_v37 = vunpack.c.l.bf16 %v11606_v5  ;;  %15195 = sst [smem:[#allocation25_spill]] %s11862_s1  ;;  %s11869_s1 = smov 12 }
  0x1a   :  { %2793 = vst [vmem:[#allocation1 + $0x230] sm:$0xff] %v10430_v38  ;;  %v10402_v38 = vunpack.c.l.bf16 %v11612_v7  ;;  %15197 = sst [smem:[#allocation27_spill]] %s11869_s1  ;;  %s11876_s1 = smov 192 }
  0x1b   :  { %2823 = vst [vmem:[#allocation1 + $0x220] sm:$0xff] %v10434_v39  ;;  %15199 = sst [smem:[#allocation29_spill]] %s11876_s1  ;;  %s11883_s1 = smov 12 }
  0x1c   :  { %v4175_v48 = vld [vmem:[#allocation1 + $0xf] ss:$16 sm:%s4174_s13]   ;;  %2853 = vst [vmem:[#allocation1 + $0x210] sm:$0xff] %v10438_v42  ;;  %v10410_v42 = vunpack.c.l.bf16 %v11624_v11  ;;  %s11719_s13 = smov 3  ;;  %15201 = sst [smem:[#allocation31_spill]] %s11883_s1 }
  0x1d   :  { %v4178_v49 = vld [vmem:[#allocation1 + $0xf] ss:$16 sm:%s4177_s14]   ;;  %2883 = vst [vmem:[#allocation1 + $0x200] sm:$0xff] %v10442_v43  ;;  %s11722_s14 = smov 12  ;;  %s11890_s1 = smov 192 }
  0x1e   :  { %v4183_v50 = vld [vmem:[#allocation1 + $0xf] ss:$16 sm:%s4182_s15]   ;;  %v4180_v52 = vsel %vm3846_vm0, %v4178_v49, %v4175_v48  ;;  %3633 = vst [vmem:[#allocation1 + $0x70] sm:$0xff] %v10542_v46  ;;  %s11724_s15 = smov 48  ;;  %v10514_v46 = vunpack.c.l.bf16 %v11636_v15  ;;  %15203 = sst [smem:[#allocation33_spill]] %s11890_s1 }
  0x1f   :  { %v4188_v53 = vld [vmem:[#allocation1 + $0xf] ss:$16 sm:%s4187_s16]   ;;  %v4185_v56 = vsel %vm3850_vm1, %v4183_v50, %v4180_v52  ;;  %3663 = vst [vmem:[#allocation1 + $0x60] sm:$0xff] %v10546_v47  ;;  %v10518_v50 = vunpack.c.l.bf16 %v11642_v17  ;;  %s11734_s16 = smov 192  ;;  %s11897_s1 = smov 12 }
  0x20   :  { %v4190_v58 = vsel %vm3854_vm2, %v4188_v53, %v4185_v56  ;;  %3693 = vst [vmem:[#allocation1 + $0x50] sm:$0xff] %v10550_v51  ;;  %v10526_v56 = vunpack.c.l.bf16 %v11654_v21 }
  0x21   :  { %v10761_v60 = vpack.i.bf16 %v4212_v54, %v4190_v58  ;;  %3723 = vst [vmem:[#allocation1 + $0x40] sm:$0xff] %v10554_v55  ;;  %v10522_v54 = vunpack.c.l.bf16 %v11648_v19  ;;  %v10530_v58 = vunpack.c.l.bf16 %v11660_v23 }
  0x22   :  { %3753 = vst [vmem:[#allocation1 + $0x30] sm:$0xff] %v10558_v57 }
  0x23   :  { %10762 = vrot.lane.b32.xlu0 %v10761_v60, %s15159_s21  ;;  %3783 = vst [vmem:[#allocation1 + $0x20] sm:$0xff] %v10562_v59  ;;  %v10636_v60 = vld [vmem:[%s15157_s0 + $0x338] sm:$0xff]  }
  0x24   :  { %3813 = vst [vmem:[#allocation1 + $0x10] sm:$0xff] %v10566_v62  ;;  %v10637_v62 = vld [vmem:[%s15157_s0 + $0x330] sm:$0xff]   ;;  %v10159_v1 = vunpack.c.h.bf16 %v10636_v60 }
  0x25   :  { %3841 = vst [vmem:[#allocation1] sm:$0xff] %v10570_v0  ;;  %v10638_v0 = vld [vmem:[%s15157_s0 + $0x328] sm:$0xff]   ;;  %v10163_v3 = vunpack.c.h.bf16 %v10637_v62 }
  0x26   :  { %2418 = vst [vmem:[#allocation1 + $0x2f8] sm:$0xff] %v10383_v2  ;;  %v10639_v2 = vld [vmem:[%s15157_s0 + $0x320] sm:$0xff]   ;;  %v10167_v5 = vunpack.c.h.bf16 %v10638_v0 }
  0x27   :  { %2448 = vst [vmem:[#allocation1 + $0x2e8] sm:$0xff] %v10387_v4  ;;  %v10640_v4 = vld [vmem:[%s15157_s0 + $0x318] sm:$0xff]   ;;  %v10171_v7 = vunpack.c.h.bf16 %v10639_v2  ;;  %v10665_v2 = vld [vmem:[%s15157_s0 + $0x250] sm:$0xff]  }
  0x28   :  { %2478 = vst [vmem:[#allocation1 + $0x2d8] sm:$0xff] %v10391_v6  ;;  %v10641_v6 = vld [vmem:[%s15157_s0 + $0x310] sm:$0xff]   ;;  %v10175_v9 = vunpack.c.h.bf16 %v10640_v4 }
  0x29   :  { %2508 = vst [vmem:[#allocation1 + $0x2c8] sm:$0xff] %v10395_v8  ;;  %v10642_v8 = vld [vmem:[%s15157_s0 + $0x308] sm:$0xff]   ;;  %v10179_v11 = vunpack.c.h.bf16 %v10641_v6 }
  0x2a   :  { %2538 = vst [vmem:[#allocation1 + $0x2b8] sm:$0xff] %v10399_v10  ;;  %v10643_v10 = vld [vmem:[%s15157_s0 + $0x300] sm:$0xff]   ;;  %v10183_v13 = vunpack.c.h.bf16 %v10642_v8 }
  0x2b   :  { %2568 = vst [vmem:[#allocation1 + $0x2a8] sm:$0xff] %v10403_v12  ;;  %v10668_v12 = vld [vmem:[%s15157_s0 + $0x238] sm:$0xff]   ;;  %v10187_v15 = vunpack.c.h.bf16 %v10643_v10  ;;  %v10667_v8 = vld [vmem:[%s15157_s0 + $0x240] sm:$0xff]   ;;  %v10275_v10 = vunpack.c.h.bf16 %v10665_v2 }
  0x2c   :  { %2598 = vst [vmem:[#allocation1 + $0x298] sm:$0xff] %v10407_v14  ;;  %v10669_v14 = vld [vmem:[%s15157_s0 + $0x230] sm:$0xff]   ;;  %v10287_v17 = vunpack.c.h.bf16 %v10668_v12  ;;  %v10616_v2 = vld [vmem:[%s15157_s0 + $0x3d8] sm:$0xff]  }
  0x2d   :  { %2628 = vst [vmem:[#allocation1 + $0x288] sm:$0xff] %v10411_v16  ;;  %v10670_v16 = vld [vmem:[%s15157_s0 + $0x228] sm:$0xff]   ;;  %v10291_v19 = vunpack.c.h.bf16 %v10669_v14  ;;  %v10283_v14 = vunpack.c.h.bf16 %v10667_v8  ;;  %v10079_v8 = vunpack.c.h.bf16 %v10616_v2 }
  0x2e   :  { %3378 = vst [vmem:[#allocation1 + $0xf8] sm:$0xff] %v10511_v18  ;;  %v10671_v18 = vld [vmem:[%s15157_s0 + $0x220] sm:$0xff]   ;;  %v10295_v21 = vunpack.c.h.bf16 %v10670_v16 }
  0x2f   :  { %3408 = vst [vmem:[#allocation1 + $0xe8] sm:$0xff] %v10515_v20  ;;  %v10672_v20 = vld [vmem:[%s15157_s0 + $0x218] sm:$0xff]   ;;  %v10299_v23 = vunpack.c.h.bf16 %v10671_v18 }
  0x30   :  { %3438 = vst [vmem:[#allocation1 + $0xd8] sm:$0xff] %v10519_v22  ;;  %v10673_v22 = vld [vmem:[%s15157_s0 + $0x210] sm:$0xff]   ;;  %v10303_v25 = vunpack.c.h.bf16 %v10672_v20 }
  0x31   :  { %3468 = vst [vmem:[#allocation1 + $0xc8] sm:$0xff] %v10523_v24  ;;  %v10674_v24 = vld [vmem:[%s15157_s0 + $0x208] sm:$0xff]   ;;  %v10307_v27 = vunpack.c.h.bf16 %v10673_v22  ;;  %v10681_v20 = vld [vmem:[%s15157_s0 + $0x1d0] sm:$0xff]  }
  0x32   :  { %3498 = vst [vmem:[#allocation1 + $0xb8] sm:$0xff] %v10527_v26  ;;  %v10675_v26 = vld [vmem:[%s15157_s0 + $0x200] sm:$0xff]  }
  0x33   :  { %3528 = vst [vmem:[#allocation1 + $0xa8] sm:$0xff] %v10531_v28  ;;  %v10628_v28 = vld [vmem:[%s15157_s0 + $0x378] sm:$0xff]  }
  0x34   :  { %3558 = vst [vmem:[#allocation1 + $0x98] sm:$0xff] %v10535_v29  ;;  %v4289_v34 = vld [vmem:[#allocation1 + $0x28f] ss:$16 sm:%s4288_s24]   ;;  %s11773_s24 = smov 48  ;;  %v10311_v29 = vunpack.c.h.bf16 %v10674_v24 }
  0x35   :  { %v4292_v35 = vld [vmem:[#allocation1 + $0x28f] ss:$16 sm:%s4291_s25]   ;;  %3588 = vst [vmem:[#allocation1 + $0x88] sm:$0xff] %v10539_v30  ;;  %s11754_s25 = smov 12  ;;  %15174 = sst [smem:[#allocation4_spill]] %s11773_s24  ;;  %v10629_v30 = vld [vmem:[%s15157_s0 + $0x370] sm:$0xff]  }
  0x36   :  { %2433 = vst [vmem:[#allocation1 + $0x2f0] sm:$0xff] %v10382_v31  ;;  %v4294_v39 = vsel %vm3846_vm0, %v4292_v35, %v4289_v34  ;;  %v4297_v40 = vld [vmem:[#allocation1 + $0x28f] ss:$16 sm:%s4296_s28]   ;;  %s11771_s28 = smov 12  ;;  %s11794_s24 = smov 3  ;;  %v10315_v31 = vunpack.c.h.bf16 %v10675_v26  ;;  %v10631_v34 = vld [vmem:[%s15157_s0 + $0x360] sm:$0xff]   ;;  %v10131_v35 = vunpack.c.h.bf16 %v10629_v30 }
  0x37   :  { %2463 = vst [vmem:[#allocation1 + $0x2e0] sm:$0xff] %v10386_v32  ;;  %v4299_v43 = vsel %vm3850_vm1, %v4297_v40, %v4294_v39  ;;  %v4302_v44 = vld [vmem:[#allocation1 + $0x28f] ss:$16 sm:%s4301_s29]   ;;  %s11762_s29 = smov 192  ;;  %15173 = sst [smem:[#allocation3_spill]] %s11771_s28  ;;  %v10633_v40 = vld [vmem:[%s15157_s0 + $0x350] sm:$0xff]  }
  0x38   :  { %2493 = vst [vmem:[#allocation1 + $0x2d0] sm:$0xff] %v10390_v33  ;;  %v4304_v53 = vsel %vm3854_vm2, %v4302_v44, %v4299_v43  ;;  %s11792_s28 = smov 192  ;;  %15180 = sst [smem:[#allocation10_spill]] %s11794_s24  ;;  %v10630_v32 = vld [vmem:[%s15157_s0 + $0x368] sm:$0xff]   ;;  %v10127_v33 = vunpack.c.h.bf16 %v10628_v28  ;;  %v10683_v30 = vld [vmem:[%s15157_s0 + $0x1c0] sm:$0xff]  }
  0x39   :  { %2523 = vst [vmem:[#allocation1 + $0x2c0] sm:$0xff] %v10394_v36  ;;  %15179 = sst [smem:[#allocation9_spill]] %s11792_s28  ;;  %s11801_s24 = smov 3  ;;  %v10632_v36 = vld [vmem:[%s15157_s0 + $0x358] sm:$0xff]   ;;  %v10135_v39 = vunpack.c.h.bf16 %v10630_v32  ;;  %v10634_v43 = vld [vmem:[%s15157_s0 + $0x348] sm:$0xff]  }
  0x3a   :  { %2553 = vst [vmem:[#allocation1 + $0x2b0] sm:$0xff] %v10398_v37  ;;  %15182 = sst [smem:[#allocation12_spill]] %s11801_s24  ;;  %s11808_s24 = smov 12  ;;  %v10682_v26 = vld [vmem:[%s15157_s0 + $0x1c8] sm:$0xff]  }
  0x3b   :  { %2583 = vst [vmem:[#allocation1 + $0x2a0] sm:$0xff] %v10402_v38  ;;  %15184 = sst [smem:[#allocation14_spill]] %s11808_s24  ;;  %s11815_s24 = smov 48  ;;  %v10343_v32 = vunpack.c.h.bf16 %v10682_v26 }
  0x3c   :  { %v4266_v47 = vld [vmem:[#allocation1 + $0x8f] ss:$16 sm:%s11676_s22]   ;;  %2613 = vst [vmem:[#allocation1 + $0x290] sm:$0xff] %v10406_v41  ;;  %s11748_s22 = smov 3  ;;  %15186 = sst [smem:[#allocation16_spill]] %s11815_s24  ;;  %v10139_v41 = vunpack.c.h.bf16 %v10631_v34 }
  0x3d   :  { %v4269_v48 = vld [vmem:[#allocation1 + $0x8f] ss:$16 sm:%s11678_s23]   ;;  %2643 = vst [vmem:[#allocation1 + $0x280] sm:$0xff] %v10410_v42  ;;  %s11764_s23 = smov 3  ;;  %s11822_s24 = smov 3  ;;  %v10143_v42 = vunpack.c.h.bf16 %v10632_v36  ;;  %v10347_v36 = vunpack.c.h.bf16 %v10683_v30 }
  0x3e   :  { %v4274_v49 = vld [vmem:[#allocation1 + $0x8f] ss:$16 sm:%s11681_s26]   ;;  %v4271_v51 = vsel %vm3846_vm0, %v4269_v48, %v4266_v47  ;;  %3393 = vst [vmem:[#allocation1 + $0xf0] sm:$0xff] %v10510_v45  ;;  %s11756_s26 = smov 48  ;;  %15172 = sst [smem:[#allocation2_spill]] %s11764_s23  ;;  %v10635_v47 = vld [vmem:[%s15157_s0 + $0x340] sm:$0xff]  }
  0x3f   :  { %v4279_v52 = vld [vmem:[#allocation1 + $0x8f] ss:$16 sm:%s11683_s27]   ;;  %v4276_v55 = vsel %vm3850_vm1, %v4274_v49, %v4271_v51  ;;  %3423 = vst [vmem:[#allocation1 + $0xe0] sm:$0xff] %v10514_v46  ;;  %s11780_s27 = smov 3  ;;  %s11799_s23 = smov 12  ;;  %v10147_v46 = vunpack.c.h.bf16 %v10633_v40  ;;  %v10151_v49 = vunpack.c.h.bf16 %v10634_v43 }
  0x40   :  { %v4281_v57 = vsel %vm3854_vm2, %v4279_v52, %v4276_v55  ;;  %3453 = vst [vmem:[#allocation1 + $0xd0] sm:$0xff] %v10518_v50  ;;  %15176 = sst [smem:[#allocation6_spill]] %s11780_s27  ;;  %s11827_s28 = smov 12  ;;  %v10660_v48 = vld [vmem:[%s15157_s0 + $0x278] sm:$0xff]   ;;  %v10661_v50 = vld [vmem:[%s15157_s0 + $0x270] sm:$0xff]  }
  0x41   :  { %v10771_v59 = vpack.i.bf16 %v4304_v53, %v4281_v57  ;;  %3483 = vst [vmem:[#allocation1 + $0xc0] sm:$0xff] %v10522_v54  ;;  %15181 = sst [smem:[#allocation11_spill]] %s11799_s23  ;;  %s11806_s23 = smov 48  ;;  %v10155_v53 = vunpack.c.h.bf16 %v10635_v47  ;;  %v10662_v54 = vld [vmem:[%s15157_s0 + $0x268] sm:$0xff]   ;;  %v10255_v55 = vunpack.c.h.bf16 %v10660_v48  ;;  %v10664_v57 = vld [vmem:[%s15157_s0 + $0x258] sm:$0xff]  }
  0x42   :  { %3513 = vst [vmem:[#allocation1 + $0xb0] sm:$0xff] %v10526_v56  ;;  %15183 = sst [smem:[#allocation13_spill]] %s11806_s23  ;;  %s11813_s23 = smov 192  ;;  %v10663_v56 = vld [vmem:[%s15157_s0 + $0x260] sm:$0xff]   ;;  %v10712_v40 = vld [vmem:[%s15157_s0 + $0xd8] sm:$0xff]  }
  0x43   :  { %10772 = vrot.lane.b32.xlu1 %v10771_v59, %s15159_s21  ;;  %s11778_s21 = smov 192  ;;  %3543 = vst [vmem:[#allocation1 + $0xa0] sm:$0xff] %v10530_v58  ;;  %15185 = sst [smem:[#allocation15_spill]] %s11813_s23  ;;  %v10267_v4 = vunpack.c.h.bf16 %v10663_v56 }
  0x44   :  { %15175 = sst [smem:[#allocation5_spill]] %s11778_s21  ;;  %s11787_s21 = smov 48  ;;  %3573 = vst [vmem:[#allocation1 + $0x90] sm:$0xff] %v10534_v61  ;;  %v10259_v61 = vunpack.c.h.bf16 %v10661_v50 }
  0x45   :  { %15178 = sst [smem:[#allocation8_spill]] %s11787_s21  ;;  %3603 = vst [vmem:[#allocation1 + $0x80] sm:$0xff] %v10538_v63  ;;  %s11820_s23 = smov 192 }
  0x46   :  { %738 = vst [vmem:[#allocation1 + $0x678] sm:$0xff] %v10159_v1  ;;  %15187 = sst [smem:[#allocation17_spill]] %s11820_s23  ;;  %s11829_s23 = smov 48  ;;  %v10263_v1 = vunpack.c.h.bf16 %v10662_v54  ;;  %v10463_v54 = vunpack.c.h.bf16 %v10712_v40 }
  0x47   :  { %768 = vst [vmem:[#allocation1 + $0x668] sm:$0xff] %v10163_v3  ;;  %s11836_s21 = smov 3  ;;  %s11841_s27 = smov 12 }
  0x48   :  { %798 = vst [vmem:[#allocation1 + $0x658] sm:$0xff] %v10167_v5  ;;  %15189 = sst [smem:[#allocation19_spill]] %s11841_s27  ;;  %s11846_s27 = smov 48  ;;  %v10666_v5 = vld [vmem:[%s15157_s0 + $0x248] sm:$0xff]  }
  0x49   :  { %828 = vst [vmem:[#allocation1 + $0x648] sm:$0xff] %v10171_v7  ;;  %15190 = sst [smem:[#allocation20_spill]] %s11846_s27  ;;  %s11853_s27 = smov 3  ;;  %v10271_v7 = vunpack.c.h.bf16 %v10664_v57  ;;  %v10279_v12 = vunpack.c.h.bf16 %v10666_v5 }
  0x4a   :  { %858 = vst [vmem:[#allocation1 + $0x638] sm:$0xff] %v10175_v9  ;;  %15192 = sst [smem:[#allocation22_spill]] %s11853_s27  ;;  %s11860_s27 = smov 48 }
  0x4b   :  { %888 = vst [vmem:[#allocation1 + $0x628] sm:$0xff] %v10179_v11  ;;  %15194 = sst [smem:[#allocation24_spill]] %s11860_s27  ;;  %s11867_s27 = smov 3  ;;  %v10676_v11 = vld [vmem:[%s15157_s0 + $0x1f8] sm:$0xff]  }
  0x4c   :  { %918 = vst [vmem:[#allocation1 + $0x618] sm:$0xff] %v10183_v13  ;;  %15196 = sst [smem:[#allocation26_spill]] %s11867_s27  ;;  %s11874_s27 = smov 48  ;;  %v10677_v13 = vld [vmem:[%s15157_s0 + $0x1f0] sm:$0xff]   ;;  %v10319_v16 = vunpack.c.h.bf16 %v10676_v11 }
  0x4d   :  { %948 = vst [vmem:[#allocation1 + $0x608] sm:$0xff] %v10187_v15  ;;  %15198 = sst [smem:[#allocation28_spill]] %s11874_s27  ;;  %s11881_s27 = smov 3  ;;  %v10678_v15 = vld [vmem:[%s15157_s0 + $0x1e8] sm:$0xff]   ;;  %v10323_v18 = vunpack.c.h.bf16 %v10677_v13  ;;  %v10619_v13 = vld [vmem:[%s15157_s0 + $0x3c0] sm:$0xff]  }
  0x4e   :  { %1698 = vst [vmem:[#allocation1 + $0x478] sm:$0xff] %v10287_v17  ;;  %15200 = sst [smem:[#allocation30_spill]] %s11881_s27  ;;  %s11888_s27 = smov 48  ;;  %v10679_v17 = vld [vmem:[%s15157_s0 + $0x1e0] sm:$0xff]  }
  0x4f   :  { %1728 = vst [vmem:[#allocation1 + $0x468] sm:$0xff] %v10291_v19  ;;  %15202 = sst [smem:[#allocation32_spill]] %s11888_s27  ;;  %s11895_s27 = smov 3  ;;  %v10680_v19 = vld [vmem:[%s15157_s0 + $0x1d8] sm:$0xff]   ;;  %v10331_v24 = vunpack.c.h.bf16 %v10679_v17 }
  0x50   :  { %1758 = vst [vmem:[#allocation1 + $0x458] sm:$0xff] %v10295_v21 }
  0x51   :  { %1788 = vst [vmem:[#allocation1 + $0x448] sm:$0xff] %v10299_v23  ;;  %v10327_v23 = vunpack.c.h.bf16 %v10678_v15 }
  0x52   :  { %1818 = vst [vmem:[#allocation1 + $0x438] sm:$0xff] %v10303_v25  ;;  %v10335_v25 = vunpack.c.h.bf16 %v10680_v19  ;;  %v10091_v19 = vunpack.c.h.bf16 %v10619_v13  ;;  %v12323_v13 = vld [vmem:[%s15157_s0 + $0xb0] sm:$0xff]  }
  0x53   :  { %1848 = vst [vmem:[#allocation1 + $0x428] sm:$0xff] %v10307_v27 }
  0x54   :  { %1878 = vst [vmem:[#allocation1 + $0x418] sm:$0xff] %v10311_v29  ;;  %v4243_v37 = vld [vmem:[#allocation1 + $0x60f] ss:$16 sm:%s11698_s5]   ;;  %s11904_s5 = smov 48  ;;  %v10339_v29 = vunpack.c.h.bf16 %v10681_v20 }
  0x55   :  { %v4246_v38 = vld [vmem:[#allocation1 + $0x60f] ss:$16 sm:%s11702_s6]   ;;  %1908 = vst [vmem:[#allocation1 + $0x408] sm:$0xff] %v10315_v31  ;;  %15204 = sst [smem:[#allocation34_spill]] %s11904_s5  ;;  %s11906_s6 = smov 192 }
  0x56   :  { %15205 = sst [smem:[#allocation35_spill]] %s11906_s6  ;;  %498 = vst [vmem:[#allocation1 + $0x6f8] sm:$0xff] %v10127_v33  ;;  %s11911_s5 = smov 3  ;;  %v4248_v44 = vsel %vm3846_vm0, %v4246_v38, %v4243_v37  ;;  %v4251_v45 = vld [vmem:[#allocation1 + $0x60f] ss:$16 sm:%s11704_s7]   ;;  %v10709_v33 = vld [vmem:[%s15157_s0 + $0xf0] sm:$0xff]  }
  0x57   :  { %15206 = sst [smem:[#allocation36_spill]] %s11911_s5  ;;  %s11913_s6 = smov 12  ;;  %528 = vst [vmem:[#allocation1 + $0x6e8] sm:$0xff] %v10131_v35  ;;  %v4253_v51 = vsel %vm3850_vm1, %v4251_v45, %v4248_v44  ;;  %v4256_v52 = vld [vmem:[#allocation1 + $0x60f] ss:$16 sm:%s11706_s8]   ;;  %v10451_v44 = vunpack.c.h.bf16 %v10709_v33 }
  0x58   :  { %15207 = sst [smem:[#allocation37_spill]] %s11913_s6  ;;  %s11920_s6 = smov 48  ;;  %558 = vst [vmem:[#allocation1 + $0x6d8] sm:$0xff] %v10135_v39  ;;  %v4258_v0 = vsel %vm3854_vm2, %v4256_v52, %v4253_v51  ;;  %v10708_v31 = vld [vmem:[%s15157_s0 + $0xf8] sm:$0xff]   ;;  %v10710_v37 = vld [vmem:[%s15157_s0 + $0xe8] sm:$0xff]   ;;  %v10711_v39 = vld [vmem:[%s15157_s0 + $0xe0] sm:$0xff]  }
  0x59   :  { %15208 = sst [smem:[#allocation38_spill]] %s11920_s6  ;;  %s11922_s7 = smov 3  ;;  %588 = vst [vmem:[#allocation1 + $0x6c8] sm:$0xff] %v10139_v41  ;;  %v10447_v38 = vunpack.c.h.bf16 %v10708_v31  ;;  %v10455_v48 = vunpack.c.h.bf16 %v10710_v37  ;;  %v10459_v51 = vunpack.c.h.bf16 %v10711_v39  ;;  %v10714_v52 = vld [vmem:[%s15157_s0 + $0xc8] sm:$0xff]  }
  0x5a   :  { %15209 = sst [smem:[#allocation39_spill]] %s11922_s7  ;;  %s11927_s5 = smov 192  ;;  %618 = vst [vmem:[#allocation1 + $0x6b8] sm:$0xff] %v10143_v42  ;;  %v10646_v20 = vld [vmem:[%s15157_s0 + $0x2e8] sm:$0xff]  }
  0x5b   :  { %15210 = sst [smem:[#allocation40_spill]] %s11927_s5  ;;  %s11929_s6 = smov 12  ;;  %648 = vst [vmem:[#allocation1 + $0x6a8] sm:$0xff] %v10147_v46  ;;  %v10199_v33 = vunpack.c.h.bf16 %v10646_v20 }
  0x5c   :  { %15211 = sst [smem:[#allocation41_spill]] %s11929_s6  ;;  %s11934_s5 = smov 48  ;;  %v4220_v58 = vld [vmem:[#allocation1 + $0x40f] ss:$16 sm:%s11688_s30]   ;;  %678 = vst [vmem:[#allocation1 + $0x698] sm:$0xff] %v10151_v49  ;;  %v10713_v49 = vld [vmem:[%s15157_s0 + $0xd0] sm:$0xff]  }
  0x5d   :  { %15212 = sst [smem:[#allocation42_spill]] %s11934_s5  ;;  %s11936_s6 = smov 192  ;;  %v4223_v59 = vld [vmem:[#allocation1 + $0x40f] ss:$16 sm:%s11691_s2]   ;;  %708 = vst [vmem:[#allocation1 + $0x688] sm:$0xff] %v10155_v53  ;;  %v10467_v57 = vunpack.c.h.bf16 %v10713_v49 }
  0x5e   :  { %15213 = sst [smem:[#allocation43_spill]] %s11936_s6  ;;  %s11943_s6 = smov 3  ;;  %v4228_v60 = vld [vmem:[#allocation1 + $0x40f] ss:$16 sm:%s11693_s3]   ;;  %v4225_v62 = vsel %vm3846_vm0, %v4223_v59, %v4220_v58  ;;  %1458 = vst [vmem:[#allocation1 + $0x4f8] sm:$0xff] %v10255_v55  ;;  %v10715_v55 = vld [vmem:[%s15157_s0 + $0xc0] sm:$0xff]   ;;  %v10471_v59 = vunpack.c.h.bf16 %v10714_v52 }
  0x5f   :  { %15214 = sst [smem:[#allocation44_spill]] %s11943_s6  ;;  %s11945_s8 = smov 12  ;;  %v4233_v63 = vld [vmem:[#allocation1 + $0x40f] ss:$16 sm:%s11696_s4]   ;;  %v4230_v3 = vsel %vm3850_vm1, %v4228_v60, %v4225_v62  ;;  %1488 = vst [vmem:[#allocation1 + $0x4e8] sm:$0xff] %v10259_v61  ;;  %v10613_v60 = vld [vmem:[%s15157_s0 + $0x3f0] sm:$0xff]   ;;  %v10475_v61 = vunpack.c.h.bf16 %v10715_v55 }
  0x60   :  { %15215 = sst [smem:[#allocation45_spill]] %s11945_s8  ;;  %s11953_s6 = smov 48  ;;  %v4235_v6 = vsel %vm3854_vm2, %v4233_v63, %v4230_v3  ;;  %1518 = vst [vmem:[#allocation1 + $0x4d8] sm:$0xff] %v10263_v1  ;;  %v10612_v58 = vld [vmem:[%s15157_s0 + $0x3f8] sm:$0xff]   ;;  %v10614_v62 = vld [vmem:[%s15157_s0 + $0x3e8] sm:$0xff]   ;;  %v10067_v1 = vunpack.c.h.bf16 %v10613_v60  ;;  %v10617_v3 = vld [vmem:[%s15157_s0 + $0x3d0] sm:$0xff]  }
  0x61   :  { %15216 = sst [smem:[#allocation46_spill]] %s11953_s6  ;;  %s11955_s8 = smov 192  ;;  %v10766_v9 = vpack.i.bf16 %v4258_v0, %v4235_v6  ;;  %1548 = vst [vmem:[#allocation1 + $0x4c8] sm:$0xff] %v10267_v4  ;;  %v10063_v63 = vunpack.c.h.bf16 %v10612_v58  ;;  %v10615_v0 = vld [vmem:[%s15157_s0 + $0x3e0] sm:$0xff]   ;;  %v10071_v6 = vunpack.c.h.bf16 %v10614_v62  ;;  %v4587_v37 = vld [vmem:[#allocation1 + $0x40e] ss:$16 sm:%s11822_s24]  }
  0x62   :  { %15217 = sst [smem:[#allocation47_spill]] %s11955_s8  ;;  %s11966_s3 = smov 3  ;;  %1578 = vst [vmem:[#allocation1 + $0x4b8] sm:$0xff] %v10271_v7  ;;  %v10075_v7 = vunpack.c.h.bf16 %v10615_v0 }
  0x63   :  { %15218 = sst [smem:[#allocation48_spill]] %s11966_s3  ;;  %s11968_s4 = smov 12  ;;  %1608 = vst [vmem:[#allocation1 + $0x4a8] sm:$0xff] %v10275_v10 }
  0x64   :  { %15219 = sst [smem:[#allocation49_spill]] %s11968_s4  ;;  %s11974_s30 = smov 48  ;;  %1638 = vst [vmem:[#allocation1 + $0x498] sm:$0xff] %v10279_v12  ;;  %v4335_v21 = vld [vmem:[#allocation1 + $0x68f] ss:$16 sm:%s11719_s13]   ;;  %v10083_v12 = vunpack.c.h.bf16 %v10617_v3  ;;  %v12290_v3 = vld [vmem:[%s15157_s0 + $0x190] sm:$0xff]  }
  0x65   :  { %15220 = sst [smem:[#allocation50_spill]] %s11974_s30  ;;  %s11976_s2 = smov 192  ;;  %v4338_v22 = vld [vmem:[#allocation1 + $0x68f] ss:$16 sm:%s11722_s14]   ;;  %1668 = vst [vmem:[#allocation1 + $0x488] sm:$0xff] %v10283_v14 }
  0x66   :  { %15221 = sst [smem:[#allocation51_spill]] %s11976_s2  ;;  %s11982_s6 = smov 3  ;;  %1938 = vst [vmem:[#allocation1 + $0x3f8] sm:$0xff] %v10319_v16  ;;  %v4340_v27 = vsel %vm3846_vm0, %v4338_v22, %v4335_v21  ;;  %v4343_v28 = vld [vmem:[#allocation1 + $0x68f] ss:$16 sm:%s11724_s15]   ;;  %v10645_v16 = vld [vmem:[%s15157_s0 + $0x2f0] sm:$0xff]  }
  0x67   :  { %15222 = sst [smem:[#allocation52_spill]] %s11982_s6  ;;  %s11984_s8 = smov 12  ;;  %1968 = vst [vmem:[#allocation1 + $0x3e8] sm:$0xff] %v10323_v18  ;;  %v4345_v34 = vsel %vm3850_vm1, %v4343_v28, %v4340_v27  ;;  %v4348_v35 = vld [vmem:[#allocation1 + $0x68f] ss:$16 sm:%s11734_s16]   ;;  %v10647_v22 = vld [vmem:[%s15157_s0 + $0x2e0] sm:$0xff]   ;;  %v10195_v28 = vunpack.c.h.bf16 %v10645_v16 }
  0x68   :  { %15223 = sst [smem:[#allocation53_spill]] %s11984_s8  ;;  %s11989_s2 = smov 48  ;;  %1998 = vst [vmem:[#allocation1 + $0x3d8] sm:$0xff] %v10327_v23  ;;  %v4350_v47 = vsel %vm3854_vm2, %v4348_v35, %v4345_v34  ;;  %v10644_v14 = vld [vmem:[%s15157_s0 + $0x2f8] sm:$0xff]   ;;  %v10651_v34 = vld [vmem:[%s15157_s0 + $0x2c0] sm:$0xff]  }
  0x69   :  { %15224 = sst [smem:[#allocation54_spill]] %s11989_s2  ;;  %s11991_s8 = smov 192  ;;  %2028 = vst [vmem:[#allocation1 + $0x3c8] sm:$0xff] %v10331_v24  ;;  %v10191_v21 = vunpack.c.h.bf16 %v10644_v14  ;;  %v10648_v23 = vld [vmem:[%s15157_s0 + $0x2d8] sm:$0xff]   ;;  %v10649_v24 = vld [vmem:[%s15157_s0 + $0x2d0] sm:$0xff]   ;;  %v10219_v55 = vunpack.c.h.bf16 %v10651_v34  ;;  %v12332_v14 = vld [vmem:[%s15157_s0 + $0xa8] sm:$0xff]  }
  0x6a   :  { %15225 = sst [smem:[#allocation55_spill]] %s11991_s8  ;;  %s11996_s2 = smov 3  ;;  %2058 = vst [vmem:[#allocation1 + $0x3b8] sm:$0xff] %v10335_v25  ;;  %v10207_v40 = vunpack.c.h.bf16 %v10648_v23  ;;  %v12356_v23 = vld [vmem:[%s15157_s0 + $0x98] sm:$0xff]  }
  0x6b   :  { %15226 = sst [smem:[#allocation56_spill]] %s11996_s2  ;;  %s11998_s8 = smov 12  ;;  %2088 = vst [vmem:[#allocation1 + $0x3a8] sm:$0xff] %v10339_v29  ;;  %v10650_v29 = vld [vmem:[%s15157_s0 + $0x2c8] sm:$0xff]  }
  0x6c   :  { %15227 = sst [smem:[#allocation57_spill]] %s11998_s8  ;;  %s15228_s8 = smov 120   ;;  %v4312_v41 = vld [vmem:[#allocation1 + $0x48f] ss:$16 sm:%s11708_s9]   ;;  %2118 = vst [vmem:[#allocation1 + $0x398] sm:$0xff] %v10343_v32 }
  0x6d   :  { %10767 = vrot.lane.b32.xlu0 %v10766_v9, %s15228_s8  ;;  %s12004_s6 = smov 48  ;;  %s12006_s2 = smov 192  ;;  %v4315_v42 = vld [vmem:[#allocation1 + $0x48f] ss:$16 sm:%s11711_s10]   ;;  %2148 = vst [vmem:[#allocation1 + $0x388] sm:$0xff] %v10347_v36  ;;  %v10203_v36 = vunpack.c.h.bf16 %v10647_v22 }
  0x6e   :  { %15229 = sst [smem:[#allocation58_spill]] %s12004_s6  ;;  %s12011_s6 = smov 3  ;;  %v4320_v43 = vld [vmem:[#allocation1 + $0x48f] ss:$16 sm:%s11713_s11]   ;;  %v4317_v45 = vsel %vm3846_vm0, %v4315_v42, %v4312_v41  ;;  %2898 = vst [vmem:[#allocation1 + $0x1f8] sm:$0xff] %v10447_v38 }
  0x6f   :  { %15230 = sst [smem:[#allocation59_spill]] %s12006_s2  ;;  %s12013_s2 = smov 12  ;;  %v4325_v46 = vld [vmem:[#allocation1 + $0x48f] ss:$16 sm:%s11717_s12]   ;;  %v4322_v50 = vsel %vm3850_vm1, %v4320_v43, %v4317_v45  ;;  %2928 = vst [vmem:[#allocation1 + $0x1e8] sm:$0xff] %v10451_v44  ;;  %v10211_v45 = vunpack.c.h.bf16 %v10649_v24 }
  0x70   :  { %s12021_s4 = smov 48  ;;  %s12023_s30 = smov 192  ;;  %v4327_v53 = vsel %vm3854_vm2, %v4325_v46, %v4322_v50  ;;  %2958 = vst [vmem:[#allocation1 + $0x1d8] sm:$0xff] %v10455_v48  ;;  %v10618_v9 = vld [vmem:[%s15157_s0 + $0x3c8] sm:$0xff]   ;;  %v12238_v46 = vld [vmem:[%s15157_s0 + $0x1b8] sm:$0xff]   ;;  %v10215_v50 = vunpack.c.h.bf16 %v10650_v29 }
  0x71   :  { %s12027_s13 = smov 3  ;;  %s12029_s14 = smov 12  ;;  %v10776_v56 = vpack.i.bf16 %v4350_v47, %v4327_v53  ;;  %2988 = vst [vmem:[#allocation1 + $0x1c8] sm:$0xff] %v10459_v51  ;;  %v10087_v15 = vunpack.c.h.bf16 %v10618_v9  ;;  %v4590_v38 = vld [vmem:[#allocation1 + $0x40e] ss:$16 sm:%s11827_s28]   ;;  %v12246_v51 = vld [vmem:[%s15157_s0 + $0x1b0] sm:$0xff]   ;;  %v10351_v58 = vunpack.c.h.bf16 %v12238_v46  ;;  %v10350_v46 = vunpack.c.l.bf16 %v12238_v46 }
  0x72   :  { %s12031_s3 = smov 48  ;;  %s12036_s7 = smov 192  ;;  %3018 = vst [vmem:[#allocation1 + $0x1b8] sm:$0xff] %v10463_v54  ;;  %v4592_v41 = vsel %vm3846_vm0, %v4590_v38, %v4587_v37  ;;  %v4595_v42 = vld [vmem:[#allocation1 + $0x40e] ss:$16 sm:%s11829_s23]   ;;  %v10355_v62 = vunpack.c.h.bf16 %v12246_v51  ;;  %v10354_v51 = vunpack.c.l.bf16 %v12246_v51 }
  0x73   :  { %s12038_s5 = smov 3  ;;  %s12047_s15 = smov 48  ;;  %10777 = vrot.lane.b32.xlu1 %v10776_v56, %s15228_s8  ;;  %3048 = vst [vmem:[#allocation1 + $0x1a8] sm:$0xff] %v10467_v57  ;;  %v4610_v43 = vld [vmem:[#allocation1 + $0x60e] ss:$16 sm:%s11836_s21]   ;;  %v4597_v47 = vsel %vm3850_vm1, %v4595_v42, %v4592_v41 }
  0x74   :  { %15231 = sst [smem:[#allocation60_spill]] %s12038_s5  ;;  %s12045_s5 = smov 12  ;;  %3078 = vst [vmem:[#allocation1 + $0x198] sm:$0xff] %v10471_v59  ;;  %v4473_v4 = vld [vmem:[#allocation1 + $0x38f] ss:$16 sm:%s11748_s22]   ;;  %v12266_v59 = vld [vmem:[%s15157_s0 + $0x1a0] sm:$0xff]  }
  0x75   :  { %15232 = sst [smem:[#allocation61_spill]] %s12045_s5  ;;  %s12052_s5 = smov 192  ;;  %v4476_v5 = vld [vmem:[#allocation1 + $0x38f] ss:$16 sm:%s11754_s25]   ;;  %3108 = vst [vmem:[#allocation1 + $0x188] sm:$0xff] %v10475_v61 }
  0x76   :  { %15233 = sst [smem:[#allocation62_spill]] %s12047_s15  ;;  %s12059_s15 = smov 12  ;;  %18 = vst [vmem:[#allocation1 + $0x7f8] sm:$0xff] %v10063_v63  ;;  %v4478_v10 = vsel %vm3846_vm0, %v4476_v5, %v4473_v4  ;;  %v4481_v11 = vld [vmem:[#allocation1 + $0x38f] ss:$16 sm:%s11756_s26]   ;;  %v10363_v4 = vunpack.c.h.bf16 %v12266_v59  ;;  %v10362_v59 = vunpack.c.l.bf16 %v12266_v59 }
  0x77   :  { %15234 = sst [smem:[#allocation63_spill]] %s12052_s5  ;;  %s12057_s5 = smov 3  ;;  %48 = vst [vmem:[#allocation1 + $0x7e8] sm:$0xff] %v10067_v1  ;;  %v4483_v17 = vsel %vm3850_vm1, %v4481_v11, %v4478_v10  ;;  %v4486_v18 = vld [vmem:[#allocation1 + $0x38f] ss:$16 sm:%s11762_s29]  }
  0x78   :  { %15235 = sst [smem:[#allocation64_spill]] %s12057_s5  ;;  %s12068_s16 = smov 192  ;;  %78 = vst [vmem:[#allocation1 + $0x7d8] sm:$0xff] %v10071_v6  ;;  %v4488_v32 = vsel %vm3854_vm2, %v4486_v18, %v4483_v17  ;;  %v12255_v56 = vld [vmem:[%s15157_s0 + $0x1a8] sm:$0xff]   ;;  %v12278_v63 = vld [vmem:[%s15157_s0 + $0x198] sm:$0xff]   ;;  %v12343_v17 = vld [vmem:[%s15157_s0 + $0xa0] sm:$0xff]  }
  0x79   :  { %15236 = sst [smem:[#allocation65_spill]] %s12059_s15  ;;  %s12066_s15 = smov 48  ;;  %108 = vst [vmem:[#allocation1 + $0x7c8] sm:$0xff] %v10075_v7  ;;  %v10359_v2 = vunpack.c.h.bf16 %v12255_v56  ;;  %v10367_v6 = vunpack.c.h.bf16 %v12278_v63  ;;  %v12301_v7 = vld [vmem:[%s15157_s0 + $0x188] sm:$0xff]   ;;  %v12311_v9 = vld [vmem:[%s15157_s0 + $0xb8] sm:$0xff]   ;;  %v10358_v56 = vunpack.c.l.bf16 %v12255_v56 }
  0x7a   :  { %15237 = sst [smem:[#allocation66_spill]] %s12066_s15  ;;  %s12076_s15 = smov 3  ;;  %138 = vst [vmem:[#allocation1 + $0x7b8] sm:$0xff] %v10079_v8  ;;  %v12306_v8 = vld [vmem:[%s15157_s0 + $0x180] sm:$0xff]   ;;  %v10375_v16 = vunpack.c.h.bf16 %v12301_v7  ;;  %v12390_v41 = vld [vmem:[%s15157_s0 + $0x88] sm:$0xff]  }
  0x7b   :  { %15238 = sst [smem:[#allocation67_spill]] %s12068_s16  ;;  %s12078_s16 = smov 12  ;;  %168 = vst [vmem:[#allocation1 + $0x7a8] sm:$0xff] %v10083_v12  ;;  %v10371_v12 = vunpack.c.h.bf16 %v12290_v3  ;;  %v10379_v22 = vunpack.c.h.bf16 %v12306_v8 }
  0x7c   :  { %15239 = sst [smem:[#allocation68_spill]] %s12076_s15  ;;  %s12089_s11 = smov 48  ;;  %v4450_v25 = vld [vmem:[#allocation1 + $0x18f] ss:$16 sm:%s11736_s17]   ;;  %198 = vst [vmem:[#allocation1 + $0x798] sm:$0xff] %v10087_v15 }
  0x7d   :  { %15240 = sst [smem:[#allocation69_spill]] %s12078_s16  ;;  %s12091_s12 = smov 192  ;;  %v4453_v26 = vld [vmem:[#allocation1 + $0x18f] ss:$16 sm:%s11740_s18]   ;;  %228 = vst [vmem:[#allocation1 + $0x788] sm:$0xff] %v10091_v19 }
  0x7e   :  { %15241 = sst [smem:[#allocation70_spill]] %s12089_s11  ;;  %s12097_s9 = smov 3  ;;  %v4458_v27 = vld [vmem:[#allocation1 + $0x18f] ss:$16 sm:%s11742_s19]   ;;  %v4455_v30 = vsel %vm3846_vm0, %v4453_v26, %v4450_v25  ;;  %978 = vst [vmem:[#allocation1 + $0x5f8] sm:$0xff] %v10191_v21  ;;  %v10479_v25 = vunpack.c.h.bf16 %v12311_v9  ;;  %v12365_v26 = vld [vmem:[%s15157_s0 + $0x90] sm:$0xff]   ;;  %v10478_v9 = vunpack.c.l.bf16 %v12311_v9 }
  0x7f   :  { %15242 = sst [smem:[#allocation71_spill]] %s12091_s12  ;;  %s12099_s10 = smov 12  ;;  %v4463_v31 = vld [vmem:[#allocation1 + $0x18f] ss:$16 sm:%s11746_s20]   ;;  %v4460_v35 = vsel %vm3850_vm1, %v4458_v27, %v4455_v30  ;;  %1008 = vst [vmem:[#allocation1 + $0x5e8] sm:$0xff] %v10195_v28 }
  0x80   :  { %15243 = sst [smem:[#allocation72_spill]] %s12097_s9  ;;  %s12105_s11 = smov 48  ;;  %v4465_v39 = vsel %vm3854_vm2, %v4463_v31, %v4460_v35  ;;  %1038 = vst [vmem:[#allocation1 + $0x5d8] sm:$0xff] %v10199_v33  ;;  %v10483_v31 = vunpack.c.h.bf16 %v12323_v13 }
  0x81   :  { %15244 = sst [smem:[#allocation73_spill]] %s12099_s10  ;;  %s12107_s12 = smov 192  ;;  %v10791_v44 = vpack.i.bf16 %v4488_v32, %v4465_v39  ;;  %1068 = vst [vmem:[#allocation1 + $0x5c8] sm:$0xff] %v10203_v36  ;;  %v10487_v32 = vunpack.c.h.bf16 %v12332_v14  ;;  %v10486_v14 = vunpack.c.l.bf16 %v12332_v14 }
  0x82   :  { %15245 = sst [smem:[#allocation74_spill]] %s12105_s11  ;;  %s12112_s11 = smov 3  ;;  %1098 = vst [vmem:[#allocation1 + $0x5b8] sm:$0xff] %v10207_v40  ;;  %v10491_v40 = vunpack.c.h.bf16 %v12343_v17  ;;  %v10490_v17 = vunpack.c.l.bf16 %v12343_v17 }
  0x83   :  { %15246 = sst [smem:[#allocation75_spill]] %s12107_s12  ;;  %s12114_s12 = smov 12  ;;  %10792 = vrot.lane.b32.xlu0 %v10791_v44, %s15228_s8  ;;  %1128 = vst [vmem:[#allocation1 + $0x5a8] sm:$0xff] %v10211_v45  ;;  %v12401_v44 = vld [vmem:[%s15157_s0 + $0x80] sm:$0xff]  }
  0x84   :  { %s12119_s9 = smov 48  ;;  %s12121_s10 = smov 192  ;;  %1158 = vst [vmem:[#allocation1 + $0x598] sm:$0xff] %v10215_v50 }
  0x85   :  { %s12127_s15 = smov 3  ;;  %s12129_s16 = smov 12  ;;  %1188 = vst [vmem:[#allocation1 + $0x588] sm:$0xff] %v10219_v55 }
  0x86   :  { %15247 = sst [smem:[#allocation76_spill]] %s12129_s16  ;;  %s12134_s5 = smov 48  ;;  %2178 = vst [vmem:[#allocation1 + $0x378] sm:$0xff] %v10351_v58 }
  0x87   :  { %15248 = sst [smem:[#allocation77_spill]] %s12134_s5  ;;  %s12136_s16 = smov 192  ;;  %2208 = vst [vmem:[#allocation1 + $0x368] sm:$0xff] %v10355_v62  ;;  %v10366_v62 = vunpack.c.l.bf16 %v12278_v63 }
  0x88   :  { %15249 = sst [smem:[#allocation78_spill]] %s12136_s16  ;;  %s12144_s5 = smov 3  ;;  %2238 = vst [vmem:[#allocation1 + $0x358] sm:$0xff] %v10359_v2 }
  0x89   :  { %s12146_s16 = smov 12  ;;  %s12150_s22 = smov 48  ;;  %2268 = vst [vmem:[#allocation1 + $0x348] sm:$0xff] %v10363_v4  ;;  %v10374_v4 = vunpack.c.l.bf16 %v12301_v7  ;;  %v10378_v7 = vunpack.c.l.bf16 %v12306_v8 }
  0x8a   :  { %15250 = sst [smem:[#allocation79_spill]] %s12150_s22  ;;  %s12152_s25 = smov 192  ;;  %2298 = vst [vmem:[#allocation1 + $0x338] sm:$0xff] %v10367_v6 }
  0x8b   :  { %15251 = sst [smem:[#allocation80_spill]] %s12152_s25  ;;  %s12154_s25 = smov 3  ;;  %2328 = vst [vmem:[#allocation1 + $0x328] sm:$0xff] %v10371_v12  ;;  %v10482_v12 = vunpack.c.l.bf16 %v12323_v13 }
  0x8c   :  { %15252 = sst [smem:[#allocation81_spill]] %s12154_s25  ;;  %s12159_s22 = smov 12  ;;  %2358 = vst [vmem:[#allocation1 + $0x318] sm:$0xff] %v10375_v16 }
  0x8d   :  { %s12161_s25 = smov 48  ;;  %s12170_s26 = smov 3  ;;  %2388 = vst [vmem:[#allocation1 + $0x308] sm:$0xff] %v10379_v22 }
  0x8e   :  { %15253 = sst [smem:[#allocation82_spill]] %s12161_s25  ;;  %s12168_s25 = smov 192  ;;  %3138 = vst [vmem:[#allocation1 + $0x178] sm:$0xff] %v10479_v25 }
  0x8f   :  { %15254 = sst [smem:[#allocation83_spill]] %s12168_s25  ;;  %s12175_s25 = smov 12  ;;  %3168 = vst [vmem:[#allocation1 + $0x168] sm:$0xff] %v10483_v31 }
  0x90   :  { %15255 = sst [smem:[#allocation84_spill]] %s12170_s26  ;;  %s12177_s26 = smov 48  ;;  %3198 = vst [vmem:[#allocation1 + $0x158] sm:$0xff] %v10487_v32 }
  0x91   :  { %15256 = sst [smem:[#allocation85_spill]] %s12175_s25  ;;  %s12182_s25 = smov 192  ;;  %3228 = vst [vmem:[#allocation1 + $0x148] sm:$0xff] %v10491_v40  ;;  %v10622_v40 = vld [vmem:[%s15157_s0 + $0x3a8] sm:$0xff]  }
  0x92   :  { %15257 = sst [smem:[#allocation86_spill]] %s12177_s26  ;;  %s12184_s26 = smov 3  ;;  %2193 = vst [vmem:[#allocation1 + $0x370] sm:$0xff] %v10350_v46 }
  0x93   :  { %15258 = sst [smem:[#allocation87_spill]] %s12182_s25  ;;  %s12191_s25 = smov 12  ;;  %2223 = vst [vmem:[#allocation1 + $0x360] sm:$0xff] %v10354_v51  ;;  %v4866_v51 = vld [vmem:[#allocation1 + $0x58e] ss:$16 sm:%s12013_s2]  }
  0x94   :  { %15259 = sst [smem:[#allocation88_spill]] %s12184_s26  ;;  %s12193_s29 = smov 48  ;;  %v4748_v63 = vld [vmem:[#allocation1 + $0x30e] ss:$16 sm:%s11895_s27]   ;;  %2253 = vst [vmem:[#allocation1 + $0x350] sm:$0xff] %v10358_v56 }
  0x95   :  { %15260 = sst [smem:[#allocation89_spill]] %s12191_s25  ;;  %s12204_s25 = smov 192  ;;  %2283 = vst [vmem:[#allocation1 + $0x340] sm:$0xff] %v10362_v59  ;;  %v4871_v59 = vld [vmem:[#allocation1 + $0x58e] ss:$16 sm:%s12021_s4]  }
  0x96   :  { %15261 = sst [smem:[#allocation90_spill]] %s12193_s29  ;;  %s12206_s29 = smov 3  ;;  %2313 = vst [vmem:[#allocation1 + $0x330] sm:$0xff] %v10366_v62 }
  0x97   :  { %15262 = sst [smem:[#allocation91_spill]] %s12204_s25  ;;  %s12220_s17 = smov 12  ;;  %2373 = vst [vmem:[#allocation1 + $0x310] sm:$0xff] %v10374_v4 }
  0x98   :  { %s12222_s18 = smov 48  ;;  %s15263_s19 = sld [smem:[#allocation18_spill]]  ;;  %2403 = vst [vmem:[#allocation1 + $0x300] sm:$0xff] %v10378_v7 }
  0x99   :  { %s15264_s24 = sld [smem:[#allocation19_spill]]  ;;  %s12227_s28 = smov 192  ;;  %3153 = vst [vmem:[#allocation1 + $0x170] sm:$0xff] %v10478_v9 }
  0x9a   :  { %s15265_s20 = sld [smem:[#allocation20_spill]]  ;;  %s12233_s23 = smov 3  ;;  %3183 = vst [vmem:[#allocation1 + $0x160] sm:$0xff] %v10482_v12 }
  0x9b   :  { %s15266_s25 = sld [smem:[#allocation21_spill]]  ;;  %s12258_s21 = smov 12  ;;  %3213 = vst [vmem:[#allocation1 + $0x150] sm:$0xff] %v10486_v14  ;;  %v10659_v14 = vld [vmem:[%s15157_s0 + $0x280] sm:$0xff]  }
  0x9c   :  { %15267 = sst [smem:[#allocation18_spill]] %s12233_s23  ;;  %3243 = vst [vmem:[#allocation1 + $0x140] sm:$0xff] %v10490_v17  ;;  %s12591_s4 = smov 192  ;;  %v5003_v17 = vld [vmem:[#allocation1 + $0x8d] ss:$16 sm:%s12114_s12]  }
  0x9d   :  { %15269 = sst [smem:[#allocation19_spill]] %s12258_s21  ;;  %s12623_s2 = smov 48 }
  0x9e   :  { %v4600_v48 = vld [vmem:[#allocation1 + $0x40e] ss:$16 sm:%s15263_s19]   ;;  %s15270_s26 = sld [smem:[#allocation7_spill]]  ;;  %s12260_s19 = smov 48 }
  0x9f   :  { %v4613_v49 = vld [vmem:[#allocation1 + $0x60e] ss:$16 sm:%s15264_s24]   ;;  %15271 = sst [smem:[#allocation20_spill]] %s12260_s19  ;;  %v4602_v60 = vsel %vm3854_vm2, %v4600_v48, %v4597_v47  ;;  %s12272_s24 = smov 3  ;;  %v10499_v47 = vunpack.c.h.bf16 %v12365_v26  ;;  %v10498_v26 = vunpack.c.l.bf16 %v12365_v26 }
  0xa0   :  { %v4615_v52 = vsel %vm3846_vm0, %v4613_v49, %v4610_v43  ;;  %v4618_v53 = vld [vmem:[#allocation1 + $0x60e] ss:$16 sm:%s15265_s20]   ;;  %s15268_s20 = sld [smem:[#allocation6_spill]]  ;;  %s12325_s19 = smov 192  ;;  %v10495_v43 = vunpack.c.h.bf16 %v12356_v23  ;;  %v10494_v23 = vunpack.c.l.bf16 %v12356_v23 }
  0xa1   :  { %v4623_v54 = vld [vmem:[#allocation1 + $0x60e] ss:$16 sm:%s15266_s25]   ;;  %v4620_v57 = vsel %vm3850_vm1, %v4618_v53, %v4615_v52  ;;  %s12270_s25 = smov 192  ;;  %15273 = sst [smem:[#allocation6_spill]] %s12272_s24  ;;  %v10503_v53 = vunpack.c.h.bf16 %v12390_v41  ;;  %3288 = vst [vmem:[#allocation1 + $0x128] sm:$0xff] %v10499_v47  ;;  %v10625_v47 = vld [vmem:[%s15157_s0 + $0x390] sm:$0xff]  }
  0xa2   :  { %v4625_v61 = vsel %vm3854_vm2, %v4623_v54, %v4620_v57  ;;  %15272 = sst [smem:[#allocation21_spill]] %s12270_s25  ;;  %s12280_s25 = smov 12  ;;  %v10507_v54 = vunpack.c.h.bf16 %v12401_v44  ;;  %3258 = vst [vmem:[#allocation1 + $0x138] sm:$0xff] %v10495_v43  ;;  %v10115_v46 = vunpack.c.h.bf16 %v10625_v47 }
  0xa3   :  { %15274 = sst [smem:[#allocation7_spill]] %s12280_s25  ;;  %s12282_s24 = smov 48  ;;  %v10806_v5 = vpack.i.bf16 %v4625_v61, %v4602_v60  ;;  %3318 = vst [vmem:[#allocation1 + $0x118] sm:$0xff] %v10503_v53  ;;  %v10652_v53 = vld [vmem:[%s15157_s0 + $0x2b8] sm:$0xff]  }
  0xa4   :  { %15275 = sst [smem:[#allocation92_spill]] %s12282_s24  ;;  %v4522_v1 = vld [vmem:[#allocation1 + $0x78f] ss:$16 sm:%s15270_s26]   ;;  %s12293_s24 = smov 192  ;;  %3348 = vst [vmem:[#allocation1 + $0x108] sm:$0xff] %v10507_v54  ;;  %v10653_v54 = vld [vmem:[%s15157_s0 + $0x2b0] sm:$0xff]  }
  0xa5   :  { %s12295_s26 = smov 3  ;;  %s12313_s25 = smov 12  ;;  %3273 = vst [vmem:[#allocation1 + $0x130] sm:$0xff] %v10494_v23  ;;  %v10227_v7 = vunpack.c.h.bf16 %v10653_v54 }
  0xa6   :  { %v4519_v0 = vld [vmem:[#allocation1 + $0x78f] ss:$16 sm:%s15268_s20]   ;;  %s15276_s20 = sld [smem:[#allocation8_spill]]  ;;  %3303 = vst [vmem:[#allocation1 + $0x120] sm:$0xff] %v10498_v26 }
  0xa7   :  { %15277 = sst [smem:[#allocation8_spill]] %s12293_s24  ;;  %v4524_v10 = vsel %vm3846_vm0, %v4522_v1, %v4519_v0  ;;  %v4751_v0 = vld [vmem:[#allocation1 + $0x30e] ss:$16 sm:%s11897_s1]   ;;  %s12448_s1 = smov 192  ;;  %v10370_v1 = vunpack.c.l.bf16 %v12290_v3  ;;  %408 = vst [vmem:[#allocation1 + $0x728] sm:$0xff] %v10115_v46 }
  0xa8   :  { %15278 = sst [smem:[#allocation93_spill]] %s12295_s26  ;;  %s12315_s26 = smov 48  ;;  %1248 = vst [vmem:[#allocation1 + $0x568] sm:$0xff] %v10227_v7 }
  0xa9   :  { %s15279_s24 = sld [smem:[#allocation22_spill]]  ;;  %2343 = vst [vmem:[#allocation1 + $0x320] sm:$0xff] %v10370_v1  ;;  %v4889_v1 = vld [vmem:[#allocation1 + $0x78e] ss:$16 sm:%s12029_s14]   ;;  %s12618_s14 = smov 12 }
  0xaa   :  { %15280 = sst [smem:[#allocation22_spill]] %s12313_s25 }
  0xab   :  { %15281 = sst [smem:[#allocation94_spill]] %s12315_s26 }
  0xac   :  { %v4527_v11 = vld [vmem:[#allocation1 + $0x78f] ss:$16 sm:%s15276_s20]   ;;  %s15282_s20 = sld [smem:[#allocation23_spill]] }
  0xad   :  { %s15283_s26 = sld [smem:[#allocation26_spill]]  ;;  %v4529_v20 = vsel %vm3850_vm1, %v4527_v11, %v4524_v10 }
  0xae   :  { %15284 = sst [smem:[#allocation23_spill]] %s12325_s19  ;;  %s12327_s19 = smov 3 }
  0xaf   :  { %s15285_s25 = sld [smem:[#allocation9_spill]]  ;;  %v4633_v15 = vld [vmem:[#allocation1 + $0x8e] ss:$16 sm:%s15279_s24]   ;;  %s12335_s24 = smov 12 }
  0xb0   :  { %15286 = sst [smem:[#allocation26_spill]] %s12327_s19  ;;  %s12337_s19 = smov 48 }
  0xb1   :  { %s15287_s21 = sld [smem:[#allocation27_spill]] }
  0xb2   :  { %15288 = sst [smem:[#allocation9_spill]] %s12335_s24  ;;  %v4636_v18 = vld [vmem:[#allocation1 + $0x8e] ss:$16 sm:%s15282_s20]  }
  0xb3   :  { %15289 = sst [smem:[#allocation27_spill]] %s12337_s19  ;;  %s15162_s19 = smov 112   ;;  %v4656_v19 = vld [vmem:[#allocation1 + $0x28e] ss:$16 sm:%s15283_s26]   ;;  %v4638_v36 = vsel %vm3846_vm0, %v4636_v18, %v4633_v15 }
  0xb4   :  { %s15290_s24 = sld [smem:[#allocation24_spill]]  ;;  %10807 = vrot.lane.b32.xlu0 %v10806_v5, %s15162_s19  ;;  %s12348_s19 = smov 192  ;;  %v4753_v5 = vsel %vm3846_vm0, %v4751_v0, %v4748_v63  ;;  %v4886_v0 = vld [vmem:[#allocation1 + $0x78e] ss:$16 sm:%s12027_s13]  }
  0xb5   :  { %s15291_s20 = sld [smem:[#allocation2_spill]]  ;;  %v4532_v21 = vld [vmem:[#allocation1 + $0x78f] ss:$16 sm:%s15285_s25]   ;;  %s12370_s25 = smov 48  ;;  %v4891_v4 = vsel %vm3846_vm0, %v4889_v1, %v4886_v0 }
  0xb6   :  { %s15292_s26 = sld [smem:[#allocation3_spill]]  ;;  %v4534_v35 = vsel %vm3854_vm2, %v4532_v21, %v4529_v20  ;;  %s12616_s13 = smov 3 }
  0xb7   :  { %15293 = sst [smem:[#allocation24_spill]] %s12348_s19  ;;  %v4659_v24 = vld [vmem:[#allocation1 + $0x28e] ss:$16 sm:%s15287_s21]   ;;  %s12359_s21 = smov 3 }
  0xb8   :  { %s15294_s19 = sld [smem:[#allocation4_spill]]  ;;  %v4661_v37 = vsel %vm3846_vm0, %v4659_v24, %v4656_v19 }
  0xb9   :  { %s15295_s23 = sld [smem:[#allocation5_spill]] }
  0xba   :  { %15296 = sst [smem:[#allocation2_spill]] %s12359_s21  ;;  %v4641_v27 = vld [vmem:[#allocation1 + $0x8e] ss:$16 sm:%s15290_s24]   ;;  %s12368_s24 = smov 12 }
  0xbb   :  { %s15297_s21 = sld [smem:[#allocation28_spill]]  ;;  %v4496_v28 = vld [vmem:[#allocation1 + $0x58f] ss:$16 sm:%s15291_s20]   ;;  %v4643_v48 = vsel %vm3850_vm1, %v4641_v27, %v4638_v36 }
  0xbc   :  { %15298 = sst [smem:[#allocation3_spill]] %s12368_s24  ;;  %v4499_v29 = vld [vmem:[#allocation1 + $0x58f] ss:$16 sm:%s15292_s26]   ;;  %s12392_s26 = smov 3 }
  0xbd   :  { %15299 = sst [smem:[#allocation4_spill]] %s12370_s25  ;;  %v4501_v33 = vsel %vm3846_vm0, %v4499_v29, %v4496_v28  ;;  %s12403_s25 = smov 48 }
  0xbe   :  { %v4504_v30 = vld [vmem:[#allocation1 + $0x58f] ss:$16 sm:%s15294_s19]   ;;  %s12383_s19 = smov 192  ;;  %s15301_s20 = sld [smem:[#allocation25_spill]] }
  0xbf   :  { %v4509_v34 = vld [vmem:[#allocation1 + $0x58f] ss:$16 sm:%s15295_s23]   ;;  %15300 = sst [smem:[#allocation5_spill]] %s12383_s19  ;;  %v4506_v39 = vsel %vm3850_vm1, %v4504_v30, %v4501_v33  ;;  %s12394_s23 = smov 12 }
  0xc0   :  { %15303 = sst [smem:[#allocation28_spill]] %s12394_s23  ;;  %v4511_v42 = vsel %vm3854_vm2, %v4509_v34, %v4506_v39  ;;  %s12405_s19 = smov 192  ;;  %v10620_v34 = vld [vmem:[%s15157_s0 + $0x3b8] sm:$0xff]  }
  0xc1   :  { %v4664_v38 = vld [vmem:[#allocation1 + $0x28e] ss:$16 sm:%s15297_s21]   ;;  %s15302_s21 = sld [smem:[#allocation29_spill]]  ;;  %v10796_v45 = vpack.i.bf16 %v4534_v35, %v4511_v42  ;;  %v10502_v35 = vunpack.c.l.bf16 %v12390_v41  ;;  %v10095_v41 = vunpack.c.h.bf16 %v10620_v34  ;;  %v10623_v42 = vld [vmem:[%s15157_s0 + $0x3a0] sm:$0xff]   ;;  %v5013_v34 = vld [vmem:[#allocation1 + $0x8d] ss:$16 sm:%s12121_s10]  }
  0xc2   :  { %15304 = sst [smem:[#allocation25_spill]] %s12403_s25  ;;  %v4666_v50 = vsel %vm3850_vm1, %v4664_v38, %v4661_v37  ;;  %s12467_s25 = smov 12  ;;  %v10621_v37 = vld [vmem:[%s15157_s0 + $0x3b0] sm:$0xff]   ;;  %v10506_v38 = vunpack.c.l.bf16 %v12401_v44  ;;  %v10624_v44 = vld [vmem:[%s15157_s0 + $0x398] sm:$0xff]  }
  0xc3   :  { %15305 = sst [smem:[#allocation29_spill]] %s12405_s19  ;;  %10797 = vrot.lane.b32.xlu1 %v10796_v45, %s15228_s8  ;;  %s12465_s19 = smov 3  ;;  %v10099_v43 = vunpack.c.h.bf16 %v10621_v37  ;;  %3333 = vst [vmem:[#allocation1 + $0x110] sm:$0xff] %v10502_v35  ;;  %v10103_v45 = vunpack.c.h.bf16 %v10622_v40  ;;  %v5023_v37 = vld [vmem:[#allocation1 + $0x28d] ss:$16 sm:%s12127_s15]  }
  0xc4   :  { %v4646_v49 = vld [vmem:[#allocation1 + $0x8e] ss:$16 sm:%s15301_s20]   ;;  %s12413_s20 = smov 3  ;;  %s15308_s24 = sld [smem:[#allocation12_spill]]  ;;  %3363 = vst [vmem:[#allocation1 + $0x100] sm:$0xff] %v10506_v38 }
  0xc5   :  { %15306 = sst [smem:[#allocation95_spill]] %s12413_s20  ;;  %s12419_s20 = smov 48  ;;  %v4648_v55 = vsel %vm3854_vm2, %v4646_v49, %v4643_v48  ;;  %v10107_v48 = vunpack.c.h.bf16 %v10623_v42  ;;  %v10626_v49 = vld [vmem:[%s15157_s0 + $0x388] sm:$0xff]   ;;  %258 = vst [vmem:[#allocation1 + $0x778] sm:$0xff] %v10095_v41 }
  0xc6   :  { %15310 = sst [smem:[#allocation12_spill]] %s12419_s20  ;;  %s12421_s20 = smov 192  ;;  %288 = vst [vmem:[#allocation1 + $0x768] sm:$0xff] %v10099_v43  ;;  %v10119_v56 = vunpack.c.h.bf16 %v10626_v49 }
  0xc7   :  { %v4669_v52 = vld [vmem:[#allocation1 + $0x28e] ss:$16 sm:%s15302_s21]   ;;  %s12415_s21 = smov 12  ;;  %s15320_s27 = sld [smem:[#allocation34_spill]]  ;;  %318 = vst [vmem:[#allocation1 + $0x758] sm:$0xff] %v10103_v45 }
  0xc8   :  { %15307 = sst [smem:[#allocation96_spill]] %s12415_s21  ;;  %v4671_v57 = vsel %vm3854_vm2, %v4669_v52, %v4666_v50  ;;  %v10111_v50 = vunpack.c.h.bf16 %v10624_v44  ;;  %v10627_v52 = vld [vmem:[%s15157_s0 + $0x380] sm:$0xff]   ;;  %348 = vst [vmem:[#allocation1 + $0x748] sm:$0xff] %v10107_v48 }
  0xc9   :  { %s15309_s21 = sld [smem:[#allocation14_spill]]  ;;  %v10811_v61 = vpack.i.bf16 %v4671_v57, %v4648_v55  ;;  %v10654_v55 = vld [vmem:[%s15157_s0 + $0x2a8] sm:$0xff]   ;;  %v10123_v62 = vunpack.c.h.bf16 %v10627_v52  ;;  %438 = vst [vmem:[#allocation1 + $0x718] sm:$0xff] %v10119_v56 }
  0xca   :  { %15311 = sst [smem:[#allocation14_spill]] %s12421_s20  ;;  %s12426_s20 = smov 3  ;;  %v4381_v58 = vld [vmem:[#allocation1 + $0x30f] ss:$16 sm:%s15308_s24]   ;;  %v4863_v57 = vld [vmem:[#allocation1 + $0x58e] ss:$16 sm:%s12011_s6]   ;;  %v10231_v9 = vunpack.c.h.bf16 %v10654_v55 }
  0xcb   :  { %15312 = sst [smem:[#allocation97_spill]] %s12426_s20  ;;  %s12428_s20 = smov 12  ;;  %378 = vst [vmem:[#allocation1 + $0x738] sm:$0xff] %v10111_v50 }
  0xcc   :  { %15313 = sst [smem:[#allocation98_spill]] %s12428_s20  ;;  %s12431_s20 = smov 48  ;;  %468 = vst [vmem:[#allocation1 + $0x708] sm:$0xff] %v10123_v62 }
  0xcd   :  { %15314 = sst [smem:[#allocation99_spill]] %s12431_s20  ;;  %s12433_s20 = smov 192  ;;  %v4756_v6 = vld [vmem:[#allocation1 + $0x30e] ss:$16 sm:%s15320_s27]   ;;  %1278 = vst [vmem:[#allocation1 + $0x558] sm:$0xff] %v10231_v9 }
  0xce   :  { %15315 = sst [smem:[#allocation100_spill]] %s12433_s20  ;;  %s12438_s24 = smov 3  ;;  %v4758_v18 = vsel %vm3850_vm1, %v4756_v6, %v4753_v5  ;;  %v4894_v5 = vld [vmem:[#allocation1 + $0x78e] ss:$16 sm:%s12031_s3]  }
  0xcf   :  { %s15316_s20 = sld [smem:[#allocation16_spill]]  ;;  %v4384_v60 = vld [vmem:[#allocation1 + $0x30f] ss:$16 sm:%s15309_s21]   ;;  %s12441_s21 = smov 12  ;;  %v4899_v6 = vld [vmem:[#allocation1 + $0x78e] ss:$16 sm:%s12036_s7]  }
  0xd0   :  { %15317 = sst [smem:[#allocation16_spill]] %s12438_s24  ;;  %v4386_v2 = vsel %vm3846_vm0, %v4384_v60, %v4381_v58  ;;  %s12583_s6 = smov 48  ;;  %v10655_v58 = vld [vmem:[%s15157_s0 + $0x2a0] sm:$0xff]   ;;  %v4868_v60 = vsel %vm3846_vm0, %v4866_v51, %v4863_v57 }
  0xd1   :  { %15318 = sst [smem:[#allocation101_spill]] %s12441_s21  ;;  %s12443_s21 = smov 48  ;;  %v4873_v63 = vsel %vm3850_vm1, %v4871_v59, %v4868_v60 }
  0xd2   :  { %15319 = sst [smem:[#allocation102_spill]] %s12443_s21  ;;  %s15328_s21 = smov 112  }
  0xd3   :  { %15321 = sst [smem:[#allocation34_spill]] %s12448_s1  ;;  %s12453_s1 = smov 3  ;;  %10812 = vrot.lane.b32.xlu1 %v10811_v61, %s15328_s21  ;;  %v4876_v61 = vld [vmem:[#allocation1 + $0x58e] ss:$16 sm:%s12023_s30]  }
  0xd4   :  { %s15329_s24 = sld [smem:[#allocation10_spill]]  ;;  %s12596_s30 = smov 3 }
  0xd5   :  { %v4389_v3 = vld [vmem:[#allocation1 + $0x30f] ss:$16 sm:%s15316_s20]   ;;  %s15322_s20 = sld [smem:[#allocation17_spill]]  ;;  %s12602_s3 = smov 12 }
  0xd6   :  { %15323 = sst [smem:[#allocation17_spill]] %s12453_s1  ;;  %s12455_s1 = smov 12  ;;  %v4391_v8 = vsel %vm3850_vm1, %v4389_v3, %v4386_v2  ;;  %v10223_v2 = vunpack.c.h.bf16 %v10652_v53  ;;  %v4878_v3 = vsel %vm3854_vm2, %v4876_v61, %v4873_v63 }
  0xd7   :  { %15324 = sst [smem:[#allocation103_spill]] %s12455_s1  ;;  %s12457_s1 = smov 48 }
  0xd8   :  { %15325 = sst [smem:[#allocation104_spill]] %s12457_s1  ;;  %s12459_s1 = smov 192  ;;  %1218 = vst [vmem:[#allocation1 + $0x578] sm:$0xff] %v10223_v2 }
  0xd9   :  { %15326 = sst [smem:[#allocation105_spill]] %s12459_s1  ;;  %s12608_s7 = smov 48 }
  0xda   :  { %s15327_s1 = sld [smem:[#allocation35_spill]]  ;;  %v4358_v13 = vld [vmem:[#allocation1 + $0x10f] ss:$16 sm:%s15329_s24]   ;;  %s12505_s24 = smov 3 }
  0xdb   :  { %s15330_s27 = sld [smem:[#allocation11_spill]]  ;;  %v4394_v10 = vld [vmem:[#allocation1 + $0x30f] ss:$16 sm:%s15322_s20]  }
  0xdc   :  { %15331 = sst [smem:[#allocation35_spill]] %s12465_s19  ;;  %v4396_v21 = vsel %vm3854_vm2, %v4394_v10, %v4391_v8  ;;  %v10656_v8 = vld [vmem:[%s15157_s0 + $0x298] sm:$0xff]   ;;  %v4896_v10 = vsel %vm3850_vm1, %v4894_v5, %v4891_v4 }
  0xdd   :  { %s15332_s19 = sld [smem:[#allocation13_spill]]  ;;  %v4901_v12 = vsel %vm3854_vm2, %v4899_v6, %v4896_v10 }
  0xde   :  { %15333 = sst [smem:[#allocation10_spill]] %s12467_s25  ;;  %s12472_s25 = smov 48 }
  0xdf   :  { %s15334_s20 = sld [smem:[#allocation15_spill]] }
  0xe0   :  { %15335 = sst [smem:[#allocation11_spill]] %s12472_s25  ;;  %s12474_s25 = smov 192  ;;  %v4761_v11 = vld [vmem:[#allocation1 + $0x30e] ss:$16 sm:%s15327_s1]  }
  0xe1   :  { %15336 = sst [smem:[#allocation13_spill]] %s12474_s25  ;;  %s12478_s1 = smov 3  ;;  %v4361_v15 = vld [vmem:[#allocation1 + $0x10f] ss:$16 sm:%s15330_s27]   ;;  %v4763_v31 = vsel %vm3854_vm2, %v4761_v11, %v4758_v18  ;;  %v10657_v11 = vld [vmem:[%s15157_s0 + $0x290] sm:$0xff]   ;;  %v10239_v18 = vunpack.c.h.bf16 %v10656_v8 }
  0xe2   :  { %s15337_s25 = sld [smem:[#allocation30_spill]]  ;;  %v4363_v19 = vsel %vm3846_vm0, %v4361_v15, %v4358_v13  ;;  %s12507_s27 = smov 12  ;;  %v10235_v13 = vunpack.c.h.bf16 %v10655_v58  ;;  %v10658_v15 = vld [vmem:[%s15157_s0 + $0x288] sm:$0xff]  }
  0xe3   :  { %15338 = sst [smem:[#allocation15_spill]] %s12478_s1  ;;  %s12480_s1 = smov 12  ;;  %v4366_v16 = vld [vmem:[#allocation1 + $0x10f] ss:$16 sm:%s15332_s19]   ;;  %1338 = vst [vmem:[#allocation1 + $0x538] sm:$0xff] %v10239_v18 }
  0xe4   :  { %15339 = sst [smem:[#allocation30_spill]] %s12480_s1  ;;  %v4368_v24 = vsel %vm3850_vm1, %v4366_v16, %v4363_v19  ;;  %v10836_v16 = vpack.i.bf16 %v4901_v12, %v4878_v3  ;;  %v10243_v19 = vunpack.c.h.bf16 %v10657_v11  ;;  %s12635_s0 = smov 48  ;;  %1308 = vst [vmem:[#allocation1 + $0x548] sm:$0xff] %v10235_v13 }
  0xe5   :  { %s15340_s1 = sld [smem:[#allocation31_spill]]  ;;  %v4371_v20 = vld [vmem:[#allocation1 + $0x10f] ss:$16 sm:%s15334_s20]   ;;  %s12516_s20 = smov 192 }
  0xe6   :  { %s15341_s23 = sld [smem:[#allocation32_spill]]  ;;  %v4373_v28 = vsel %vm3854_vm2, %v4371_v20, %v4368_v24  ;;  %v10247_v20 = vunpack.c.h.bf16 %v10658_v15  ;;  %1368 = vst [vmem:[#allocation1 + $0x528] sm:$0xff] %v10243_v19 }
  0xe7   :  { %s15342_s19 = sld [smem:[#allocation33_spill]]  ;;  %v10781_v32 = vpack.i.bf16 %v4396_v21, %v4373_v28  ;;  %v10251_v21 = vunpack.c.h.bf16 %v10659_v14 }
  0xe8   :  { %v4725_v22 = vld [vmem:[#allocation1 + $0x10e] ss:$16 sm:%s15337_s25]   ;;  %s12492_s25 = smov 48  ;;  %15343 = sst [smem:[#allocation31_spill]] %s12516_s20  ;;  %1398 = vst [vmem:[#allocation1 + $0x518] sm:$0xff] %v10247_v20 }
  0xe9   :  { %s12523_s20 = smov 3  ;;  %10782 = vrot.lane.b32.xlu2 %v10781_v32, %s15228_s8  ;;  %15358 = sst [smem:[#allocation118_spill]] %s12583_s6  ;;  %1428 = vst [vmem:[#allocation1 + $0x508] sm:$0xff] %v10251_v21 }
  0xea   :  { %15344 = sst [smem:[#allocation32_spill]] %s12523_s20  ;;  %s12532_s20 = smov 48 }
  0xeb   :  { %v4728_v25 = vld [vmem:[#allocation1 + $0x10e] ss:$16 sm:%s15340_s1]   ;;  %s12525_s1 = smov 12  ;;  %15346 = sst [smem:[#allocation106_spill]] %s12532_s20 }
  0xec   :  { %v4733_v27 = vld [vmem:[#allocation1 + $0x10e] ss:$16 sm:%s15341_s23]   ;;  %s12498_s23 = smov 192  ;;  %v4730_v29 = vsel %vm3846_vm0, %v4728_v25, %v4725_v22  ;;  %15345 = sst [smem:[#allocation33_spill]] %s12525_s1  ;;  %v5000_v22 = vld [vmem:[#allocation1 + $0x8d] ss:$16 sm:%s12112_s11]  }
  0xed   :  { %v4738_v30 = vld [vmem:[#allocation1 + $0x10e] ss:$16 sm:%s15342_s19]   ;;  %v4735_v33 = vsel %vm3850_vm1, %v4733_v27, %v4730_v29  ;;  %s12514_s19 = smov 48  ;;  %s12534_s1 = smov 192  ;;  %v5005_v27 = vsel %vm3846_vm0, %v5003_v17, %v5000_v22 }
  0xee   :  { %v4740_v36 = vsel %vm3854_vm2, %v4738_v30, %v4735_v33  ;;  %15347 = sst [smem:[#allocation107_spill]] %s12534_s1  ;;  %s12539_s20 = smov 3  ;;  %v5008_v33 = vld [vmem:[#allocation1 + $0x8d] ss:$16 sm:%s12119_s9]  }
  0xef   :  { %v10821_v39 = vpack.i.bf16 %v4763_v31, %v4740_v36  ;;  %15348 = sst [smem:[#allocation108_spill]] %s12539_s20  ;;  %s12541_s1 = smov 12  ;;  %v5010_v36 = vsel %vm3850_vm1, %v5008_v33, %v5005_v27  ;;  %v5072_v33 = vld [vmem:[#allocation1 + $0x68d] ss:$16 sm:%s12159_s22]  }
  0xf0   :  { %15349 = sst [smem:[#allocation109_spill]] %s12541_s1  ;;  %s12547_s20 = smov 48  ;;  %v5015_v42 = vsel %vm3854_vm2, %v5013_v34, %v5010_v36  ;;  %v5138_v34 = vld [vmem:[#allocation1 + $0x50d] ss:$16 sm:%s12206_s29]  }
  0xf1   :  { %10822 = vrot.lane.b32.xlu0 %v10821_v39, %s15328_s21  ;;  %15350 = sst [smem:[#allocation110_spill]] %s12547_s20  ;;  %s12549_s1 = smov 192 }
  0xf2   :  { %15351 = sst [smem:[#allocation111_spill]] %s12549_s1  ;;  %s12554_s20 = smov 3 }
  0xf3   :  { %15352 = sst [smem:[#allocation112_spill]] %s12554_s20  ;;  %s12556_s1 = smov 12 }
  0xf4   :  { %15353 = sst [smem:[#allocation113_spill]] %s12556_s1  ;;  %s12561_s20 = smov 48 }
  0xf5   :  { %15354 = sst [smem:[#allocation114_spill]] %s12561_s20  ;;  %s12563_s1 = smov 192 }
  0xf6   :  { %15355 = sst [smem:[#allocation115_spill]] %s12563_s1  ;;  %s12574_s20 = smov 3 }
  0xf7   :  { %15356 = sst [smem:[#allocation116_spill]] %s12574_s20  ;;  %s12576_s1 = smov 12 }
  0xf8   :  { %15357 = sst [smem:[#allocation117_spill]] %s12576_s1  ;;  %s12610_s1 = smov 192 }
  0xf9   :  { %15359 = sst [smem:[#allocation119_spill]] %s12591_s4  ;;  %s12625_s20 = smov 192  ;;  %10837 = vrot.lane.b32.xlu0 %v10836_v16, %s15328_s21 }
  0xfa   :  { %15360 = sst [smem:[#allocation120_spill]] %s12610_s1  ;;  %s12630_s6 = smov 3 }
  0xfb   :  { %15361 = sst [smem:[#allocation121_spill]] %s12616_s13  ;;  %s12632_s4 = smov 12 }
  0xfc   :  { %15362 = sst [smem:[#allocation122_spill]] %s12618_s14  ;;  %s12649_s14 = smov 12 }
  0xfd   :  { %15363 = sst [smem:[#allocation123_spill]] %s12623_s2  ;;  %s12647_s2 = smov 3 }
  0xfe   :  { %15364 = sst [smem:[#allocation124_spill]] %s12625_s20  ;;  %s12653_s13 = smov 48 }
  0xff   :  { %15365 = sst [smem:[#allocation125_spill]] %s12630_s6  ;;  %s12639_s6 = smov 3 }
 0x100   :  { %15366 = sst [smem:[#allocation126_spill]] %s12632_s4  ;;  %s12662_s1 = smov 12 }
 0x101   :  { %15367 = sst [smem:[#allocation127_spill]] %s12635_s0  ;;  %s12637_s0 = smov 192 }
 0x102   :  { %15368 = sst [smem:[#allocation128_spill]] %s12637_s0 }
 0x103   :  { %s15369_s0 = sld [smem:[#allocation39_spill]] }
 0x104   :  { %s15370_s4 = sld [smem:[#allocation41_spill]] }
 0x105   :  { %15371 = sst [smem:[#allocation39_spill]] %s12639_s6  ;;  %s12641_s6 = smov 12 }
 0x106   :  { %15372 = sst [smem:[#allocation41_spill]] %s12641_s6  ;;  %s12643_s6 = smov 48 }
 0x107   :  { %15373 = sst [smem:[#allocation129_spill]] %s12643_s6  ;;  %s12645_s6 = smov 192 }
 0x108   :  { %15374 = sst [smem:[#allocation130_spill]] %s12645_s6 }
 0x109   :  { %s15375_s6 = sld [smem:[#allocation42_spill]]  ;;  %v4427_v24 = vld [vmem:[#allocation1 + $0x70f] ss:$16 sm:%s15369_s0]   ;;  %s12657_s0 = smov 192 }
 0x10a   :  { %s15376_s20 = sld [smem:[#allocation48_spill]]  ;;  %v4430_v25 = vld [vmem:[#allocation1 + $0x70f] ss:$16 sm:%s15370_s4]  }
 0x10b   :  { %15377 = sst [smem:[#allocation42_spill]] %s12647_s2  ;;  %v4432_v30 = vsel %vm3846_vm0, %v4430_v25, %v4427_v24 }
 0x10c   :  { %s15378_s2 = sld [smem:[#allocation49_spill]] }
 0x10d   :  { %15379 = sst [smem:[#allocation48_spill]] %s12649_s14 }
 0x10e   :  { %s15380_s14 = sld [smem:[#allocation50_spill]] }
 0x10f   :  { %s15381_s11 = sld [smem:[#allocation52_spill]]  ;;  %v4435_v23 = vld [vmem:[#allocation1 + $0x70f] ss:$16 sm:%s15375_s6]  }
 0x110   :  { %s15382_s12 = sld [smem:[#allocation53_spill]]  ;;  %v4794_v28 = vld [vmem:[#allocation1 + $0x70e] ss:$16 sm:%s15376_s20]   ;;  %v4437_v45 = vsel %vm3850_vm1, %v4435_v23, %v4432_v30 }
 0x111   :  { %15383 = sst [smem:[#allocation49_spill]] %s12653_s13  ;;  %s12660_s13 = smov 3 }
 0x112   :  { %15384 = sst [smem:[#allocation50_spill]] %s12657_s0  ;;  %v4797_v29 = vld [vmem:[#allocation1 + $0x70e] ss:$16 sm:%s15378_s2]  }
 0x113   :  { %s15385_s4 = sld [smem:[#allocation76_spill]]  ;;  %v4799_v35 = vsel %vm3846_vm0, %v4797_v29, %v4794_v28 }
 0x114   :  { %s15386_s0 = sld [smem:[#allocation77_spill]]  ;;  %v4802_v31 = vld [vmem:[#allocation1 + $0x70e] ss:$16 sm:%s15380_s14]  }
 0x115   :  { %15387 = sst [smem:[#allocation52_spill]] %s12660_s13  ;;  %v4542_v26 = vld [vmem:[#allocation1 + $0xe] ss:$16 sm:%s15381_s11]   ;;  %v4804_v52 = vsel %vm3850_vm1, %v4802_v31, %v4799_v35  ;;  %v5046_v31 = vld [vmem:[#allocation1 + $0x48d] ss:$16 sm:%s12144_s5]  }
 0x116   :  { %s15388_s13 = sld [smem:[#allocation56_spill]]  ;;  %v4545_v32 = vld [vmem:[#allocation1 + $0xe] ss:$16 sm:%s15382_s12]   ;;  %v5141_v35 = vld [vmem:[#allocation1 + $0x50d] ss:$16 sm:%s12220_s17]  }
 0x117   :  { %15389 = sst [smem:[#allocation53_spill]] %s12662_s1  ;;  %v4547_v59 = vsel %vm3846_vm0, %v4545_v32, %v4542_v26  ;;  %v5049_v26 = vld [vmem:[#allocation1 + $0x48d] ss:$16 sm:%s12146_s16]   ;;  %v5143_v36 = vsel %vm3846_vm0, %v5141_v35, %v5138_v34 }
 0x118   :  { %s15390_s1 = sld [smem:[#allocation57_spill]] }
 0x119   :  { %s15391_s2 = sld [smem:[#allocation78_spill]]  ;;  %v5026_v38 = vld [vmem:[#allocation1 + $0x28d] ss:$16 sm:%s15385_s4]  }
 0x11a   :  { %s15392_s14 = sld [smem:[#allocation43_spill]]  ;;  %v5031_v39 = vld [vmem:[#allocation1 + $0x28d] ss:$16 sm:%s15386_s0]   ;;  %v5028_v43 = vsel %vm3846_vm0, %v5026_v38, %v5023_v37 }
 0x11b   :  { %s15393_s20 = sld [smem:[#allocation60_spill]]  ;;  %v5033_v50 = vsel %vm3850_vm1, %v5031_v39, %v5028_v43  ;;  %v5146_v37 = vld [vmem:[#allocation1 + $0x50d] ss:$16 sm:%s12222_s18]  }
 0x11c   :  { %s15394_s6 = sld [smem:[#allocation61_spill]]  ;;  %v4564_v40 = vld [vmem:[#allocation1 + $0x20e] ss:$16 sm:%s15388_s13]   ;;  %v5151_v38 = vld [vmem:[#allocation1 + $0x50d] ss:$16 sm:%s12227_s28]   ;;  %s12752_s28 = smov 48 }
 0x11d   :  { %s15395_s9 = sld [smem:[#allocation51_spill]] }
 0x11e   :  { %s15396_s10 = sld [smem:[#allocation54_spill]]  ;;  %v4567_v41 = vld [vmem:[#allocation1 + $0x20e] ss:$16 sm:%s15390_s1]  }
 0x11f   :  { %s15397_s15 = sld [smem:[#allocation58_spill]]  ;;  %v5036_v44 = vld [vmem:[#allocation1 + $0x28d] ss:$16 sm:%s15391_s2]   ;;  %v4569_v4 = vsel %vm3846_vm0, %v4567_v41, %v4564_v40 }
 0x120   :  { %s15398_s11 = sld [smem:[#allocation64_spill]]  ;;  %v4440_v47 = vld [vmem:[#allocation1 + $0x70f] ss:$16 sm:%s15392_s14]   ;;  %v5038_v51 = vsel %vm3854_vm2, %v5036_v44, %v5033_v50 }
 0x121   :  { %s15399_s12 = sld [smem:[#allocation65_spill]]  ;;  %v4909_v48 = vld [vmem:[#allocation1 + $0xd] ss:$16 sm:%s15393_s20]   ;;  %v10851_v62 = vpack.i.bf16 %v5038_v51, %v5015_v42  ;;  %v4442_v1 = vsel %vm3854_vm2, %v4440_v47, %v4437_v45  ;;  %v5148_v42 = vsel %vm3850_vm1, %v5146_v37, %v5143_v36 }
 0x122   :  { %s15400_s1 = sld [smem:[#allocation36_spill]]  ;;  %v4912_v49 = vld [vmem:[#allocation1 + $0xd] ss:$16 sm:%s15394_s6]  }
 0x123   :  { %s15401_s13 = sld [smem:[#allocation37_spill]]  ;;  %v4807_v53 = vld [vmem:[#allocation1 + $0x70e] ss:$16 sm:%s15395_s9]   ;;  %v4914_v5 = vsel %vm3846_vm0, %v4912_v49, %v4909_v48  ;;  %v5153_v49 = vsel %vm3854_vm2, %v5151_v38, %v5148_v42 }
 0x124   :  { %s15402_s0 = sld [smem:[#allocation38_spill]]  ;;  %v4550_v54 = vld [vmem:[#allocation1 + $0xe] ss:$16 sm:%s15396_s10]   ;;  %v4809_v9 = vsel %vm3854_vm2, %v4807_v53, %v4804_v52 }
 0x125   :  { %s15403_s4 = sld [smem:[#allocation62_spill]]  ;;  %v4572_v46 = vld [vmem:[#allocation1 + $0x20e] ss:$16 sm:%s15397_s15]   ;;  %v4552_v22 = vsel %vm3850_vm1, %v4550_v54, %v4547_v59 }
 0x126   :  { %s15404_s2 = sld [smem:[#allocation40_spill]]  ;;  %v4931_v55 = vld [vmem:[#allocation1 + $0x20d] ss:$16 sm:%s15398_s11]   ;;  %v4574_v17 = vsel %vm3850_vm1, %v4572_v46, %v4569_v4 }
 0x127   :  { %s15405_s14 = sld [smem:[#allocation44_spill]]  ;;  %v4934_v57 = vld [vmem:[#allocation1 + $0x20d] ss:$16 sm:%s15399_s12]  }
 0x128   :  { %s15406_s20 = sld [smem:[#allocation45_spill]]  ;;  %v4404_v56 = vld [vmem:[#allocation1 + $0x50f] ss:$16 sm:%s15400_s1]   ;;  %v4936_v12 = vsel %vm3846_vm0, %v4934_v57, %v4931_v55 }
 0x129   :  { %s15407_s6 = sld [smem:[#allocation46_spill]]  ;;  %v4407_v58 = vld [vmem:[#allocation1 + $0x50f] ss:$16 sm:%s15401_s13]  }
 0x12a   :  { %s15408_s9 = sld [smem:[#allocation47_spill]]  ;;  %v4412_v60 = vld [vmem:[#allocation1 + $0x50f] ss:$16 sm:%s15402_s0]   ;;  %v4409_v63 = vsel %vm3846_vm0, %v4407_v58, %v4404_v56  ;;  %v5051_v56 = vsel %vm3846_vm0, %v5049_v26, %v5046_v31 }
 0x12b   :  { %s15409_s10 = sld [smem:[#allocation55_spill]]  ;;  %v4917_v61 = vld [vmem:[#allocation1 + $0xd] ss:$16 sm:%s15403_s4]   ;;  %v4414_v6 = vsel %vm3850_vm1, %v4412_v60, %v4409_v63 }
 0x12c   :  { %s15410_s15 = sld [smem:[#allocation66_spill]]  ;;  %v4417_v0 = vld [vmem:[#allocation1 + $0x50f] ss:$16 sm:%s15404_s2]   ;;  %v4919_v29 = vsel %vm3850_vm1, %v4917_v61, %v4914_v5 }
 0x12d   :  { %v4771_v2 = vld [vmem:[#allocation1 + $0x50e] ss:$16 sm:%s15405_s14]   ;;  %s15411_s11 = sld [smem:[#allocation59_spill]]  ;;  %s11443_s14 = smov 104   ;;  %v4419_v15 = vsel %vm3854_vm2, %v4417_v0, %v4414_v6 }
 0x12e   :  { %v4774_v3 = vld [vmem:[#allocation1 + $0x50e] ss:$16 sm:%s15406_s20]   ;;  %s15412_s12 = sld [smem:[#allocation63_spill]]  ;;  %10852 = vrot.lane.b32.xlu0 %v10851_v62, %s11443_s14  ;;  %v10786_v20 = vpack.i.bf16 %v4442_v1, %v4419_v15 }
 0x12f   :  { %s15413_s1 = sld [smem:[#allocation67_spill]]  ;;  %v4776_v7 = vsel %vm3846_vm0, %v4774_v3, %v4771_v2  ;;  %v4779_v8 = vld [vmem:[#allocation1 + $0x50e] ss:$16 sm:%s15407_s6]  }
 0x130   :  { %v4784_v10 = vld [vmem:[#allocation1 + $0x50e] ss:$16 sm:%s15408_s9]   ;;  %s15414_s13 = sld [smem:[#allocation68_spill]]  ;;  %v4781_v16 = vsel %vm3850_vm1, %v4779_v8, %v4776_v7  ;;  %10787 = vrot.lane.b32.xlu2 %v10786_v20, %s15228_s8 }
 0x131   :  { %s15415_s0 = sld [smem:[#allocation69_spill]]  ;;  %v4555_v11 = vld [vmem:[#allocation1 + $0xe] ss:$16 sm:%s15409_s10]   ;;  %v4786_v21 = vsel %vm3854_vm2, %v4784_v10, %v4781_v16  ;;  %v5276_v16 = vld [vmem:[#allocation1 + $0xc] ss:$16 sm:%s12392_s26]  }
 0x132   :  { %s15416_s4 = sld [smem:[#allocation72_spill]]  ;;  %v4939_v13 = vld [vmem:[#allocation1 + $0x20d] ss:$16 sm:%s15410_s15]   ;;  %v10826_v28 = vpack.i.bf16 %v4809_v9, %v4786_v21  ;;  %v4557_v40 = vsel %vm3854_vm2, %v4555_v11, %v4552_v22  ;;  %s12754_s15 = smov 192 }
 0x133   :  { %s15417_s2 = sld [smem:[#allocation73_spill]]  ;;  %v4577_v18 = vld [vmem:[#allocation1 + $0x20e] ss:$16 sm:%s15411_s11]   ;;  %v4941_v30 = vsel %vm3850_vm1, %v4939_v13, %v4936_v12 }
 0x134   :  { %s15418_s20 = sld [smem:[#allocation81_spill]]  ;;  %v4922_v14 = vld [vmem:[#allocation1 + $0xd] ss:$16 sm:%s15412_s12]   ;;  %10827 = vrot.lane.b32.xlu1 %v10826_v28, %s15328_s21  ;;  %v4579_v41 = vsel %vm3854_vm2, %v4577_v18, %v4574_v17 }
 0x135   :  { %v4944_v19 = vld [vmem:[#allocation1 + $0x20d] ss:$16 sm:%s15413_s1]   ;;  %s15419_s6 = sld [smem:[#allocation18_spill]]  ;;  %v4924_v47 = vsel %vm3854_vm2, %v4922_v14, %v4919_v29  ;;  %v10801_v57 = vpack.i.bf16 %v4579_v41, %v4557_v40 }
 0x136   :  { %v4679_v24 = vld [vmem:[#allocation1 + $0x48e] ss:$16 sm:%s15414_s13]   ;;  %s15420_s9 = sld [smem:[#allocation19_spill]]  ;;  %v4946_v48 = vsel %vm3854_vm2, %v4944_v19, %v4941_v30  ;;  %s12761_s13 = smov 3 }
 0x137   :  { %v4682_v25 = vld [vmem:[#allocation1 + $0x48e] ss:$16 sm:%s15415_s0]   ;;  %s15421_s5 = sld [smem:[#allocation20_spill]]  ;;  %v10841_v62 = vpack.i.bf16 %v4946_v48, %v4924_v47 }
 0x138   :  { %v4702_v27 = vld [vmem:[#allocation1 + $0x68e] ss:$16 sm:%s15416_s4]   ;;  %s15422_s16 = sld [smem:[#allocation21_spill]]  ;;  %v4684_v52 = vsel %vm3846_vm0, %v4682_v25, %v4679_v24  ;;  %10802 = vrot.lane.b32.xlu2 %v10801_v57, %s15328_s21 }
 0x139   :  { %v4705_v23 = vld [vmem:[#allocation1 + $0x68e] ss:$16 sm:%s15417_s2]   ;;  %s15423_s8 = sld [smem:[#allocation70_spill]] }
 0x13a   :  { %v5069_v32 = vld [vmem:[#allocation1 + $0x68d] ss:$16 sm:%s15418_s20]   ;;  %s15424_s22 = sld [smem:[#allocation74_spill]]  ;;  %v4707_v54 = vsel %vm3846_vm0, %v4705_v23, %v4702_v27 }
 0x13b   :  { %v5161_v39 = vld [vmem:[#allocation1 + $0x70d] ss:$16 sm:%s15419_s6]   ;;  %s15425_s29 = sld [smem:[#allocation71_spill]]  ;;  %v5074_v60 = vsel %vm3846_vm0, %v5072_v33, %v5069_v32 }
 0x13c   :  { %v5164_v43 = vld [vmem:[#allocation1 + $0x70d] ss:$16 sm:%s15420_s9]   ;;  %s15426_s17 = sld [smem:[#allocation79_spill]]  ;;  %10842 = vrot.lane.b32.xlu1 %v10841_v62, %s11443_s14 }
 0x13d   :  { %v5169_v44 = vld [vmem:[#allocation1 + $0x70d] ss:$16 sm:%s15421_s5]   ;;  %s15427_s18 = sld [smem:[#allocation82_spill]]  ;;  %v5166_v50 = vsel %vm3846_vm0, %v5164_v43, %v5161_v39 }
 0x13e   :  { %v5174_v45 = vld [vmem:[#allocation1 + $0x70d] ss:$16 sm:%s15422_s16]   ;;  %s15428_s10 = sld [smem:[#allocation75_spill]]  ;;  %v5171_v55 = vsel %vm3850_vm1, %v5169_v44, %v5166_v50 }
 0x13f   :  { %s15429_s11 = sld [smem:[#allocation80_spill]]  ;;  %v4687_v53 = vld [vmem:[#allocation1 + $0x48e] ss:$16 sm:%s15423_s8]   ;;  %v5176_v61 = vsel %vm3854_vm2, %v5174_v45, %v5171_v55 }
 0x140   :  { %s15430_s12 = sld [smem:[#allocation83_spill]]  ;;  %v4710_v46 = vld [vmem:[#allocation1 + $0x68e] ss:$16 sm:%s15424_s22]   ;;  %v10866_v2 = vpack.i.bf16 %v5176_v61, %v5153_v49  ;;  %v4689_v3 = vsel %vm3850_vm1, %v4687_v53, %v4684_v52 }
 0x141   :  { %s15431_s1 = sld [smem:[#allocation84_spill]]  ;;  %v4692_v51 = vld [vmem:[#allocation1 + $0x48e] ss:$16 sm:%s15425_s29]   ;;  %v4712_v4 = vsel %vm3850_vm1, %v4710_v46, %v4707_v54 }
 0x142   :  { %s15432_s0 = sld [smem:[#allocation85_spill]]  ;;  %v5054_v58 = vld [vmem:[#allocation1 + $0x48d] ss:$16 sm:%s15426_s17]   ;;  %10867 = vrot.lane.b32.xlu0 %v10866_v2, %s11443_s14  ;;  %v4694_v22 = vsel %vm3854_vm2, %v4692_v51, %v4689_v3 }
 0x143   :  { %s15433_s4 = sld [smem:[#allocation88_spill]]  ;;  %v5077_v59 = vld [vmem:[#allocation1 + $0x68d] ss:$16 sm:%s15427_s18]   ;;  %v5056_v10 = vsel %vm3850_vm1, %v5054_v58, %v5051_v56 }
 0x144   :  { %s15434_s2 = sld [smem:[#allocation89_spill]]  ;;  %v4715_v63 = vld [vmem:[#allocation1 + $0x68e] ss:$16 sm:%s15428_s10]   ;;  %v5079_v9 = vsel %vm3850_vm1, %v5077_v59, %v5074_v60 }
 0x145   :  { %s15435_s20 = sld [smem:[#allocation6_spill]]  ;;  %v5059_v0 = vld [vmem:[#allocation1 + $0x48d] ss:$16 sm:%s15429_s11]   ;;  %v4717_v17 = vsel %vm3854_vm2, %v4715_v63, %v4712_v4  ;;  %v5421_v63 = vld [vmem:[#allocation1 + $0x48c] ss:$16 sm:%s12492_s25]  }
 0x146   :  { %s15436_s6 = sld [smem:[#allocation7_spill]]  ;;  %v5082_v1 = vld [vmem:[#allocation1 + $0x68d] ss:$16 sm:%s15430_s12]   ;;  %v5061_v28 = vsel %vm3854_vm2, %v5059_v0, %v5056_v10  ;;  %v10816_v36 = vpack.i.bf16 %v4717_v17, %v4694_v22  ;;  %v5426_v0 = vld [vmem:[#allocation1 + $0x48c] ss:$16 sm:%s12498_s23]  }
 0x147   :  { %s15437_s9 = sld [smem:[#allocation93_spill]]  ;;  %v4817_v5 = vld [vmem:[#allocation1 + $0x18e] ss:$16 sm:%s15431_s1]   ;;  %v5084_v29 = vsel %vm3854_vm2, %v5082_v1, %v5079_v9  ;;  %v5436_v1 = vld [vmem:[#allocation1 + $0x68c] ss:$16 sm:%s12505_s24]  }
 0x148   :  { %s15438_s5 = sld [smem:[#allocation22_spill]]  ;;  %v4820_v6 = vld [vmem:[#allocation1 + $0x18e] ss:$16 sm:%s15432_s0]   ;;  %v10856_v43 = vpack.i.bf16 %v5084_v29, %v5061_v28  ;;  %10817 = vrot.lane.b32.xlu2 %v10816_v36, %s15328_s21 }
 0x149   :  { %s15439_s16 = sld [smem:[#allocation28_spill]]  ;;  %v4840_v7 = vld [vmem:[#allocation1 + $0x38e] ss:$16 sm:%s15433_s4]   ;;  %s12803_s4 = smov 12  ;;  %v4822_v26 = vsel %vm3846_vm0, %v4820_v6, %v4817_v5  ;;  %v5439_v5 = vld [vmem:[#allocation1 + $0x68c] ss:$16 sm:%s12507_s27]  }
 0x14a   :  { %s15440_s8 = sld [smem:[#allocation25_spill]]  ;;  %v4843_v8 = vld [vmem:[#allocation1 + $0x38e] ss:$16 sm:%s15434_s2]   ;;  %s12805_s2 = smov 48  ;;  %10857 = vrot.lane.b32.xlu1 %v10856_v43, %s11443_s14  ;;  %v5444_v6 = vld [vmem:[#allocation1 + $0x68c] ss:$16 sm:%s12514_s19]  }
 0x14b   :  { %s15441_s22 = sld [smem:[#allocation29_spill]]  ;;  %v5184_v11 = vld [vmem:[#allocation1 + $0x18d] ss:$16 sm:%s15435_s20]   ;;  %v4845_v33 = vsel %vm3846_vm0, %v4843_v8, %v4840_v7 }
 0x14c   :  { %s15442_s29 = sld [smem:[#allocation95_spill]]  ;;  %v5187_v12 = vld [vmem:[#allocation1 + $0x18d] ss:$16 sm:%s15436_s6]  }
 0x14d   :  { %s15443_s17 = sld [smem:[#allocation96_spill]]  ;;  %v5207_v13 = vld [vmem:[#allocation1 + $0x38d] ss:$16 sm:%s15437_s9]   ;;  %v5189_v38 = vsel %vm3846_vm0, %v5187_v12, %v5184_v11  ;;  %v5441_v11 = vsel %vm3846_vm0, %v5439_v5, %v5436_v1 }
 0x14e   :  { %s15444_s18 = sld [smem:[#allocation12_spill]]  ;;  %v5210_v15 = vld [vmem:[#allocation1 + $0x38d] ss:$16 sm:%s15438_s5]   ;;  %s12812_s5 = smov 192 }
 0x14f   :  { %s15445_s10 = sld [smem:[#allocation14_spill]]  ;;  %v5279_v18 = vld [vmem:[#allocation1 + $0xc] ss:$16 sm:%s15439_s16]   ;;  %v5212_v40 = vsel %vm3846_vm0, %v5210_v15, %v5207_v13 }
 0x150   :  { %v5281_v14 = vsel %vm3846_vm0, %v5279_v18, %v5276_v16  ;;  %v5284_v19 = vld [vmem:[#allocation1 + $0xc] ss:$16 sm:%s15440_s8]   ;;  %s15446_s26 = sld [smem:[#allocation86_spill]]  ;;  %s12814_s8 = smov 3  ;;  %v5446_v18 = vsel %vm3850_vm1, %v5444_v6, %v5441_v11 }
 0x151   :  { %v5289_v20 = vld [vmem:[#allocation1 + $0xc] ss:$16 sm:%s15441_s22]   ;;  %s15447_s11 = sld [smem:[#allocation90_spill]]  ;;  %v5286_v24 = vsel %vm3850_vm1, %v5284_v19, %v5281_v14 }
 0x152   :  { %v5298_v21 = vld [vmem:[#allocation1 + $0x20c] ss:$16 sm:%s15442_s29]   ;;  %s15448_s12 = sld [smem:[#allocation87_spill]]  ;;  %v5291_v30 = vsel %vm3854_vm2, %v5289_v20, %v5286_v24 }
 0x153   :  { %v5301_v25 = vld [vmem:[#allocation1 + $0x20c] ss:$16 sm:%s15443_s17]   ;;  %s15449_s1 = sld [smem:[#allocation92_spill]] }
 0x154   :  { %v5306_v27 = vld [vmem:[#allocation1 + $0x20c] ss:$16 sm:%s15444_s18]   ;;  %s15450_s0 = sld [smem:[#allocation94_spill]]  ;;  %v5303_v31 = vsel %vm3846_vm0, %v5301_v25, %v5298_v21 }
 0x155   :  { %v5311_v23 = vld [vmem:[#allocation1 + $0x20c] ss:$16 sm:%s15445_s10]   ;;  %s15451_s20 = sld [smem:[#allocation91_spill]]  ;;  %v5308_v35 = vsel %vm3850_vm1, %v5306_v27, %v5303_v31 }
 0x156   :  { %s15452_s6 = sld [smem:[#allocation8_spill]]  ;;  %v4825_v32 = vld [vmem:[#allocation1 + $0x18e] ss:$16 sm:%s15446_s26]   ;;  %v5313_v42 = vsel %vm3854_vm2, %v5311_v23, %v5308_v35 }
 0x157   :  { %s15453_s9 = sld [smem:[#allocation23_spill]]  ;;  %v4848_v34 = vld [vmem:[#allocation1 + $0x38e] ss:$16 sm:%s15447_s11]   ;;  %v10881_v48 = vpack.i.bf16 %v5313_v42, %v5291_v30  ;;  %v4827_v49 = vsel %vm3850_vm1, %v4825_v32, %v4822_v26  ;;  %v5554_v42 = vld [vmem:[#allocation1 + $0x18c] ss:$16 sm:%s12602_s3]  }
 0x158   :  { %s15454_s16 = sld [smem:[#allocation26_spill]]  ;;  %v4830_v37 = vld [vmem:[#allocation1 + $0x18e] ss:$16 sm:%s15448_s12]   ;;  %v4850_v50 = vsel %vm3850_vm1, %v4848_v34, %v4845_v33 }
 0x159   :  { %s15455_s22 = sld [smem:[#allocation9_spill]]  ;;  %v5192_v39 = vld [vmem:[#allocation1 + $0x18d] ss:$16 sm:%s15449_s1]   ;;  %v4832_v2 = vsel %vm3854_vm2, %v4830_v37, %v4827_v49 }
 0x15a   :  { %s15456_s29 = sld [smem:[#allocation2_spill]]  ;;  %v5215_v41 = vld [vmem:[#allocation1 + $0x38d] ss:$16 sm:%s15450_s0]   ;;  %v5194_v55 = vsel %vm3850_vm1, %v5192_v39, %v5189_v38  ;;  %s11444_s0 = smov 96  }
 0x15b   :  { %s15457_s17 = sld [smem:[#allocation3_spill]]  ;;  %v4853_v44 = vld [vmem:[#allocation1 + $0x38e] ss:$16 sm:%s15451_s20]   ;;  %v5217_v57 = vsel %vm3850_vm1, %v5215_v41, %v5212_v40  ;;  %10882 = vrot.lane.b32.xlu0 %v10881_v48, %s11444_s0  ;;  %v5551_v41 = vld [vmem:[#allocation1 + $0x18c] ss:$16 sm:%s12596_s30]  }
 0x15c   :  { %s15458_s18 = sld [smem:[#allocation97_spill]]  ;;  %v5197_v45 = vld [vmem:[#allocation1 + $0x18d] ss:$16 sm:%s15452_s6]   ;;  %v4855_v3 = vsel %vm3854_vm2, %v4853_v44, %v4850_v50  ;;  %s12856_s6 = smov 12  ;;  %v5556_v43 = vsel %vm3846_vm0, %v5554_v42, %v5551_v41  ;;  %v5559_v44 = vld [vmem:[#allocation1 + $0x18c] ss:$16 sm:%s12608_s7]  }
 0x15d   :  { %s15459_s10 = sld [smem:[#allocation98_spill]]  ;;  %v5220_v47 = vld [vmem:[#allocation1 + $0x38d] ss:$16 sm:%s15453_s9]   ;;  %v5199_v8 = vsel %vm3854_vm2, %v5197_v45, %v5194_v55  ;;  %s12858_s9 = smov 48  ;;  %v10831_v14 = vpack.i.bf16 %v4855_v3, %v4832_v2  ;;  %v5561_v50 = vsel %vm3850_vm1, %v5559_v44, %v5556_v43 }
 0x15e   :  { %s15460_s26 = sld [smem:[#allocation16_spill]]  ;;  %v4954_v52 = vld [vmem:[#allocation1 + $0x40d] ss:$16 sm:%s15454_s16]   ;;  %v5222_v10 = vsel %vm3854_vm2, %v5220_v47, %v5217_v57 }
 0x15f   :  { %s15461_s11 = sld [smem:[#allocation101_spill]]  ;;  %v4957_v53 = vld [vmem:[#allocation1 + $0x40d] ss:$16 sm:%s15455_s22]   ;;  %v10871_v25 = vpack.i.bf16 %v5222_v10, %v5199_v8  ;;  %10832 = vrot.lane.b32.xlu2 %v10831_v14, %s15328_s21 }
 0x160   :  { %s15462_s12 = sld [smem:[#allocation15_spill]]  ;;  %v4977_v54 = vld [vmem:[#allocation1 + $0x60d] ss:$16 sm:%s15456_s29]   ;;  %v4959_v12 = vsel %vm3846_vm0, %v4957_v53, %v4954_v52 }
 0x161   :  { %s15463_s1 = sld [smem:[#allocation30_spill]]  ;;  %v4980_v46 = vld [vmem:[#allocation1 + $0x60d] ss:$16 sm:%s15457_s17]   ;;  %s12865_s17 = smov 192  ;;  %10872 = vrot.lane.b32.xlu1 %v10871_v25, %s11443_s14 }
 0x162   :  { %v5321_v51 = vld [vmem:[#allocation1 + $0x40c] ss:$16 sm:%s15458_s18]   ;;  %s15464_s20 = sld [smem:[#allocation31_spill]]  ;;  %v4982_v15 = vsel %vm3846_vm0, %v4980_v46, %v4977_v54 }
 0x163   :  { %v5324_v56 = vld [vmem:[#allocation1 + $0x40c] ss:$16 sm:%s15459_s10]   ;;  %s15465_s25 = sld [smem:[#allocation27_spill]]  ;;  %s12867_s10 = smov 3 }
 0x164   :  { %v5344_v58 = vld [vmem:[#allocation1 + $0x60c] ss:$16 sm:%s15460_s26]   ;;  %s15466_s23 = sld [smem:[#allocation4_spill]]  ;;  %v5326_v20 = vsel %vm3846_vm0, %v5324_v56, %v5321_v51 }
 0x165   :  { %v5347_v60 = vld [vmem:[#allocation1 + $0x60c] ss:$16 sm:%s15461_s11]   ;;  %s15467_s24 = sld [smem:[#allocation24_spill]] }
 0x166   :  { %v5413_v59 = vld [vmem:[#allocation1 + $0x48c] ss:$16 sm:%s15462_s12]   ;;  %s15468_s27 = sld [smem:[#allocation99_spill]]  ;;  %v5349_v22 = vsel %vm3846_vm0, %v5347_v60, %v5344_v58 }
 0x167   :  { %v5416_v61 = vld [vmem:[#allocation1 + $0x48c] ss:$16 sm:%s15463_s1]   ;;  %s15469_s19 = sld [smem:[#allocation102_spill]] }
 0x168   :  { %v5418_v62 = vsel %vm3846_vm0, %v5416_v61, %v5413_v59  ;;  %v5449_v7 = vld [vmem:[#allocation1 + $0x68c] ss:$16 sm:%s15464_s20]   ;;  %s15470_s16 = sld [smem:[#allocation5_spill]] }
 0x169   :  { %v5423_v4 = vsel %vm3850_vm1, %v5421_v63, %v5418_v62  ;;  %s15471_s22 = sld [smem:[#allocation100_spill]]  ;;  %v4962_v13 = vld [vmem:[#allocation1 + $0x40d] ss:$16 sm:%s15465_s25]   ;;  %v5451_v24 = vsel %vm3854_vm2, %v5449_v7, %v5446_v18 }
 0x16a   :  { %v5428_v9 = vsel %vm3854_vm2, %v5426_v0, %v5423_v4  ;;  %s15472_s29 = sld [smem:[#allocation34_spill]]  ;;  %v4985_v16 = vld [vmem:[#allocation1 + $0x60d] ss:$16 sm:%s15466_s23]   ;;  %v4964_v30 = vsel %vm3850_vm1, %v4962_v13, %v4959_v12 }
 0x16b   :  { %s15473_s18 = sld [smem:[#allocation17_spill]]  ;;  %v4967_v19 = vld [vmem:[#allocation1 + $0x40d] ss:$16 sm:%s15467_s24]   ;;  %v10896_v29 = vpack.i.bf16 %v5451_v24, %v5428_v9  ;;  %v4987_v31 = vsel %vm3850_vm1, %v4985_v16, %v4982_v15  ;;  %v5691_v24 = vld [vmem:[#allocation1 + $0x40b] ss:$16 sm:%s12803_s4]  }
 0x16c   :  { %s15474_s26 = sld [smem:[#allocation103_spill]]  ;;  %v5329_v21 = vld [vmem:[#allocation1 + $0x40c] ss:$16 sm:%s15468_s27]   ;;  %v4969_v48 = vsel %vm3854_vm2, %v4967_v19, %v4964_v30 }
 0x16d   :  { %s15475_s11 = sld [smem:[#allocation35_spill]]  ;;  %v5352_v17 = vld [vmem:[#allocation1 + $0x60c] ss:$16 sm:%s15469_s19]   ;;  %v5331_v35 = vsel %vm3850_vm1, %v5329_v21, %v5326_v20  ;;  %10897 = vrot.lane.b32.xlu0 %v10896_v29, %s11444_s0 }
 0x16e   :  { %s15476_s12 = sld [smem:[#allocation10_spill]]  ;;  %v4990_v27 = vld [vmem:[#allocation1 + $0x60d] ss:$16 sm:%s15470_s16]   ;;  %v5354_v36 = vsel %vm3850_vm1, %v5352_v17, %v5349_v22  ;;  %v5688_v17 = vld [vmem:[#allocation1 + $0x40b] ss:$16 sm:%s12761_s13]  }
 0x16f   :  { %s15477_s1 = sld [smem:[#allocation32_spill]]  ;;  %v5334_v23 = vld [vmem:[#allocation1 + $0x40c] ss:$16 sm:%s15471_s22]   ;;  %v4992_v49 = vsel %vm3854_vm2, %v4990_v27, %v4987_v31  ;;  %v5693_v25 = vsel %vm3846_vm0, %v5691_v24, %v5688_v17  ;;  %v5696_v27 = vld [vmem:[#allocation1 + $0x40b] ss:$16 sm:%s12805_s2]  }
 0x170   :  { %s15478_s20 = sld [smem:[#allocation33_spill]]  ;;  %v5357_v28 = vld [vmem:[#allocation1 + $0x60c] ss:$16 sm:%s15472_s29]   ;;  %v5336_v46 = vsel %vm3854_vm2, %v5334_v23, %v5331_v35  ;;  %v10846_v62 = vpack.i.bf16 %v4992_v49, %v4969_v48  ;;  %v5701_v23 = vld [vmem:[#allocation1 + $0x40b] ss:$16 sm:%s12812_s5]   ;;  %v5698_v31 = vsel %vm3850_vm1, %v5696_v27, %v5693_v25 }
 0x171   :  { %s15479_s25 = sld [smem:[#allocation108_spill]]  ;;  %v5092_v26 = vld [vmem:[#allocation1 + $0x10d] ss:$16 sm:%s15473_s18]   ;;  %v5359_v55 = vsel %vm3854_vm2, %v5357_v28, %v5354_v36  ;;  %s12909_s18 = smov 12  ;;  %v5711_v28 = vld [vmem:[#allocation1 + $0x60b] ss:$16 sm:%s12814_s8]   ;;  %v5703_v36 = vsel %vm3854_vm2, %v5701_v23, %v5698_v31 }
 0x172   :  { %s15480_s23 = sld [smem:[#allocation109_spill]]  ;;  %v5095_v32 = vld [vmem:[#allocation1 + $0x10d] ss:$16 sm:%s15474_s26]   ;;  %s12911_s26 = smov 48  ;;  %v10886_v5 = vpack.i.bf16 %v5359_v55, %v5336_v46  ;;  %10847 = vrot.lane.b32.xlu2 %v10846_v62, %s11443_s14 }
 0x173   :  { %s15481_s24 = sld [smem:[#allocation120_spill]]  ;;  %v5115_v33 = vld [vmem:[#allocation1 + $0x30d] ss:$16 sm:%s15475_s11]   ;;  %v5097_v56 = vsel %vm3846_vm0, %v5095_v32, %v5092_v26  ;;  %v5714_v26 = vld [vmem:[#allocation1 + $0x60b] ss:$16 sm:%s12856_s6]  }
 0x174   :  { %s15482_s27 = sld [smem:[#allocation121_spill]]  ;;  %v5118_v34 = vld [vmem:[#allocation1 + $0x30d] ss:$16 sm:%s15476_s12]   ;;  %10887 = vrot.lane.b32.xlu1 %v10886_v5, %s11444_s0  ;;  %v5719_v32 = vld [vmem:[#allocation1 + $0x60b] ss:$16 sm:%s12858_s9]   ;;  %s12962_s9 = smov 12 }
 0x175   :  { %s15483_s19 = sld [smem:[#allocation122_spill]]  ;;  %v5459_v37 = vld [vmem:[#allocation1 + $0x10c] ss:$16 sm:%s15477_s1]   ;;  %v5120_v60 = vsel %vm3846_vm0, %v5118_v34, %v5115_v33  ;;  %v5724_v33 = vld [vmem:[#allocation1 + $0x60b] ss:$16 sm:%s12865_s17]   ;;  %s12964_s17 = smov 48 }
 0x176   :  { %s15484_s16 = sld [smem:[#allocation123_spill]]  ;;  %v5462_v38 = vld [vmem:[#allocation1 + $0x10c] ss:$16 sm:%s15478_s20]   ;;  %s12918_s20 = smov 192 }
 0x177   :  { %s15485_s22 = sld [smem:[#allocation124_spill]]  ;;  %v5482_v39 = vld [vmem:[#allocation1 + $0x30c] ss:$16 sm:%s15479_s25]   ;;  %v5464_v0 = vsel %vm3846_vm0, %v5462_v38, %v5459_v37  ;;  %v5716_v37 = vsel %vm3846_vm0, %v5714_v26, %v5711_v28 }
 0x178   :  { %v5485_v40 = vld [vmem:[#allocation1 + $0x30c] ss:$16 sm:%s15480_s23]   ;;  %s15486_s21 = sld [smem:[#allocation104_spill]]  ;;  %s12920_s23 = smov 3  ;;  %v5721_v42 = vsel %vm3850_vm1, %v5719_v32, %v5716_v37 }
 0x179   :  { %v5564_v45 = vld [vmem:[#allocation1 + $0x18c] ss:$16 sm:%s15481_s24]   ;;  %s15487_s30 = sld [smem:[#allocation11_spill]]  ;;  %v5487_v2 = vsel %vm3846_vm0, %v5485_v40, %v5482_v39 }
 0x17a   :  { %v5574_v47 = vld [vmem:[#allocation1 + $0x38c] ss:$16 sm:%s15482_s27]   ;;  %s15488_s3 = sld [smem:[#allocation105_spill]]  ;;  %v5566_v57 = vsel %vm3854_vm2, %v5564_v45, %v5561_v50 }
 0x17b   :  { %v5577_v52 = vld [vmem:[#allocation1 + $0x38c] ss:$16 sm:%s15483_s19]   ;;  %s15489_s7 = sld [smem:[#allocation106_spill]] }
 0x17c   :  { %v5582_v53 = vld [vmem:[#allocation1 + $0x38c] ss:$16 sm:%s15484_s16]   ;;  %s15490_s29 = sld [smem:[#allocation110_spill]]  ;;  %v5579_v51 = vsel %vm3846_vm0, %v5577_v52, %v5574_v47  ;;  %v5726_v52 = vsel %vm3854_vm2, %v5724_v33, %v5721_v42 }
 0x17d   :  { %v5587_v54 = vld [vmem:[#allocation1 + $0x38c] ss:$16 sm:%s15485_s22]   ;;  %s15491_s11 = sld [smem:[#allocation13_spill]]  ;;  %v5584_v61 = vsel %vm3850_vm1, %v5582_v53, %v5579_v51  ;;  %v10926_v55 = vpack.i.bf16 %v5726_v52, %v5703_v36  ;;  %v13061_v52 = vpop.permute.xlu0 %10762 }
 0x17e   :  { %s15492_s12 = sld [smem:[#allocation107_spill]]  ;;  %v5100_v58 = vld [vmem:[#allocation1 + $0x10d] ss:$16 sm:%s15486_s21]   ;;  %v5589_v4 = vsel %vm3854_vm2, %v5587_v54, %v5584_v61  ;;  %v5398_v5 = vld [vmem:[#allocation1 + $0x28c] ss:$16 sm:%s12752_s28]   ;;  %s5828_s28 = smov 12 }
 0x17f   :  { %s15493_s1 = sld [smem:[#allocation111_spill]]  ;;  %v5123_v59 = vld [vmem:[#allocation1 + $0x30d] ss:$16 sm:%s15487_s30]   ;;  %v10911_v10 = vpack.i.bf16 %v5589_v4, %v5566_v57  ;;  %v5102_v9 = vsel %vm3850_vm1, %v5100_v58, %v5097_v56 }
 0x180   :  { %s15494_s25 = sld [smem:[#allocation112_spill]]  ;;  %v5105_v63 = vld [vmem:[#allocation1 + $0x10d] ss:$16 sm:%s15488_s3]   ;;  %v5125_v11 = vsel %vm3850_vm1, %v5123_v59, %v5120_v60 }
 0x181   :  { %s15495_s24 = sld [smem:[#allocation113_spill]]  ;;  %v5467_v1 = vld [vmem:[#allocation1 + $0x10c] ss:$16 sm:%s15489_s7]   ;;  %10912 = vrot.lane.b32.xlu0 %v10911_v10, %s11444_s0  ;;  %v5107_v29 = vsel %vm3854_vm2, %v5105_v63, %v5102_v9  ;;  %v5734_v63 = vld [vmem:[#allocation1 + $0x8b] ss:$16 sm:%s12867_s10]   ;;  %s13002_s10 = smov 12 }
 0x182   :  { %s15496_s27 = sld [smem:[#allocation116_spill]]  ;;  %v5490_v3 = vld [vmem:[#allocation1 + $0x30c] ss:$16 sm:%s15490_s29]   ;;  %v5469_v18 = vsel %vm3850_vm1, %v5467_v1, %v5464_v0  ;;  %s12971_s29 = smov 192  ;;  %v5737_v0 = vld [vmem:[#allocation1 + $0x8b] ss:$16 sm:%s12909_s18]  }
 0x183   :  { %s15497_s19 = sld [smem:[#allocation117_spill]]  ;;  %v5128_v6 = vld [vmem:[#allocation1 + $0x30d] ss:$16 sm:%s15491_s11]   ;;  %v5492_v14 = vsel %vm3850_vm1, %v5490_v3, %v5487_v2  ;;  %s12973_s11 = smov 3  ;;  %v5757_v1 = vld [vmem:[#allocation1 + $0x28b] ss:$16 sm:%s12920_s23]   ;;  %v5739_v17 = vsel %vm3846_vm0, %v5737_v0, %v5734_v63 }
 0x184   :  { %s15498_s16 = sld [smem:[#allocation125_spill]]  ;;  %v5472_v7 = vld [vmem:[#allocation1 + $0x10c] ss:$16 sm:%s15492_s12]   ;;  %v5130_v30 = vsel %vm3854_vm2, %v5128_v6, %v5125_v11  ;;  %s13009_s18 = smov 192  ;;  %v5760_v6 = vld [vmem:[#allocation1 + $0x28b] ss:$16 sm:%s12962_s9]  }
 0x185   :  { %s15499_s22 = sld [smem:[#allocation126_spill]]  ;;  %v5495_v8 = vld [vmem:[#allocation1 + $0x30c] ss:$16 sm:%s15493_s1]   ;;  %v5474_v34 = vsel %vm3854_vm2, %v5472_v7, %v5469_v18  ;;  %v10861_v43 = vpack.i.bf16 %v5130_v30, %v5107_v29  ;;  %s5825_s23 = smov 3  ;;  %v5742_v9 = vld [vmem:[#allocation1 + $0x8b] ss:$16 sm:%s12911_s26]   ;;  %v5762_v24 = vsel %vm3846_vm0, %v5760_v6, %v5757_v1 }
 0x186   :  { %s15500_s21 = sld [smem:[#allocation39_spill]]  ;;  %v5230_v12 = vld [vmem:[#allocation1 + $0x58d] ss:$16 sm:%s15494_s25]   ;;  %v5497_v35 = vsel %vm3854_vm2, %v5495_v8, %v5492_v14  ;;  %v5826_v7 = vld [vmem:[#allocation1 + $0x10b] ss:$16 sm:%s5825_s23]   ;;  %s5838_s26 = smov 192 }
 0x187   :  { %s15501_s30 = sld [smem:[#allocation41_spill]]  ;;  %v5233_v13 = vld [vmem:[#allocation1 + $0x58d] ss:$16 sm:%s15495_s24]   ;;  %v10901_v53 = vpack.i.bf16 %v5497_v35, %v5474_v34  ;;  %10862 = vrot.lane.b32.xlu2 %v10861_v43, %s11443_s14  ;;  %v5765_v11 = vld [vmem:[#allocation1 + $0x28b] ss:$16 sm:%s12964_s17]   ;;  %s5871_s9 = smov 3 }
 0x188   :  { %v5253_v15 = vld [vmem:[#allocation1 + $0x78d] ss:$16 sm:%s15496_s27]   ;;  %s15502_s13 = sld [smem:[#allocation114_spill]]  ;;  %v5235_v38 = vsel %vm3846_vm0, %v5233_v13, %v5230_v12  ;;  %s12984_s27 = smov 12  ;;  %v5829_v12 = vld [vmem:[#allocation1 + $0x10b] ss:$16 sm:%s5828_s28]  }
 0x189   :  { %v5256_v16 = vld [vmem:[#allocation1 + $0x78d] ss:$16 sm:%s15497_s19]   ;;  %s15503_s4 = sld [smem:[#allocation118_spill]]  ;;  %s12986_s19 = smov 48  ;;  %10902 = vrot.lane.b32.xlu1 %v10901_v53, %s11444_s0  ;;  %v5831_v18 = vsel %vm3846_vm0, %v5829_v12, %v5826_v7  ;;  %v5839_v14 = vld [vmem:[#allocation1 + $0x10b] ss:$16 sm:%s5838_s26]  }
 0x18a   :  { %v5597_v19 = vld [vmem:[#allocation1 + $0x58c] ss:$16 sm:%s15498_s16]   ;;  %s15504_s2 = sld [smem:[#allocation115_spill]]  ;;  %v5258_v40 = vsel %vm3846_vm0, %v5256_v16, %v5253_v15  ;;  %s12993_s16 = smov 192  ;;  %v5747_v29 = vld [vmem:[#allocation1 + $0x8b] ss:$16 sm:%s12918_s20]  }
 0x18b   :  { %v5600_v20 = vld [vmem:[#allocation1 + $0x58c] ss:$16 sm:%s15499_s22]   ;;  %s15505_s5 = sld [smem:[#allocation119_spill]]  ;;  %s12995_s22 = smov 3  ;;  %v5770_v30 = vld [vmem:[#allocation1 + $0x28b] ss:$16 sm:%s12971_s29]  }
 0x18c   :  { %v5620_v21 = vld [vmem:[#allocation1 + $0x78c] ss:$16 sm:%s15500_s21]   ;;  %s15506_s8 = sld [smem:[#allocation127_spill]]  ;;  %v5602_v47 = vsel %vm3846_vm0, %v5600_v20, %v5597_v19  ;;  %s5874_s20 = smov 12 }
 0x18d   :  { %v5623_v22 = vld [vmem:[#allocation1 + $0x78c] ss:$16 sm:%s15501_s30]   ;;  %s15507_s6 = sld [smem:[#allocation129_spill]]  ;;  %s11445_s30 = smov 88  }
 0x18e   :  { %s15508_s3 = sld [smem:[#allocation128_spill]]  ;;  %v5238_v39 = vld [vmem:[#allocation1 + $0x58d] ss:$16 sm:%s15502_s13]   ;;  %v5625_v49 = vsel %vm3846_vm0, %v5623_v22, %v5620_v21  ;;  %10927 = vrot.lane.b32.xlu0 %v10926_v55, %s11445_s30  ;;  %s13004_s13 = smov 48  ;;  %v5403_v22 = vld [vmem:[#allocation1 + $0x28c] ss:$16 sm:%s12754_s15]  }
 0x18f   :  { %s15509_s7 = sld [smem:[#allocation130_spill]]  ;;  %v5261_v41 = vld [vmem:[#allocation1 + $0x78d] ss:$16 sm:%s15503_s4]   ;;  %v5240_v57 = vsel %vm3850_vm1, %v5238_v39, %v5235_v38  ;;  %s5833_s4 = smov 48  ;;  %v5505_v35 = vld [vmem:[#allocation1 + $0x50c] ss:$16 sm:%s12973_s11]   ;;  %v5744_v38 = vsel %vm3850_vm1, %v5742_v9, %v5739_v17  ;;  %v5767_v39 = vsel %vm3850_vm1, %v5765_v11, %v5762_v24 }
 0x190   :  { %s15510_s12 = sld [smem:[#allocation42_spill]]  ;;  %v5243_v44 = vld [vmem:[#allocation1 + $0x58d] ss:$16 sm:%s15504_s2]   ;;  %v5263_v51 = vsel %vm3850_vm1, %v5261_v41, %v5258_v40  ;;  %v5834_v13 = vld [vmem:[#allocation1 + $0x10b] ss:$16 sm:%s5833_s4]   ;;  %s5861_s15 = smov 192  ;;  %v5749_v53 = vsel %vm3854_vm2, %v5747_v29, %v5744_v38 }
 0x191   :  { %s15511_s1 = sld [smem:[#allocation48_spill]]  ;;  %v5266_v45 = vld [vmem:[#allocation1 + $0x78d] ss:$16 sm:%s15505_s5]   ;;  %v5245_v2 = vsel %vm3854_vm2, %v5243_v44, %v5240_v57  ;;  %s5848_s5 = smov 3  ;;  %v5836_v25 = vsel %vm3850_vm1, %v5834_v13, %v5831_v18  ;;  %v5862_v32 = vld [vmem:[#allocation1 + $0x30b] ss:$16 sm:%s5861_s15]  }
 0x192   :  { %s15512_s25 = sld [smem:[#allocation52_spill]]  ;;  %v5605_v48 = vld [vmem:[#allocation1 + $0x58c] ss:$16 sm:%s15506_s8]   ;;  %v5268_v3 = vsel %vm3854_vm2, %v5266_v45, %v5263_v51  ;;  %v5849_v19 = vld [vmem:[#allocation1 + $0x30b] ss:$16 sm:%s5848_s5]   ;;  %s5851_s8 = smov 12  ;;  %v5841_v31 = vsel %vm3854_vm2, %v5839_v14, %v5836_v25 }
 0x193   :  { %v5628_v50 = vld [vmem:[#allocation1 + $0x78c] ss:$16 sm:%s15507_s6]   ;;  %s15513_s24 = sld [smem:[#allocation53_spill]]  ;;  %v5607_v59 = vsel %vm3850_vm1, %v5605_v48, %v5602_v47  ;;  %s5856_s6 = smov 48  ;;  %v10876_v20 = vpack.i.bf16 %v5268_v3, %v5245_v2  ;;  %v5852_v27 = vld [vmem:[#allocation1 + $0x30b] ss:$16 sm:%s5851_s8]  }
 0x194   :  { %v5610_v54 = vld [vmem:[#allocation1 + $0x58c] ss:$16 sm:%s15508_s3]   ;;  %s15514_s21 = sld [smem:[#allocation49_spill]]  ;;  %v5630_v61 = vsel %vm3850_vm1, %v5628_v50, %v5625_v49  ;;  %v5857_v23 = vld [vmem:[#allocation1 + $0x30b] ss:$16 sm:%s5856_s6]   ;;  %v5854_v26 = vsel %vm3846_vm0, %v5852_v27, %v5849_v19  ;;  %s13033_s17 = smov 48 }
 0x195   :  { %v5633_v46 = vld [vmem:[#allocation1 + $0x78c] ss:$16 sm:%s15509_s7]   ;;  %v5612_v8 = vsel %vm3854_vm2, %v5610_v54, %v5607_v59  ;;  %s15515_s2 = sld [smem:[#allocation50_spill]]  ;;  %v5859_v37 = vsel %vm3850_vm1, %v5857_v23, %v5854_v26  ;;  %s13040_s3 = smov 192  ;;  %10877 = vrot.lane.b32.xlu2 %v10876_v20, %s11443_s14  ;;  %v5872_v44 = vld [vmem:[#allocation1 + $0x50b] ss:$16 sm:%s5871_s9]   ;;  %v5772_v54 = vsel %vm3854_vm2, %v5770_v30, %v5767_v39 }
 0x196   :  { %v5367_v56 = vld [vmem:[#allocation1 + $0x8c] ss:$16 sm:%s15510_s12]   ;;  %v5635_v10 = vsel %vm3854_vm2, %v5633_v46, %v5630_v61  ;;  %s5894_s7 = smov 3  ;;  %v5864_v42 = vsel %vm3854_vm2, %v5862_v32, %v5859_v37  ;;  %s5897_s29 = smov 12  ;;  %v5875_v45 = vld [vmem:[#allocation1 + $0x50b] ss:$16 sm:%s5874_s20]   ;;  %v13068_v46 = vpop.permute.xlu1 %10772  ;;  %v10931_v1 = vpack.i.bf16 %v5772_v54, %v5749_v53 }
 0x197   :  { %v5370_v58 = vld [vmem:[#allocation1 + $0x8c] ss:$16 sm:%s15511_s1]   ;;  %v10916_v28 = vpack.i.bf16 %v5635_v10, %v5612_v8  ;;  %s13047_s11 = smov 48  ;;  %v10941_v43 = vpack.i.bf16 %v5864_v42, %v5841_v31  ;;  %s13050_s14 = smov 192  ;;  %v5895_v49 = vld [vmem:[#allocation1 + $0x70b] ss:$16 sm:%s5894_s7]   ;;  %v5877_v61 = vsel %vm3846_vm0, %v5875_v45, %v5872_v44 }
 0x198   :  { %v5390_v60 = vld [vmem:[#allocation1 + $0x28c] ss:$16 sm:%s15512_s25]   ;;  %v5372_v15 = vsel %vm3846_vm0, %v5370_v58, %v5367_v56  ;;  %s13052_s12 = smov 3  ;;  %v5898_v50 = vld [vmem:[#allocation1 + $0x70b] ss:$16 sm:%s5897_s29]   ;;  %s13057_s1 = smov 12 }
 0x199   :  { %v5393_v62 = vld [vmem:[#allocation1 + $0x28c] ss:$16 sm:%s15513_s24]   ;;  %10917 = vrot.lane.b32.xlu1 %v10916_v28, %s11444_s0  ;;  %s13059_s25 = smov 48  ;;  %10942 = vrot.lane.b32.xlu0 %v10941_v43, %s11445_s30  ;;  %s13066_s24 = smov 192  ;;  %v5900_v63 = vsel %vm3846_vm0, %v5898_v50, %v5895_v49  ;;  %v5903_v0 = vld [vmem:[#allocation1 + $0x70b] ss:$16 sm:%s13047_s11]   ;;  %v13100_v28 = vpop.permute.xlu2 %10782 }
 0x19a   :  { %v5375_v4 = vld [vmem:[#allocation1 + $0x8c] ss:$16 sm:%s15514_s21]   ;;  %v5395_v16 = vsel %vm3846_vm0, %v5393_v62, %v5390_v60  ;;  %v5880_v62 = vld [vmem:[#allocation1 + $0x50b] ss:$16 sm:%s13033_s17]   ;;  %s5963_s21 = smov 3  ;;  %s5986_s23 = smov 3 }
 0x19b   :  { %v5380_v21 = vld [vmem:[#allocation1 + $0x8c] ss:$16 sm:%s15515_s2]   ;;  %v5377_v33 = vsel %vm3850_vm1, %v5375_v4, %v5372_v15  ;;  %v5400_v34 = vsel %vm3850_vm1, %v5398_v5, %v5395_v16  ;;  %v5885_v2 = vld [vmem:[#allocation1 + $0x50b] ss:$16 sm:%s13040_s3]   ;;  %v5882_v13 = vsel %vm3850_vm1, %v5880_v62, %v5877_v61  ;;  %v5905_v15 = vsel %vm3850_vm1, %v5903_v0, %v5900_v63  ;;  %s5989_s28 = smov 12  ;;  %s5994_s4 = smov 48 }
 0x19c   :  { %v5508_v36 = vld [vmem:[#allocation1 + $0x50c] ss:$16 sm:%s12984_s27]   ;;  %v5382_v47 = vsel %vm3854_vm2, %v5380_v21, %v5377_v33  ;;  %v5405_v48 = vsel %vm3854_vm2, %v5403_v22, %v5400_v34  ;;  %s5664_s27 = smov 3  ;;  %v5908_v3 = vld [vmem:[#allocation1 + $0x70b] ss:$16 sm:%s13050_s14]   ;;  %s5999_s2 = smov 192  ;;  %v5887_v29 = vsel %vm3854_vm2, %v5885_v2, %v5882_v13 }
 0x19d   :  { %v5528_v40 = vld [vmem:[#allocation1 + $0x70c] ss:$16 sm:%s12995_s22]   ;;  %v5510_v55 = vsel %vm3846_vm0, %v5508_v36, %v5505_v35  ;;  %s13074_s22 = smov 48  ;;  %v10891_v58 = vpack.i.bf16 %v5405_v48, %v5382_v47  ;;  %v5964_v4 = vld [vmem:[#allocation1 + $0x58b] ss:$16 sm:%s5963_s21]   ;;  %s6009_s26 = smov 3  ;;  %v5910_v30 = vsel %vm3854_vm2, %v5908_v3, %v5905_v15 }
 0x19e   :  { %v5531_v41 = vld [vmem:[#allocation1 + $0x70c] ss:$16 sm:%s13002_s10]   ;;  %s5966_s10 = smov 12  ;;  %v5643_v7 = vld [vmem:[#allocation1 + $0xb] ss:$16 sm:%s13052_s12]   ;;  %s6012_s5 = smov 12  ;;  %v10946_v44 = vpack.i.bf16 %v5910_v30, %v5887_v29 }
 0x19f   :  { %v5513_v57 = vld [vmem:[#allocation1 + $0x50c] ss:$16 sm:%s12986_s19]   ;;  %v5533_v51 = vsel %vm3846_vm0, %v5531_v41, %v5528_v40  ;;  %s5667_s19 = smov 12  ;;  %v5646_v8 = vld [vmem:[#allocation1 + $0xb] ss:$16 sm:%s13057_s1]   ;;  %10892 = vrot.lane.b32.xlu2 %v10891_v58, %s11444_s0  ;;  %s6017_s8 = smov 48 }
 0x1a0   :  { %v5536_v56 = vld [vmem:[#allocation1 + $0x70c] ss:$16 sm:%s13004_s13]   ;;  %s5971_s13 = smov 48  ;;  %v5515_v5 = vsel %vm3850_vm1, %v5513_v57, %v5510_v55  ;;  %v5665_v10 = vld [vmem:[#allocation1 + $0x20b] ss:$16 sm:%s5664_s27]   ;;  %s6022_s6 = smov 192  ;;  %v5648_v33 = vsel %vm3846_vm0, %v5646_v8, %v5643_v7 }
 0x1a1   :  { %v5518_v60 = vld [vmem:[#allocation1 + $0x50c] ss:$16 sm:%s12993_s16]   ;;  %s13082_s16 = smov 192  ;;  %v5538_v6 = vsel %vm3850_vm1, %v5536_v56, %v5533_v51  ;;  %v5668_v9 = vld [vmem:[#allocation1 + $0x20b] ss:$16 sm:%s5667_s19]   ;;  %10932 = vrot.lane.b32.xlu1 %v10931_v1, %s11445_s30  ;;  %s6031_s15 = smov 3 }
 0x1a2   :  { %v5541_v59 = vld [vmem:[#allocation1 + $0x70c] ss:$16 sm:%s13009_s18]   ;;  %v5967_v11 = vld [vmem:[#allocation1 + $0x58b] ss:$16 sm:%s5966_s10]   ;;  %s5976_s18 = smov 192  ;;  %v5520_v22 = vsel %vm3854_vm2, %v5518_v60, %v5515_v5  ;;  %v5670_v34 = vsel %vm3846_vm0, %v5668_v9, %v5665_v10  ;;  %s6034_s9 = smov 12 }
 0x1a3   :  { %v5972_v12 = vld [vmem:[#allocation1 + $0x58b] ss:$16 sm:%s5971_s13]   ;;  %v5969_v16 = vsel %vm3846_vm0, %v5967_v11, %v5964_v4  ;;  %v5543_v17 = vsel %vm3854_vm2, %v5541_v59, %v5538_v6  ;;  %v6010_v23 = vld [vmem:[#allocation1 + $0xa] ss:$16 sm:%s6009_s26]   ;;  %s6039_s20 = smov 48  ;;  %s6044_s17 = smov 192 }
 0x1a4   :  { %v5977_v18 = vld [vmem:[#allocation1 + $0x58b] ss:$16 sm:%s5976_s18]   ;;  %v5974_v19 = vsel %vm3850_vm1, %v5972_v12, %v5969_v16  ;;  %v6013_v32 = vld [vmem:[#allocation1 + $0xa] ss:$16 sm:%s6012_s5]   ;;  %v10906_v38 = vpack.i.bf16 %v5543_v17, %v5520_v22  ;;  %s5779_s3 = smov 3  ;;  %s5782_s7 = smov 12 }
 0x1a5   :  { %v5987_v14 = vld [vmem:[#allocation1 + $0x78b] ss:$16 sm:%s5986_s23]   ;;  %v5979_v24 = vsel %vm3854_vm2, %v5977_v18, %v5974_v19  ;;  %v6018_v37 = vld [vmem:[#allocation1 + $0xa] ss:$16 sm:%s6017_s8]   ;;  %v6015_v41 = vsel %vm3846_vm0, %v6013_v32, %v6010_v23  ;;  %s5787_s29 = smov 48  ;;  %s13117_s11 = smov 192 }
 0x1a6   :  { %v5990_v20 = vld [vmem:[#allocation1 + $0x78b] ss:$16 sm:%s5989_s28]   ;;  %v6032_v42 = vld [vmem:[#allocation1 + $0x20a] ss:$16 sm:%s6031_s15]   ;;  %v6020_v55 = vsel %vm3850_vm1, %v6018_v37, %v6015_v41  ;;  %s5802_s14 = smov 3  ;;  %s5805_s12 = smov 12 }
 0x1a7   :  { %v5995_v21 = vld [vmem:[#allocation1 + $0x78b] ss:$16 sm:%s5994_s4]   ;;  %v5992_v25 = vsel %vm3846_vm0, %v5990_v20, %v5987_v14  ;;  %v6035_v43 = vld [vmem:[#allocation1 + $0x20a] ss:$16 sm:%s6034_s9]   ;;  %10907 = vrot.lane.b32.xlu2 %v10906_v38, %s11444_s0  ;;  %s5810_s0 = smov 48  ;;  %s5815_s1 = smov 192 }
 0x1a8   :  { %v6000_v27 = vld [vmem:[#allocation1 + $0x78b] ss:$16 sm:%s5999_s2]   ;;  %v5997_v26 = vsel %vm3850_vm1, %v5995_v21, %v5992_v25  ;;  %v6037_v47 = vsel %vm3846_vm0, %v6035_v43, %v6032_v42  ;;  %v6040_v48 = vld [vmem:[#allocation1 + $0x20a] ss:$16 sm:%s6039_s20]   ;;  %s6108_s27 = smov 48  ;;  %s6113_s19 = smov 192 }
 0x1a9   :  { %v5651_v31 = vld [vmem:[#allocation1 + $0xb] ss:$16 sm:%s13059_s25]   ;;  %v6002_v36 = vsel %vm3854_vm2, %v6000_v27, %v5997_v26  ;;  %v6023_v53 = vld [vmem:[#allocation1 + $0xa] ss:$16 sm:%s6022_s6]   ;;  %v6042_v57 = vsel %vm3850_vm1, %v6040_v48, %v6037_v47  ;;  %10947 = vrot.lane.b32.xlu1 %v10946_v44, %s11445_s30  ;;  %s6100_s25 = smov 3  ;;  %s6131_s21 = smov 48  ;;  %v10764_v48 = vunpack.i.l.bf16 %v13061_v52  ;;  %v10765_v52 = vunpack.i.h.bf16 %v13061_v52 }
 0x1aa   :  { %v5673_v35 = vld [vmem:[#allocation1 + $0x20b] ss:$16 sm:%s13074_s22]   ;;  %v10956_v40 = vpack.i.bf16 %v6002_v36, %v5979_v24  ;;  %v5653_v49 = vsel %vm3850_vm1, %v5651_v31, %v5648_v33  ;;  %v6045_v54 = vld [vmem:[#allocation1 + $0x20a] ss:$16 sm:%s6044_s17]   ;;  %v6025_v0 = vsel %vm3854_vm2, %v6023_v53, %v6020_v55  ;;  %s6123_s22 = smov 3  ;;  %s6136_s10 = smov 192 }
 0x1ab   :  { %v5656_v39 = vld [vmem:[#allocation1 + $0xb] ss:$16 sm:%s13066_s24]   ;;  %v5675_v50 = vsel %vm3850_vm1, %v5673_v35, %v5670_v34  ;;  %s6103_s24 = smov 12  ;;  %v6047_v1 = vsel %vm3854_vm2, %v6045_v54, %v6042_v57  ;;  %v6101_v2 = vld [vmem:[#allocation1 + $0x8a] ss:$16 sm:%s6100_s25]   ;;  %s6146_s13 = smov 3 }
 0x1ac   :  { %v5678_v45 = vld [vmem:[#allocation1 + $0x20b] ss:$16 sm:%s13082_s16]   ;;  %10957 = vrot.lane.b32.xlu0 %v10956_v40, %s11445_s30  ;;  %v5658_v59 = vsel %vm3854_vm2, %v5656_v39, %v5653_v49  ;;  %v6104_v3 = vld [vmem:[#allocation1 + $0x8a] ss:$16 sm:%s6103_s24]   ;;  %s6126_s16 = smov 12  ;;  %v10961_v16 = vpack.i.bf16 %v6047_v1, %v6025_v0  ;;  %s6149_s18 = smov 12  ;;  %v10774_v1 = vunpack.i.l.bf16 %v13068_v46  ;;  %v10775_v46 = vunpack.i.h.bf16 %v13068_v46 }
 0x1ad   :  { %v5780_v51 = vld [vmem:[#allocation1 + $0x48b] ss:$16 sm:%s5779_s3]   ;;  %v5680_v61 = vsel %vm3854_vm2, %v5678_v45, %v5675_v50  ;;  %v6106_v6 = vsel %vm3846_vm0, %v6104_v3, %v6101_v2  ;;  %v6109_v7 = vld [vmem:[#allocation1 + $0x8a] ss:$16 sm:%s6108_s27]   ;;  %s6154_s23 = smov 48  ;;  %s6159_s28 = smov 192 }
 0x1ae   :  { %v5783_v56 = vld [vmem:[#allocation1 + $0x48b] ss:$16 sm:%s5782_s7]   ;;  %v6114_v8 = vld [vmem:[#allocation1 + $0x8a] ss:$16 sm:%s6113_s19]   ;;  %v10921_v10 = vpack.i.bf16 %v5680_v61, %v5658_v59  ;;  %v6111_v12 = vsel %vm3850_vm1, %v6109_v7, %v6106_v6  ;;  %s6169_s4 = smov 3  ;;  %s6172_s2 = smov 12 }
 0x1af   :  { %v5803_v58 = vld [vmem:[#allocation1 + $0x68b] ss:$16 sm:%s5802_s14]   ;;  %v5785_v4 = vsel %vm3846_vm0, %v5783_v56, %v5780_v51  ;;  %v6124_v13 = vld [vmem:[#allocation1 + $0x28a] ss:$16 sm:%s6123_s22]   ;;  %v6116_v18 = vsel %vm3854_vm2, %v6114_v8, %v6111_v12  ;;  %s6177_s26 = smov 48  ;;  %s6182_s5 = smov 192 }
 0x1b0   :  { %v5806_v60 = vld [vmem:[#allocation1 + $0x68b] ss:$16 sm:%s5805_s12]   ;;  %v6127_v15 = vld [vmem:[#allocation1 + $0x28a] ss:$16 sm:%s6126_s16]   ;;  %10922 = vrot.lane.b32.xlu2 %v10921_v10, %s11445_s30  ;;  %s15166_s8 = smov 80   ;;  %s3842_s6 = smov 3 }
 0x1b1   :  { %v5788_v62 = vld [vmem:[#allocation1 + $0x48b] ss:$16 sm:%s5787_s29]   ;;  %v5808_v5 = vsel %vm3846_vm0, %v5806_v60, %v5803_v58  ;;  %v6129_v14 = vsel %vm3846_vm0, %v6127_v15, %v6124_v13  ;;  %v6132_v19 = vld [vmem:[#allocation1 + $0x28a] ss:$16 sm:%s6131_s21]   ;;  %10962 = vrot.lane.b32.xlu1 %v10961_v16, %s15166_s8  ;;  %s3844_s15 = smov 12  ;;  %s3848_s9 = smov 48 }
 0x1b2   :  { %v5811_v63 = vld [vmem:[#allocation1 + $0x68b] ss:$16 sm:%s5810_s0]   ;;  %v6137_v20 = vld [vmem:[#allocation1 + $0x28a] ss:$16 sm:%s6136_s10]   ;;  %v5790_v21 = vsel %vm3850_vm1, %v5788_v62, %v5785_v4  ;;  %v6134_v17 = vsel %vm3850_vm1, %v6132_v19, %v6129_v14  ;;  %v3843_v41 = vld [vmem:[#allocation1] ss:$16 sm:%s3842_s6]   ;;  %v10784_v14 = vunpack.i.l.bf16 %v13100_v28  ;;  %v10785_v28 = vunpack.i.h.bf16 %v13100_v28 }
 0x1b3   :  { %v5793_v9 = vld [vmem:[#allocation1 + $0x48b] ss:$16 sm:%s13117_s11]   ;;  %v5813_v22 = vsel %vm3850_vm1, %v5811_v63, %v5808_v5  ;;  %v6147_v24 = vld [vmem:[#allocation1 + $0x48a] ss:$16 sm:%s6146_s13]   ;;  %v6139_v27 = vsel %vm3854_vm2, %v6137_v20, %v6134_v17  ;;  %v3845_v42 = vld [vmem:[#allocation1] ss:$16 sm:%s3844_s15]  }
 0x1b4   :  { %v5816_v11 = vld [vmem:[#allocation1 + $0x68b] ss:$16 sm:%s5815_s1]   ;;  %v6150_v25 = vld [vmem:[#allocation1 + $0x48a] ss:$16 sm:%s6149_s18]   ;;  %v10971_v31 = vpack.i.bf16 %v6139_v27, %v6116_v18  ;;  %v5795_v34 = vsel %vm3854_vm2, %v5793_v9, %v5790_v21  ;;  %s3852_s20 = smov 192  ;;  %v3847_v44 = vsel %vm3846_vm0, %v3845_v42, %v3843_v41  ;;  %s3922_s17 = smov 3 }
 0x1b5   :  { %v6152_v23 = vsel %vm3846_vm0, %v6150_v25, %v6147_v24  ;;  %v6155_v29 = vld [vmem:[#allocation1 + $0x48a] ss:$16 sm:%s6154_s23]   ;;  %v5818_v35 = vsel %vm3854_vm2, %v5816_v11, %v5813_v22  ;;  %v3849_v45 = vld [vmem:[#allocation1] ss:$16 sm:%s3848_s9]   ;;  %s3925_s3 = smov 12  ;;  %s3930_s7 = smov 48 }
 0x1b6   :  { %v6160_v30 = vld [vmem:[#allocation1 + $0x48a] ss:$16 sm:%s6159_s28]   ;;  %v6157_v26 = vsel %vm3850_vm1, %v6155_v29, %v6152_v23  ;;  %10972 = vrot.lane.b32.xlu0 %v10971_v31, %s15166_s8  ;;  %v3853_v47 = vld [vmem:[#allocation1] ss:$16 sm:%s3852_s20]   ;;  %v10936_v49 = vpack.i.bf16 %v5818_v35, %v5795_v34  ;;  %v3851_v50 = vsel %vm3850_vm1, %v3849_v45, %v3847_v44  ;;  %s3935_s29 = smov 192  ;;  %s3859_s11 = smov 3 }
 0x1b7   :  { %v6170_v32 = vld [vmem:[#allocation1 + $0x68a] ss:$16 sm:%s6169_s4]   ;;  %v6162_v39 = vsel %vm3854_vm2, %v6160_v30, %v6157_v26  ;;  %v3923_v53 = vld [vmem:[#allocation1 + $0x200] ss:$16 sm:%s3922_s17]   ;;  %v3855_v57 = vsel %vm3854_vm2, %v3853_v47, %v3851_v50  ;;  %s3862_s14 = smov 12  ;;  %s3867_s12 = smov 48 }
 0x1b8   :  { %v6173_v33 = vld [vmem:[#allocation1 + $0x68a] ss:$16 sm:%s6172_s2]   ;;  %v3926_v54 = vld [vmem:[#allocation1 + $0x200] ss:$16 sm:%s3925_s3]   ;;  %3857 = vst.msk [vmem:[#allocation0] sm:$0xff] %vm3856_vm3, %v3855_v57   ;;  %s3872_s0 = smov 192  ;;  %10937 = vrot.lane.b32.xlu2 %v10936_v49, %s11445_s30 }
 0x1b9   :  { %v6175_v36 = vsel %vm3846_vm0, %v6173_v33, %v6170_v32  ;;  %v6178_v37 = vld [vmem:[#allocation1 + $0x68a] ss:$16 sm:%s6177_s26]   ;;  %v3928_v51 = vsel %vm3846_vm0, %v3926_v54, %v3923_v53  ;;  %v3931_v56 = vld [vmem:[#allocation1 + $0x200] ss:$16 sm:%s3930_s7]   ;;  %4194 = vst.msk [vmem:[#allocation0] sm:$0xff] %vm4193_vm4, %v10764_v48   ;;  %s3943_s1 = smov 3 }
 0x1ba   :  { %v6183_v38 = vld [vmem:[#allocation1 + $0x68a] ss:$16 sm:%s6182_s5]   ;;  %v6180_v40 = vsel %vm3850_vm1, %v6178_v37, %v6175_v36  ;;  %v3936_v58 = vld [vmem:[#allocation1 + $0x200] ss:$16 sm:%s3935_s29]   ;;  %v3933_v60 = vsel %vm3850_vm1, %v3931_v56, %v3928_v51  ;;  %s3946_s25 = smov 12  ;;  %s3951_s24 = smov 48  ;;  %v13189_v36 = vpop.permute.xlu0 %10767 }
 0x1bb   :  { %v6185_v43 = vsel %vm3854_vm2, %v6183_v38, %v6180_v40  ;;  %v3860_v59 = vld [vmem:[#allocation1 + $0x80] ss:$16 sm:%s3859_s11]   ;;  %v3938_v62 = vsel %vm3854_vm2, %v3936_v58, %v3933_v60  ;;  %s3956_s27 = smov 192  ;;  %s3880_s19 = smov 3 }
 0x1bc   :  { %v10976_v55 = vpack.i.bf16 %v6185_v43, %v6162_v39  ;;  %v3863_v61 = vld [vmem:[#allocation1 + $0x80] ss:$16 sm:%s3862_s14]   ;;  %3941 = vst.msk [vmem:[#allocation0 + $0x20] sm:$0xff] %vm3856_vm3, %v3938_v62   ;;  %s3883_s22 = smov 12  ;;  %s3888_s16 = smov 48 }
 0x1bd   :  { %v3865_v63 = vsel %vm3846_vm0, %v3863_v61, %v3860_v59  ;;  %v3868_v0 = vld [vmem:[#allocation1 + $0x80] ss:$16 sm:%s3867_s12]   ;;  %4217 = vst.msk [vmem:[#allocation0 + $0x20] sm:$0xff] %vm4193_vm4, %v10765_v52   ;;  %s3893_s21 = smov 192  ;;  %s3964_s10 = smov 3 }
 0x1be   :  { %v3870_v2 = vsel %vm3850_vm1, %v3868_v0, %v3865_v63  ;;  %v3873_v3 = vld [vmem:[#allocation1 + $0x80] ss:$16 sm:%s3872_s0]   ;;  %10977 = vrot.lane.b32.xlu1 %v10976_v55, %s15166_s8  ;;  %s3967_s13 = smov 12  ;;  %s3972_s18 = smov 48 }
 0x1bf   :  { %v3875_v4 = vsel %vm3854_vm2, %v3873_v3, %v3870_v2  ;;  %v3944_v5 = vld [vmem:[#allocation1 + $0x280] ss:$16 sm:%s3943_s1]   ;;  %s3977_s23 = smov 192  ;;  %s5917_s28 = smov 3 }
 0x1c0   :  { %v3947_v6 = vld [vmem:[#allocation1 + $0x280] ss:$16 sm:%s3946_s25]   ;;  %3878 = vst.msk [vmem:[#allocation0 + $0x8] sm:$0xff] %vm3856_vm3, %v3875_v4   ;;  %s5920_s4 = smov 12  ;;  %v5918_v23 = vld [vmem:[#allocation1 + $0x18b] ss:$16 sm:%s5917_s28]  }
 0x1c1   :  { %v3949_v7 = vsel %vm3846_vm0, %v3947_v6, %v3944_v5  ;;  %v3952_v8 = vld [vmem:[#allocation1 + $0x280] ss:$16 sm:%s3951_s24]   ;;  %4286 = vst.msk [vmem:[#allocation0 + $0x8] sm:$0xff] %vm4193_vm4, %v10774_v1   ;;  %v5921_v29 = vld [vmem:[#allocation1 + $0x18b] ss:$16 sm:%s5920_s4]   ;;  %s5925_s2 = smov 48 }
 0x1c2   :  { %v3957_v10 = vld [vmem:[#allocation1 + $0x280] ss:$16 sm:%s3956_s27]   ;;  %v3954_v9 = vsel %vm3850_vm1, %v3952_v8, %v3949_v7  ;;  %v5923_v31 = vsel %vm3846_vm0, %v5921_v29, %v5918_v23  ;;  %v5926_v26 = vld [vmem:[#allocation1 + $0x18b] ss:$16 sm:%s5925_s2]   ;;  %s5930_s26 = smov 192  ;;  %s5940_s5 = smov 3 }
 0x1c3   :  { %v3881_v11 = vld [vmem:[#allocation1 + $0x100] ss:$16 sm:%s3880_s19]   ;;  %v3959_v12 = vsel %vm3854_vm2, %v3957_v10, %v3954_v9  ;;  %v5928_v32 = vsel %vm3850_vm1, %v5926_v26, %v5923_v31  ;;  %v5931_v33 = vld [vmem:[#allocation1 + $0x18b] ss:$16 sm:%s5930_s26]   ;;  %s5943_s6 = smov 12  ;;  %s5948_s15 = smov 48 }
 0x1c4   :  { %v3884_v13 = vld [vmem:[#allocation1 + $0x100] ss:$16 sm:%s3883_s22]   ;;  %3962 = vst.msk [vmem:[#allocation0 + $0x28] sm:$0xff] %vm3856_vm3, %v3959_v12   ;;  %v5941_v34 = vld [vmem:[#allocation1 + $0x38b] ss:$16 sm:%s5940_s5]   ;;  %s5953_s9 = smov 192  ;;  %v5933_v37 = vsel %vm3854_vm2, %v5931_v33, %v5928_v32 }
 0x1c5   :  { %v3889_v15 = vld [vmem:[#allocation1 + $0x100] ss:$16 sm:%s3888_s16]   ;;  %v3886_v16 = vsel %vm3846_vm0, %v3884_v13, %v3881_v11  ;;  %4309 = vst.msk [vmem:[#allocation0 + $0x28] sm:$0xff] %vm4193_vm4, %v10775_v46   ;;  %v5944_v35 = vld [vmem:[#allocation1 + $0x38b] ss:$16 sm:%s5943_s6]   ;;  %s6238_s20 = smov 3 }
 0x1c6   :  { %v3894_v18 = vld [vmem:[#allocation1 + $0x100] ss:$16 sm:%s3893_s21]   ;;  %v3891_v19 = vsel %vm3850_vm1, %v3889_v15, %v3886_v16  ;;  %v5946_v38 = vsel %vm3846_vm0, %v5944_v35, %v5941_v34  ;;  %v5949_v39 = vld [vmem:[#allocation1 + $0x38b] ss:$16 sm:%s5948_s15]   ;;  %s6241_s17 = smov 12  ;;  %s6246_s3 = smov 48 }
 0x1c7   :  { %v3965_v20 = vld [vmem:[#allocation1 + $0x300] ss:$16 sm:%s3964_s10]   ;;  %v3896_v22 = vsel %vm3854_vm2, %v3894_v18, %v3891_v19  ;;  %v5954_v40 = vld [vmem:[#allocation1 + $0x38b] ss:$16 sm:%s5953_s9]   ;;  %v5951_v41 = vsel %vm3850_vm1, %v5949_v39, %v5946_v38  ;;  %v6239_v42 = vld [vmem:[#allocation1 + $0x50a] ss:$16 sm:%s6238_s20]  }
 0x1c8   :  { %v3968_v21 = vld [vmem:[#allocation1 + $0x300] ss:$16 sm:%s3967_s13]   ;;  %3899 = vst.msk [vmem:[#allocation0 + $0x10] sm:$0xff] %vm3856_vm3, %v3896_v22   ;;  %v6242_v43 = vld [vmem:[#allocation1 + $0x50a] ss:$16 sm:%s6241_s17]   ;;  %s6251_s7 = smov 192  ;;  %v5956_v44 = vsel %vm3854_vm2, %v5954_v40, %v5951_v41 }
 0x1c9   :  { %v3970_v17 = vsel %vm3846_vm0, %v3968_v21, %v3965_v20  ;;  %v3973_v24 = vld [vmem:[#allocation1 + $0x300] ss:$16 sm:%s3972_s18]   ;;  %4378 = vst.msk [vmem:[#allocation0 + $0x10] sm:$0xff] %vm4193_vm4, %v10784_v14   ;;  %v6244_v45 = vsel %vm3846_vm0, %v6242_v43, %v6239_v42  ;;  %v6247_v47 = vld [vmem:[#allocation1 + $0x50a] ss:$16 sm:%s6246_s3]   ;;  %s6261_s29 = smov 3  ;;  %v10951_v49 = vpack.i.bf16 %v5956_v44, %v5933_v37 }
 0x1ca   :  { %v3978_v25 = vld [vmem:[#allocation1 + $0x300] ss:$16 sm:%s3977_s23]   ;;  %v3975_v27 = vsel %vm3850_vm1, %v3973_v24, %v3970_v17  ;;  %v6252_v48 = vld [vmem:[#allocation1 + $0x50a] ss:$16 sm:%s6251_s7]   ;;  %s6264_s11 = smov 12  ;;  %v6249_v50 = vsel %vm3850_vm1, %v6247_v47, %v6244_v45  ;;  %s6269_s14 = smov 48 }
 0x1cb   :  { %v3980_v30 = vsel %vm3854_vm2, %v3978_v25, %v3975_v27  ;;  %v6262_v53 = vld [vmem:[#allocation1 + $0x70a] ss:$16 sm:%s6261_s29]   ;;  %s6274_s12 = smov 192  ;;  %v6254_v55 = vsel %vm3854_vm2, %v6252_v48, %v6249_v50  ;;  %s6284_s0 = smov 3  ;;  %10952 = vrot.lane.b32.xlu2 %v10951_v49, %s11445_s30  ;;  %v13312_v48 = vpop.permute.xlu1 %10777 }
 0x1cc   :  { %3983 = vst.msk [vmem:[#allocation0 + $0x30] sm:$0xff] %vm3856_vm3, %v3980_v30   ;;  %v6265_v54 = vld [vmem:[#allocation1 + $0x70a] ss:$16 sm:%s6264_s11]   ;;  %s6287_s1 = smov 12  ;;  %s15516_s27 = sld [smem:[#allocation131_spill]] }
 0x1cd   :  { %4401 = vst.msk [vmem:[#allocation0 + $0x30] sm:$0xff] %vm4193_vm4, %v10785_v28   ;;  %v6267_v57 = vsel %vm3846_vm0, %v6265_v54, %v6262_v53  ;;  %v6270_v52 = vld [vmem:[#allocation1 + $0x70a] ss:$16 sm:%s6269_s14]   ;;  %s6292_s30 = smov 48  ;;  %s6297_s19 = smov 192 }
 0x1ce   :  { %v6275_v51 = vld [vmem:[#allocation1 + $0x70a] ss:$16 sm:%s6274_s12]   ;;  %v6272_v60 = vsel %vm3850_vm1, %v6270_v52, %v6267_v57  ;;  %s6307_s21 = smov 3  ;;  %s6310_s10 = smov 12 }
 0x1cf   :  { %v6285_v59 = vld [vmem:[#allocation1 + $0x18a] ss:$16 sm:%s6284_s0]   ;;  %v6277_v0 = vsel %vm3854_vm2, %v6275_v51, %v6272_v60  ;;  %s6315_s23 = smov 48  ;;  %s6320_s28 = smov 192 }
 0x1d0   :  { %v6288_v61 = vld [vmem:[#allocation1 + $0x18a] ss:$16 sm:%s6287_s1]   ;;  %v10986_v6 = vpack.i.bf16 %v6277_v0, %v6254_v55  ;;  %s13226_s9 = smov 3  ;;  %s13228_s20 = smov 12 }
 0x1d1   :  { %v6290_v1 = vsel %vm3846_vm0, %v6288_v61, %v6285_v59  ;;  %v6293_v2 = vld [vmem:[#allocation1 + $0x18a] ss:$16 sm:%s6292_s30]   ;;  %s13234_s7 = smov 48  ;;  %s13236_s29 = smov 192 }
 0x1d2   :  { %v11361_v56 = vld [vmem:[%s15516_s27 + $0x330] sm:$0xff]   ;;  %v11362_v62 = vld [vmem:[%s15516_s27 + $0x328] sm:$0xff]   ;;  %v11363_v4 = vld [vmem:[%s15516_s27 + $0x320] sm:$0xff]   ;;  %v6295_v46 = vsel %vm3850_vm1, %v6293_v2, %v6290_v1  ;;  %10987 = vrot.lane.b32.xlu0 %v10986_v6, %s15166_s8  ;;  %s13241_s12 = smov 3  ;;  %s13243_s0 = smov 12 }
 0x1d3   :  { %v10162_v58 = vunpack.c.l.bf16 %v11361_v56  ;;  %v10166_v63 = vunpack.c.l.bf16 %v11362_v62  ;;  %v6298_v3 = vld [vmem:[#allocation1 + $0x18a] ss:$16 sm:%s6297_s19]   ;;  %v10170_v5 = vunpack.c.l.bf16 %v11363_v4  ;;  %v11365_v16 = vld [vmem:[%s15516_s27 + $0x310] sm:$0xff]   ;;  %v11367_v22 = vld [vmem:[%s15516_s27 + $0x300] sm:$0xff]   ;;  %s13248_s24 = smov 48  ;;  %s13250_s30 = smov 192 }
 0x1d4   :  { %v6308_v7 = vld [vmem:[#allocation1 + $0x38a] ss:$16 sm:%s6307_s21]   ;;  %v6300_v11 = vsel %vm3854_vm2, %v6298_v3, %v6295_v46  ;;  %v10178_v18 = vunpack.c.l.bf16 %v11365_v16  ;;  %v10186_v28 = vunpack.c.l.bf16 %v11367_v22  ;;  %v11369_v27 = vld [vmem:[%s15516_s27 + $0x230] sm:$0xff]   ;;  %s13256_s16 = smov 3  ;;  %s13258_s21 = smov 12  ;;  %v11371_v31 = vld [vmem:[%s15516_s27 + $0x220] sm:$0xff]   ;;  %v10769_v3 = vunpack.i.l.bf16 %v13189_v36 }
 0x1d5   :  { %v6311_v8 = vld [vmem:[#allocation1 + $0x38a] ss:$16 sm:%s6310_s10]   ;;  %783 = vst [vmem:[#allocation1 + $0x660] sm:$0xff] %v10162_v58  ;;  %v10290_v23 = vunpack.c.l.bf16 %v11369_v27  ;;  %v10298_v26 = vunpack.c.l.bf16 %v11371_v31  ;;  %s13263_s18 = smov 48  ;;  %s13270_s2 = smov 3  ;;  %v11373_v34 = vld [vmem:[%s15516_s27 + $0x210] sm:$0xff]   ;;  %v10770_v36 = vunpack.i.h.bf16 %v13189_v36 }
 0x1d6   :  { %v11364_v10 = vld [vmem:[%s15516_s27 + $0x318] sm:$0xff]   ;;  %v6313_v12 = vsel %vm3846_vm0, %v6311_v8, %v6308_v7  ;;  %813 = vst [vmem:[#allocation1 + $0x650] sm:$0xff] %v10166_v63  ;;  %v11366_v19 = vld [vmem:[%s15516_s27 + $0x308] sm:$0xff]   ;;  %s13272_s26 = smov 12  ;;  %v10306_v35 = vunpack.c.l.bf16 %v11373_v34  ;;  %s13277_s15 = smov 48  ;;  %v11375_v39 = vld [vmem:[%s15516_s27 + $0x200] sm:$0xff]  }
 0x1d7   :  { %v10174_v9 = vunpack.c.l.bf16 %v11364_v10  ;;  %v6316_v13 = vld [vmem:[#allocation1 + $0x38a] ss:$16 sm:%s6315_s23]   ;;  %v10182_v20 = vunpack.c.l.bf16 %v11366_v19  ;;  %843 = vst [vmem:[#allocation1 + $0x640] sm:$0xff] %v10170_v5  ;;  %s13265_s23 = smov 192  ;;  %s13279_s17 = smov 192  ;;  %v10314_v40 = vunpack.c.l.bf16 %v11375_v39  ;;  %v11377_v43 = vld [vmem:[%s15516_s27 + $0x370] sm:$0xff]  }
 0x1d8   :  { %v6321_v15 = vld [vmem:[#allocation1 + $0x38a] ss:$16 sm:%s6320_s28]   ;;  %v6318_v14 = vsel %vm3850_vm1, %v6316_v13, %v6313_v12  ;;  %903 = vst [vmem:[#allocation1 + $0x620] sm:$0xff] %v10178_v18  ;;  %s13284_s14 = smov 3  ;;  %s13286_s1 = smov 12  ;;  %v10130_v44 = vunpack.c.l.bf16 %v11377_v43  ;;  %v11379_v49 = vld [vmem:[%s15516_s27 + $0x360] sm:$0xff]  }
 0x1d9   :  { %v6323_v21 = vsel %vm3854_vm2, %v6321_v15, %v6318_v14  ;;  %873 = vst [vmem:[#allocation1 + $0x630] sm:$0xff] %v10174_v9  ;;  %v11368_v24 = vld [vmem:[%s15516_s27 + $0x238] sm:$0xff]   ;;  %v11370_v29 = vld [vmem:[%s15516_s27 + $0x228] sm:$0xff]   ;;  %15517 = sst [smem:[#allocation76_spill]] %s13284_s14  ;;  %s13291_s22 = smov 48  ;;  %v10138_v50 = vunpack.c.l.bf16 %v11379_v49  ;;  %v11381_v55 = vld [vmem:[%s15516_s27 + $0x350] sm:$0xff]  }
 0x1da   :  { %v10991_v17 = vpack.i.bf16 %v6323_v21, %v6300_v11  ;;  %v10286_v25 = vunpack.c.l.bf16 %v11368_v24  ;;  %933 = vst [vmem:[#allocation1 + $0x610] sm:$0xff] %v10182_v20  ;;  %v10294_v30 = vunpack.c.l.bf16 %v11370_v29  ;;  %v11372_v32 = vld [vmem:[%s15516_s27 + $0x218] sm:$0xff]   ;;  %v11374_v37 = vld [vmem:[%s15516_s27 + $0x208] sm:$0xff]   ;;  %15518 = sst [smem:[#allocation77_spill]] %s13286_s1  ;;  %s13293_s10 = smov 192  ;;  %v10146_v57 = vunpack.c.l.bf16 %v11381_v55  ;;  %v11383_v56 = vld [vmem:[%s15516_s27 + $0x340] sm:$0xff]  }
 0x1db   :  { %963 = vst [vmem:[#allocation1 + $0x600] sm:$0xff] %v10186_v28  ;;  %v10302_v33 = vunpack.c.l.bf16 %v11372_v32  ;;  %v10310_v38 = vunpack.c.l.bf16 %v11374_v37  ;;  %15519 = sst [smem:[#allocation56_spill]] %s13291_s22  ;;  %v11376_v41 = vld [vmem:[%s15516_s27 + $0x338] sm:$0xff]   ;;  %s13298_s4 = smov 3  ;;  %v11378_v45 = vld [vmem:[%s15516_s27 + $0x368] sm:$0xff]   ;;  %v10154_v58 = vunpack.c.l.bf16 %v11383_v56  ;;  %v11385_v11 = vld [vmem:[%s15516_s27 + $0x270] sm:$0xff]  }
 0x1dc   :  { %10992 = vrot.lane.b32.xlu1 %v10991_v17, %s15166_s8  ;;  %1713 = vst [vmem:[#allocation1 + $0x470] sm:$0xff] %v10286_v25  ;;  %15520 = sst [smem:[#allocation57_spill]] %s13293_s10  ;;  %v10158_v42 = vunpack.c.l.bf16 %v11376_v41  ;;  %s13300_s5 = smov 12  ;;  %v10134_v47 = vunpack.c.l.bf16 %v11378_v45  ;;  %v11380_v53 = vld [vmem:[%s15516_s27 + $0x358] sm:$0xff]   ;;  %v11382_v52 = vld [vmem:[%s15516_s27 + $0x348] sm:$0xff]   ;;  %v10258_v12 = vunpack.c.l.bf16 %v11385_v11  ;;  %v11387_v16 = vld [vmem:[%s15516_s27 + $0x260] sm:$0xff]  }
 0x1dd   :  { %1743 = vst [vmem:[#allocation1 + $0x460] sm:$0xff] %v10290_v23  ;;  %15521 = sst [smem:[#allocation78_spill]] %s13298_s4  ;;  %s13305_s11 = smov 48  ;;  %v10142_v54 = vunpack.c.l.bf16 %v11380_v53  ;;  %v10150_v51 = vunpack.c.l.bf16 %v11382_v52  ;;  %v11384_v10 = vld [vmem:[%s15516_s27 + $0x278] sm:$0xff]   ;;  %v11386_v13 = vld [vmem:[%s15516_s27 + $0x268] sm:$0xff]   ;;  %v10266_v18 = vunpack.c.l.bf16 %v11387_v16  ;;  %v11389_v20 = vld [vmem:[%s15516_s27 + $0x250] sm:$0xff]  }
 0x1de   :  { %1773 = vst [vmem:[#allocation1 + $0x450] sm:$0xff] %v10294_v30  ;;  %15522 = sst [smem:[#allocation43_spill]] %s13300_s5  ;;  %s13307_s25 = smov 192  ;;  %v10254_v9 = vunpack.c.l.bf16 %v11384_v10  ;;  %v10262_v15 = vunpack.c.l.bf16 %v11386_v13  ;;  %v11388_v14 = vld [vmem:[%s15516_s27 + $0x258] sm:$0xff]   ;;  %v10274_v21 = vunpack.c.l.bf16 %v11389_v20  ;;  %v11390_v22 = vld [vmem:[%s15516_s27 + $0x248] sm:$0xff]   ;;  %v11391_v17 = vld [vmem:[%s15516_s27 + $0x240] sm:$0xff]  }
 0x1df   :  { %1803 = vst [vmem:[#allocation1 + $0x440] sm:$0xff] %v10298_v26  ;;  %15523 = sst [smem:[#allocation60_spill]] %s13305_s11  ;;  %s13314_s28 = smov 3  ;;  %v10270_v19 = vunpack.c.l.bf16 %v11388_v14  ;;  %v10278_v28 = vunpack.c.l.bf16 %v11390_v22  ;;  %v10282_v24 = vunpack.c.l.bf16 %v11391_v17  ;;  %v11392_v25 = vld [vmem:[%s15516_s27 + $0x378] sm:$0xff]   ;;  %v11393_v23 = vld [vmem:[%s15516_s27 + $0x3b0] sm:$0xff]   ;;  %v11394_v30 = vld [vmem:[%s15516_s27 + $0x3a8] sm:$0xff]   ;;  %v13458_v26 = vpop.permute.xlu2 %10787 }
 0x1e0   :  { %1833 = vst [vmem:[#allocation1 + $0x430] sm:$0xff] %v10302_v33  ;;  %15524 = sst [smem:[#allocation61_spill]] %s13307_s25  ;;  %s13316_s6 = smov 12  ;;  %v10126_v27 = vunpack.c.l.bf16 %v11392_v25  ;;  %v10098_v29 = vunpack.c.l.bf16 %v11393_v23  ;;  %v10102_v31 = vunpack.c.l.bf16 %v11394_v30  ;;  %v11395_v32 = vld [vmem:[%s15516_s27 + $0x3a0] sm:$0xff]   ;;  %v11396_v34 = vld [vmem:[%s15516_s27 + $0x398] sm:$0xff]   ;;  %v11397_v39 = vld [vmem:[%s15516_s27 + $0x390] sm:$0xff]  }
 0x1e1   :  { %1863 = vst [vmem:[#allocation1 + $0x420] sm:$0xff] %v10306_v35  ;;  %s13321_s13 = smov 48  ;;  %s13323_s3 = smov 192  ;;  %v10106_v33 = vunpack.c.l.bf16 %v11395_v32  ;;  %v10110_v35 = vunpack.c.l.bf16 %v11396_v34  ;;  %v6055_v37 = vld [vmem:[#allocation1 + $0x40a] ss:$16 sm:%s13314_s28]   ;;  %v11401_v17 = vld [vmem:[%s15516_s27 + $0x2b0] sm:$0xff]  }
 0x1e2   :  { %1893 = vst [vmem:[#allocation1 + $0x410] sm:$0xff] %v10310_v38  ;;  %s13328_s8 = smov 3  ;;  %s13330_s19 = smov 12  ;;  %v6058_v38 = vld [vmem:[#allocation1 + $0x40a] ss:$16 sm:%s13316_s6]  }
 0x1e3   :  { %1923 = vst [vmem:[#allocation1 + $0x400] sm:$0xff] %v10314_v40  ;;  %s13335_s11 = smov 48  ;;  %s13337_s25 = smov 192  ;;  %v10114_v40 = vunpack.c.l.bf16 %v11397_v39  ;;  %v6060_v41 = vsel %vm3846_vm0, %v6058_v38, %v6055_v37  ;;  %v6078_v43 = vld [vmem:[#allocation1 + $0x60a] ss:$16 sm:%s13328_s8]  }
 0x1e4   :  { %753 = vst [vmem:[#allocation1 + $0x670] sm:$0xff] %v10158_v42  ;;  %s13339_s5 = smov 3  ;;  %s13341_s4 = smov 12  ;;  %v6063_v42 = vld [vmem:[#allocation1 + $0x40a] ss:$16 sm:%s13321_s13]  }
 0x1e5   :  { %543 = vst [vmem:[#allocation1 + $0x6e0] sm:$0xff] %v10130_v44  ;;  %s13343_s10 = smov 48  ;;  %s13345_s22 = smov 192  ;;  %v6065_v44 = vsel %vm3850_vm1, %v6063_v42, %v6060_v41  ;;  %v6068_v45 = vld [vmem:[#allocation1 + $0x40a] ss:$16 sm:%s13323_s3]  }
 0x1e6   :  { %573 = vst [vmem:[#allocation1 + $0x6d0] sm:$0xff] %v10134_v47  ;;  %s13350_s14 = smov 3  ;;  %s13357_s1 = smov 48  ;;  %v6081_v47 = vld [vmem:[#allocation1 + $0x60a] ss:$16 sm:%s13330_s19]   ;;  %v6070_v49 = vsel %vm3854_vm2, %v6068_v45, %v6065_v44 }
 0x1e7   :  { %603 = vst [vmem:[#allocation1 + $0x6c0] sm:$0xff] %v10138_v50  ;;  %15525 = sst [smem:[#allocation51_spill]] %s13350_s14  ;;  %s13355_s14 = smov 12  ;;  %v6083_v50 = vsel %vm3846_vm0, %v6081_v47, %v6078_v43  ;;  %v6086_v53 = vld [vmem:[#allocation1 + $0x60a] ss:$16 sm:%s13335_s11]  }
 0x1e8   :  { %633 = vst [vmem:[#allocation1 + $0x6b0] sm:$0xff] %v10142_v54  ;;  %s13476_s28 = smov 48  ;;  %s13484_s13 = smov 192  ;;  %v6091_v54 = vld [vmem:[#allocation1 + $0x60a] ss:$16 sm:%s13337_s25]   ;;  %v6088_v52 = vsel %vm3850_vm1, %v6086_v53, %v6083_v50  ;;  %v11405_v50 = vld [vmem:[%s15516_s27 + $0x290] sm:$0xff]  }
 0x1e9   :  { %663 = vst [vmem:[#allocation1 + $0x6a0] sm:$0xff] %v10146_v57  ;;  %s13489_s3 = smov 3  ;;  %s13495_s8 = smov 12  ;;  %v11398_v55 = vld [vmem:[%s15516_s27 + $0x388] sm:$0xff]   ;;  %v11400_v14 = vld [vmem:[%s15516_s27 + $0x2b8] sm:$0xff]   ;;  %v10242_v53 = vunpack.c.l.bf16 %v11405_v50 }
 0x1ea   :  { %v4007_v60 = vld [vmem:[#allocation1 + $0x400] ss:$16 sm:%s13226_s9]   ;;  %693 = vst [vmem:[#allocation1 + $0x690] sm:$0xff] %v10150_v51  ;;  %s13371_s9 = smov 192  ;;  %v10118_v57 = vunpack.c.l.bf16 %v11398_v55  ;;  %v6377_v51 = vld [vmem:[#allocation1 + $0x9] ss:$16 sm:%s13339_s5]  }
 0x1eb   :  { %v4010_v59 = vld [vmem:[#allocation1 + $0x400] ss:$16 sm:%s13228_s20]   ;;  %723 = vst [vmem:[#allocation1 + $0x680] sm:$0xff] %v10154_v58  ;;  %s13376_s20 = smov 3  ;;  %v6380_v56 = vld [vmem:[#allocation1 + $0x9] ss:$16 sm:%s13341_s4]  }
 0x1ec   :  { %v4015_v61 = vld [vmem:[#allocation1 + $0x400] ss:$16 sm:%s13234_s7]   ;;  %v4012_v62 = vsel %vm3846_vm0, %v4010_v59, %v4007_v60  ;;  %s13378_s7 = smov 12  ;;  %1473 = vst [vmem:[#allocation1 + $0x4f0] sm:$0xff] %v10254_v9  ;;  %s13503_s4 = smov 48  ;;  %v6093_v59 = vsel %vm3854_vm2, %v6091_v54, %v6088_v52  ;;  %v11404_v42 = vld [vmem:[%s15516_s27 + $0x298] sm:$0xff]  }
 0x1ed   :  { %v4020_v63 = vld [vmem:[#allocation1 + $0x400] ss:$16 sm:%s13236_s29]   ;;  %v4017_v2 = vsel %vm3850_vm1, %v4015_v61, %v4012_v62  ;;  %s13403_s29 = smov 192  ;;  %1503 = vst [vmem:[#allocation1 + $0x4e0] sm:$0xff] %v10258_v12  ;;  %v6382_v61 = vsel %vm3846_vm0, %v6380_v56, %v6377_v51  ;;  %v6385_v62 = vld [vmem:[#allocation1 + $0x9] ss:$16 sm:%s13343_s10]   ;;  %v10238_v43 = vunpack.c.l.bf16 %v11404_v42 }
 0x1ee   :  { %v4091_v0 = vld [vmem:[#allocation1 + $0x600] ss:$16 sm:%s13241_s12]   ;;  %v4022_v46 = vsel %vm3854_vm2, %v4020_v63, %v4017_v2  ;;  %s13393_s12 = smov 3  ;;  %15528 = sst [smem:[#allocation64_spill]] %s13403_s29  ;;  %1533 = vst [vmem:[#allocation1 + $0x4d0] sm:$0xff] %v10262_v15  ;;  %v11406_v55 = vld [vmem:[%s15516_s27 + $0x288] sm:$0xff]  }
 0x1ef   :  { %v4094_v1 = vld [vmem:[#allocation1 + $0x600] ss:$16 sm:%s13243_s0]   ;;  %4025 = vst.msk [vmem:[#allocation0 + $0x40] sm:$0xff] %vm3856_vm3, %v4022_v46   ;;  %s13385_s0 = smov 48  ;;  %s13411_s29 = smov 12 }
 0x1f0   :  { %v4096_v4 = vsel %vm3846_vm0, %v4094_v1, %v4091_v0  ;;  %v4099_v5 = vld [vmem:[#allocation1 + $0x600] ss:$16 sm:%s13248_s24]   ;;  %s13387_s24 = smov 192  ;;  %4240 = vst.msk [vmem:[#allocation0 + $0x40] sm:$0xff] %vm4193_vm4, %v10769_v3   ;;  %15530 = sst [smem:[#allocation36_spill]] %s13411_s29  ;;  %v10966_v3 = vpack.i.bf16 %v6093_v59, %v6070_v49 }
 0x1f1   :  { %v4104_v6 = vld [vmem:[#allocation1 + $0x600] ss:$16 sm:%s13250_s30]   ;;  %v4101_v7 = vsel %vm3850_vm1, %v4099_v5, %v4096_v4  ;;  %s13395_s30 = smov 12  ;;  %s13418_s29 = smov 192  ;;  %1563 = vst [vmem:[#allocation1 + $0x4c0] sm:$0xff] %v10266_v18 }
 0x1f2   :  { %v4106_v8 = vsel %vm3854_vm2, %v4104_v6, %v4101_v7  ;;  %15526 = sst [smem:[#allocation54_spill]] %s13395_s30  ;;  %s13401_s30 = smov 48  ;;  %1593 = vst [vmem:[#allocation1 + $0x4b0] sm:$0xff] %v10270_v19  ;;  %v11399_v58 = vld [vmem:[%s15516_s27 + $0x380] sm:$0xff]   ;;  %v6390_v63 = vld [vmem:[#allocation1 + $0x9] ss:$16 sm:%s13345_s22]   ;;  %v10222_v19 = vunpack.c.l.bf16 %v11400_v14 }
 0x1f3   :  { %4109 = vst.msk [vmem:[#allocation0 + $0x60] sm:$0xff] %vm3856_vm3, %v4106_v8   ;;  %15527 = sst [smem:[#allocation58_spill]] %s13401_s30  ;;  %s13409_s30 = smov 3  ;;  %v10122_v60 = vunpack.c.l.bf16 %v11399_v58  ;;  %v10779_v8 = vunpack.i.l.bf16 %v13312_v48  ;;  %v10780_v48 = vunpack.i.h.bf16 %v13312_v48  ;;  %v6402_v16 = vld [vmem:[#allocation1 + $0x209] ss:$16 sm:%s13355_s14]   ;;  %v11407_v51 = vld [vmem:[%s15516_s27 + $0x280] sm:$0xff]  }
 0x1f4   :  { %4263 = vst.msk [vmem:[#allocation0 + $0x60] sm:$0xff] %vm4193_vm4, %v10770_v36   ;;  %15529 = sst [smem:[#allocation65_spill]] %s13409_s30  ;;  %s13416_s30 = smov 48  ;;  %v6387_v36 = vsel %vm3850_vm1, %v6385_v62, %v6382_v61  ;;  %v6407_v22 = vld [vmem:[#allocation1 + $0x209] ss:$16 sm:%s13357_s1]   ;;  %v10250_v56 = vunpack.c.l.bf16 %v11407_v51 }
 0x1f5   :  { %15531 = sst [smem:[#allocation37_spill]] %s13416_s30  ;;  %s13423_s30 = smov 3  ;;  %1623 = vst [vmem:[#allocation1 + $0x4a0] sm:$0xff] %v10274_v21  ;;  %v6392_v20 = vsel %vm3854_vm2, %v6390_v63, %v6387_v36  ;;  %v6425_v23 = vld [vmem:[#allocation1 + $0x409] ss:$16 sm:%s13378_s7]   ;;  %v11410_v63 = vld [vmem:[%s15516_s27 + $0x1f0] sm:$0xff]  }
 0x1f6   :  { %15532 = sst [smem:[#allocation38_spill]] %s13418_s29  ;;  %s13425_s29 = smov 12  ;;  %1653 = vst [vmem:[#allocation1 + $0x490] sm:$0xff] %v10278_v28  ;;  %v6412_v28 = vld [vmem:[#allocation1 + $0x209] ss:$16 sm:%s13371_s9]  }
 0x1f7   :  { %15533 = sst [smem:[#allocation62_spill]] %s13423_s30  ;;  %s13430_s30 = smov 48  ;;  %1683 = vst [vmem:[#allocation1 + $0x480] sm:$0xff] %v10282_v24  ;;  %v10226_v24 = vunpack.c.l.bf16 %v11401_v17  ;;  %v6435_v34 = vld [vmem:[#allocation1 + $0x409] ss:$16 sm:%s13387_s24]  }
 0x1f8   :  { %15534 = sst [smem:[#allocation40_spill]] %s13425_s29  ;;  %s13432_s29 = smov 192  ;;  %513 = vst [vmem:[#allocation1 + $0x6f0] sm:$0xff] %v10126_v27  ;;  %v6422_v27 = vld [vmem:[#allocation1 + $0x409] ss:$16 sm:%s13376_s20]  }
 0x1f9   :  { %15535 = sst [smem:[#allocation44_spill]] %s13430_s30  ;;  %s13437_s30 = smov 3  ;;  %303 = vst [vmem:[#allocation1 + $0x760] sm:$0xff] %v10098_v29  ;;  %v11402_v29 = vld [vmem:[%s15516_s27 + $0x2a8] sm:$0xff]   ;;  %v6427_v32 = vsel %vm3846_vm0, %v6425_v23, %v6422_v27  ;;  %v11409_v61 = vld [vmem:[%s15516_s27 + $0x1f8] sm:$0xff]  }
 0x1fa   :  { %15536 = sst [smem:[#allocation45_spill]] %s13432_s29  ;;  %s13439_s29 = smov 12  ;;  %333 = vst [vmem:[#allocation1 + $0x750] sm:$0xff] %v10102_v31  ;;  %v10230_v30 = vunpack.c.l.bf16 %v11402_v29  ;;  %v10318_v62 = vunpack.c.l.bf16 %v11409_v61  ;;  %v11417_v23 = vld [vmem:[%s15516_s27 + $0xf8] sm:$0xff]  }
 0x1fb   :  { %15537 = sst [smem:[#allocation46_spill]] %s13437_s30  ;;  %s13444_s30 = smov 48  ;;  %363 = vst [vmem:[#allocation1 + $0x740] sm:$0xff] %v10106_v33  ;;  %v6430_v33 = vld [vmem:[#allocation1 + $0x409] ss:$16 sm:%s13385_s0]   ;;  %v10446_v29 = vunpack.c.l.bf16 %v11417_v23 }
 0x1fc   :  { %15538 = sst [smem:[#allocation47_spill]] %s13439_s29  ;;  %s13446_s29 = smov 192  ;;  %393 = vst [vmem:[#allocation1 + $0x730] sm:$0xff] %v10110_v35  ;;  %v11403_v35 = vld [vmem:[%s15516_s27 + $0x2a0] sm:$0xff]   ;;  %v6432_v39 = vsel %vm3850_vm1, %v6430_v33, %v6427_v32  ;;  %v11419_v32 = vld [vmem:[%s15516_s27 + $0xe8] sm:$0xff]  }
 0x1fd   :  { %15539 = sst [smem:[#allocation55_spill]] %s13444_s30  ;;  %s13451_s30 = smov 3  ;;  %423 = vst [vmem:[#allocation1 + $0x720] sm:$0xff] %v10114_v40  ;;  %v10234_v37 = vunpack.c.l.bf16 %v11403_v35  ;;  %v6445_v40 = vld [vmem:[#allocation1 + $0x609] ss:$16 sm:%s13393_s12]   ;;  %v6437_v44 = vsel %vm3854_vm2, %v6435_v34, %v6432_v39  ;;  %v10454_v33 = vunpack.c.l.bf16 %v11419_v32  ;;  %v11420_v34 = vld [vmem:[%s15516_s27 + $0xe0] sm:$0xff]  }
 0x1fe   :  { %15540 = sst [smem:[#allocation66_spill]] %s13446_s29  ;;  %s13453_s29 = smov 12  ;;  %v4028_v0 = vld [vmem:[#allocation1 + $0x480] ss:$16 sm:%s13256_s16]   ;;  %453 = vst [vmem:[#allocation1 + $0x710] sm:$0xff] %v10118_v57  ;;  %v10246_v57 = vunpack.c.l.bf16 %v11406_v55  ;;  %v10458_v35 = vunpack.c.l.bf16 %v11420_v34 }
 0x1ff   :  { %15541 = sst [smem:[#allocation59_spill]] %s13451_s30  ;;  %s13460_s30 = smov 48  ;;  %v4031_v1 = vld [vmem:[#allocation1 + $0x480] ss:$16 sm:%s13258_s21]   ;;  %483 = vst [vmem:[#allocation1 + $0x700] sm:$0xff] %v10122_v60  ;;  %v11408_v60 = vld [vmem:[%s15516_s27 + $0x3b8] sm:$0xff]  }
 0x200   :  { %15542 = sst [smem:[#allocation63_spill]] %s13453_s29  ;;  %s13462_s29 = smov 192  ;;  %v4036_v2 = vld [vmem:[#allocation1 + $0x480] ss:$16 sm:%s13263_s18]   ;;  %v4033_v4 = vsel %vm3846_vm0, %v4031_v1, %v4028_v0  ;;  %1233 = vst [vmem:[#allocation1 + $0x570] sm:$0xff] %v10222_v19  ;;  %v10094_v59 = vunpack.c.l.bf16 %v11408_v60  ;;  %v10322_v0 = vunpack.c.l.bf16 %v11410_v63  ;;  %v11411_v1 = vld [vmem:[%s15516_s27 + $0x1e8] sm:$0xff]   ;;  %v10789_v19 = vunpack.i.l.bf16 %v13458_v26 }
 0x201   :  { %15543 = sst [smem:[#allocation67_spill]] %s13460_s30  ;;  %s13467_s30 = smov 3  ;;  %v4041_v5 = vld [vmem:[#allocation1 + $0x480] ss:$16 sm:%s13265_s23]   ;;  %v4038_v7 = vsel %vm3850_vm1, %v4036_v2, %v4033_v4  ;;  %1263 = vst [vmem:[#allocation1 + $0x560] sm:$0xff] %v10226_v24  ;;  %v10326_v2 = vunpack.c.l.bf16 %v11411_v1  ;;  %v13636_v4 = vpop.permute.xlu2 %10802  ;;  %v10790_v26 = vunpack.i.h.bf16 %v13458_v26 }
 0x202   :  { %15544 = sst [smem:[#allocation68_spill]] %s13462_s29  ;;  %s13469_s29 = smov 12  ;;  %v4112_v6 = vld [vmem:[#allocation1 + $0x680] ss:$16 sm:%s13270_s2]   ;;  %v4043_v12 = vsel %vm3854_vm2, %v4041_v5, %v4038_v7  ;;  %1293 = vst [vmem:[#allocation1 + $0x550] sm:$0xff] %v10230_v30 }
 0x203   :  { %15545 = sst [smem:[#allocation69_spill]] %s13467_s30  ;;  %s13512_s22 = smov 192  ;;  %v4115_v46 = vld [vmem:[#allocation1 + $0x680] ss:$16 sm:%s13272_s26]   ;;  %4046 = vst.msk [vmem:[#allocation0 + $0x48] sm:$0xff] %vm3856_vm3, %v4043_v12  }
 0x204   :  { %15546 = sst [smem:[#allocation72_spill]] %s13469_s29  ;;  %v4117_v10 = vsel %vm3846_vm0, %v4115_v46, %v4112_v6  ;;  %v4120_v9 = vld [vmem:[#allocation1 + $0x680] ss:$16 sm:%s13277_s15]   ;;  %s15548_s21 = smov 80   ;;  %4332 = vst.msk [vmem:[#allocation0 + $0x48] sm:$0xff] %vm4193_vm4, %v10779_v8   ;;  %v11413_v46 = vld [vmem:[%s15516_s27 + $0x1d8] sm:$0xff]  }
 0x205   :  { %s15547_s16 = sld [smem:[#allocation51_spill]]  ;;  %v4125_v11 = vld [vmem:[#allocation1 + $0x680] ss:$16 sm:%s13279_s17]   ;;  %10967 = vrot.lane.b32.xlu2 %v10966_v3, %s15548_s21  ;;  %s13528_s18 = smov 3  ;;  %v4122_v13 = vsel %vm3850_vm1, %v4120_v9, %v4117_v10  ;;  %1323 = vst [vmem:[#allocation1 + $0x540] sm:$0xff] %v10234_v37  ;;  %v13634_v3 = vpop.permute.xlu0 %10792  ;;  %v10334_v36 = vunpack.c.l.bf16 %v11413_v46  ;;  %v11415_v10 = vld [vmem:[%s15516_s27 + $0x1c8] sm:$0xff]  }
 0x206   :  { %s13535_s23 = smov 12  ;;  %v4127_v18 = vsel %vm3854_vm2, %v4125_v11, %v4122_v13  ;;  %s13546_s15 = smov 48  ;;  %1353 = vst [vmem:[#allocation1 + $0x530] sm:$0xff] %v10238_v43  ;;  %v11412_v5 = vld [vmem:[%s15516_s27 + $0x1e0] sm:$0xff]   ;;  %v11414_v7 = vld [vmem:[%s15516_s27 + $0x1d0] sm:$0xff]   ;;  %v10342_v9 = vunpack.c.l.bf16 %v11415_v10  ;;  %v11421_v37 = vld [vmem:[%s15516_s27 + $0xd8] sm:$0xff]  }
 0x207   :  { %4130 = vst.msk [vmem:[#allocation0 + $0x68] sm:$0xff] %vm3856_vm3, %v4127_v18   ;;  %s15549_s14 = sld [smem:[#allocation54_spill]]  ;;  %s13555_s1 = smov 192  ;;  %v10330_v6 = vunpack.c.l.bf16 %v11412_v5  ;;  %v10338_v8 = vunpack.c.l.bf16 %v11414_v7  ;;  %v11418_v30 = vld [vmem:[%s15516_s27 + $0xf0] sm:$0xff]   ;;  %v11424_v43 = vld [vmem:[%s15516_s27 + $0xc0] sm:$0xff]  }
 0x208   :  { %s15550_s7 = sld [smem:[#allocation58_spill]]  ;;  %s13565_s24 = smov 3  ;;  %4355 = vst.msk [vmem:[#allocation0 + $0x68] sm:$0xff] %vm4193_vm4, %v10780_v48   ;;  %v11422_v39 = vld [vmem:[%s15516_s27 + $0xd0] sm:$0xff]   ;;  %v6201_v1 = vld [vmem:[#allocation1 + $0x10a] ss:$16 sm:%s13476_s28]  }
 0x209   :  { %s15551_s0 = sld [smem:[#allocation64_spill]]  ;;  %s13574_s12 = smov 12  ;;  %1383 = vst [vmem:[#allocation1 + $0x520] sm:$0xff] %v10242_v53  ;;  %v13777_v53 = vpop.permute.xlu1 %10797  ;;  %v6206_v5 = vld [vmem:[#allocation1 + $0x10a] ss:$16 sm:%s13484_s13]   ;;  %v11427_v46 = vld [vmem:[%s15516_s27 + $0x3e0] sm:$0xff]  }
 0x20a   :  { %s13583_s11 = smov 48  ;;  %s13590_s2 = smov 192  ;;  %1413 = vst [vmem:[#allocation1 + $0x510] sm:$0xff] %v10246_v57  ;;  %v6224_v10 = vld [vmem:[#allocation1 + $0x30a] ss:$16 sm:%s13503_s4]  }
 0x20b   :  { %v6399_v15 = vld [vmem:[#allocation1 + $0x209] ss:$16 sm:%s15547_s16]   ;;  %s15168_s16 = smov 72   ;;  %s13592_s26 = smov 3  ;;  %1443 = vst [vmem:[#allocation1 + $0x500] sm:$0xff] %v10250_v56  ;;  %v11425_v56 = vld [vmem:[%s15516_s27 + $0x3f0] sm:$0xff]  }
 0x20c   :  { %v6404_v21 = vsel %vm3846_vm0, %v6402_v16, %v6399_v15  ;;  %s13600_s9 = smov 48  ;;  %s13607_s29 = smov 3  ;;  %273 = vst [vmem:[#allocation1 + $0x770] sm:$0xff] %v10094_v59 }
 0x20d   :  { %v6409_v25 = vsel %vm3850_vm1, %v6407_v22, %v6404_v21  ;;  %v6448_v41 = vld [vmem:[#allocation1 + $0x609] ss:$16 sm:%s15549_s14]   ;;  %s13598_s14 = smov 12  ;;  %s13612_s19 = smov 12  ;;  %1953 = vst [vmem:[#allocation1 + $0x3f0] sm:$0xff] %v10318_v62 }
 0x20e   :  { %v6414_v31 = vsel %vm3854_vm2, %v6412_v28, %v6409_v25  ;;  %v6450_v45 = vsel %vm3846_vm0, %v6448_v41, %v6445_v40  ;;  %v6453_v47 = vld [vmem:[#allocation1 + $0x609] ss:$16 sm:%s15550_s7]   ;;  %s13614_s5 = smov 48  ;;  %s13620_s10 = smov 192  ;;  %1983 = vst [vmem:[#allocation1 + $0x3e0] sm:$0xff] %v10322_v0  ;;  %v11416_v25 = vld [vmem:[%s15516_s27 + $0x1c0] sm:$0xff]   ;;  %v10466_v40 = vunpack.c.l.bf16 %v11422_v39 }
 0x20f   :  { %v11001_v38 = vpack.i.bf16 %v6414_v31, %v6392_v20  ;;  %v6458_v49 = vld [vmem:[#allocation1 + $0x609] ss:$16 sm:%s15551_s0]   ;;  %v6455_v54 = vsel %vm3850_vm1, %v6453_v47, %v6450_v45  ;;  %s13605_s0 = smov 192  ;;  %15552 = sst [smem:[#allocation73_spill]] %s13614_s5  ;;  %2013 = vst [vmem:[#allocation1 + $0x3d0] sm:$0xff] %v10326_v2  ;;  %v10346_v27 = vunpack.c.l.bf16 %v11416_v25  ;;  %v10450_v31 = vunpack.c.l.bf16 %v11418_v30  ;;  %v11431_v39 = vld [vmem:[%s15516_s27 + $0x3c0] sm:$0xff]  }
 0x210   :  { %v6460_v52 = vsel %vm3854_vm2, %v6458_v49, %v6455_v54  ;;  %15553 = sst [smem:[#allocation81_spill]] %s13620_s10  ;;  %s13622_s20 = smov 3  ;;  %2043 = vst [vmem:[#allocation1 + $0x3c0] sm:$0xff] %v10330_v6  ;;  %v11423_v41 = vld [vmem:[%s15516_s27 + $0xc8] sm:$0xff]   ;;  %v10805_v45 = vunpack.i.h.bf16 %v13636_v4  ;;  %v10804_v47 = vunpack.i.l.bf16 %v13636_v4 }
 0x211   :  { %11002 = vrot.lane.b32.xlu0 %v11001_v38, %s15168_s16  ;;  %v11006_v58 = vpack.i.bf16 %v6460_v52, %v6437_v44  ;;  %15554 = sst [smem:[#allocation18_spill]] %s13622_s20  ;;  %s13627_s30 = smov 12  ;;  %2073 = vst [vmem:[#allocation1 + $0x3b0] sm:$0xff] %v10334_v36  ;;  %v10462_v38 = vunpack.c.l.bf16 %v11421_v37  ;;  %v10470_v42 = vunpack.c.l.bf16 %v11423_v41  ;;  %v10474_v44 = vunpack.c.l.bf16 %v11424_v43  ;;  %v11426_v62 = vld [vmem:[%s15516_s27 + $0x3e8] sm:$0xff]   ;;  %v13847_v23 = vpop.permute.xlu1 %10812 }
 0x212   :  { %15555 = sst [smem:[#allocation19_spill]] %s13627_s30  ;;  %s13629_s25 = smov 48  ;;  %2103 = vst [vmem:[#allocation1 + $0x3a0] sm:$0xff] %v10338_v8  ;;  %v10795_v52 = vunpack.i.h.bf16 %v13634_v3  ;;  %v10070_v63 = vunpack.c.l.bf16 %v11426_v62  ;;  %v6216_v2 = vld [vmem:[#allocation1 + $0x30a] ss:$16 sm:%s13489_s3]   ;;  %v10074_v36 = vunpack.c.l.bf16 %v11427_v46  ;;  %v10794_v3 = vunpack.i.l.bf16 %v13634_v3 }
 0x213   :  { %11007 = vrot.lane.b32.xlu1 %v11006_v58, %s15168_s16  ;;  %15556 = sst [smem:[#allocation20_spill]] %s13629_s25  ;;  %s13638_s6 = smov 192  ;;  %2133 = vst [vmem:[#allocation1 + $0x390] sm:$0xff] %v10342_v9  ;;  %v10066_v58 = vunpack.c.l.bf16 %v11425_v56  ;;  %v6219_v6 = vld [vmem:[#allocation1 + $0x30a] ss:$16 sm:%s13495_s8]  }
 0x214   :  { %15557 = sst [smem:[#allocation21_spill]] %s13638_s6  ;;  %s13640_s17 = smov 3  ;;  %2163 = vst [vmem:[#allocation1 + $0x380] sm:$0xff] %v10346_v27  ;;  %v6221_v8 = vsel %vm3846_vm0, %v6219_v6, %v6216_v2  ;;  %v6229_v9 = vld [vmem:[#allocation1 + $0x30a] ss:$16 sm:%s13512_s22]  }
 0x215   :  { %15558 = sst [smem:[#allocation70_spill]] %s13640_s17  ;;  %s13645_s16 = smov 12  ;;  %2913 = vst [vmem:[#allocation1 + $0x1f0] sm:$0xff] %v10446_v29  ;;  %v6545_v37 = vld [vmem:[#allocation1 + $0x689] ss:$16 sm:%s13583_s11]  }
 0x216   :  { %15559 = sst [smem:[#allocation74_spill]] %s13645_s16  ;;  %s13647_s7 = smov 48  ;;  %2943 = vst [vmem:[#allocation1 + $0x1e0] sm:$0xff] %v10450_v31  ;;  %v6537_v31 = vld [vmem:[#allocation1 + $0x689] ss:$16 sm:%s13565_s24]  }
 0x217   :  { %15560 = sst [smem:[#allocation71_spill]] %s13647_s7  ;;  %s13652_s16 = smov 192  ;;  %2973 = vst [vmem:[#allocation1 + $0x1d0] sm:$0xff] %v10454_v33  ;;  %v11430_v33 = vld [vmem:[%s15516_s27 + $0x3c8] sm:$0xff]  }
 0x218   :  { %15561 = sst [smem:[#allocation79_spill]] %s13652_s16  ;;  %s13654_s7 = smov 3  ;;  %3003 = vst [vmem:[#allocation1 + $0x1c0] sm:$0xff] %v10458_v35  ;;  %v10086_v34 = vunpack.c.l.bf16 %v11430_v33  ;;  %v6540_v35 = vld [vmem:[#allocation1 + $0x689] ss:$16 sm:%s13574_s12]  }
 0x219   :  { %15562 = sst [smem:[#allocation82_spill]] %s13654_s7  ;;  %s13656_s16 = smov 12  ;;  %3033 = vst [vmem:[#allocation1 + $0x1b0] sm:$0xff] %v10462_v38  ;;  %v6550_v43 = vld [vmem:[#allocation1 + $0x689] ss:$16 sm:%s13590_s2]  }
 0x21a   :  { %s15563_s7 = sld [smem:[#allocation76_spill]]  ;;  %s13658_s17 = smov 48  ;;  %3063 = vst [vmem:[#allocation1 + $0x1a0] sm:$0xff] %v10466_v40  ;;  %v10090_v40 = vunpack.c.l.bf16 %v11431_v39  ;;  %v6573_v56 = vld [vmem:[#allocation1 + $0x109] ss:$16 sm:%s13605_s0]  }
 0x21b   :  { %15564 = sst [smem:[#allocation75_spill]] %s13656_s16  ;;  %s13660_s6 = smov 192  ;;  %3093 = vst [vmem:[#allocation1 + $0x190] sm:$0xff] %v10470_v42  ;;  %v6542_v42 = vsel %vm3846_vm0, %v6540_v35, %v6537_v31  ;;  %v11440_v33 = vld [vmem:[%s15516_s27 + $0x3f8] sm:$0xff]  }
 0x21c   :  { %s15565_s16 = sld [smem:[#allocation77_spill]]  ;;  %s13662_s25 = smov 3  ;;  %3123 = vst [vmem:[#allocation1 + $0x180] sm:$0xff] %v10474_v44  ;;  %v6560_v44 = vld [vmem:[#allocation1 + $0x109] ss:$16 sm:%s13592_s26]  }
 0x21d   :  { %15566 = sst [smem:[#allocation80_spill]] %s13658_s17  ;;  %s13667_s30 = smov 12  ;;  %4584 = vst.msk [vmem:[#allocation0 + $0x20] sm:$0xff] %vm4560_vm5, %v10805_v45   ;;  %v11432_v45 = vld [vmem:[%s15516_s27 + $0x2f8] sm:$0xff]  }
 0x21e   :  { %s15567_s17 = sld [smem:[#allocation56_spill]]  ;;  %s13674_s10 = smov 192  ;;  %4561 = vst.msk [vmem:[#allocation0] sm:$0xff] %vm4560_vm5, %v10804_v47   ;;  %v10190_v47 = vunpack.c.l.bf16 %v11432_v45 }
 0x21f   :  { %15568 = sst [smem:[#allocation83_spill]] %s13660_s6  ;;  %s13804_s28 = smov 3  ;;  %63 = vst [vmem:[#allocation1 + $0x7e0] sm:$0xff] %v10066_v58  ;;  %v6583_v58 = vld [vmem:[#allocation1 + $0x309] ss:$16 sm:%s13607_s29]  }
 0x220   :  { %s15569_s6 = sld [smem:[#allocation57_spill]]  ;;  %v4049_v11 = vld [vmem:[#allocation1 + $0x500] ss:$16 sm:%s15563_s7]   ;;  %s13712_s7 = smov 48  ;;  %93 = vst [vmem:[#allocation1 + $0x7d0] sm:$0xff] %v10070_v63 }
 0x221   :  { %15570 = sst [smem:[#allocation84_spill]] %s13662_s25  ;;  %s13810_s13 = smov 12  ;;  %123 = vst [vmem:[#allocation1 + $0x7c0] sm:$0xff] %v10074_v36 }
 0x222   :  { %s15571_s25 = sld [smem:[#allocation78_spill]]  ;;  %v4052_v12 = vld [vmem:[#allocation1 + $0x500] ss:$16 sm:%s15565_s16]   ;;  %s13722_s16 = smov 12  ;;  %213 = vst [vmem:[#allocation1 + $0x790] sm:$0xff] %v10086_v34  ;;  %v10062_v34 = vunpack.c.l.bf16 %v11440_v33 }
 0x223   :  { %s15572_s20 = sld [smem:[#allocation43_spill]]  ;;  %v4054_v13 = vsel %vm3846_vm0, %v4052_v12, %v4049_v11  ;;  %v13820_v11 = vpop.permute.xlu0 %10807  ;;  %v13822_v12 = vpop.permute.xlu2 %10817  ;;  %s13824_s4 = smov 48  ;;  %243 = vst [vmem:[#allocation1 + $0x780] sm:$0xff] %v10090_v40 }
 0x224   :  { %15573 = sst [smem:[#allocation85_spill]] %s13667_s30  ;;  %s13669_s30 = smov 48  ;;  %v4057_v48 = vld [vmem:[#allocation1 + $0x500] ss:$16 sm:%s15567_s17]   ;;  %993 = vst [vmem:[#allocation1 + $0x5f0] sm:$0xff] %v10190_v47  ;;  %v10809_v39 = vunpack.i.l.bf16 %v13820_v11  ;;  %v10810_v11 = vunpack.i.h.bf16 %v13820_v11 }
 0x225   :  { %15574 = sst [smem:[#allocation88_spill]] %s13669_s30  ;;  %v4059_v14 = vsel %vm3850_vm1, %v4057_v48, %v4054_v13  ;;  %s13697_s17 = smov 192  ;;  %v11428_v48 = vld [vmem:[%s15516_s27 + $0x3d8] sm:$0xff]   ;;  %33 = vst [vmem:[#allocation1 + $0x7f0] sm:$0xff] %v10062_v34  ;;  %v10799_v34 = vunpack.i.l.bf16 %v13777_v53  ;;  %v10800_v53 = vunpack.i.h.bf16 %v13777_v53 }
 0x226   :  { %s15575_s30 = sld [smem:[#allocation60_spill]]  ;;  %v4062_v15 = vld [vmem:[#allocation1 + $0x500] ss:$16 sm:%s15569_s6]   ;;  %s13695_s6 = smov 48  ;;  %v10078_v13 = vunpack.c.l.bf16 %v11428_v48  ;;  %4607 = vst.msk [vmem:[#allocation0 + $0x40] sm:$0xff] %vm4560_vm5, %v10809_v39  }
 0x227   :  { %s15576_s5 = sld [smem:[#allocation61_spill]]  ;;  %v4064_v28 = vsel %vm3854_vm2, %v4062_v15, %v4059_v14  ;;  %v6226_v15 = vsel %vm3850_vm1, %v6224_v10, %v6221_v8  ;;  %v11429_v14 = vld [vmem:[%s15516_s27 + $0x3d0] sm:$0xff]   ;;  %s13862_s12 = smov 48  ;;  %v11436_v8 = vld [vmem:[%s15516_s27 + $0x2d8] sm:$0xff]   ;;  %4630 = vst.msk [vmem:[#allocation0 + $0x60] sm:$0xff] %vm4560_vm5, %v10810_v11  }
 0x228   :  { %15577 = sst [smem:[#allocation89_spill]] %s13674_s10  ;;  %s13676_s10 = smov 3  ;;  %v4133_v16 = vld [vmem:[#allocation1 + $0x700] ss:$16 sm:%s15571_s25]   ;;  %4067 = vst.msk [vmem:[#allocation0 + $0x50] sm:$0xff] %vm3856_vm3, %v4064_v28   ;;  %v10206_v10 = vunpack.c.l.bf16 %v11436_v8 }
 0x229   :  { %v4136_v18 = vld [vmem:[#allocation1 + $0x700] ss:$16 sm:%s15572_s20]   ;;  %s13690_s25 = smov 12  ;;  %15578 = sst [smem:[#allocation6_spill]] %s13697_s17  ;;  %4424 = vst.msk [vmem:[#allocation0 + $0x50] sm:$0xff] %vm4193_vm4, %v10789_v19   ;;  %v10082_v19 = vunpack.c.l.bf16 %v11429_v14 }
 0x22a   :  { %v4138_v20 = vsel %vm3846_vm0, %v4136_v18, %v4133_v16  ;;  %s13704_s20 = smov 3  ;;  %15581 = sst [smem:[#allocation22_spill]] %s13712_s7  ;;  %v6514_v16 = vld [vmem:[#allocation1 + $0x489] ss:$16 sm:%s13528_s18]   ;;  %153 = vst [vmem:[#allocation1 + $0x7b0] sm:$0xff] %v10078_v13 }
 0x22b   :  { %15579 = sst [smem:[#allocation7_spill]] %s13704_s20  ;;  %s13766_s20 = smov 12  ;;  %v6517_v18 = vld [vmem:[#allocation1 + $0x489] ss:$16 sm:%s13535_s23]   ;;  %183 = vst [vmem:[#allocation1 + $0x7a0] sm:$0xff] %v10082_v19 }
 0x22c   :  { %v4141_v21 = vld [vmem:[#allocation1 + $0x700] ss:$16 sm:%s15575_s30]   ;;  %s13706_s30 = smov 12  ;;  %15584 = sst [smem:[#allocation29_spill]] %s13722_s16  ;;  %v6527_v28 = vld [vmem:[#allocation1 + $0x489] ss:$16 sm:%s13555_s1]  }
 0x22d   :  { %v4146_v22 = vld [vmem:[#allocation1 + $0x700] ss:$16 sm:%s15576_s5]   ;;  %v4143_v17 = vsel %vm3850_vm1, %v4141_v21, %v4138_v20  ;;  %15580 = sst [smem:[#allocation93_spill]] %s13706_s30  ;;  %s13714_s5 = smov 192  ;;  %v6231_v20 = vsel %vm3854_vm2, %v6229_v9, %v6226_v15  ;;  %v6519_v21 = vsel %vm3846_vm0, %v6517_v18, %v6514_v16  ;;  %v13921_v15 = vpop.permute.xlu1 %10827  ;;  %1113 = vst [vmem:[#allocation1 + $0x5b0] sm:$0xff] %v10206_v10 }
 0x22e   :  { %v4148_v24 = vsel %vm3854_vm2, %v4146_v22, %v4143_v17  ;;  %15582 = sst [smem:[#allocation28_spill]] %s13714_s5  ;;  %s13720_s5 = smov 3  ;;  %v6522_v22 = vld [vmem:[#allocation1 + $0x489] ss:$16 sm:%s13546_s15]   ;;  %v11437_v16 = vld [vmem:[%s15516_s27 + $0x2d0] sm:$0xff]  }
 0x22f   :  { %4151 = vst.msk [vmem:[#allocation0 + $0x70] sm:$0xff] %vm3856_vm3, %v4148_v24   ;;  %15583 = sst [smem:[#allocation25_spill]] %s13720_s5  ;;  %s13728_s5 = smov 48  ;;  %v6524_v27 = vsel %vm3850_vm1, %v6522_v22, %v6519_v21  ;;  %v10210_v18 = vunpack.c.l.bf16 %v11437_v16  ;;  %v11438_v22 = vld [vmem:[%s15516_s27 + $0x2c8] sm:$0xff]  }
 0x230   :  { %4447 = vst.msk [vmem:[#allocation0 + $0x70] sm:$0xff] %vm4193_vm4, %v10790_v26   ;;  %15585 = sst [smem:[#allocation95_spill]] %s13728_s5  ;;  %s13730_s16 = smov 192  ;;  %v6529_v41 = vsel %vm3854_vm2, %v6527_v28, %v6524_v27  ;;  %v10214_v28 = vunpack.c.l.bf16 %v11438_v22  ;;  %v11439_v27 = vld [vmem:[%s15516_s27 + $0x2c0] sm:$0xff]  }
 0x231   :  { %15586 = sst [smem:[#allocation96_spill]] %s13730_s16  ;;  %s13735_s5 = smov 3  ;;  %1143 = vst [vmem:[#allocation1 + $0x5a0] sm:$0xff] %v10210_v18 }
 0x232   :  { %15587 = sst [smem:[#allocation12_spill]] %s13735_s5  ;;  %s13737_s16 = smov 12  ;;  %1173 = vst [vmem:[#allocation1 + $0x590] sm:$0xff] %v10214_v28 }
 0x233   :  { %15588 = sst [smem:[#allocation14_spill]] %s13737_s16  ;;  %s13742_s5 = smov 48 }
 0x234   :  { %15589 = sst [smem:[#allocation86_spill]] %s13742_s5  ;;  %s13744_s16 = smov 192 }
 0x235   :  { %15590 = sst [smem:[#allocation90_spill]] %s13744_s16  ;;  %s13749_s5 = smov 3 }
 0x236   :  { %15591 = sst [smem:[#allocation87_spill]] %s13749_s5  ;;  %s13754_s5 = smov 12 }
 0x237   :  { %15592 = sst [smem:[#allocation92_spill]] %s13754_s5  ;;  %s13756_s16 = smov 48 }
 0x238   :  { %15593 = sst [smem:[#allocation94_spill]] %s13756_s16  ;;  %s13761_s5 = smov 192 }
 0x239   :  { %s15594_s16 = sld [smem:[#allocation62_spill]]  ;;  %s13832_s18 = smov 192 }
 0x23a   :  { %s15595_s7 = sld [smem:[#allocation40_spill]]  ;;  %s13841_s15 = smov 3 }
 0x23b   :  { %15596 = sst [smem:[#allocation91_spill]] %s13761_s5  ;;  %s13763_s5 = smov 3 }
 0x23c   :  { %15597 = sst [smem:[#allocation8_spill]] %s13763_s5  ;;  %s13853_s1 = smov 12 }
 0x23d   :  { %s15598_s5 = sld [smem:[#allocation44_spill]]  ;;  %s13872_s2 = smov 192 }
 0x23e   :  { %s15599_s30 = sld [smem:[#allocation45_spill]]  ;;  %s13895_s8 = smov 12 }
 0x23f   :  { %15600 = sst [smem:[#allocation23_spill]] %s13766_s20  ;;  %s13768_s20 = smov 48  ;;  %v3986_v49 = vld [vmem:[#allocation1 + $0x380] ss:$16 sm:%s15594_s16]  }
 0x240   :  { %15601 = sst [smem:[#allocation26_spill]] %s13768_s20  ;;  %s13771_s20 = smov 192  ;;  %v3989_v50 = vld [vmem:[#allocation1 + $0x380] ss:$16 sm:%s15595_s7]  }
 0x241   :  { %15602 = sst [smem:[#allocation9_spill]] %s13771_s20  ;;  %s13773_s20 = smov 3  ;;  %v3991_v54 = vsel %vm3846_vm0, %v3989_v50, %v3986_v49  ;;  %v6547_v49 = vsel %vm3850_vm1, %v6545_v37, %v6542_v42  ;;  %v6563_v50 = vld [vmem:[#allocation1 + $0x109] ss:$16 sm:%s13598_s14]  }
 0x242   :  { %15603 = sst [smem:[#allocation2_spill]] %s13773_s20  ;;  %s13779_s16 = smov 12 }
 0x243   :  { %s15604_s20 = sld [smem:[#allocation69_spill]]  ;;  %v3994_v55 = vld [vmem:[#allocation1 + $0x380] ss:$16 sm:%s15598_s5]   ;;  %s13881_s14 = smov 3 }
 0x244   :  { %s15605_s17 = sld [smem:[#allocation72_spill]]  ;;  %v3999_v57 = vld [vmem:[#allocation1 + $0x380] ss:$16 sm:%s15599_s30]   ;;  %s13785_s30 = smov 48  ;;  %v3996_v51 = vsel %vm3850_vm1, %v3994_v55, %v3991_v54  ;;  %v6568_v54 = vld [vmem:[#allocation1 + $0x109] ss:$16 sm:%s13600_s9]  }
 0x245   :  { %v4001_v61 = vsel %vm3854_vm2, %v3999_v57, %v3996_v51  ;;  %s15606_s22 = sld [smem:[#allocation65_spill]]  ;;  %v11433_v55 = vld [vmem:[%s15516_s27 + $0x2f0] sm:$0xff]   ;;  %v6565_v51 = vsel %vm3846_vm0, %v6563_v50, %v6560_v44  ;;  %s13903_s11 = smov 48 }
 0x246   :  { %4004 = vst.msk [vmem:[#allocation0 + $0x38] sm:$0xff] %vm3856_vm3, %v4001_v61   ;;  %s15607_s7 = sld [smem:[#allocation36_spill]]  ;;  %v10194_v57 = vunpack.c.l.bf16 %v11433_v55  ;;  %v11434_v61 = vld [vmem:[%s15516_s27 + $0x2e8] sm:$0xff]   ;;  %s13912_s9 = smov 192  ;;  %v10820_v55 = vunpack.i.h.bf16 %v13822_v12  ;;  %v10819_v12 = vunpack.i.l.bf16 %v13822_v12 }
 0x247   :  { %4493 = vst.msk [vmem:[#allocation0 + $0x38] sm:$0xff] %vm4193_vm4, %v10795_v52   ;;  %s15608_s3 = sld [smem:[#allocation37_spill]]  ;;  %v6552_v52 = vsel %vm3854_vm2, %v6550_v43, %v6547_v49  ;;  %v10198_v62 = vunpack.c.l.bf16 %v11434_v61  ;;  %v6701_v61 = vld [vmem:[#allocation1 + $0x589] ss:$16 sm:%s13690_s25]   ;;  %s13991_s25 = smov 3 }
 0x248   :  { %s15609_s23 = sld [smem:[#allocation38_spill]]  ;;  %v11016_v63 = vpack.i.bf16 %v6552_v52, %v6529_v41  ;;  %1023 = vst [vmem:[#allocation1 + $0x5e0] sm:$0xff] %v10194_v57 }
 0x249   :  { %v6193_v60 = vld [vmem:[#allocation1 + $0x10a] ss:$16 sm:%s15604_s20]   ;;  %s15611_s0 = sld [smem:[#allocation81_spill]]  ;;  %1053 = vst [vmem:[#allocation1 + $0x5d0] sm:$0xff] %v10198_v62  ;;  %s13975_s20 = smov 48 }
 0x24a   :  { %v6196_v59 = vld [vmem:[#allocation1 + $0x10a] ss:$16 sm:%s15605_s17]   ;;  %s13794_s17 = smov 192  ;;  %s15612_s29 = sld [smem:[#allocation18_spill]]  ;;  %v6706_v62 = vld [vmem:[#allocation1 + $0x589] ss:$16 sm:%s13695_s6]  }
 0x24b   :  { %v6198_v0 = vsel %vm3846_vm0, %v6196_v59, %v6193_v60  ;;  %v3902_v26 = vld [vmem:[#allocation1 + $0x180] ss:$16 sm:%s15606_s22]   ;;  %v13891_v60 = vpop.permute.xlu0 %10822  ;;  %v13893_v59 = vpop.permute.xlu2 %10832  ;;  %s15614_s22 = sld [smem:[#allocation20_spill]]  ;;  %4722 = vst.msk [vmem:[#allocation0 + $0x68] sm:$0xff] %vm4560_vm5, %v10820_v55  }
 0x24c   :  { %v6203_v4 = vsel %vm3850_vm1, %v6201_v1, %v6198_v0  ;;  %v3905_v17 = vld [vmem:[#allocation1 + $0x180] ss:$16 sm:%s15607_s7]   ;;  %v6570_v0 = vsel %vm3850_vm1, %v6568_v54, %v6565_v51  ;;  %v6586_v1 = vld [vmem:[#allocation1 + $0x309] ss:$16 sm:%s13612_s19]   ;;  %s15613_s19 = sld [smem:[#allocation19_spill]]  ;;  %4699 = vst.msk [vmem:[#allocation0 + $0x48] sm:$0xff] %vm4560_vm5, %v10819_v12   ;;  %v10835_v55 = vunpack.i.h.bf16 %v13893_v59  ;;  %v10834_v59 = vunpack.i.l.bf16 %v13893_v59 }
 0x24d   :  { %v6208_v7 = vsel %vm3854_vm2, %v6206_v5, %v6203_v4  ;;  %v3910_v24 = vld [vmem:[#allocation1 + $0x180] ss:$16 sm:%s15608_s3]   ;;  %v3907_v29 = vsel %vm3846_vm0, %v3905_v17, %v3902_v26  ;;  %v6575_v6 = vsel %vm3854_vm2, %v6573_v56, %v6570_v0  ;;  %v6588_v46 = vsel %vm3846_vm0, %v6586_v1, %v6583_v58  ;;  %s15615_s7 = sld [smem:[#allocation21_spill]]  ;;  %v6698_v56 = vld [vmem:[#allocation1 + $0x589] ss:$16 sm:%s13676_s10]   ;;  %s13982_s10 = smov 192 }
 0x24e   :  { %v10981_v25 = vpack.i.bf16 %v6231_v20, %v6208_v7  ;;  %v3915_v30 = vld [vmem:[#allocation1 + $0x180] ss:$16 sm:%s15609_s23]   ;;  %v3912_v32 = vsel %vm3850_vm1, %v3910_v24, %v3907_v29  ;;  %s15610_s23 = sld [smem:[#allocation73_spill]]  ;;  %v10218_v29 = vunpack.c.l.bf16 %v11439_v27  ;;  %v10815_v0 = vunpack.i.h.bf16 %v13847_v23  ;;  %4860 = vst.msk [vmem:[#allocation0 + $0x38] sm:$0xff] %vm4560_vm5, %v10835_v55  }
 0x24f   :  { %v3917_v38 = vsel %vm3854_vm2, %v3915_v30, %v3912_v32  ;;  %v11435_v4 = vld [vmem:[%s15516_s27 + $0x2e0] sm:$0xff]   ;;  %v6596_v36 = vld [vmem:[#allocation1 + $0x309] ss:$16 sm:%s15611_s0]   ;;  %s15616_s3 = sld [smem:[#allocation70_spill]]  ;;  %v10814_v23 = vunpack.i.l.bf16 %v13847_v23 }
 0x250   :  { %10982 = vrot.lane.b32.xlu2 %v10981_v25, %s15548_s21  ;;  %3920 = vst.msk [vmem:[#allocation0 + $0x18] sm:$0xff] %vm3856_vm3, %v3917_v38   ;;  %v10202_v5 = vunpack.c.l.bf16 %v11435_v4  ;;  %v6331_v7 = vld [vmem:[#allocation1 + $0x58a] ss:$16 sm:%s15612_s29]   ;;  %s15617_s29 = smov 72   ;;  %s15618_s5 = sld [smem:[#allocation74_spill]] }
 0x251   :  { %4470 = vst.msk [vmem:[#allocation0 + $0x18] sm:$0xff] %vm4193_vm4, %v10794_v3   ;;  %11017 = vrot.lane.b32.xlu0 %v11016_v63, %s15617_s29  ;;  %v6339_v13 = vld [vmem:[#allocation1 + $0x58a] ss:$16 sm:%s15614_s22]   ;;  %s15619_s24 = sld [smem:[#allocation71_spill]]  ;;  %s13940_s22 = smov 48  ;;  %v13989_v63 = vpop.permute.xlu1 %10842 }
 0x252   :  { %v6334_v48 = vld [vmem:[#allocation1 + $0x58a] ss:$16 sm:%s15613_s19]   ;;  %s13923_s19 = smov 3  ;;  %s15620_s26 = sld [smem:[#allocation79_spill]]  ;;  %1083 = vst [vmem:[#allocation1 + $0x5c0] sm:$0xff] %v10202_v5 }
 0x253   :  { %v6336_v19 = vsel %vm3846_vm0, %v6334_v48, %v6331_v7  ;;  %v6344_v20 = vld [vmem:[#allocation1 + $0x58a] ss:$16 sm:%s15615_s7]   ;;  %s15621_s7 = sld [smem:[#allocation82_spill]]  ;;  %v13965_v44 = vpop.permute.xlu2 %10847  ;;  %v13967_v45 = vpop.permute.xlu0 %10837  ;;  %1203 = vst [vmem:[#allocation1 + $0x580] sm:$0xff] %v10218_v29 }
 0x254   :  { %v6591_v2 = vld [vmem:[#allocation1 + $0x309] ss:$16 sm:%s15610_s23]   ;;  %v6341_v17 = vsel %vm3850_vm1, %v6339_v13, %v6336_v19  ;;  %s15624_s0 = sld [smem:[#allocation83_spill]]  ;;  %4676 = vst.msk [vmem:[#allocation0 + $0x28] sm:$0xff] %vm4560_vm5, %v10815_v0   ;;  %v10825_v19 = vunpack.i.h.bf16 %v13891_v60  ;;  %v10824_v60 = vunpack.i.l.bf16 %v13891_v60 }
 0x255   :  { %v6593_v9 = vsel %vm3850_vm1, %v6591_v2, %v6588_v46  ;;  %v6354_v21 = vld [vmem:[#allocation1 + $0x78a] ss:$16 sm:%s15616_s3]   ;;  %s13932_s3 = smov 12  ;;  %v6346_v30 = vsel %vm3854_vm2, %v6344_v20, %v6341_v17  ;;  %s15626_s27 = sld [smem:[#allocation85_spill]]  ;;  %v6703_v2 = vsel %vm3846_vm0, %v6701_v61, %v6698_v56  ;;  %4653 = vst.msk [vmem:[#allocation0 + $0x8] sm:$0xff] %vm4560_vm5, %v10814_v23   ;;  %v10850_v23 = vunpack.i.h.bf16 %v13965_v44 }
 0x256   :  { %v6598_v14 = vsel %vm3854_vm2, %v6596_v36, %v6593_v9  ;;  %v6357_v24 = vld [vmem:[#allocation1 + $0x78a] ss:$16 sm:%s15618_s5]   ;;  %s15622_s5 = sld [smem:[#allocation75_spill]]  ;;  %v6708_v46 = vsel %vm3850_vm1, %v6706_v62, %v6703_v2  ;;  %4768 = vst.msk [vmem:[#allocation0 + $0x30] sm:$0xff] %vm4560_vm5, %v10825_v19   ;;  %v10830_v62 = vunpack.i.h.bf16 %v13921_v15  ;;  %v10829_v15 = vunpack.i.l.bf16 %v13921_v15 }
 0x257   :  { %v11021_v26 = vpack.i.bf16 %v6598_v14, %v6575_v6  ;;  %v6362_v25 = vld [vmem:[#allocation1 + $0x78a] ss:$16 sm:%s15619_s24]   ;;  %s15623_s24 = sld [smem:[#allocation80_spill]]  ;;  %v6359_v3 = vsel %vm3846_vm0, %v6357_v24, %v6354_v21  ;;  %4745 = vst.msk [vmem:[#allocation0 + $0x10] sm:$0xff] %vm4560_vm5, %v10824_v60   ;;  %v10849_v44 = vunpack.i.l.bf16 %v13965_v44  ;;  %v6642_v60 = vld [vmem:[#allocation1 + $0x709] ss:$16 sm:%s13912_s9]  }
 0x258   :  { %v6367_v31 = vld [vmem:[#allocation1 + $0x78a] ss:$16 sm:%s15620_s26]   ;;  %s15625_s26 = sld [smem:[#allocation84_spill]]  ;;  %v6364_v35 = vsel %vm3850_vm1, %v6362_v25, %v6359_v3  ;;  %4837 = vst.msk [vmem:[#allocation0 + $0x18] sm:$0xff] %vm4560_vm5, %v10834_v59   ;;  %s14179_s9 = smov 48 }
 0x259   :  { %v6652_v32 = vld [vmem:[#allocation1 + $0x189] ss:$16 sm:%s15621_s7]   ;;  %s13949_s7 = smov 192  ;;  %11022 = vrot.lane.b32.xlu1 %v11021_v26, %s15617_s29  ;;  %v6369_v40 = vsel %vm3854_vm2, %v6367_v31, %v6364_v35  ;;  %s15629_s23 = sld [smem:[#allocation6_spill]]  ;;  %v14051_v39 = vpop.permute.xlu1 %10857  ;;  %4814 = vst.msk [vmem:[#allocation0 + $0x70] sm:$0xff] %vm4560_vm5, %v10830_v62  }
 0x25a   :  { %v6665_v42 = vld [vmem:[#allocation1 + $0x189] ss:$16 sm:%s15624_s0]   ;;  %s15628_s0 = sld [smem:[#allocation89_spill]]  ;;  %v10996_v47 = vpack.i.bf16 %v6369_v40, %v6346_v30  ;;  %4791 = vst.msk [vmem:[#allocation0 + $0x50] sm:$0xff] %vm4560_vm5, %v10829_v15  }
 0x25b   :  { %v6678_v50 = vld [vmem:[#allocation1 + $0x389] ss:$16 sm:%s15626_s27]   ;;  %s15630_s27 = sld [smem:[#allocation7_spill]]  ;;  %v14030_v28 = vpop.permute.xlu2 %10862  ;;  %v14032_v26 = vpop.permute.xlu0 %10852  ;;  %4997 = vst.msk [vmem:[#allocation0 + $0x60] sm:$0xff] %vm4927_vm6, %v10850_v23  }
 0x25c   :  { %v6655_v37 = vld [vmem:[#allocation1 + $0x189] ss:$16 sm:%s15622_s5]   ;;  %s15627_s5 = sld [smem:[#allocation88_spill]]  ;;  %10997 = vrot.lane.b32.xlu2 %v10996_v47, %s15548_s21  ;;  %4974 = vst.msk [vmem:[#allocation0 + $0x40] sm:$0xff] %vm4927_vm6, %v10849_v44   ;;  %v10865_v59 = vunpack.i.h.bf16 %v14030_v28  ;;  %v10864_v28 = vunpack.i.l.bf16 %v14030_v28 }
 0x25d   :  { %v6660_v38 = vld [vmem:[#allocation1 + $0x189] ss:$16 sm:%s15623_s24]   ;;  %s13958_s24 = smov 3  ;;  %v6657_v41 = vsel %vm3846_vm0, %v6655_v37, %v6652_v32  ;;  %15631 = sst [smem:[#allocation3_spill]] %s13982_s10 }
 0x25e   :  { %v6675_v43 = vld [vmem:[#allocation1 + $0x389] ss:$16 sm:%s15625_s26]   ;;  %s13969_s26 = smov 12  ;;  %v6662_v49 = vsel %vm3850_vm1, %v6660_v38, %v6657_v41  ;;  %s15632_s21 = sld [smem:[#allocation93_spill]]  ;;  %5135 = vst.msk [vmem:[#allocation0 + $0x30] sm:$0xff] %vm4927_vm6, %v10865_v59  }
 0x25f   :  { %v6667_v57 = vsel %vm3854_vm2, %v6665_v42, %v6662_v49  ;;  %v6680_v52 = vsel %vm3846_vm0, %v6678_v50, %v6675_v43  ;;  %15634 = sst [smem:[#allocation97_spill]] %s13991_s25  ;;  %v6711_v4 = vld [vmem:[#allocation1 + $0x589] ss:$16 sm:%s15629_s23]   ;;  %s13999_s23 = smov 12  ;;  %5112 = vst.msk [vmem:[#allocation0 + $0x10] sm:$0xff] %vm4927_vm6, %v10864_v28  }
 0x260   :  { %v6688_v51 = vld [vmem:[#allocation1 + $0x389] ss:$16 sm:%s15628_s0]   ;;  %s15635_s6 = sld [smem:[#allocation28_spill]]  ;;  %v6713_v8 = vsel %vm3854_vm2, %v6711_v4, %v6708_v46 }
 0x261   :  { %s15636_s0 = sld [smem:[#allocation25_spill]]  ;;  %v6721_v5 = vld [vmem:[#allocation1 + $0x789] ss:$16 sm:%s15630_s27]   ;;  %v14120_v19 = vpop.permute.xlu1 %10872 }
 0x262   :  { %v6683_v54 = vld [vmem:[#allocation1 + $0x389] ss:$16 sm:%s15627_s5]   ;;  %s15633_s5 = sld [smem:[#allocation22_spill]] }
 0x263   :  { %v6685_v58 = vsel %vm3850_vm1, %v6683_v54, %v6680_v52  ;;  %15637 = sst [smem:[#allocation98_spill]] %s13999_s23 }
 0x264   :  { %v6690_v1 = vsel %vm3854_vm2, %v6688_v51, %v6685_v58  ;;  %s15638_s27 = sld [smem:[#allocation29_spill]]  ;;  %v6724_v36 = vld [vmem:[#allocation1 + $0x789] ss:$16 sm:%s15632_s21]   ;;  %s14005_s21 = smov 48 }
 0x265   :  { %v11031_v6 = vpack.i.bf16 %v6690_v1, %v6667_v57  ;;  %s15639_s23 = sld [smem:[#allocation95_spill]]  ;;  %v6726_v10 = vsel %vm3846_vm0, %v6724_v36, %v6721_v5  ;;  %v14092_v5 = vpop.permute.xlu2 %10877 }
 0x266   :  { %15640 = sst [smem:[#allocation16_spill]] %s14005_s21  ;;  %v6734_v9 = vld [vmem:[#allocation1 + $0x789] ss:$16 sm:%s15635_s6]   ;;  %s14012_s6 = smov 192 }
 0x267   :  { %s15642_s21 = sld [smem:[#allocation12_spill]]  ;;  %v6468_v48 = vld [vmem:[#allocation1 + $0x89] ss:$16 sm:%s15636_s0]   ;;  %11032 = vrot.lane.b32.xlu0 %v11031_v6, %s15617_s29  ;;  %v14094_v6 = vpop.permute.xlu0 %10867 }
 0x268   :  { %v6729_v7 = vld [vmem:[#allocation1 + $0x789] ss:$16 sm:%s15633_s5]   ;;  %s15641_s5 = sld [smem:[#allocation96_spill]] }
 0x269   :  { %15643 = sst [smem:[#allocation101_spill]] %s14012_s6  ;;  %v6731_v13 = vsel %vm3850_vm1, %v6729_v7, %v6726_v10 }
 0x26a   :  { %s15644_s0 = sld [smem:[#allocation46_spill]]  ;;  %v6471_v16 = vld [vmem:[#allocation1 + $0x89] ss:$16 sm:%s15638_s27]   ;;  %s14020_s27 = smov 3  ;;  %v6736_v14 = vsel %vm3854_vm2, %v6734_v9, %v6731_v13  ;;  %v6838_v9 = vld [vmem:[#allocation1 + $0x88] ss:$16 sm:%s13779_s16]  }
 0x26b   :  { %s15645_s6 = sld [smem:[#allocation47_spill]]  ;;  %v6476_v18 = vld [vmem:[#allocation1 + $0x89] ss:$16 sm:%s15639_s23]   ;;  %v6473_v20 = vsel %vm3846_vm0, %v6471_v16, %v6468_v48  ;;  %v11036_v27 = vpack.i.bf16 %v6736_v14, %v6713_v8  ;;  %v6843_v48 = vld [vmem:[#allocation1 + $0x88] ss:$16 sm:%s13785_s30]   ;;  %s14110_s16 = smov 12 }
 0x26c   :  { %s15646_s25 = sld [smem:[#allocation55_spill]]  ;;  %v6478_v32 = vsel %vm3850_vm1, %v6476_v18, %v6473_v20  ;;  %v6848_v18 = vld [vmem:[#allocation1 + $0x88] ss:$16 sm:%s13794_s17]   ;;  %s14118_s30 = smov 48 }
 0x26d   :  { %s15647_s23 = sld [smem:[#allocation66_spill]]  ;;  %v6491_v22 = vld [vmem:[#allocation1 + $0x289] ss:$16 sm:%s15642_s21]   ;;  %11037 = vrot.lane.b32.xlu1 %v11036_v27, %s15617_s29  ;;  %v6858_v14 = vld [vmem:[#allocation1 + $0x288] ss:$16 sm:%s13804_s28]   ;;  %s14127_s17 = smov 192 }
 0x26e   :  { %15648 = sst [smem:[#allocation15_spill]] %s14020_s27  ;;  %v6481_v21 = vld [vmem:[#allocation1 + $0x89] ss:$16 sm:%s15641_s5]   ;;  %s14028_s5 = smov 12 }
 0x26f   :  { %s15649_s27 = sld [smem:[#allocation59_spill]]  ;;  %v6483_v47 = vsel %vm3854_vm2, %v6481_v21, %v6478_v32  ;;  %s14135_s28 = smov 3  ;;  %v6609_v32 = vld [vmem:[#allocation1 + $0x509] ss:$16 sm:%s13853_s1]  }
 0x270   :  { %s15650_s10 = sld [smem:[#allocation63_spill]]  ;;  %v4070_v17 = vld [vmem:[#allocation1 + $0x580] ss:$16 sm:%s15644_s0]   ;;  %s14164_s1 = smov 3 }
 0x271   :  { %s15651_s21 = sld [smem:[#allocation67_spill]]  ;;  %v4073_v24 = vld [vmem:[#allocation1 + $0x580] ss:$16 sm:%s15645_s6]  }
 0x272   :  { %15652 = sst [smem:[#allocation30_spill]] %s14028_s5  ;;  %v4078_v25 = vld [vmem:[#allocation1 + $0x580] ss:$16 sm:%s15646_s25]   ;;  %v4075_v29 = vsel %vm3846_vm0, %v4073_v24, %v4070_v17  ;;  %v6866_v17 = vld [vmem:[#allocation1 + $0x288] ss:$16 sm:%s13824_s4]   ;;  %v10839_v24 = vunpack.i.l.bf16 %v13967_v45  ;;  %v10840_v45 = vunpack.i.h.bf16 %v13967_v45  ;;  %s14143_s4 = smov 12 }
 0x273   :  { %s15653_s5 = sld [smem:[#allocation68_spill]]  ;;  %v4083_v30 = vld [vmem:[#allocation1 + $0x580] ss:$16 sm:%s15647_s23]   ;;  %v4080_v33 = vsel %vm3850_vm1, %v4078_v25, %v4075_v29  ;;  %s14049_s23 = smov 48  ;;  %v6871_v29 = vld [vmem:[#allocation1 + $0x288] ss:$16 sm:%s13832_s18]  }
 0x274   :  { %s15655_s25 = sld [smem:[#allocation86_spill]]  ;;  %v4085_v40 = vsel %vm3854_vm2, %v4083_v30, %v4080_v33  ;;  %v6606_v30 = vld [vmem:[#allocation1 + $0x509] ss:$16 sm:%s13841_s15]   ;;  %s14151_s18 = smov 48  ;;  %v7004_v44 = vld [vmem:[#allocation1 + $0x708] ss:$16 sm:%s14049_s23]  }
 0x275   :  { %v4154_v3 = vld [vmem:[#allocation1 + $0x780] ss:$16 sm:%s15649_s27]   ;;  %s15656_s6 = sld [smem:[#allocation90_spill]]  ;;  %4088 = vst.msk [vmem:[#allocation0 + $0x58] sm:$0xff] %vm3856_vm3, %v4085_v40   ;;  %v6614_v33 = vld [vmem:[#allocation1 + $0x509] ss:$16 sm:%s13862_s12]  }
 0x276   :  { %v4157_v31 = vld [vmem:[#allocation1 + $0x780] ss:$16 sm:%s15650_s10]   ;;  %s15654_s10 = sld [smem:[#allocation14_spill]]  ;;  %4516 = vst.msk [vmem:[#allocation0 + $0x58] sm:$0xff] %vm4193_vm4, %v10799_v34   ;;  %s14157_s15 = smov 192 }
 0x277   :  { %v4159_v35 = vsel %vm3846_vm0, %v4157_v31, %v4154_v3  ;;  %v4162_v37 = vld [vmem:[#allocation1 + $0x780] ss:$16 sm:%s15651_s21]   ;;  %s15657_s0 = sld [smem:[#allocation87_spill]]  ;;  %v10845_v31 = vunpack.i.h.bf16 %v13989_v63  ;;  %v10844_v63 = vunpack.i.l.bf16 %v13989_v63  ;;  %4883 = vst.msk [vmem:[#allocation0 + $0x58] sm:$0xff] %vm4560_vm5, %v10839_v24   ;;  %s7123_s23 = smov 192 }
 0x278   :  { %v4164_v41 = vsel %vm3850_vm1, %v4162_v37, %v4159_v35  ;;  %s15658_s27 = sld [smem:[#allocation92_spill]]  ;;  %v6611_v35 = vsel %vm3846_vm0, %v6609_v32, %v6606_v30  ;;  %v6619_v37 = vld [vmem:[#allocation1 + $0x509] ss:$16 sm:%s13872_s2]   ;;  %s14171_s2 = smov 12 }
 0x279   :  { %v4167_v38 = vld [vmem:[#allocation1 + $0x780] ss:$16 sm:%s15653_s5]   ;;  %s15659_s21 = sld [smem:[#allocation94_spill]]  ;;  %s14059_s5 = smov 192  ;;  %4951 = vst.msk [vmem:[#allocation0 + $0x20] sm:$0xff] %vm4927_vm6, %v10845_v31  }
 0x27a   :  { %v6499_v43 = vld [vmem:[#allocation1 + $0x289] ss:$16 sm:%s15655_s25]   ;;  %v4169_v11 = vsel %vm3854_vm2, %v4167_v38, %v4164_v41  ;;  %s15661_s25 = sld [smem:[#allocation8_spill]]  ;;  %4928 = vst.msk [vmem:[#allocation0] sm:$0xff] %vm4927_vm6, %v10844_v63  }
 0x27b   :  { %v6504_v50 = vld [vmem:[#allocation1 + $0x289] ss:$16 sm:%s15656_s6]   ;;  %s14068_s6 = smov 3  ;;  %4172 = vst.msk [vmem:[#allocation0 + $0x78] sm:$0xff] %vm3856_vm3, %v4169_v11   ;;  %s15667_s12 = sld [smem:[#allocation3_spill]] }
 0x27c   :  { %v6494_v42 = vld [vmem:[#allocation1 + $0x289] ss:$16 sm:%s15654_s10]   ;;  %s15660_s10 = sld [smem:[#allocation91_spill]]  ;;  %4539 = vst.msk [vmem:[#allocation0 + $0x78] sm:$0xff] %vm4193_vm4, %v10800_v53   ;;  %v6616_v53 = vsel %vm3850_vm1, %v6614_v33, %v6611_v35 }
 0x27d   :  { %v6496_v49 = vsel %vm3846_vm0, %v6494_v42, %v6491_v22  ;;  %v6789_v54 = vld [vmem:[#allocation1 + $0x408] ss:$16 sm:%s15657_s0]   ;;  %15662 = sst [smem:[#allocation31_spill]] %s14068_s6  ;;  %v6629_v38 = vld [vmem:[#allocation1 + $0x709] ss:$16 sm:%s13881_s14]   ;;  %4906 = vst.msk [vmem:[#allocation0 + $0x78] sm:$0xff] %vm4560_vm5, %v10840_v45  }
 0x27e   :  { %s15663_s0 = sld [smem:[#allocation23_spill]]  ;;  %v6501_v57 = vsel %vm3850_vm1, %v6499_v43, %v6496_v49  ;;  %v6792_v52 = vld [vmem:[#allocation1 + $0x408] ss:$16 sm:%s15658_s27]   ;;  %s14075_s27 = smov 12  ;;  %v6632_v41 = vld [vmem:[#allocation1 + $0x709] ss:$16 sm:%s13895_s8]   ;;  %v6621_v43 = vsel %vm3854_vm2, %v6619_v37, %v6616_v53 }
 0x27f   :  { %s15664_s6 = sld [smem:[#allocation26_spill]]  ;;  %v6797_v51 = vld [vmem:[#allocation1 + $0x408] ss:$16 sm:%s15659_s21]   ;;  %v6506_v56 = vsel %vm3854_vm2, %v6504_v50, %v6501_v57  ;;  %v6794_v12 = vsel %vm3846_vm0, %v6792_v52, %v6789_v54  ;;  %v6637_v42 = vld [vmem:[#allocation1 + $0x709] ss:$16 sm:%s13903_s11]   ;;  %v6634_v11 = vsel %vm3846_vm0, %v6632_v41, %v6629_v38 }
 0x280   :  { %s15665_s21 = sld [smem:[#allocation9_spill]]  ;;  %v6812_v61 = vld [vmem:[#allocation1 + $0x608] ss:$16 sm:%s15661_s25]   ;;  %s14083_s25 = smov 48  ;;  %v11011_v0 = vpack.i.bf16 %v6506_v56, %v6483_v47  ;;  %v6799_v1 = vsel %vm3850_vm1, %v6797_v51, %v6794_v12  ;;  %v6639_v49 = vsel %vm3850_vm1, %v6637_v42, %v6634_v11  ;;  %v10879_v42 = vunpack.i.l.bf16 %v14092_v5 }
 0x281   :  { %v6861_v22 = vld [vmem:[#allocation1 + $0x288] ss:$16 sm:%s13810_s13]   ;;  %s11448_s13 = smov 64   ;;  %s15668_s14 = sld [smem:[#allocation97_spill]]  ;;  %v6644_v55 = vsel %vm3854_vm2, %v6642_v60, %v6639_v49  ;;  %v10880_v5 = vunpack.i.h.bf16 %v14092_v5 }
 0x282   :  { %v6802_v58 = vld [vmem:[#allocation1 + $0x408] ss:$16 sm:%s15660_s10]   ;;  %s15666_s10 = sld [smem:[#allocation2_spill]]  ;;  %11012 = vrot.lane.b32.xlu2 %v11011_v0, %s15617_s29  ;;  %v6863_v27 = vsel %vm3846_vm0, %v6861_v22, %v6858_v14  ;;  %v11026_v56 = vpack.i.bf16 %v6644_v55, %v6621_v43  ;;  %5250 = vst.msk [vmem:[#allocation0 + $0x58] sm:$0xff] %vm4927_vm6, %v10879_v42  }
 0x283   :  { %v6804_v46 = vsel %vm3854_vm2, %v6802_v58, %v6799_v1  ;;  %v6868_v3 = vsel %vm3850_vm1, %v6866_v17, %v6863_v27  ;;  %v6927_v47 = vld [vmem:[#allocation1 + $0x108] ss:$16 sm:%s13923_s19]   ;;  %s15669_s8 = sld [smem:[#allocation98_spill]]  ;;  %5273 = vst.msk [vmem:[#allocation0 + $0x78] sm:$0xff] %vm4927_vm6, %v10880_v5  }
 0x284   :  { %v6815_v2 = vld [vmem:[#allocation1 + $0x608] ss:$16 sm:%s15663_s0]   ;;  %s14102_s0 = smov 3  ;;  %v6873_v34 = vsel %vm3854_vm2, %v6871_v29, %v6868_v3  ;;  %s15670_s11 = sld [smem:[#allocation16_spill]] }
 0x285   :  { %v6820_v4 = vld [vmem:[#allocation1 + $0x608] ss:$16 sm:%s15664_s6]   ;;  %s14090_s6 = smov 192  ;;  %v6817_v36 = vsel %vm3846_vm0, %v6815_v2, %v6812_v61  ;;  %s15671_s19 = sld [smem:[#allocation101_spill]] }
 0x286   :  { %v6825_v7 = vld [vmem:[#allocation1 + $0x608] ss:$16 sm:%s15665_s21]   ;;  %v6822_v10 = vsel %vm3850_vm1, %v6820_v4, %v6817_v36  ;;  %v14192_v36 = vpop.permute.xlu2 %10892  ;;  %s7140_s21 = smov 48 }
 0x287   :  { %v6827_v13 = vsel %vm3854_vm2, %v6825_v7, %v6822_v10  ;;  %v6930_v50 = vld [vmem:[#allocation1 + $0x108] ss:$16 sm:%s13932_s3]   ;;  %s15672_s3 = sld [smem:[#allocation15_spill]]  ;;  %v14194_v7 = vpop.permute.xlu0 %10882 }
 0x288   :  { %v6835_v8 = vld [vmem:[#allocation1 + $0x88] ss:$16 sm:%s15666_s10]   ;;  %v11046_v20 = vpack.i.bf16 %v6827_v13, %v6804_v46  ;;  %v6932_v57 = vsel %vm3846_vm0, %v6930_v50, %v6927_v47  ;;  %v10854_v46 = vunpack.i.l.bf16 %v14032_v26  ;;  %v10855_v26 = vunpack.i.h.bf16 %v14032_v26  ;;  %v14203_v13 = vpop.permute.xlu1 %10887  ;;  %s7145_s10 = smov 192 }
 0x289   :  { %v6840_v16 = vsel %vm3846_vm0, %v6838_v9, %v6835_v8  ;;  %v6935_v54 = vld [vmem:[#allocation1 + $0x108] ss:$16 sm:%s13940_s22]   ;;  %s15673_s22 = sld [smem:[#allocation30_spill]] }
 0x28a   :  { %v6845_v21 = vsel %vm3850_vm1, %v6843_v48, %v6840_v16  ;;  %11047 = vrot.lane.b32.xlu0 %v11046_v20, %s11448_s13  ;;  %v6940_v52 = vld [vmem:[#allocation1 + $0x108] ss:$16 sm:%s13949_s7]   ;;  %v6937_v12 = vsel %vm3850_vm1, %v6935_v54, %v6932_v57  ;;  %11027 = vrot.lane.b32.xlu2 %v11026_v56, %s15617_s29  ;;  %s15674_s29 = sld [smem:[#allocation31_spill]]  ;;  %s14212_s7 = smov 192  ;;  %5020 = vst.msk [vmem:[#allocation0 + $0x8] sm:$0xff] %vm4927_vm6, %v10854_v46   ;;  %v10875_v46 = vunpack.i.h.bf16 %v14120_v19  ;;  %v10874_v19 = vunpack.i.l.bf16 %v14120_v19 }
 0x28b   :  { %v6850_v25 = vsel %vm3854_vm2, %v6848_v18, %v6845_v21  ;;  %v6950_v51 = vld [vmem:[#allocation1 + $0x308] ss:$16 sm:%s13958_s24]   ;;  %v6942_v0 = vsel %vm3854_vm2, %v6940_v52, %v6937_v12  ;;  %v10860_v21 = vunpack.i.h.bf16 %v14051_v39  ;;  %v10859_v39 = vunpack.i.l.bf16 %v14051_v39  ;;  %s14220_s24 = smov 3  ;;  %5043 = vst.msk [vmem:[#allocation0 + $0x28] sm:$0xff] %vm4927_vm6, %v10855_v26  }
 0x28c   :  { %v11051_v40 = vpack.i.bf16 %v6873_v34, %v6850_v25  ;;  %v6953_v58 = vld [vmem:[#allocation1 + $0x308] ss:$16 sm:%s13969_s26]   ;;  %s14227_s26 = smov 12  ;;  %v7111_v56 = vld [vmem:[#allocation1 + $0x7] ss:$16 sm:%s14220_s24]   ;;  %5227 = vst.msk [vmem:[#allocation0 + $0x38] sm:$0xff] %vm4927_vm6, %v10875_v46  }
 0x28d   :  { %v6958_v61 = vld [vmem:[#allocation1 + $0x308] ss:$16 sm:%s13975_s20]   ;;  %v6955_v1 = vsel %vm3846_vm0, %v6953_v58, %v6950_v51  ;;  %s7118_s20 = smov 48  ;;  %5089 = vst.msk [vmem:[#allocation0 + $0x68] sm:$0xff] %vm4927_vm6, %v10860_v21   ;;  %v7114_v12 = vld [vmem:[#allocation1 + $0x7] ss:$16 sm:%s14227_s26]  }
 0x28e   :  { %11052 = vrot.lane.b32.xlu1 %v11051_v40, %s11448_s13  ;;  %v6963_v62 = vld [vmem:[#allocation1 + $0x308] ss:$16 sm:%s15667_s12]   ;;  %v6960_v8 = vsel %vm3850_vm1, %v6958_v61, %v6955_v1  ;;  %5066 = vst.msk [vmem:[#allocation0 + $0x48] sm:$0xff] %vm4927_vm6, %v10859_v39   ;;  %v7119_v58 = vld [vmem:[#allocation1 + $0x7] ss:$16 sm:%s7118_s20]   ;;  %v10869_v61 = vunpack.i.l.bf16 %v14094_v6  ;;  %v7116_v28 = vsel %vm3846_vm0, %v7114_v12, %v7111_v56  ;;  %v10870_v6 = vunpack.i.h.bf16 %v14094_v6  ;;  %v14272_v26 = vpop.permute.xlu2 %10907  ;;  %s7209_s12 = smov 48 }
 0x28f   :  { %v6973_v2 = vld [vmem:[#allocation1 + $0x508] ss:$16 sm:%s15668_s14]   ;;  %v6965_v16 = vsel %vm3854_vm2, %v6963_v62, %v6960_v8  ;;  %5204 = vst.msk [vmem:[#allocation0 + $0x18] sm:$0xff] %vm4927_vm6, %v10874_v19   ;;  %s7224_s14 = smov 3  ;;  %s7273_s24 = smov 12  ;;  %v10890_v12 = vunpack.i.h.bf16 %v14203_v13  ;;  %v10889_v13 = vunpack.i.l.bf16 %v14203_v13 }
 0x290   :  { %v6976_v4 = vld [vmem:[#allocation1 + $0x508] ss:$16 sm:%s15669_s8]   ;;  %v11061_v22 = vpack.i.bf16 %v6965_v16, %v6942_v0  ;;  %v7124_v0 = vld [vmem:[#allocation1 + $0x7] ss:$16 sm:%s7123_s23]   ;;  %v14274_v16 = vpop.permute.xlu0 %10897  ;;  %5158 = vst.msk [vmem:[#allocation0 + $0x50] sm:$0xff] %vm4927_vm6, %v10869_v61   ;;  %s7227_s8 = smov 12 }
 0x291   :  { %v6981_v15 = vld [vmem:[#allocation1 + $0x508] ss:$16 sm:%s15670_s11]   ;;  %v6978_v10 = vsel %vm3846_vm0, %v6976_v4, %v6973_v2  ;;  %v7121_v2 = vsel %vm3850_vm1, %v7119_v58, %v7116_v28  ;;  %5181 = vst.msk [vmem:[#allocation0 + $0x70] sm:$0xff] %vm4927_vm6, %v10870_v6   ;;  %s7232_s11 = smov 48  ;;  %s7278_s26 = smov 48 }
 0x292   :  { %v6986_v9 = vld [vmem:[#allocation1 + $0x508] ss:$16 sm:%s15671_s19]   ;;  %v6983_v18 = vsel %vm3850_vm1, %v6981_v15, %v6978_v10  ;;  %11062 = vrot.lane.b32.xlu0 %v11061_v22, %s11448_s13  ;;  %v7126_v10 = vsel %vm3854_vm2, %v7124_v0, %v7121_v2  ;;  %s7247_s19 = smov 3  ;;  %v7279_v28 = vld [vmem:[#allocation1 + $0x687] ss:$16 sm:%s7278_s26]   ;;  %s7283_s20 = smov 192  ;;  %v10909_v2 = vunpack.i.l.bf16 %v14272_v26  ;;  %v10910_v26 = vunpack.i.h.bf16 %v14272_v26 }
 0x293   :  { %v6996_v48 = vld [vmem:[#allocation1 + $0x708] ss:$16 sm:%s15672_s3]   ;;  %v6988_v17 = vsel %vm3854_vm2, %v6986_v9, %v6983_v18  ;;  %s7250_s3 = smov 12  ;;  %s7018_s23 = smov 3  ;;  %5364 = vst.msk [vmem:[#allocation0 + $0x60] sm:$0xff] %vm5294_vm7, %v10890_v12  }
 0x294   :  { %v6999_v23 = vld [vmem:[#allocation1 + $0x708] ss:$16 sm:%s15673_s22]   ;;  %s7255_s22 = smov 48  ;;  %5341 = vst.msk [vmem:[#allocation0 + $0x40] sm:$0xff] %vm5294_vm7, %v10889_v13   ;;  %s7178_s26 = smov 3 }
 0x295   :  { %v7001_v14 = vsel %vm3846_vm0, %v6999_v23, %v6996_v48  ;;  %v7009_v20 = vld [vmem:[#allocation1 + $0x708] ss:$16 sm:%s14059_s5]   ;;  %s7132_s5 = smov 3  ;;  %v7141_v48 = vld [vmem:[#allocation1 + $0x207] ss:$16 sm:%s7140_s21]   ;;  %s7031_s21 = smov 192 }
 0x296   :  { %v7006_v24 = vsel %vm3850_vm1, %v7004_v44, %v7001_v14  ;;  %v6744_v25 = vld [vmem:[#allocation1 + $0x8] ss:$16 sm:%s15674_s29]   ;;  %v7133_v4 = vld [vmem:[#allocation1 + $0x207] ss:$16 sm:%s7132_s5]   ;;  %v10894_v44 = vunpack.i.l.bf16 %v14192_v36  ;;  %v10895_v36 = vunpack.i.h.bf16 %v14192_v36  ;;  %s7260_s29 = smov 192  ;;  %s7021_s5 = smov 12 }
 0x297   :  { %v6747_v27 = vld [vmem:[#allocation1 + $0x8] ss:$16 sm:%s14075_s27]   ;;  %v7011_v29 = vsel %vm3854_vm2, %v7009_v20, %v7006_v24  ;;  %s7135_s27 = smov 12  ;;  %v7146_v23 = vld [vmem:[#allocation1 + $0x207] ss:$16 sm:%s7145_s10]   ;;  %v14279_v20 = vpop.permute.xlu1 %10902  ;;  %s7041_s10 = smov 3 }
 0x298   :  { %v6749_v45 = vsel %vm3846_vm0, %v6747_v27, %v6744_v25  ;;  %v6752_v30 = vld [vmem:[#allocation1 + $0x8] ss:$16 sm:%s14083_s25]   ;;  %v11066_v31 = vpack.i.bf16 %v7011_v29, %v6988_v17  ;;  %v7136_v15 = vld [vmem:[#allocation1 + $0x207] ss:$16 sm:%s7135_s27]   ;;  %s6880_s25 = smov 3  ;;  %5387 = vst.msk [vmem:[#allocation0 + $0x8] sm:$0xff] %vm5294_vm7, %v10894_v44  }
 0x299   :  { %v6757_v3 = vld [vmem:[#allocation1 + $0x8] ss:$16 sm:%s14090_s6]   ;;  %v6754_v32 = vsel %vm3850_vm1, %v6752_v30, %v6749_v45  ;;  %v7138_v9 = vsel %vm3846_vm0, %v7136_v15, %v7133_v4  ;;  %s6883_s6 = smov 12  ;;  %5410 = vst.msk [vmem:[#allocation0 + $0x28] sm:$0xff] %vm5294_vm7, %v10895_v36   ;;  %v14313_v4 = vpop.permute.xlu2 %10922  ;;  %v14315_v15 = vpop.permute.xlu0 %10912  ;;  %s7026_s27 = smov 48 }
 0x29a   :  { %v6766_v33 = vld [vmem:[#allocation1 + $0x208] ss:$16 sm:%s14102_s0]   ;;  %v6759_v63 = vsel %vm3854_vm2, %v6757_v3, %v6754_v32  ;;  %11067 = vrot.lane.b32.xlu1 %v11066_v31, %s11448_s13  ;;  %v7143_v18 = vsel %vm3850_vm1, %v7141_v48, %v7138_v9  ;;  %s6888_s0 = smov 48  ;;  %5525 = vst.msk [vmem:[#allocation0 + $0x50] sm:$0xff] %vm5294_vm7, %v10909_v2  }
 0x29b   :  { %v6769_v34 = vld [vmem:[#allocation1 + $0x208] ss:$16 sm:%s14110_s16]   ;;  %v7148_v21 = vsel %vm3854_vm2, %v7146_v23, %v7143_v18  ;;  %s6893_s16 = smov 192  ;;  %5548 = vst.msk [vmem:[#allocation0 + $0x70] sm:$0xff] %vm5294_vm7, %v10910_v26  }
 0x29c   :  { %v6771_v35 = vsel %vm3846_vm0, %v6769_v34, %v6766_v33  ;;  %v6774_v37 = vld [vmem:[#allocation1 + $0x208] ss:$16 sm:%s14118_s30]   ;;  %v11081_v24 = vpack.i.bf16 %v7148_v21, %v7126_v10  ;;  %s6903_s30 = smov 3 }
 0x29d   :  { %v6779_v38 = vld [vmem:[#allocation1 + $0x208] ss:$16 sm:%s14127_s17]   ;;  %v6776_v40 = vsel %vm3850_vm1, %v6774_v37, %v6771_v35  ;;  %s6906_s17 = smov 12  ;;  %v7210_v37 = vld [vmem:[#allocation1 + $0x87] ss:$16 sm:%s7209_s12]   ;;  %s7375_s12 = smov 192 }
 0x29e   :  { %v7065_v53 = vld [vmem:[#allocation1 + $0x588] ss:$16 sm:%s14135_s28]   ;;  %v6781_v43 = vsel %vm3854_vm2, %v6779_v38, %v6776_v40  ;;  %s6911_s28 = smov 48 }
 0x29f   :  { %v7068_v41 = vld [vmem:[#allocation1 + $0x588] ss:$16 sm:%s14143_s4]   ;;  %v11041_v50 = vpack.i.bf16 %v6781_v43, %v6759_v63  ;;  %s11449_s4 = smov 56   ;;  %v7228_v43 = vld [vmem:[#allocation1 + $0x287] ss:$16 sm:%s7227_s8]   ;;  %v14320_v9 = vpop.permute.xlu1 %10917  ;;  %s7398_s8 = smov 192 }
 0x2a0   :  { %v7070_v11 = vsel %vm3846_vm0, %v7068_v41, %v7065_v53  ;;  %v7073_v60 = vld [vmem:[#allocation1 + $0x588] ss:$16 sm:%s14151_s18]   ;;  %s6916_s18 = smov 192  ;;  %v7225_v41 = vld [vmem:[#allocation1 + $0x287] ss:$16 sm:%s7224_s14]   ;;  %s7388_s14 = smov 12 }
 0x2a1   :  { %v7078_v47 = vld [vmem:[#allocation1 + $0x588] ss:$16 sm:%s14157_s15]   ;;  %v7075_v54 = vsel %vm3850_vm1, %v7073_v60, %v7070_v11  ;;  %11042 = vrot.lane.b32.xlu2 %v11041_v50, %s11448_s13  ;;  %s7201_s15 = smov 3  ;;  %v7233_v11 = vld [vmem:[#allocation1 + $0x287] ss:$16 sm:%s7232_s11]   ;;  %s7408_s11 = smov 3  ;;  %v14352_v12 = vpop.permute.xlu0 %10927 }
 0x2a2   :  { %v7088_v49 = vld [vmem:[#allocation1 + $0x788] ss:$16 sm:%s14164_s1]   ;;  %v7080_v51 = vsel %vm3854_vm2, %v7078_v47, %v7075_v54  ;;  %11082 = vrot.lane.b32.xlu1 %v11081_v24, %s11449_s4  ;;  %v7202_v34 = vld [vmem:[#allocation1 + $0x87] ss:$16 sm:%s7201_s15]   ;;  %s7204_s1 = smov 12  ;;  %v7230_v47 = vsel %vm3846_vm0, %v7228_v43, %v7225_v41  ;;  %v10884_v54 = vunpack.i.l.bf16 %v14194_v7  ;;  %v10885_v7 = vunpack.i.h.bf16 %v14194_v7  ;;  %s7365_s15 = smov 12 }
 0x2a3   :  { %v7091_v55 = vld [vmem:[#allocation1 + $0x788] ss:$16 sm:%s14171_s2]   ;;  %v7205_v35 = vld [vmem:[#allocation1 + $0x87] ss:$16 sm:%s7204_s1]   ;;  %s7214_s2 = smov 192  ;;  %s7370_s1 = smov 48 }
 0x2a4   :  { %v7096_v57 = vld [vmem:[#allocation1 + $0x788] ss:$16 sm:%s14179_s9]   ;;  %v7093_v59 = vsel %vm3846_vm0, %v7091_v55, %v7088_v49  ;;  %v7207_v40 = vsel %vm3846_vm0, %v7205_v35, %v7202_v34  ;;  %v7215_v53 = vld [vmem:[#allocation1 + $0x87] ss:$16 sm:%s7214_s2]   ;;  %s7237_s9 = smov 192  ;;  %v7235_v55 = vsel %vm3850_vm1, %v7233_v11, %v7230_v47  ;;  %5295 = vst.msk [vmem:[#allocation0] sm:$0xff] %vm5294_vm7, %v10884_v54   ;;  %v10899_v11 = vunpack.i.l.bf16 %v14274_v16 }
 0x2a5   :  { %v7101_v52 = vld [vmem:[#allocation1 + $0x788] ss:$16 sm:%s14212_s7]   ;;  %v7098_v62 = vsel %vm3850_vm1, %v7096_v57, %v7093_v59  ;;  %v7212_v42 = vsel %vm3850_vm1, %v7210_v37, %v7207_v40  ;;  %v7238_v49 = vld [vmem:[#allocation1 + $0x287] ss:$16 sm:%s7237_s9]   ;;  %s7270_s7 = smov 3  ;;  %5318 = vst.msk [vmem:[#allocation0 + $0x20] sm:$0xff] %vm5294_vm7, %v10885_v7   ;;  %v10900_v16 = vunpack.i.h.bf16 %v14274_v16 }
 0x2a6   :  { %v7103_v1 = vsel %vm3854_vm2, %v7101_v52, %v7098_v62  ;;  %v6881_v14 = vld [vmem:[#allocation1 + $0x488] ss:$16 sm:%s6880_s25]   ;;  %v7217_v60 = vsel %vm3854_vm2, %v7215_v53, %v7212_v42  ;;  %v7248_v50 = vld [vmem:[#allocation1 + $0x487] ss:$16 sm:%s7247_s19]   ;;  %v7240_v5 = vsel %vm3854_vm2, %v7238_v49, %v7235_v55  ;;  %s7044_s25 = smov 12  ;;  %s7385_s2 = smov 3 }
 0x2a7   :  { %v11076_v8 = vpack.i.bf16 %v7103_v1, %v7080_v51  ;;  %v6884_v22 = vld [vmem:[#allocation1 + $0x488] ss:$16 sm:%s6883_s6]   ;;  %v7251_v57 = vld [vmem:[#allocation1 + $0x487] ss:$16 sm:%s7250_s3]   ;;  %v11091_v58 = vpack.i.bf16 %v7240_v5, %v7217_v60  ;;  %s7049_s6 = smov 48  ;;  %s7411_s9 = smov 12 }
 0x2a8   :  { %v6889_v17 = vld [vmem:[#allocation1 + $0x488] ss:$16 sm:%s6888_s0]   ;;  %v6886_v39 = vsel %vm3846_vm0, %v6884_v22, %v6881_v14  ;;  %v7256_v52 = vld [vmem:[#allocation1 + $0x487] ss:$16 sm:%s7255_s22]   ;;  %v7253_v51 = vsel %vm3846_vm0, %v7251_v57, %v7248_v50  ;;  %s7054_s0 = smov 192  ;;  %s7416_s19 = smov 48 }
 0x2a9   :  { %11077 = vrot.lane.b32.xlu0 %v11076_v8, %s11448_s13  ;;  %v6894_v25 = vld [vmem:[#allocation1 + $0x488] ss:$16 sm:%s6893_s16]   ;;  %v6891_v27 = vsel %vm3850_vm1, %v6889_v17, %v6886_v39  ;;  %v7261_v59 = vld [vmem:[#allocation1 + $0x487] ss:$16 sm:%s7260_s29]   ;;  %v7258_v61 = vsel %vm3850_vm1, %v7256_v52, %v7253_v51  ;;  %s7339_s16 = smov 3  ;;  %s7421_s3 = smov 192  ;;  %v10905_v52 = vunpack.i.h.bf16 %v14279_v20  ;;  %v10904_v20 = vunpack.i.l.bf16 %v14279_v20 }
 0x2aa   :  { %v6904_v29 = vld [vmem:[#allocation1 + $0x688] ss:$16 sm:%s6903_s30]   ;;  %v6896_v30 = vsel %vm3854_vm2, %v6894_v25, %v6891_v27  ;;  %v7271_v56 = vld [vmem:[#allocation1 + $0x687] ss:$16 sm:%s7270_s7]   ;;  %v7263_v0 = vsel %vm3854_vm2, %v7261_v59, %v7258_v61  ;;  %s7342_s30 = smov 12  ;;  %s7155_s22 = smov 3 }
 0x2ab   :  { %v6907_v45 = vld [vmem:[#allocation1 + $0x688] ss:$16 sm:%s6906_s17]   ;;  %v7274_v62 = vld [vmem:[#allocation1 + $0x687] ss:$16 sm:%s7273_s24]   ;;  %s7347_s17 = smov 48  ;;  %5433 = vst.msk [vmem:[#allocation0 + $0x48] sm:$0xff] %vm5294_vm7, %v10899_v11  }
 0x2ac   :  { %v6909_v3 = vsel %vm3846_vm0, %v6907_v45, %v6904_v29  ;;  %v6912_v31 = vld [vmem:[#allocation1 + $0x688] ss:$16 sm:%s6911_s28]   ;;  %v7276_v6 = vsel %vm3846_vm0, %v7274_v62, %v7271_v56  ;;  %v7284_v1 = vld [vmem:[#allocation1 + $0x687] ss:$16 sm:%s7283_s20]   ;;  %s7352_s28 = smov 192  ;;  %v14350_v56 = vpop.permute.xlu2 %10937  ;;  %s7158_s29 = smov 12  ;;  %v10924_v62 = vunpack.i.l.bf16 %v14313_v4  ;;  %v10925_v4 = vunpack.i.h.bf16 %v14313_v4 }
 0x2ad   :  { %v6914_v32 = vsel %vm3850_vm1, %v6912_v31, %v6909_v3  ;;  %v6917_v33 = vld [vmem:[#allocation1 + $0x688] ss:$16 sm:%s6916_s18]   ;;  %v7281_v46 = vsel %vm3850_vm1, %v7279_v28, %v7276_v6  ;;  %v7340_v29 = vld [vmem:[#allocation1 + $0x507] ss:$16 sm:%s7339_s16]   ;;  %s7362_s18 = smov 3  ;;  %s7163_s7 = smov 48  ;;  %v14358_v28 = vpop.permute.xlu1 %10932 }
 0x2ae   :  { %v6919_v63 = vsel %vm3854_vm2, %v6917_v33, %v6914_v32  ;;  %v7019_v8 = vld [vmem:[#allocation1 + $0x188] ss:$16 sm:%s7018_s23]   ;;  %v7286_v48 = vsel %vm3854_vm2, %v7284_v1, %v7281_v46  ;;  %v7343_v45 = vld [vmem:[#allocation1 + $0x507] ss:$16 sm:%s7342_s30]   ;;  %5456 = vst.msk [vmem:[#allocation0 + $0x68] sm:$0xff] %vm5294_vm7, %v10900_v16   ;;  %s7168_s24 = smov 192 }
 0x2af   :  { %v11056_v38 = vpack.i.bf16 %v6919_v63, %v6896_v30  ;;  %v7022_v10 = vld [vmem:[#allocation1 + $0x188] ss:$16 sm:%s7021_s5]   ;;  %v11096_v18 = vpack.i.bf16 %v7286_v48, %v7263_v0  ;;  %v7345_v3 = vsel %vm3846_vm0, %v7343_v45, %v7340_v29  ;;  %v7348_v31 = vld [vmem:[#allocation1 + $0x507] ss:$16 sm:%s7347_s17]   ;;  %5502 = vst.msk [vmem:[#allocation0 + $0x30] sm:$0xff] %vm5294_vm7, %v10905_v52   ;;  %s7181_s20 = smov 12 }
 0x2b0   :  { %v7024_v23 = vsel %vm3846_vm0, %v7022_v10, %v7019_v8  ;;  %v7027_v19 = vld [vmem:[#allocation1 + $0x188] ss:$16 sm:%s7026_s27]   ;;  %v7353_v32 = vld [vmem:[#allocation1 + $0x507] ss:$16 sm:%s7352_s28]   ;;  %v7350_v34 = vsel %vm3850_vm1, %v7348_v31, %v7345_v3  ;;  %5479 = vst.msk [vmem:[#allocation0 + $0x10] sm:$0xff] %vm5294_vm7, %v10904_v20   ;;  %s7186_s23 = smov 48 }
 0x2b1   :  { %11057 = vrot.lane.b32.xlu2 %v11056_v38, %s11448_s13  ;;  %11092 = vrot.lane.b32.xlu0 %v11091_v58, %s11449_s4  ;;  %v7029_v14 = vsel %vm3850_vm1, %v7027_v19, %v7024_v23  ;;  %v7032_v44 = vld [vmem:[#allocation1 + $0x188] ss:$16 sm:%s7031_s21]   ;;  %v7363_v63 = vld [vmem:[#allocation1 + $0x707] ss:$16 sm:%s7362_s18]   ;;  %v7355_v37 = vsel %vm3854_vm2, %v7353_v32, %v7350_v34  ;;  %s7191_s5 = smov 192  ;;  %s7477_s27 = smov 3  ;;  %v10914_v34 = vunpack.i.l.bf16 %v14315_v15  ;;  %v10915_v15 = vunpack.i.h.bf16 %v14315_v15 }
 0x2b2   :  { %v7042_v21 = vld [vmem:[#allocation1 + $0x388] ss:$16 sm:%s7041_s10]   ;;  %11097 = vrot.lane.b32.xlu1 %v11096_v18, %s11449_s4  ;;  %v7034_v17 = vsel %vm3854_vm2, %v7032_v44, %v7029_v14  ;;  %v7366_v35 = vld [vmem:[#allocation1 + $0x707] ss:$16 sm:%s7365_s15]   ;;  %5662 = vst.msk [vmem:[#allocation0] sm:$0xff] %vm5661_vm8, %v10924_v62   ;;  %s7480_s21 = smov 12 }
 0x2b3   :  { %v7045_v22 = vld [vmem:[#allocation1 + $0x388] ss:$16 sm:%s7044_s25]   ;;  %v7368_v38 = vsel %vm3846_vm0, %v7366_v35, %v7363_v63  ;;  %v7371_v40 = vld [vmem:[#allocation1 + $0x707] ss:$16 sm:%s7370_s1]   ;;  %s7485_s10 = smov 48  ;;  %s7490_s25 = smov 192 }
 0x2b4   :  { %v7047_v24 = vsel %vm3846_vm0, %v7045_v22, %v7042_v21  ;;  %v7050_v39 = vld [vmem:[#allocation1 + $0x388] ss:$16 sm:%s7049_s6]   ;;  %v7376_v53 = vld [vmem:[#allocation1 + $0x707] ss:$16 sm:%s7375_s12]   ;;  %v7373_v41 = vsel %vm3850_vm1, %v7371_v40, %v7368_v38  ;;  %v7478_v21 = vld [vmem:[#allocation1 + $0x6] ss:$16 sm:%s7477_s27]  }
 0x2b5   :  { %v7055_v25 = vld [vmem:[#allocation1 + $0x388] ss:$16 sm:%s7054_s0]   ;;  %v7052_v27 = vsel %vm3850_vm1, %v7050_v39, %v7047_v24  ;;  %v7386_v42 = vld [vmem:[#allocation1 + $0x187] ss:$16 sm:%s7385_s2]   ;;  %v7378_v36 = vsel %vm3854_vm2, %v7376_v53, %v7373_v41  ;;  %v7486_v24 = vld [vmem:[#allocation1 + $0x6] ss:$16 sm:%s7485_s10]   ;;  %v10919_v41 = vunpack.i.l.bf16 %v14320_v9  ;;  %v10920_v9 = vunpack.i.h.bf16 %v14320_v9  ;;  %v14397_v52 = vpop.permute.xlu1 %10947 }
 0x2b6   :  { %v7057_v30 = vsel %vm3854_vm2, %v7055_v25, %v7052_v27  ;;  %v7389_v43 = vld [vmem:[#allocation1 + $0x187] ss:$16 sm:%s7388_s14]   ;;  %v11106_v50 = vpack.i.bf16 %v7378_v36, %v7355_v37  ;;  %v7491_v27 = vld [vmem:[#allocation1 + $0x6] ss:$16 sm:%s7490_s25]   ;;  %s7499_s6 = smov 3  ;;  %s7502_s0 = smov 12 }
 0x2b7   :  { %v11071_v33 = vpack.i.bf16 %v7057_v30, %v7034_v17  ;;  %v7391_v60 = vsel %vm3846_vm0, %v7389_v43, %v7386_v42  ;;  %v7399_v49 = vld [vmem:[#allocation1 + $0x187] ss:$16 sm:%s7398_s8]   ;;  %v7481_v17 = vld [vmem:[#allocation1 + $0x6] ss:$16 sm:%s7480_s21]   ;;  %5685 = vst.msk [vmem:[#allocation0 + $0x20] sm:$0xff] %vm5661_vm8, %v10925_v4   ;;  %s7507_s16 = smov 48 }
 0x2b8   :  { %v7409_v55 = vld [vmem:[#allocation1 + $0x387] ss:$16 sm:%s7408_s11]   ;;  %v7483_v25 = vsel %vm3846_vm0, %v7481_v17, %v7478_v21  ;;  %v7500_v45 = vld [vmem:[#allocation1 + $0x206] ss:$16 sm:%s7499_s6]   ;;  %s7512_s30 = smov 192  ;;  %s7522_s17 = smov 3 }
 0x2b9   :  { %11072 = vrot.lane.b32.xlu2 %v11071_v33, %s11448_s13  ;;  %s7393_s13 = smov 48  ;;  %v7412_v57 = vld [vmem:[#allocation1 + $0x387] ss:$16 sm:%s7411_s9]   ;;  %11107 = vrot.lane.b32.xlu0 %v11106_v50, %s11449_s4  ;;  %v7488_v29 = vsel %vm3850_vm1, %v7486_v24, %v7483_v25  ;;  %v7503_v30 = vld [vmem:[#allocation1 + $0x206] ss:$16 sm:%s7502_s0]   ;;  %s7525_s28 = smov 12  ;;  %v14390_v50 = vpop.permute.xlu2 %10952  ;;  %v10939_v25 = vunpack.i.l.bf16 %v14350_v56  ;;  %v10940_v56 = vunpack.i.h.bf16 %v14350_v56 }
 0x2ba   :  { %v7394_v47 = vld [vmem:[#allocation1 + $0x187] ss:$16 sm:%s7393_s13]   ;;  %v7414_v5 = vsel %vm3846_vm0, %v7412_v57, %v7409_v55  ;;  %v7493_v3 = vsel %vm3854_vm2, %v7491_v27, %v7488_v29  ;;  %v7505_v31 = vsel %vm3846_vm0, %v7503_v30, %v7500_v45  ;;  %v7508_v32 = vld [vmem:[#allocation1 + $0x206] ss:$16 sm:%s7507_s16]   ;;  %s7530_s18 = smov 48  ;;  %s7535_s15 = smov 192 }
 0x2bb   :  { %v7396_v54 = vsel %vm3850_vm1, %v7394_v47, %v7391_v60  ;;  %v7417_v51 = vld [vmem:[#allocation1 + $0x387] ss:$16 sm:%s7416_s19]   ;;  %v7513_v33 = vld [vmem:[#allocation1 + $0x206] ss:$16 sm:%s7512_s30]   ;;  %v7510_v63 = vsel %vm3850_vm1, %v7508_v32, %v7505_v31  ;;  %s7545_s1 = smov 3  ;;  %s7548_s12 = smov 12 }
 0x2bc   :  { %v7401_v7 = vsel %vm3854_vm2, %v7399_v49, %v7396_v54  ;;  %v7422_v59 = vld [vmem:[#allocation1 + $0x387] ss:$16 sm:%s7421_s3]   ;;  %v7419_v58 = vsel %vm3850_vm1, %v7417_v51, %v7414_v5  ;;  %v7523_v35 = vld [vmem:[#allocation1 + $0x406] ss:$16 sm:%s7522_s17]   ;;  %v7515_v38 = vsel %vm3854_vm2, %v7513_v33, %v7510_v63  ;;  %s7553_s2 = smov 48  ;;  %s7558_s14 = smov 192  ;;  %v14392_v54 = vpop.permute.xlu0 %10942  ;;  %v10929_v33 = vunpack.i.l.bf16 %v14352_v12 }
 0x2bd   :  { %v7156_v61 = vld [vmem:[#allocation1 + $0x407] ss:$16 sm:%s7155_s22]   ;;  %v7424_v13 = vsel %vm3854_vm2, %v7422_v59, %v7419_v58  ;;  %v7526_v37 = vld [vmem:[#allocation1 + $0x406] ss:$16 sm:%s7525_s28]   ;;  %v11121_v42 = vpack.i.bf16 %v7515_v38, %v7493_v3  ;;  %5571 = vst.msk [vmem:[#allocation0 + $0x18] sm:$0xff] %vm5294_vm7, %v10914_v34   ;;  %s7293_s13 = smov 3  ;;  %v10930_v12 = vunpack.i.h.bf16 %v14352_v12 }
 0x2be   :  { %v7159_v0 = vld [vmem:[#allocation1 + $0x407] ss:$16 sm:%s7158_s29]   ;;  %v11111_v1 = vpack.i.bf16 %v7424_v13, %v7401_v7  ;;  %v7528_v40 = vsel %vm3846_vm0, %v7526_v37, %v7523_v35  ;;  %v7531_v53 = vld [vmem:[#allocation1 + $0x406] ss:$16 sm:%s7530_s18]   ;;  %s11450_s8 = smov 48   ;;  %5594 = vst.msk [vmem:[#allocation0 + $0x38] sm:$0xff] %vm5294_vm7, %v10915_v15  }
 0x2bf   :  { %v7164_v6 = vld [vmem:[#allocation1 + $0x407] ss:$16 sm:%s7163_s7]   ;;  %v7161_v2 = vsel %vm3846_vm0, %v7159_v0, %v7156_v61  ;;  %v7536_v26 = vld [vmem:[#allocation1 + $0x406] ss:$16 sm:%s7535_s15]   ;;  %v7533_v43 = vsel %vm3850_vm1, %v7531_v53, %v7528_v40  ;;  %s7296_s11 = smov 12  ;;  %s7301_s9 = smov 48 }
 0x2c0   :  { %v7169_v46 = vld [vmem:[#allocation1 + $0x407] ss:$16 sm:%s7168_s24]   ;;  %v7166_v8 = vsel %vm3850_vm1, %v7164_v6, %v7161_v2  ;;  %11112 = vrot.lane.b32.xlu1 %v11111_v1, %s11449_s4  ;;  %v7546_v11 = vld [vmem:[#allocation1 + $0x606] ss:$16 sm:%s7545_s1]   ;;  %v7538_v60 = vsel %vm3854_vm2, %v7536_v26, %v7533_v43  ;;  %5617 = vst.msk [vmem:[#allocation0 + $0x58] sm:$0xff] %vm5294_vm7, %v10919_v41   ;;  %s7306_s19 = smov 192  ;;  %v10934_v26 = vunpack.i.l.bf16 %v14358_v28  ;;  %v10935_v28 = vunpack.i.h.bf16 %v14358_v28 }
 0x2c1   :  { %v7179_v10 = vld [vmem:[#allocation1 + $0x607] ss:$16 sm:%s7178_s26]   ;;  %v7171_v23 = vsel %vm3854_vm2, %v7169_v46, %v7166_v8  ;;  %v7549_v36 = vld [vmem:[#allocation1 + $0x606] ss:$16 sm:%s7548_s12]   ;;  %11122 = vrot.lane.b32.xlu0 %v11121_v42, %s11450_s8  ;;  %5640 = vst.msk [vmem:[#allocation0 + $0x78] sm:$0xff] %vm5294_vm7, %v10920_v9   ;;  %s7316_s3 = smov 3  ;;  %v14430_v43 = vpop.permute.xlu2 %10967 }
 0x2c2   :  { %v7182_v48 = vld [vmem:[#allocation1 + $0x607] ss:$16 sm:%s7181_s20]   ;;  %v7551_v47 = vsel %vm3846_vm0, %v7549_v36, %v7546_v11  ;;  %v7554_v49 = vld [vmem:[#allocation1 + $0x606] ss:$16 sm:%s7553_s2]   ;;  %s7319_s22 = smov 12  ;;  %s7324_s29 = smov 48 }
 0x2c3   :  { %v7184_v19 = vsel %vm3846_vm0, %v7182_v48, %v7179_v10  ;;  %v7187_v18 = vld [vmem:[#allocation1 + $0x607] ss:$16 sm:%s7186_s23]   ;;  %v7559_v16 = vld [vmem:[#allocation1 + $0x606] ss:$16 sm:%s7558_s14]   ;;  %v7556_v55 = vsel %vm3850_vm1, %v7554_v49, %v7551_v47  ;;  %s7329_s7 = smov 192  ;;  %s7614_s24 = smov 3  ;;  %v14436_v47 = vpop.permute.xlu1 %10962 }
 0x2c4   :  { %v7189_v14 = vsel %vm3850_vm1, %v7187_v18, %v7184_v19  ;;  %v7192_v44 = vld [vmem:[#allocation1 + $0x607] ss:$16 sm:%s7191_s5]   ;;  %v7561_v7 = vsel %vm3854_vm2, %v7559_v16, %v7556_v55  ;;  %s7617_s26 = smov 12  ;;  %v7615_v8 = vld [vmem:[#allocation1 + $0x486] ss:$16 sm:%s7614_s24]   ;;  %s7622_s20 = smov 48  ;;  %v14432_v11 = vpop.permute.xlu0 %10957 }
 0x2c5   :  { %v7194_v22 = vsel %vm3854_vm2, %v7192_v44, %v7189_v14  ;;  %v7294_v57 = vld [vmem:[#allocation1 + $0x107] ss:$16 sm:%s7293_s13]   ;;  %v11126_v59 = vpack.i.bf16 %v7561_v7, %v7538_v60  ;;  %v7618_v10 = vld [vmem:[#allocation1 + $0x486] ss:$16 sm:%s7617_s26]   ;;  %s7627_s23 = smov 192  ;;  %s7637_s5 = smov 3 }
 0x2c6   :  { %v11086_v39 = vpack.i.bf16 %v7194_v22, %v7171_v23  ;;  %v7297_v5 = vld [vmem:[#allocation1 + $0x107] ss:$16 sm:%s7296_s11]   ;;  %v7620_v4 = vsel %vm3846_vm0, %v7618_v10, %v7615_v8  ;;  %v7623_v23 = vld [vmem:[#allocation1 + $0x486] ss:$16 sm:%s7622_s20]   ;;  %s7640_s27 = smov 12  ;;  %s7645_s21 = smov 48 }
 0x2c7   :  { %v7302_v51 = vld [vmem:[#allocation1 + $0x107] ss:$16 sm:%s7301_s9]   ;;  %v7299_v20 = vsel %vm3846_vm0, %v7297_v5, %v7294_v57  ;;  %v7628_v19 = vld [vmem:[#allocation1 + $0x486] ss:$16 sm:%s7627_s23]   ;;  %v7625_v14 = vsel %vm3850_vm1, %v7623_v23, %v7620_v4  ;;  %s7650_s10 = smov 192  ;;  %s7660_s25 = smov 3  ;;  %v10954_v23 = vunpack.i.l.bf16 %v14390_v50  ;;  %v10955_v50 = vunpack.i.h.bf16 %v14390_v50 }
 0x2c8   :  { %11087 = vrot.lane.b32.xlu2 %v11086_v39, %s11449_s4  ;;  %v7307_v58 = vld [vmem:[#allocation1 + $0x107] ss:$16 sm:%s7306_s19]   ;;  %v7304_v61 = vsel %vm3850_vm1, %v7302_v51, %v7299_v20  ;;  %11127 = vrot.lane.b32.xlu1 %v11126_v59, %s11450_s8  ;;  %v7638_v44 = vld [vmem:[#allocation1 + $0x686] ss:$16 sm:%s7637_s5]   ;;  %v7630_v22 = vsel %vm3854_vm2, %v7628_v19, %v7625_v14  ;;  %s7663_s6 = smov 12  ;;  %s7668_s0 = smov 48 }
 0x2c9   :  { %v7317_v62 = vld [vmem:[#allocation1 + $0x307] ss:$16 sm:%s7316_s3]   ;;  %v7309_v0 = vsel %vm3854_vm2, %v7307_v58, %v7304_v61  ;;  %v7641_v21 = vld [vmem:[#allocation1 + $0x686] ss:$16 sm:%s7640_s27]   ;;  %s7673_s16 = smov 192  ;;  %s7683_s30 = smov 3 }
 0x2ca   :  { %v7320_v13 = vld [vmem:[#allocation1 + $0x307] ss:$16 sm:%s7319_s22]   ;;  %v7643_v17 = vsel %vm3846_vm0, %v7641_v21, %v7638_v44  ;;  %v7646_v24 = vld [vmem:[#allocation1 + $0x686] ss:$16 sm:%s7645_s21]   ;;  %s7686_s17 = smov 12  ;;  %s7691_s28 = smov 48 }
 0x2cb   :  { %v7322_v6 = vsel %vm3846_vm0, %v7320_v13, %v7317_v62  ;;  %v7325_v1 = vld [vmem:[#allocation1 + $0x307] ss:$16 sm:%s7324_s29]   ;;  %v7651_v39 = vld [vmem:[#allocation1 + $0x686] ss:$16 sm:%s7650_s10]   ;;  %v7648_v27 = vsel %vm3850_vm1, %v7646_v24, %v7643_v17  ;;  %s7696_s18 = smov 192  ;;  %5800 = vst.msk [vmem:[#allocation0 + $0x48] sm:$0xff] %vm5661_vm8, %v10939_v25   ;;  %v10944_v24 = vunpack.i.l.bf16 %v14392_v54  ;;  %v10945_v54 = vunpack.i.h.bf16 %v14392_v54 }
 0x2cc   :  { %v7330_v2 = vld [vmem:[#allocation1 + $0x307] ss:$16 sm:%s7329_s7]   ;;  %v7327_v46 = vsel %vm3850_vm1, %v7325_v1, %v7322_v6  ;;  %v7661_v29 = vld [vmem:[#allocation1 + $0x106] ss:$16 sm:%s7660_s25]   ;;  %v7653_v30 = vsel %vm3854_vm2, %v7651_v39, %v7648_v27  ;;  %s7752_s15 = smov 3  ;;  %5823 = vst.msk [vmem:[#allocation0 + $0x68] sm:$0xff] %vm5661_vm8, %v10940_v56  }
 0x2cd   :  { %v7332_v48 = vsel %vm3854_vm2, %v7330_v2, %v7327_v46  ;;  %v7664_v45 = vld [vmem:[#allocation1 + $0x106] ss:$16 sm:%s7663_s6]   ;;  %v11136_v34 = vpack.i.bf16 %v7653_v30, %v7630_v22  ;;  %s7755_s1 = smov 12  ;;  %s7760_s12 = smov 48  ;;  %5708 = vst.msk [vmem:[#allocation0 + $0x40] sm:$0xff] %vm5661_vm8, %v10929_v33  }
 0x2ce   :  { %v11101_v18 = vpack.i.bf16 %v7332_v48, %v7309_v0  ;;  %v7666_v3 = vsel %vm3846_vm0, %v7664_v45, %v7661_v29  ;;  %v7669_v31 = vld [vmem:[#allocation1 + $0x106] ss:$16 sm:%s7668_s0]   ;;  %s7765_s2 = smov 192  ;;  %5731 = vst.msk [vmem:[#allocation0 + $0x60] sm:$0xff] %vm5661_vm8, %v10930_v12   ;;  %s7775_s14 = smov 3 }
 0x2cf   :  { %v7674_v32 = vld [vmem:[#allocation1 + $0x106] ss:$16 sm:%s7673_s16]   ;;  %v7671_v63 = vsel %vm3850_vm1, %v7669_v31, %v7666_v3  ;;  %11137 = vrot.lane.b32.xlu0 %v11136_v34, %s11450_s8  ;;  %s7778_s13 = smov 12  ;;  %5754 = vst.msk [vmem:[#allocation0 + $0x8] sm:$0xff] %vm5661_vm8, %v10934_v26   ;;  %s7783_s11 = smov 48  ;;  %v10949_v31 = vunpack.i.l.bf16 %v14397_v52  ;;  %v10950_v52 = vunpack.i.h.bf16 %v14397_v52 }
 0x2d0   :  { %11102 = vrot.lane.b32.xlu2 %v11101_v18, %s11449_s4  ;;  %v7684_v35 = vld [vmem:[#allocation1 + $0x306] ss:$16 sm:%s7683_s30]   ;;  %v7676_v15 = vsel %vm3854_vm2, %v7674_v32, %v7671_v63  ;;  %5777 = vst.msk [vmem:[#allocation0 + $0x28] sm:$0xff] %vm5661_vm8, %v10935_v28   ;;  %s7788_s9 = smov 192  ;;  %s7798_s19 = smov 3  ;;  %v14467_v63 = vpop.permute.xlu2 %10982 }
 0x2d1   :  { %v7687_v37 = vld [vmem:[#allocation1 + $0x306] ss:$16 sm:%s7686_s17]   ;;  %s7801_s3 = smov 12  ;;  %s7806_s22 = smov 48  ;;  %5938 = vst.msk [vmem:[#allocation0 + $0x18] sm:$0xff] %vm5661_vm8, %v10954_v23  }
 0x2d2   :  { %v7689_v38 = vsel %vm3846_vm0, %v7687_v37, %v7684_v35  ;;  %v7692_v40 = vld [vmem:[#allocation1 + $0x306] ss:$16 sm:%s7691_s28]   ;;  %s7811_s29 = smov 192  ;;  %s7821_s7 = smov 3  ;;  %5961 = vst.msk [vmem:[#allocation0 + $0x38] sm:$0xff] %vm5661_vm8, %v10955_v50   ;;  %v14469_v35 = vpop.permute.xlu0 %10972 }
 0x2d3   :  { %v7697_v53 = vld [vmem:[#allocation1 + $0x306] ss:$16 sm:%s7696_s18]   ;;  %v7694_v41 = vsel %vm3850_vm1, %v7692_v40, %v7689_v38  ;;  %s7824_s24 = smov 12  ;;  %s7829_s26 = smov 48  ;;  %5846 = vst.msk [vmem:[#allocation0 + $0x10] sm:$0xff] %vm5661_vm8, %v10944_v24   ;;  %v14475_v38 = vpop.permute.xlu1 %10977 }
 0x2d4   :  { %v7753_v42 = vld [vmem:[#allocation1 + $0x186] ss:$16 sm:%s7752_s15]   ;;  %v7699_v36 = vsel %vm3854_vm2, %v7697_v53, %v7694_v41  ;;  %s7834_s20 = smov 192  ;;  %s7431_s23 = smov 3  ;;  %5869 = vst.msk [vmem:[#allocation0 + $0x30] sm:$0xff] %vm5661_vm8, %v10945_v54   ;;  %v10984_v54 = vunpack.i.l.bf16 %v14467_v63  ;;  %v10985_v63 = vunpack.i.h.bf16 %v14467_v63 }
 0x2d5   :  { %v7756_v9 = vld [vmem:[#allocation1 + $0x186] ss:$16 sm:%s7755_s1]   ;;  %v11141_v49 = vpack.i.bf16 %v7699_v36, %v7676_v15  ;;  %v7432_v44 = vld [vmem:[#allocation1 + $0x587] ss:$16 sm:%s7431_s23]   ;;  %s7434_s5 = smov 12  ;;  %s7439_s27 = smov 48  ;;  %v10969_v15 = vunpack.i.l.bf16 %v14430_v43  ;;  %v10970_v43 = vunpack.i.h.bf16 %v14430_v43 }
 0x2d6   :  { %v7761_v60 = vld [vmem:[#allocation1 + $0x186] ss:$16 sm:%s7760_s12]   ;;  %v7758_v16 = vsel %vm3846_vm0, %v7756_v9, %v7753_v42  ;;  %v7435_v22 = vld [vmem:[#allocation1 + $0x587] ss:$16 sm:%s7434_s5]   ;;  %s7444_s21 = smov 192  ;;  %s7454_s10 = smov 3 }
 0x2d7   :  { %v7766_v55 = vld [vmem:[#allocation1 + $0x186] ss:$16 sm:%s7765_s2]   ;;  %v7763_v57 = vsel %vm3850_vm1, %v7761_v60, %v7758_v16  ;;  %11142 = vrot.lane.b32.xlu1 %v11141_v49, %s11450_s8  ;;  %v7440_v17 = vld [vmem:[#allocation1 + $0x587] ss:$16 sm:%s7439_s27]   ;;  %v7437_v25 = vsel %vm3846_vm0, %v7435_v22, %v7432_v44  ;;  %s7457_s25 = smov 12  ;;  %s7462_s6 = smov 48 }
 0x2d8   :  { %v7776_v7 = vld [vmem:[#allocation1 + $0x386] ss:$16 sm:%s7775_s14]   ;;  %v7768_v51 = vsel %vm3854_vm2, %v7766_v55, %v7763_v57  ;;  %v7445_v27 = vld [vmem:[#allocation1 + $0x587] ss:$16 sm:%s7444_s21]   ;;  %v7442_v56 = vsel %vm3850_vm1, %v7440_v17, %v7437_v25  ;;  %s7467_s0 = smov 192  ;;  %s7889_s16 = smov 3 }
 0x2d9   :  { %v7779_v5 = vld [vmem:[#allocation1 + $0x386] ss:$16 sm:%s7778_s13]   ;;  %v7455_v29 = vld [vmem:[#allocation1 + $0x787] ss:$16 sm:%s7454_s10]   ;;  %v7447_v32 = vsel %vm3854_vm2, %v7445_v27, %v7442_v56  ;;  %v7890_v12 = vld [vmem:[#allocation1 + $0x405] ss:$16 sm:%s7889_s16]  }
 0x2da   :  { %v7781_v59 = vsel %vm3846_vm0, %v7779_v5, %v7776_v7  ;;  %v7784_v20 = vld [vmem:[#allocation1 + $0x386] ss:$16 sm:%s7783_s11]   ;;  %v7458_v30 = vld [vmem:[#allocation1 + $0x787] ss:$16 sm:%s7457_s25]   ;;  %s7892_s30 = smov 12  ;;  %s7897_s17 = smov 48  ;;  %v14510_v56 = vpop.permute.xlu0 %10987 }
 0x2db   :  { %v7786_v58 = vsel %vm3850_vm1, %v7784_v20, %v7781_v59  ;;  %v7789_v61 = vld [vmem:[#allocation1 + $0x386] ss:$16 sm:%s7788_s9]   ;;  %v7463_v3 = vld [vmem:[#allocation1 + $0x787] ss:$16 sm:%s7462_s6]   ;;  %v7460_v33 = vsel %vm3846_vm0, %v7458_v30, %v7455_v29  ;;  %v7893_v53 = vld [vmem:[#allocation1 + $0x405] ss:$16 sm:%s7892_s30]  }
 0x2dc   :  { %v7799_v62 = vld [vmem:[#allocation1 + $0x586] ss:$16 sm:%s7798_s19]   ;;  %v7791_v13 = vsel %vm3854_vm2, %v7789_v61, %v7786_v58  ;;  %v7468_v34 = vld [vmem:[#allocation1 + $0x787] ss:$16 sm:%s7467_s0]   ;;  %v7465_v37 = vsel %vm3850_vm1, %v7463_v3, %v7460_v33  ;;  %v7898_v26 = vld [vmem:[#allocation1 + $0x405] ss:$16 sm:%s7897_s17]   ;;  %v7895_v28 = vsel %vm3846_vm0, %v7893_v53, %v7890_v12 }
 0x2dd   :  { %v7802_v0 = vld [vmem:[#allocation1 + $0x586] ss:$16 sm:%s7801_s3]   ;;  %v11151_v1 = vpack.i.bf16 %v7791_v13, %v7768_v51  ;;  %v7470_v40 = vsel %vm3854_vm2, %v7468_v34, %v7465_v37  ;;  %s7902_s28 = smov 192  ;;  %5892 = vst.msk [vmem:[#allocation0 + $0x50] sm:$0xff] %vm5661_vm8, %v10949_v31   ;;  %s7912_s18 = smov 3  ;;  %v7900_v36 = vsel %vm3850_vm1, %v7898_v26, %v7895_v28 }
 0x2de   :  { %v7807_v6 = vld [vmem:[#allocation1 + $0x586] ss:$16 sm:%s7806_s22]   ;;  %v7804_v2 = vsel %vm3846_vm0, %v7802_v0, %v7799_v62  ;;  %v11116_v41 = vpack.i.bf16 %v7470_v40, %v7447_v32  ;;  %v7903_v42 = vld [vmem:[#allocation1 + $0x405] ss:$16 sm:%s7902_s28]   ;;  %s7915_s15 = smov 12  ;;  %5915 = vst.msk [vmem:[#allocation0 + $0x70] sm:$0xff] %vm5661_vm8, %v10950_v52   ;;  %v14515_v32 = vpop.permute.xlu1 %10992 }
 0x2df   :  { %v7812_v46 = vld [vmem:[#allocation1 + $0x586] ss:$16 sm:%s7811_s29]   ;;  %v7809_v10 = vsel %vm3850_vm1, %v7807_v6, %v7804_v2  ;;  %11152 = vrot.lane.b32.xlu0 %v11151_v1, %s11450_s8  ;;  %v7913_v9 = vld [vmem:[#allocation1 + $0x605] ss:$16 sm:%s7912_s18]   ;;  %s7920_s1 = smov 48  ;;  %v7905_v49 = vsel %vm3854_vm2, %v7903_v42, %v7900_v36  ;;  %s7935_s12 = smov 3 }
 0x2e0   :  { %v7822_v8 = vld [vmem:[#allocation1 + $0x786] ss:$16 sm:%s7821_s7]   ;;  %v7814_v19 = vsel %vm3854_vm2, %v7812_v46, %v7809_v10  ;;  %v7916_v60 = vld [vmem:[#allocation1 + $0x605] ss:$16 sm:%s7915_s15]   ;;  %11117 = vrot.lane.b32.xlu2 %v11116_v41, %s11449_s4  ;;  %s7925_s4 = smov 192  ;;  %6075 = vst.msk [vmem:[#allocation0 + $0x40] sm:$0xff] %vm6028_vm9, %v10969_v15  }
 0x2e1   :  { %v7825_v48 = vld [vmem:[#allocation1 + $0x786] ss:$16 sm:%s7824_s24]   ;;  %v7918_v16 = vsel %vm3846_vm0, %v7916_v60, %v7913_v9  ;;  %v7921_v55 = vld [vmem:[#allocation1 + $0x605] ss:$16 sm:%s7920_s1]   ;;  %s7938_s2 = smov 12  ;;  %s7943_s14 = smov 48 }
 0x2e2   :  { %v7830_v4 = vld [vmem:[#allocation1 + $0x786] ss:$16 sm:%s7829_s26]   ;;  %v7827_v18 = vsel %vm3846_vm0, %v7825_v48, %v7822_v8  ;;  %v7923_v57 = vsel %vm3850_vm1, %v7921_v55, %v7918_v16  ;;  %v7926_v7 = vld [vmem:[#allocation1 + $0x605] ss:$16 sm:%s7925_s4]   ;;  %s7948_s13 = smov 192  ;;  %s7958_s11 = smov 3  ;;  %v10959_v48 = vunpack.i.l.bf16 %v14432_v11  ;;  %v10960_v11 = vunpack.i.h.bf16 %v14432_v11 }
 0x2e3   :  { %v7835_v14 = vld [vmem:[#allocation1 + $0x786] ss:$16 sm:%s7834_s20]   ;;  %v7832_v21 = vsel %vm3850_vm1, %v7830_v4, %v7827_v18  ;;  %v7936_v5 = vld [vmem:[#allocation1 + $0x85] ss:$16 sm:%s7935_s12]   ;;  %v7928_v51 = vsel %vm3854_vm2, %v7926_v7, %v7923_v57  ;;  %s7961_s9 = smov 12  ;;  %s7966_s19 = smov 48 }
 0x2e4   :  { %v7837_v39 = vsel %vm3854_vm2, %v7835_v14, %v7832_v21  ;;  %v7939_v59 = vld [vmem:[#allocation1 + $0x85] ss:$16 sm:%s7938_s2]   ;;  %v11166_v58 = vpack.i.bf16 %v7928_v51, %v7905_v49  ;;  %s7971_s3 = smov 192  ;;  %s7568_s22 = smov 3  ;;  %v10964_v21 = vunpack.i.l.bf16 %v14436_v47  ;;  %6098 = vst.msk [vmem:[#allocation0 + $0x60] sm:$0xff] %vm6028_vm9, %v10970_v43   ;;  %v10965_v47 = vunpack.i.h.bf16 %v14436_v47 }
 0x2e5   :  { %v11156_v45 = vpack.i.bf16 %v7837_v39, %v7814_v19  ;;  %v7944_v20 = vld [vmem:[#allocation1 + $0x85] ss:$16 sm:%s7943_s14]   ;;  %v7941_v61 = vsel %vm3846_vm0, %v7939_v59, %v7936_v5  ;;  %s11451_s29 = smov 40   ;;  %v7569_v10 = vld [vmem:[#allocation1 + $0x86] ss:$16 sm:%s7568_s22]   ;;  %s7571_s7 = smov 12 }
 0x2e6   :  { %v7949_v62 = vld [vmem:[#allocation1 + $0x85] ss:$16 sm:%s7948_s13]   ;;  %v7946_v0 = vsel %vm3850_vm1, %v7944_v20, %v7941_v61  ;;  %s7576_s24 = smov 48  ;;  %v7572_v23 = vld [vmem:[#allocation1 + $0x86] ss:$16 sm:%s7571_s7]   ;;  %s7581_s26 = smov 192 }
 0x2e7   :  { %11157 = vrot.lane.b32.xlu1 %v11156_v45, %s11450_s8  ;;  %v7959_v13 = vld [vmem:[#allocation1 + $0x285] ss:$16 sm:%s7958_s11]   ;;  %11167 = vrot.lane.b32.xlu0 %v11166_v58, %s11451_s29  ;;  %v7951_v2 = vsel %vm3854_vm2, %v7949_v62, %v7946_v0  ;;  %v7577_v19 = vld [vmem:[#allocation1 + $0x86] ss:$16 sm:%s7576_s24]   ;;  %s7591_s20 = smov 3  ;;  %v7574_v14 = vsel %vm3846_vm0, %v7572_v23, %v7569_v10  ;;  %s7594_s23 = smov 12  ;;  %v14508_v45 = vpop.permute.xlu2 %10997 }
 0x2e8   :  { %v7962_v6 = vld [vmem:[#allocation1 + $0x285] ss:$16 sm:%s7961_s9]   ;;  %v7582_v44 = vld [vmem:[#allocation1 + $0x86] ss:$16 sm:%s7581_s26]   ;;  %s7599_s5 = smov 48  ;;  %v7579_v17 = vsel %vm3850_vm1, %v7577_v19, %v7574_v14  ;;  %s7604_s27 = smov 192  ;;  %v10979_v19 = vunpack.i.l.bf16 %v14475_v38  ;;  %v10980_v38 = vunpack.i.h.bf16 %v14475_v38 }
 0x2e9   :  { %v7967_v1 = vld [vmem:[#allocation1 + $0x285] ss:$16 sm:%s7966_s19]   ;;  %v7964_v46 = vsel %vm3846_vm0, %v7962_v6, %v7959_v13  ;;  %v7592_v50 = vld [vmem:[#allocation1 + $0x286] ss:$16 sm:%s7591_s20]   ;;  %v7584_v25 = vsel %vm3854_vm2, %v7582_v44, %v7579_v17  ;;  %5984 = vst.msk [vmem:[#allocation0 + $0x58] sm:$0xff] %vm5661_vm8, %v10959_v48   ;;  %s8027_s21 = smov 3 }
 0x2ea   :  { %v7972_v8 = vld [vmem:[#allocation1 + $0x285] ss:$16 sm:%s7971_s3]   ;;  %v7969_v4 = vsel %vm3850_vm1, %v7967_v1, %v7964_v46  ;;  %v7595_v24 = vld [vmem:[#allocation1 + $0x286] ss:$16 sm:%s7594_s23]   ;;  %s8030_s10 = smov 12  ;;  %6007 = vst.msk [vmem:[#allocation0 + $0x78] sm:$0xff] %vm5661_vm8, %v10960_v11   ;;  %v10974_v1 = vunpack.i.l.bf16 %v14469_v35  ;;  %v10975_v35 = vunpack.i.h.bf16 %v14469_v35 }
 0x2eb   :  { %v7974_v18 = vsel %vm3854_vm2, %v7972_v8, %v7969_v4  ;;  %v7600_v39 = vld [vmem:[#allocation1 + $0x286] ss:$16 sm:%s7599_s5]   ;;  %v7597_v27 = vsel %vm3846_vm0, %v7595_v24, %v7592_v50  ;;  %v8028_v3 = vld [vmem:[#allocation1 + $0x105] ss:$16 sm:%s8027_s21]   ;;  %s8035_s25 = smov 48  ;;  %6029 = vst.msk [vmem:[#allocation0] sm:$0xff] %vm6028_vm9, %v10964_v21   ;;  %v14547_v21 = vpop.permute.xlu0 %11002  ;;  %v10999_v24 = vunpack.i.l.bf16 %v14508_v45  ;;  %v11000_v45 = vunpack.i.h.bf16 %v14508_v45 }
 0x2ec   :  { %v11171_v22 = vpack.i.bf16 %v7974_v18, %v7951_v2  ;;  %v7605_v29 = vld [vmem:[#allocation1 + $0x286] ss:$16 sm:%s7604_s27]   ;;  %v7602_v30 = vsel %vm3850_vm1, %v7600_v39, %v7597_v27  ;;  %v8031_v31 = vld [vmem:[#allocation1 + $0x105] ss:$16 sm:%s8030_s10]   ;;  %s8040_s6 = smov 192  ;;  %s8050_s0 = smov 3  ;;  %v14553_v39 = vpop.permute.xlu1 %11007 }
 0x2ed   :  { %v7607_v33 = vsel %vm3854_vm2, %v7605_v29, %v7602_v30  ;;  %v8033_v34 = vsel %vm3846_vm0, %v8031_v31, %v8028_v3  ;;  %v8036_v52 = vld [vmem:[#allocation1 + $0x105] ss:$16 sm:%s8035_s25]   ;;  %6052 = vst.msk [vmem:[#allocation0 + $0x20] sm:$0xff] %vm6028_vm9, %v10965_v47   ;;  %s8053_s16 = smov 12  ;;  %s8058_s30 = smov 48 }
 0x2ee   :  { %v11131_v37 = vpack.i.bf16 %v7607_v33, %v7584_v25  ;;  %v8038_v12 = vsel %vm3850_vm1, %v8036_v52, %v8033_v34  ;;  %v8041_v15 = vld [vmem:[#allocation1 + $0x105] ss:$16 sm:%s8040_s6]   ;;  %s8063_s17 = smov 192  ;;  %6213 = vst.msk [vmem:[#allocation0 + $0x10] sm:$0xff] %vm6028_vm9, %v10984_v54   ;;  %s8073_s28 = smov 3 }
 0x2ef   :  { %11172 = vrot.lane.b32.xlu1 %v11171_v22, %s11451_s29  ;;  %v8051_v40 = vld [vmem:[#allocation1 + $0x305] ss:$16 sm:%s8050_s0]   ;;  %v8043_v26 = vsel %vm3854_vm2, %v8041_v15, %v8038_v12  ;;  %s8076_s18 = smov 12  ;;  %s8081_s15 = smov 48  ;;  %6236 = vst.msk [vmem:[#allocation0 + $0x30] sm:$0xff] %vm6028_vm9, %v10985_v63   ;;  %v14545_v50 = vpop.permute.xlu2 %11012 }
 0x2f0   :  { %v8054_v53 = vld [vmem:[#allocation1 + $0x305] ss:$16 sm:%s8053_s16]   ;;  %11132 = vrot.lane.b32.xlu2 %v11131_v37, %s11450_s8  ;;  %s8086_s1 = smov 192  ;;  %s8096_s4 = smov 3  ;;  %6121 = vst.msk [vmem:[#allocation0 + $0x8] sm:$0xff] %vm6028_vm9, %v10974_v1  }
 0x2f1   :  { %v8056_v41 = vsel %vm3846_vm0, %v8054_v53, %v8051_v40  ;;  %v8059_v28 = vld [vmem:[#allocation1 + $0x305] ss:$16 sm:%s8058_s30]   ;;  %s8099_s12 = smov 12  ;;  %s8104_s2 = smov 48  ;;  %6144 = vst.msk [vmem:[#allocation0 + $0x28] sm:$0xff] %vm6028_vm9, %v10975_v35  }
 0x2f2   :  { %v8064_v42 = vld [vmem:[#allocation1 + $0x305] ss:$16 sm:%s8063_s17]   ;;  %v8061_v36 = vsel %vm3850_vm1, %v8059_v28, %v8056_v41  ;;  %s8109_s14 = smov 192  ;;  %s7706_s13 = smov 3  ;;  %6167 = vst.msk [vmem:[#allocation0 + $0x48] sm:$0xff] %vm6028_vm9, %v10979_v19  }
 0x2f3   :  { %v8074_v9 = vld [vmem:[#allocation1 + $0x505] ss:$16 sm:%s8073_s28]   ;;  %v8066_v49 = vsel %vm3854_vm2, %v8064_v42, %v8061_v36  ;;  %s7709_s11 = smov 12  ;;  %v7707_v0 = vld [vmem:[#allocation1 + $0x506] ss:$16 sm:%s7706_s13]   ;;  %s7714_s9 = smov 48 }
 0x2f4   :  { %v8077_v60 = vld [vmem:[#allocation1 + $0x505] ss:$16 sm:%s8076_s18]   ;;  %v11181_v7 = vpack.i.bf16 %v8066_v49, %v8043_v26  ;;  %v7710_v6 = vld [vmem:[#allocation1 + $0x506] ss:$16 sm:%s7709_s11]   ;;  %s7719_s19 = smov 192  ;;  %s7729_s3 = smov 3  ;;  %v14592_v19 = vpop.permute.xlu1 %11022 }
 0x2f5   :  { %v8079_v16 = vsel %vm3846_vm0, %v8077_v60, %v8074_v9  ;;  %v8082_v55 = vld [vmem:[#allocation1 + $0x505] ss:$16 sm:%s8081_s15]   ;;  %v7712_v2 = vsel %vm3846_vm0, %v7710_v6, %v7707_v0  ;;  %v7715_v46 = vld [vmem:[#allocation1 + $0x506] ss:$16 sm:%s7714_s9]   ;;  %s7732_s22 = smov 12  ;;  %s7737_s7 = smov 48 }
 0x2f6   :  { %v8087_v57 = vld [vmem:[#allocation1 + $0x505] ss:$16 sm:%s8086_s1]   ;;  %v8084_v5 = vsel %vm3850_vm1, %v8082_v55, %v8079_v16  ;;  %11182 = vrot.lane.b32.xlu0 %v11181_v7, %s11451_s29  ;;  %v7720_v8 = vld [vmem:[#allocation1 + $0x506] ss:$16 sm:%s7719_s19]   ;;  %v7717_v48 = vsel %vm3850_vm1, %v7715_v46, %v7712_v2  ;;  %s7742_s24 = smov 192  ;;  %s8165_s26 = smov 3 }
 0x2f7   :  { %v8097_v51 = vld [vmem:[#allocation1 + $0x705] ss:$16 sm:%s8096_s4]   ;;  %v8089_v20 = vsel %vm3854_vm2, %v8087_v57, %v8084_v5  ;;  %v7730_v4 = vld [vmem:[#allocation1 + $0x706] ss:$16 sm:%s7729_s3]   ;;  %v7722_v11 = vsel %vm3854_vm2, %v7720_v8, %v7717_v48  ;;  %s8168_s20 = smov 12  ;;  %s8173_s23 = smov 48  ;;  %v10989_v5 = vunpack.i.l.bf16 %v14510_v56  ;;  %v10990_v56 = vunpack.i.h.bf16 %v14510_v56  ;;  %v14587_v48 = vpop.permute.xlu0 %11017 }
 0x2f8   :  { %v8100_v59 = vld [vmem:[#allocation1 + $0x705] ss:$16 sm:%s8099_s12]   ;;  %v7733_v23 = vld [vmem:[#allocation1 + $0x706] ss:$16 sm:%s7732_s22]   ;;  %s8178_s5 = smov 192  ;;  %s8188_s27 = smov 3 }
 0x2f9   :  { %v8102_v58 = vsel %vm3846_vm0, %v8100_v59, %v8097_v51  ;;  %v8105_v61 = vld [vmem:[#allocation1 + $0x705] ss:$16 sm:%s8104_s2]   ;;  %v7735_v18 = vsel %vm3846_vm0, %v7733_v23, %v7730_v4  ;;  %v7738_v14 = vld [vmem:[#allocation1 + $0x706] ss:$16 sm:%s7737_s7]   ;;  %s8191_s21 = smov 12  ;;  %6190 = vst.msk [vmem:[#allocation0 + $0x68] sm:$0xff] %vm6028_vm9, %v10980_v38  }
 0x2fa   :  { %v8110_v62 = vld [vmem:[#allocation1 + $0x705] ss:$16 sm:%s8109_s14]   ;;  %v8107_v13 = vsel %vm3850_vm1, %v8105_v61, %v8102_v58  ;;  %v7743_v44 = vld [vmem:[#allocation1 + $0x706] ss:$16 sm:%s7742_s24]   ;;  %v7740_v22 = vsel %vm3850_vm1, %v7738_v14, %v7735_v18  ;;  %s8196_s10 = smov 48  ;;  %s8211_s25 = smov 3 }
 0x2fb   :  { %v8112_v43 = vsel %vm3854_vm2, %v8110_v62, %v8107_v13  ;;  %v8166_v17 = vld [vmem:[#allocation1 + $0x585] ss:$16 sm:%s8165_s26]   ;;  %v7745_v47 = vsel %vm3854_vm2, %v7743_v44, %v7740_v22  ;;  %6351 = vst.msk [vmem:[#allocation0 + $0x58] sm:$0xff] %vm6028_vm9, %v10999_v24   ;;  %v8212_v40 = vld [vmem:[#allocation1 + $0x4] ss:$16 sm:%s8211_s25]   ;;  %s8214_s6 = smov 12  ;;  %v10994_v13 = vunpack.i.l.bf16 %v14515_v32  ;;  %v10995_v32 = vunpack.i.h.bf16 %v14515_v32 }
 0x2fc   :  { %v11186_v10 = vpack.i.bf16 %v8112_v43, %v8089_v20  ;;  %v8169_v25 = vld [vmem:[#allocation1 + $0x585] ss:$16 sm:%s8168_s20]   ;;  %v11146_v29 = vpack.i.bf16 %v7745_v47, %v7722_v11  ;;  %s8219_s0 = smov 48  ;;  %v8215_v26 = vld [vmem:[#allocation1 + $0x4] ss:$16 sm:%s8214_s6]   ;;  %s8224_s16 = smov 192 }
 0x2fd   :  { %v8174_v27 = vld [vmem:[#allocation1 + $0x585] ss:$16 sm:%s8173_s23]   ;;  %v8171_v54 = vsel %vm3846_vm0, %v8169_v25, %v8166_v17  ;;  %v8220_v41 = vld [vmem:[#allocation1 + $0x4] ss:$16 sm:%s8219_s0]   ;;  %v8217_v42 = vsel %vm3846_vm0, %v8215_v26, %v8212_v40  ;;  %s8233_s30 = smov 3  ;;  %s8236_s17 = smov 12 }
 0x2fe   :  { %11187 = vrot.lane.b32.xlu1 %v11186_v10, %s11451_s29  ;;  %v8179_v30 = vld [vmem:[#allocation1 + $0x585] ss:$16 sm:%s8178_s5]   ;;  %v8176_v3 = vsel %vm3850_vm1, %v8174_v27, %v8171_v54  ;;  %11147 = vrot.lane.b32.xlu2 %v11146_v29, %s11450_s8  ;;  %s8201_s8 = smov 192  ;;  %v8225_v36 = vld [vmem:[#allocation1 + $0x4] ss:$16 sm:%s8224_s16]   ;;  %6374 = vst.msk [vmem:[#allocation0 + $0x78] sm:$0xff] %vm6028_vm9, %v11000_v45   ;;  %v8222_v9 = vsel %vm3850_vm1, %v8220_v41, %v8217_v42  ;;  %v14585_v10 = vpop.permute.xlu2 %11027  ;;  %v11014_v42 = vunpack.i.l.bf16 %v14545_v50  ;;  %v11015_v50 = vunpack.i.h.bf16 %v14545_v50 }
 0x2ff   :  { %v8189_v31 = vld [vmem:[#allocation1 + $0x785] ss:$16 sm:%s8188_s27]   ;;  %v8181_v34 = vsel %vm3854_vm2, %v8179_v30, %v8176_v3  ;;  %v8234_v60 = vld [vmem:[#allocation1 + $0x204] ss:$16 sm:%s8233_s30]   ;;  %s8241_s28 = smov 48  ;;  %s8246_s18 = smov 192  ;;  %v8227_v16 = vsel %vm3854_vm2, %v8225_v36, %v8222_v9 }
 0x300   :  { %v8192_v33 = vld [vmem:[#allocation1 + $0x785] ss:$16 sm:%s8191_s21]   ;;  %v8237_v49 = vld [vmem:[#allocation1 + $0x204] ss:$16 sm:%s8236_s17]   ;;  %s7844_s15 = smov 3  ;;  %s7847_s1 = smov 12 }
 0x301   :  { %v8194_v52 = vsel %vm3846_vm0, %v8192_v33, %v8189_v31  ;;  %v8197_v37 = vld [vmem:[#allocation1 + $0x785] ss:$16 sm:%s8196_s10]   ;;  %v8239_v55 = vsel %vm3846_vm0, %v8237_v49, %v8234_v60  ;;  %v8242_v57 = vld [vmem:[#allocation1 + $0x204] ss:$16 sm:%s8241_s28]   ;;  %s7852_s4 = smov 48  ;;  %s7857_s12 = smov 192 }
 0x302   :  { %v8199_v12 = vsel %vm3850_vm1, %v8197_v37, %v8194_v52  ;;  %v8202_v15 = vld [vmem:[#allocation1 + $0x785] ss:$16 sm:%s8201_s8]   ;;  %v8247_v7 = vld [vmem:[#allocation1 + $0x204] ss:$16 sm:%s8246_s18]   ;;  %v8244_v51 = vsel %vm3850_vm1, %v8242_v57, %v8239_v55  ;;  %s7866_s2 = smov 3  ;;  %s7869_s14 = smov 12 }
 0x303   :  { %v8204_v53 = vsel %vm3854_vm2, %v8202_v15, %v8199_v12  ;;  %v7845_v59 = vld [vmem:[#allocation1 + $0x5] ss:$16 sm:%s7844_s15]   ;;  %v8249_v58 = vsel %vm3854_vm2, %v8247_v7, %v8244_v51  ;;  %s7874_s13 = smov 48  ;;  %s7879_s11 = smov 192  ;;  %6259 = vst.msk [vmem:[#allocation0 + $0x50] sm:$0xff] %vm6028_vm9, %v10989_v5   ;;  %v11004_v7 = vunpack.i.l.bf16 %v14547_v21  ;;  %v11005_v21 = vunpack.i.h.bf16 %v14547_v21 }
 0x304   :  { %v11196_v28 = vpack.i.bf16 %v8204_v53, %v8181_v34  ;;  %v7848_v20 = vld [vmem:[#allocation1 + $0x5] ss:$16 sm:%s7847_s1]   ;;  %v11201_v0 = vpack.i.bf16 %v8249_v58, %v8227_v16  ;;  %s8302_s9 = smov 3  ;;  %s11452_s19 = smov 32   ;;  %6282 = vst.msk [vmem:[#allocation0 + $0x70] sm:$0xff] %vm6028_vm9, %v10990_v56  }
 0x305   :  { %v7850_v61 = vsel %vm3846_vm0, %v7848_v20, %v7845_v59  ;;  %v7853_v62 = vld [vmem:[#allocation1 + $0x5] ss:$16 sm:%s7852_s4]   ;;  %v8303_v23 = vld [vmem:[#allocation1 + $0x84] ss:$16 sm:%s8302_s9]   ;;  %s8305_s3 = smov 12  ;;  %s8310_s22 = smov 48 }
 0x306   :  { %11197 = vrot.lane.b32.xlu0 %v11196_v28, %s11451_s29  ;;  %v7858_v63 = vld [vmem:[#allocation1 + $0x5] ss:$16 sm:%s7857_s12]   ;;  %v7855_v6 = vsel %vm3850_vm1, %v7853_v62, %v7850_v61  ;;  %11202 = vrot.lane.b32.xlu1 %v11201_v0, %s11452_s19  ;;  %6305 = vst.msk [vmem:[#allocation0 + $0x18] sm:$0xff] %vm6028_vm9, %v10994_v13   ;;  %v8306_v18 = vld [vmem:[#allocation1 + $0x84] ss:$16 sm:%s8305_s3]   ;;  %s8315_s7 = smov 192 }
 0x307   :  { %v7867_v1 = vld [vmem:[#allocation1 + $0x205] ss:$16 sm:%s7866_s2]   ;;  %v7860_v2 = vsel %vm3854_vm2, %v7858_v63, %v7855_v6  ;;  %v8311_v14 = vld [vmem:[#allocation1 + $0x84] ss:$16 sm:%s8310_s22]   ;;  %6328 = vst.msk [vmem:[#allocation0 + $0x38] sm:$0xff] %vm6028_vm9, %v10995_v32   ;;  %v8308_v38 = vsel %vm3846_vm0, %v8306_v18, %v8303_v23  ;;  %s8325_s24 = smov 3  ;;  %v11009_v63 = vunpack.i.l.bf16 %v14553_v39  ;;  %v11010_v39 = vunpack.i.h.bf16 %v14553_v39  ;;  %v14625_v6 = vpop.permute.xlu2 %11042 }
 0x308   :  { %v7870_v43 = vld [vmem:[#allocation1 + $0x205] ss:$16 sm:%s7869_s14]   ;;  %v8316_v22 = vld [vmem:[#allocation1 + $0x84] ss:$16 sm:%s8315_s7]   ;;  %s8328_s26 = smov 12  ;;  %v8313_v17 = vsel %vm3850_vm1, %v8311_v14, %v8308_v38  ;;  %s8333_s20 = smov 48 }
 0x309   :  { %v7872_v46 = vsel %vm3846_vm0, %v7870_v43, %v7867_v1  ;;  %v7875_v8 = vld [vmem:[#allocation1 + $0x205] ss:$16 sm:%s7874_s13]   ;;  %v8326_v24 = vld [vmem:[#allocation1 + $0x284] ss:$16 sm:%s8325_s24]   ;;  %s8338_s23 = smov 192  ;;  %v8318_v25 = vsel %vm3854_vm2, %v8316_v22, %v8313_v17  ;;  %s8348_s5 = smov 3  ;;  %v14627_v1 = vpop.permute.xlu0 %11032 }
 0x30a   :  { %v7880_v35 = vld [vmem:[#allocation1 + $0x205] ss:$16 sm:%s7879_s11]   ;;  %v7877_v4 = vsel %vm3850_vm1, %v7875_v8, %v7872_v46  ;;  %v8329_v47 = vld [vmem:[#allocation1 + $0x284] ss:$16 sm:%s8328_s26]   ;;  %s8351_s27 = smov 12  ;;  %s8356_s21 = smov 48  ;;  %v14631_v46 = vpop.permute.xlu1 %11037 }
 0x30b   :  { %v7882_v11 = vsel %vm3854_vm2, %v7880_v35, %v7877_v4  ;;  %v8331_v27 = vsel %vm3846_vm0, %v8329_v47, %v8326_v24  ;;  %v8334_v29 = vld [vmem:[#allocation1 + $0x284] ss:$16 sm:%s8333_s20]   ;;  %s8361_s10 = smov 192  ;;  %s8371_s8 = smov 3  ;;  %6488 = vst.msk [vmem:[#allocation0 + $0x8] sm:$0xff] %vm6395_vm10, %v11014_v42  }
 0x30c   :  { %v11161_v44 = vpack.i.bf16 %v7882_v11, %v7860_v2  ;;  %v8339_v54 = vld [vmem:[#allocation1 + $0x284] ss:$16 sm:%s8338_s23]   ;;  %v8336_v30 = vsel %vm3850_vm1, %v8334_v29, %v8331_v27  ;;  %s8374_s25 = smov 12  ;;  %s8379_s6 = smov 48  ;;  %6511 = vst.msk [vmem:[#allocation0 + $0x28] sm:$0xff] %vm6395_vm10, %v11015_v50  }
 0x30d   :  { %v8349_v3 = vld [vmem:[#allocation1 + $0x484] ss:$16 sm:%s8348_s5]   ;;  %v8341_v33 = vsel %vm3854_vm2, %v8339_v54, %v8336_v30  ;;  %s8384_s0 = smov 192  ;;  %s7981_s16 = smov 3  ;;  %6396 = vst.msk [vmem:[#allocation0] sm:$0xff] %vm6395_vm10, %v11004_v7  }
 0x30e   :  { %11162 = vrot.lane.b32.xlu2 %v11161_v44, %s11451_s29  ;;  %v8352_v31 = vld [vmem:[#allocation1 + $0x484] ss:$16 sm:%s8351_s27]   ;;  %v11211_v37 = vpack.i.bf16 %v8341_v33, %v8318_v25  ;;  %s7984_s30 = smov 12  ;;  %v7982_v9 = vld [vmem:[#allocation1 + $0x485] ss:$16 sm:%s7981_s16]   ;;  %s7989_s17 = smov 48 }
 0x30f   :  { %v8354_v45 = vsel %vm3846_vm0, %v8352_v31, %v8349_v3  ;;  %v8357_v34 = vld [vmem:[#allocation1 + $0x484] ss:$16 sm:%s8356_s21]   ;;  %v7985_v60 = vld [vmem:[#allocation1 + $0x485] ss:$16 sm:%s7984_s30]   ;;  %s7994_s28 = smov 192  ;;  %s8004_s18 = smov 3 }
 0x310   :  { %v8362_v52 = vld [vmem:[#allocation1 + $0x484] ss:$16 sm:%s8361_s10]   ;;  %v8359_v12 = vsel %vm3850_vm1, %v8357_v34, %v8354_v45  ;;  %11212 = vrot.lane.b32.xlu0 %v11211_v37, %s11452_s19  ;;  %v7987_v16 = vsel %vm3846_vm0, %v7985_v60, %v7982_v9  ;;  %v7990_v55 = vld [vmem:[#allocation1 + $0x485] ss:$16 sm:%s7989_s17]   ;;  %s8007_s15 = smov 12  ;;  %s8012_s1 = smov 48  ;;  %v11029_v34 = vunpack.i.l.bf16 %v14585_v10  ;;  %v11030_v10 = vunpack.i.h.bf16 %v14585_v10 }
 0x311   :  { %v8372_v15 = vld [vmem:[#allocation1 + $0x684] ss:$16 sm:%s8371_s8]   ;;  %v8364_v53 = vsel %vm3854_vm2, %v8362_v52, %v8359_v12  ;;  %v7995_v57 = vld [vmem:[#allocation1 + $0x485] ss:$16 sm:%s7994_s28]   ;;  %v7992_v51 = vsel %vm3850_vm1, %v7990_v55, %v7987_v16  ;;  %s8017_s4 = smov 192  ;;  %s8440_s12 = smov 3  ;;  %v11024_v55 = vunpack.i.l.bf16 %v14592_v19  ;;  %v11025_v19 = vunpack.i.h.bf16 %v14592_v19 }
 0x312   :  { %v8375_v40 = vld [vmem:[#allocation1 + $0x684] ss:$16 sm:%s8374_s25]   ;;  %v8005_v59 = vld [vmem:[#allocation1 + $0x685] ss:$16 sm:%s8004_s18]   ;;  %v7997_v56 = vsel %vm3854_vm2, %v7995_v57, %v7992_v51  ;;  %s8443_s2 = smov 12  ;;  %s8448_s14 = smov 48  ;;  %v14662_v51 = vpop.permute.xlu2 %11057 }
 0x313   :  { %v8377_v26 = vsel %vm3846_vm0, %v8375_v40, %v8372_v15  ;;  %v8380_v41 = vld [vmem:[#allocation1 + $0x684] ss:$16 sm:%s8379_s6]   ;;  %v8008_v20 = vld [vmem:[#allocation1 + $0x685] ss:$16 sm:%s8007_s15]   ;;  %s8453_s13 = smov 192  ;;  %6419 = vst.msk [vmem:[#allocation0 + $0x20] sm:$0xff] %vm6395_vm10, %v11005_v21  }
 0x314   :  { %v8385_v28 = vld [vmem:[#allocation1 + $0x684] ss:$16 sm:%s8384_s0]   ;;  %v8382_v36 = vsel %vm3850_vm1, %v8380_v41, %v8377_v26  ;;  %v8010_v58 = vsel %vm3846_vm0, %v8008_v20, %v8005_v59  ;;  %v8013_v61 = vld [vmem:[#allocation1 + $0x685] ss:$16 sm:%s8012_s1]   ;;  %s8463_s11 = smov 3  ;;  %s8466_s9 = smov 12  ;;  %v11019_v41 = vunpack.i.l.bf16 %v14587_v48  ;;  %v11020_v48 = vunpack.i.h.bf16 %v14587_v48  ;;  %v14664_v59 = vpop.permute.xlu0 %11047 }
 0x315   :  { %v8387_v49 = vsel %vm3854_vm2, %v8385_v28, %v8382_v36  ;;  %v8018_v62 = vld [vmem:[#allocation1 + $0x685] ss:$16 sm:%s8017_s4]   ;;  %v8015_v13 = vsel %vm3850_vm1, %v8013_v61, %v8010_v58  ;;  %v8441_v0 = vld [vmem:[#allocation1 + $0x504] ss:$16 sm:%s8440_s12]   ;;  %6442 = vst.msk [vmem:[#allocation0 + $0x40] sm:$0xff] %vm6395_vm10, %v11009_v63   ;;  %s8471_s3 = smov 48  ;;  %v11044_v58 = vunpack.i.l.bf16 %v14625_v6  ;;  %v14670_v61 = vpop.permute.xlu1 %11052  ;;  %v11045_v6 = vunpack.i.h.bf16 %v14625_v6 }
 0x316   :  { %v11216_v5 = vpack.i.bf16 %v8387_v49, %v8364_v53  ;;  %v8020_v43 = vsel %vm3854_vm2, %v8018_v62, %v8015_v13  ;;  %v8444_v32 = vld [vmem:[#allocation1 + $0x504] ss:$16 sm:%s8443_s2]   ;;  %6465 = vst.msk [vmem:[#allocation0 + $0x60] sm:$0xff] %vm6395_vm10, %v11010_v39   ;;  %s8476_s22 = smov 192  ;;  %s8486_s7 = smov 3 }
 0x317   :  { %v8449_v2 = vld [vmem:[#allocation1 + $0x504] ss:$16 sm:%s8448_s14]   ;;  %v11176_v8 = vpack.i.bf16 %v8020_v43, %v7997_v56  ;;  %v8446_v35 = vsel %vm3846_vm0, %v8444_v32, %v8441_v0  ;;  %s8489_s24 = smov 12  ;;  %s8494_s26 = smov 48  ;;  %6626 = vst.msk [vmem:[#allocation0 + $0x50] sm:$0xff] %vm6395_vm10, %v11029_v34  }
 0x318   :  { %11217 = vrot.lane.b32.xlu1 %v11216_v5, %s11452_s19  ;;  %v8454_v4 = vld [vmem:[#allocation1 + $0x504] ss:$16 sm:%s8453_s13]   ;;  %v8451_v23 = vsel %vm3850_vm1, %v8449_v2, %v8446_v35  ;;  %s8499_s20 = smov 192  ;;  %s8509_s23 = smov 3  ;;  %6649 = vst.msk [vmem:[#allocation0 + $0x70] sm:$0xff] %vm6395_vm10, %v11030_v10  }
 0x319   :  { %v8464_v11 = vld [vmem:[#allocation1 + $0x704] ss:$16 sm:%s8463_s11]   ;;  %11177 = vrot.lane.b32.xlu2 %v11176_v8, %s11451_s29  ;;  %v8456_v14 = vsel %vm3854_vm2, %v8454_v4, %v8451_v23  ;;  %s8512_s5 = smov 12  ;;  %s8517_s27 = smov 48  ;;  %6534 = vst.msk [vmem:[#allocation0 + $0x48] sm:$0xff] %vm6395_vm10, %v11019_v41  }
 0x31a   :  { %v8467_v18 = vld [vmem:[#allocation1 + $0x704] ss:$16 sm:%s8466_s9]   ;;  %s8522_s21 = smov 192  ;;  %s8119_s10 = smov 3  ;;  %6557 = vst.msk [vmem:[#allocation0 + $0x68] sm:$0xff] %vm6395_vm10, %v11020_v48   ;;  %v11059_v48 = vunpack.i.l.bf16 %v14662_v51  ;;  %v11060_v51 = vunpack.i.h.bf16 %v14662_v51 }
 0x31b   :  { %v8469_v44 = vsel %vm3846_vm0, %v8467_v18, %v8464_v11  ;;  %v8472_v38 = vld [vmem:[#allocation1 + $0x704] ss:$16 sm:%s8471_s3]   ;;  %v8120_v15 = vld [vmem:[#allocation1 + $0x185] ss:$16 sm:%s8119_s10]   ;;  %s8122_s8 = smov 12  ;;  %s8127_s25 = smov 48 }
 0x31c   :  { %v8474_v22 = vsel %vm3850_vm1, %v8472_v38, %v8469_v44  ;;  %v8477_v17 = vld [vmem:[#allocation1 + $0x704] ss:$16 sm:%s8476_s22]   ;;  %v8123_v53 = vld [vmem:[#allocation1 + $0x185] ss:$16 sm:%s8122_s8]   ;;  %s8132_s6 = smov 192  ;;  %s8142_s0 = smov 3 }
 0x31d   :  { %v8487_v24 = vld [vmem:[#allocation1 + $0x184] ss:$16 sm:%s8486_s7]   ;;  %v8479_v47 = vsel %vm3854_vm2, %v8477_v17, %v8474_v22  ;;  %v8128_v26 = vld [vmem:[#allocation1 + $0x185] ss:$16 sm:%s8127_s25]   ;;  %v8125_v42 = vsel %vm3846_vm0, %v8123_v53, %v8120_v15  ;;  %s8145_s16 = smov 12  ;;  %s8150_s30 = smov 48 }
 0x31e   :  { %v8490_v25 = vld [vmem:[#allocation1 + $0x184] ss:$16 sm:%s8489_s24]   ;;  %v11226_v29 = vpack.i.bf16 %v8479_v47, %v8456_v14  ;;  %v8133_v36 = vld [vmem:[#allocation1 + $0x185] ss:$16 sm:%s8132_s6]   ;;  %v8130_v50 = vsel %vm3850_vm1, %v8128_v26, %v8125_v42  ;;  %s8155_s17 = smov 192  ;;  %s8578_s28 = smov 3 }
 0x31f   :  { %v8495_v27 = vld [vmem:[#allocation1 + $0x184] ss:$16 sm:%s8494_s26]   ;;  %v8492_v54 = vsel %vm3846_vm0, %v8490_v25, %v8487_v24  ;;  %v8143_v9 = vld [vmem:[#allocation1 + $0x385] ss:$16 sm:%s8142_s0]   ;;  %v8135_v57 = vsel %vm3854_vm2, %v8133_v36, %v8130_v50  ;;  %s8581_s18 = smov 12  ;;  %s8586_s15 = smov 48  ;;  %v14705_v50 = vpop.permute.xlu0 %11062 }
 0x320   :  { %v8500_v30 = vld [vmem:[#allocation1 + $0x184] ss:$16 sm:%s8499_s20]   ;;  %v8497_v31 = vsel %vm3850_vm1, %v8495_v27, %v8492_v54  ;;  %11227 = vrot.lane.b32.xlu0 %v11226_v29, %s11452_s19  ;;  %v8146_v49 = vld [vmem:[#allocation1 + $0x385] ss:$16 sm:%s8145_s16]   ;;  %v8579_v21 = vld [vmem:[#allocation1 + $0x3] ss:$16 sm:%s8578_s28]  }
 0x321   :  { %v8510_v3 = vld [vmem:[#allocation1 + $0x384] ss:$16 sm:%s8509_s23]   ;;  %v8502_v52 = vsel %vm3854_vm2, %v8500_v30, %v8497_v31  ;;  %v8151_v16 = vld [vmem:[#allocation1 + $0x385] ss:$16 sm:%s8150_s30]   ;;  %v8148_v7 = vsel %vm3846_vm0, %v8146_v49, %v8143_v9  ;;  %v8582_v56 = vld [vmem:[#allocation1 + $0x3] ss:$16 sm:%s8581_s18]  }
 0x322   :  { %v8513_v33 = vld [vmem:[#allocation1 + $0x384] ss:$16 sm:%s8512_s5]   ;;  %v8156_v5 = vld [vmem:[#allocation1 + $0x385] ss:$16 sm:%s8155_s17]   ;;  %v8153_v20 = vsel %vm3850_vm1, %v8151_v16, %v8148_v7  ;;  %v8584_v63 = vsel %vm3846_vm0, %v8582_v56, %v8579_v21  ;;  %v8587_v13 = vld [vmem:[#allocation1 + $0x3] ss:$16 sm:%s8586_s15]  }
 0x323   :  { %v8518_v45 = vld [vmem:[#allocation1 + $0x384] ss:$16 sm:%s8517_s27]   ;;  %v8515_v37 = vsel %vm3846_vm0, %v8513_v33, %v8510_v3  ;;  %v8158_v62 = vsel %vm3854_vm2, %v8156_v5, %v8153_v20  ;;  %s8591_s1 = smov 192  ;;  %6580 = vst.msk [vmem:[#allocation0 + $0x10] sm:$0xff] %vm6395_vm10, %v11024_v55   ;;  %v8589_v0 = vsel %vm3850_vm1, %v8587_v13, %v8584_v63  ;;  %s8600_s4 = smov 3  ;;  %v11034_v33 = vunpack.i.l.bf16 %v14627_v1 }
 0x324   :  { %v8523_v12 = vld [vmem:[#allocation1 + $0x384] ss:$16 sm:%s8522_s21]   ;;  %v8520_v40 = vsel %vm3850_vm1, %v8518_v45, %v8515_v37  ;;  %v11191_v39 = vpack.i.bf16 %v8158_v62, %v8135_v57  ;;  %v8592_v43 = vld [vmem:[#allocation1 + $0x3] ss:$16 sm:%s8591_s1]   ;;  %s8603_s12 = smov 12  ;;  %6603 = vst.msk [vmem:[#allocation0 + $0x30] sm:$0xff] %vm6395_vm10, %v11025_v19   ;;  %v11035_v1 = vunpack.i.h.bf16 %v14627_v1  ;;  %v14710_v57 = vpop.permute.xlu1 %11067 }
 0x325   :  { %v8525_v28 = vsel %vm3854_vm2, %v8523_v12, %v8520_v40  ;;  %v8601_v32 = vld [vmem:[#allocation1 + $0x203] ss:$16 sm:%s8600_s4]   ;;  %s8608_s2 = smov 48  ;;  %v8594_v8 = vsel %vm3854_vm2, %v8592_v43, %v8589_v0  ;;  %s8623_s14 = smov 3  ;;  %6763 = vst.msk [vmem:[#allocation0] sm:$0xff] %vm6762_vm11, %v11044_v58   ;;  %v11039_v40 = vunpack.i.l.bf16 %v14631_v46  ;;  %v11040_v46 = vunpack.i.h.bf16 %v14631_v46 }
 0x326   :  { %v11231_v60 = vpack.i.bf16 %v8525_v28, %v8502_v52  ;;  %v8604_v2 = vld [vmem:[#allocation1 + $0x203] ss:$16 sm:%s8603_s12]   ;;  %11192 = vrot.lane.b32.xlu2 %v11191_v39, %s11451_s29  ;;  %s8613_s29 = smov 192  ;;  %s8626_s13 = smov 12  ;;  %6786 = vst.msk [vmem:[#allocation0 + $0x20] sm:$0xff] %vm6762_vm11, %v11045_v6  }
 0x327   :  { %v8606_v35 = vsel %vm3846_vm0, %v8604_v2, %v8601_v32  ;;  %v8609_v4 = vld [vmem:[#allocation1 + $0x203] ss:$16 sm:%s8608_s2]   ;;  %s8631_s11 = smov 48  ;;  %s8636_s9 = smov 192  ;;  %6672 = vst.msk [vmem:[#allocation0 + $0x18] sm:$0xff] %vm6395_vm10, %v11034_v33  }
 0x328   :  { %11232 = vrot.lane.b32.xlu1 %v11231_v60, %s11452_s19  ;;  %v8611_v23 = vsel %vm3850_vm1, %v8609_v4, %v8606_v35  ;;  %v8614_v11 = vld [vmem:[#allocation1 + $0x203] ss:$16 sm:%s8613_s29]   ;;  %s8646_s3 = smov 3  ;;  %s8649_s22 = smov 12  ;;  %v14703_v60 = vpop.permute.xlu2 %11072  ;;  %6695 = vst.msk [vmem:[#allocation0 + $0x38] sm:$0xff] %vm6395_vm10, %v11035_v1  }
 0x329   :  { %v8624_v18 = vld [vmem:[#allocation1 + $0x403] ss:$16 sm:%s8623_s14]   ;;  %v8616_v14 = vsel %vm3854_vm2, %v8614_v11, %v8611_v23  ;;  %s8654_s7 = smov 48  ;;  %s8659_s24 = smov 192  ;;  %6718 = vst.msk [vmem:[#allocation0 + $0x58] sm:$0xff] %vm6395_vm10, %v11039_v40   ;;  %v14742_v40 = vpop.permute.xlu0 %11077 }
 0x32a   :  { %v8627_v44 = vld [vmem:[#allocation1 + $0x403] ss:$16 sm:%s8626_s13]   ;;  %v11241_v22 = vpack.i.bf16 %v8616_v14, %v8594_v8  ;;  %s8256_s26 = smov 3  ;;  %s11453_s20 = smov 24   ;;  %6741 = vst.msk [vmem:[#allocation0 + $0x78] sm:$0xff] %vm6395_vm10, %v11040_v46  }
 0x32b   :  { %v8632_v38 = vld [vmem:[#allocation1 + $0x403] ss:$16 sm:%s8631_s11]   ;;  %v8629_v17 = vsel %vm3846_vm0, %v8627_v44, %v8624_v18  ;;  %v8257_v31 = vld [vmem:[#allocation1 + $0x404] ss:$16 sm:%s8256_s26]   ;;  %s8259_s23 = smov 12  ;;  %s8264_s5 = smov 48 }
 0x32c   :  { %v8637_v24 = vld [vmem:[#allocation1 + $0x403] ss:$16 sm:%s8636_s9]   ;;  %v8634_v25 = vsel %vm3850_vm1, %v8632_v38, %v8629_v17  ;;  %11242 = vrot.lane.b32.xlu0 %v11241_v22, %s11453_s20  ;;  %v8260_v34 = vld [vmem:[#allocation1 + $0x404] ss:$16 sm:%s8259_s23]   ;;  %s8269_s27 = smov 192  ;;  %s8279_s21 = smov 3 }
 0x32d   :  { %v8647_v47 = vld [vmem:[#allocation1 + $0x603] ss:$16 sm:%s8646_s3]   ;;  %v8639_v54 = vsel %vm3854_vm2, %v8637_v24, %v8634_v25  ;;  %v8265_v52 = vld [vmem:[#allocation1 + $0x404] ss:$16 sm:%s8264_s5]   ;;  %v8262_v12 = vsel %vm3846_vm0, %v8260_v34, %v8257_v31  ;;  %s8282_s10 = smov 12  ;;  %s8287_s8 = smov 48 }
 0x32e   :  { %v8650_v27 = vld [vmem:[#allocation1 + $0x603] ss:$16 sm:%s8649_s22]   ;;  %v8270_v15 = vld [vmem:[#allocation1 + $0x404] ss:$16 sm:%s8269_s27]   ;;  %v8267_v26 = vsel %vm3850_vm1, %v8265_v52, %v8262_v12  ;;  %s8292_s25 = smov 192  ;;  %s8715_s6 = smov 3  ;;  %v11054_v52 = vunpack.i.l.bf16 %v14670_v61  ;;  %v11055_v61 = vunpack.i.h.bf16 %v14670_v61 }
 0x32f   :  { %v8655_v29 = vld [vmem:[#allocation1 + $0x603] ss:$16 sm:%s8654_s7]   ;;  %v8652_v30 = vsel %vm3846_vm0, %v8650_v27, %v8647_v47  ;;  %v8280_v10 = vld [vmem:[#allocation1 + $0x604] ss:$16 sm:%s8279_s21]   ;;  %v8272_v42 = vsel %vm3854_vm2, %v8270_v15, %v8267_v26  ;;  %s8718_s0 = smov 12  ;;  %s8723_s16 = smov 48 }
 0x330   :  { %v8660_v3 = vld [vmem:[#allocation1 + $0x603] ss:$16 sm:%s8659_s24]   ;;  %v8657_v45 = vsel %vm3850_vm1, %v8655_v29, %v8652_v30  ;;  %v8283_v41 = vld [vmem:[#allocation1 + $0x604] ss:$16 sm:%s8282_s10]   ;;  %s8728_s30 = smov 192  ;;  %s8738_s17 = smov 3  ;;  %v11049_v29 = vunpack.i.l.bf16 %v14664_v59  ;;  %v11050_v59 = vunpack.i.h.bf16 %v14664_v59 }
 0x331   :  { %v8662_v37 = vsel %vm3854_vm2, %v8660_v3, %v8657_v45  ;;  %v8288_v28 = vld [vmem:[#allocation1 + $0x604] ss:$16 sm:%s8287_s8]   ;;  %v8285_v36 = vsel %vm3846_vm0, %v8283_v41, %v8280_v10  ;;  %v8716_v16 = vld [vmem:[#allocation1 + $0x483] ss:$16 sm:%s8715_s6]   ;;  %s8741_s28 = smov 12  ;;  %s8746_s18 = smov 48  ;;  %v14740_v10 = vpop.permute.xlu2 %11087  ;;  %v11074_v41 = vunpack.i.l.bf16 %v14703_v60  ;;  %v11075_v60 = vunpack.i.h.bf16 %v14703_v60 }
 0x332   :  { %v11246_v53 = vpack.i.bf16 %v8662_v37, %v8639_v54  ;;  %v8293_v9 = vld [vmem:[#allocation1 + $0x604] ss:$16 sm:%s8292_s25]   ;;  %v8290_v49 = vsel %vm3850_vm1, %v8288_v28, %v8285_v36  ;;  %v8719_v55 = vld [vmem:[#allocation1 + $0x483] ss:$16 sm:%s8718_s0]   ;;  %s8751_s15 = smov 192  ;;  %6901 = vst.msk [vmem:[#allocation0 + $0x48] sm:$0xff] %vm6762_vm11, %v11059_v48   ;;  %v14748_v28 = vpop.permute.xlu1 %11082 }
 0x333   :  { %v8295_v7 = vsel %vm3854_vm2, %v8293_v9, %v8290_v49  ;;  %v8721_v5 = vsel %vm3846_vm0, %v8719_v55, %v8716_v16  ;;  %v8724_v19 = vld [vmem:[#allocation1 + $0x483] ss:$16 sm:%s8723_s16]   ;;  %s8761_s1 = smov 3  ;;  %s8764_s4 = smov 12  ;;  %6924 = vst.msk [vmem:[#allocation0 + $0x68] sm:$0xff] %vm6762_vm11, %v11060_v51  }
 0x334   :  { %11247 = vrot.lane.b32.xlu1 %v11246_v53, %s11453_s20  ;;  %v11206_v20 = vpack.i.bf16 %v8295_v7, %v8272_v42  ;;  %v8726_v21 = vsel %vm3850_vm1, %v8724_v19, %v8721_v5  ;;  %v8729_v56 = vld [vmem:[#allocation1 + $0x483] ss:$16 sm:%s8728_s30]   ;;  %s8769_s12 = smov 48  ;;  %s8774_s2 = smov 192  ;;  %6809 = vst.msk [vmem:[#allocation0 + $0x40] sm:$0xff] %vm6762_vm11, %v11049_v29  }
 0x335   :  { %v8739_v58 = vld [vmem:[#allocation1 + $0x683] ss:$16 sm:%s8738_s17]   ;;  %v8731_v63 = vsel %vm3854_vm2, %v8729_v56, %v8726_v21  ;;  %s8784_s29 = smov 3  ;;  %s8787_s14 = smov 12  ;;  %6832 = vst.msk [vmem:[#allocation0 + $0x60] sm:$0xff] %vm6762_vm11, %v11050_v59  }
 0x336   :  { %v8742_v62 = vld [vmem:[#allocation1 + $0x683] ss:$16 sm:%s8741_s28]   ;;  %11207 = vrot.lane.b32.xlu2 %v11206_v20, %s11452_s19  ;;  %s8792_s13 = smov 48  ;;  %s8797_s11 = smov 192  ;;  %6855 = vst.msk [vmem:[#allocation0 + $0x8] sm:$0xff] %vm6762_vm11, %v11054_v52  }
 0x337   :  { %v8744_v13 = vsel %vm3846_vm0, %v8742_v62, %v8739_v58  ;;  %v8747_v39 = vld [vmem:[#allocation1 + $0x683] ss:$16 sm:%s8746_s18]   ;;  %s8394_s9 = smov 3  ;;  %s8397_s3 = smov 12  ;;  %6878 = vst.msk [vmem:[#allocation0 + $0x28] sm:$0xff] %vm6762_vm11, %v11055_v61  }
 0x338   :  { %v8752_v0 = vld [vmem:[#allocation1 + $0x683] ss:$16 sm:%s8751_s15]   ;;  %v8749_v43 = vsel %vm3850_vm1, %v8747_v39, %v8744_v13  ;;  %v8395_v25 = vld [vmem:[#allocation1 + $0x104] ss:$16 sm:%s8394_s9]   ;;  %s8402_s22 = smov 48  ;;  %s8407_s7 = smov 192 }
 0x339   :  { %v8762_v32 = vld [vmem:[#allocation1 + $0x103] ss:$16 sm:%s8761_s1]   ;;  %v8754_v8 = vsel %vm3854_vm2, %v8752_v0, %v8749_v43  ;;  %v8398_v27 = vld [vmem:[#allocation1 + $0x104] ss:$16 sm:%s8397_s3]   ;;  %s8417_s24 = smov 3  ;;  %s8420_s26 = smov 12 }
 0x33a   :  { %v8765_v2 = vld [vmem:[#allocation1 + $0x103] ss:$16 sm:%s8764_s4]   ;;  %v11256_v11 = vpack.i.bf16 %v8754_v8, %v8731_v63  ;;  %v8400_v54 = vsel %vm3846_vm0, %v8398_v27, %v8395_v25  ;;  %v8403_v30 = vld [vmem:[#allocation1 + $0x104] ss:$16 sm:%s8402_s22]   ;;  %s8425_s23 = smov 48  ;;  %s8430_s5 = smov 192  ;;  %v11069_v25 = vunpack.i.l.bf16 %v14710_v57  ;;  %v11070_v57 = vunpack.i.h.bf16 %v14710_v57  ;;  %v14787_v52 = vpop.permute.xlu1 %11097 }
 0x33b   :  { %v8767_v35 = vsel %vm3846_vm0, %v8765_v2, %v8762_v32  ;;  %v8770_v4 = vld [vmem:[#allocation1 + $0x103] ss:$16 sm:%s8769_s12]   ;;  %v8408_v3 = vld [vmem:[#allocation1 + $0x104] ss:$16 sm:%s8407_s7]   ;;  %v8405_v33 = vsel %vm3850_vm1, %v8403_v30, %v8400_v54  ;;  %s8853_s27 = smov 3  ;;  %s8856_s21 = smov 12 }
 0x33c   :  { %v8775_v23 = vld [vmem:[#allocation1 + $0x103] ss:$16 sm:%s8774_s2]   ;;  %v8772_v18 = vsel %vm3850_vm1, %v8770_v4, %v8767_v35  ;;  %11257 = vrot.lane.b32.xlu0 %v11256_v11, %s11453_s20  ;;  %v8418_v45 = vld [vmem:[#allocation1 + $0x304] ss:$16 sm:%s8417_s24]   ;;  %v8410_v1 = vsel %vm3854_vm2, %v8408_v3, %v8405_v33  ;;  %s8861_s10 = smov 48  ;;  %s8866_s8 = smov 192  ;;  %v14782_v33 = vpop.permute.xlu0 %11092 }
 0x33d   :  { %v8785_v14 = vld [vmem:[#allocation1 + $0x303] ss:$16 sm:%s8784_s29]   ;;  %v8777_v38 = vsel %vm3854_vm2, %v8775_v23, %v8772_v18  ;;  %v8421_v34 = vld [vmem:[#allocation1 + $0x304] ss:$16 sm:%s8420_s26]   ;;  %s8876_s25 = smov 3  ;;  %s8879_s6 = smov 12 }
 0x33e   :  { %v8788_v44 = vld [vmem:[#allocation1 + $0x303] ss:$16 sm:%s8787_s14]   ;;  %v8423_v37 = vsel %vm3846_vm0, %v8421_v34, %v8418_v45  ;;  %v8426_v12 = vld [vmem:[#allocation1 + $0x304] ss:$16 sm:%s8425_s23]   ;;  %s8884_s0 = smov 48  ;;  %s8889_s16 = smov 192 }
 0x33f   :  { %v8790_v22 = vsel %vm3846_vm0, %v8788_v44, %v8785_v14  ;;  %v8793_v17 = vld [vmem:[#allocation1 + $0x303] ss:$16 sm:%s8792_s13]   ;;  %v8431_v15 = vld [vmem:[#allocation1 + $0x304] ss:$16 sm:%s8430_s5]   ;;  %v8428_v53 = vsel %vm3850_vm1, %v8426_v12, %v8423_v37  ;;  %s8899_s30 = smov 3  ;;  %7039 = vst.msk [vmem:[#allocation0 + $0x18] sm:$0xff] %vm6762_vm11, %v11074_v41   ;;  %v11064_v14 = vunpack.i.l.bf16 %v14705_v50  ;;  %v11065_v50 = vunpack.i.h.bf16 %v14705_v50 }
 0x340   :  { %v8798_v24 = vld [vmem:[#allocation1 + $0x303] ss:$16 sm:%s8797_s11]   ;;  %v8795_v47 = vsel %vm3850_vm1, %v8793_v17, %v8790_v22  ;;  %v8433_v46 = vsel %vm3854_vm2, %v8431_v15, %v8428_v53  ;;  %s8902_s17 = smov 12  ;;  %s8907_s28 = smov 48  ;;  %7062 = vst.msk [vmem:[#allocation0 + $0x38] sm:$0xff] %vm6762_vm11, %v11075_v60  }
 0x341   :  { %v8800_v6 = vsel %vm3854_vm2, %v8798_v24, %v8795_v47  ;;  %v8854_v26 = vld [vmem:[#allocation1 + $0x183] ss:$16 sm:%s8853_s27]   ;;  %v11221_v9 = vpack.i.bf16 %v8433_v46, %v8410_v1  ;;  %s8912_s18 = smov 192  ;;  %s8922_s15 = smov 3  ;;  %6947 = vst.msk [vmem:[#allocation0 + $0x10] sm:$0xff] %vm6762_vm11, %v11064_v14  }
 0x342   :  { %v11261_v31 = vpack.i.bf16 %v8800_v6, %v8777_v38  ;;  %v8857_v42 = vld [vmem:[#allocation1 + $0x183] ss:$16 sm:%s8856_s21]   ;;  %s8925_s1 = smov 12  ;;  %s8930_s4 = smov 48  ;;  %6970 = vst.msk [vmem:[#allocation0 + $0x30] sm:$0xff] %vm6762_vm11, %v11065_v50  }
 0x343   :  { %v8862_v36 = vld [vmem:[#allocation1 + $0x183] ss:$16 sm:%s8861_s10]   ;;  %v8859_v48 = vsel %vm3846_vm0, %v8857_v42, %v8854_v26  ;;  %11222 = vrot.lane.b32.xlu2 %v11221_v9, %s11452_s19  ;;  %s8935_s12 = smov 192  ;;  %s8532_s2 = smov 3  ;;  %6993 = vst.msk [vmem:[#allocation0 + $0x50] sm:$0xff] %vm6762_vm11, %v11069_v25  }
 0x344   :  { %11262 = vrot.lane.b32.xlu1 %v11261_v31, %s11453_s20  ;;  %v8867_v49 = vld [vmem:[#allocation1 + $0x183] ss:$16 sm:%s8866_s8]   ;;  %v8864_v16 = vsel %vm3850_vm1, %v8862_v36, %v8859_v48  ;;  %v8533_v18 = vld [vmem:[#allocation1 + $0x584] ss:$16 sm:%s8532_s2]   ;;  %s8535_s29 = smov 12  ;;  %s8540_s14 = smov 48  ;;  %v14780_v31 = vpop.permute.xlu2 %11102 }
 0x345   :  { %v8877_v55 = vld [vmem:[#allocation1 + $0x383] ss:$16 sm:%s8876_s25]   ;;  %v8869_v5 = vsel %vm3854_vm2, %v8867_v49, %v8864_v16  ;;  %v8536_v38 = vld [vmem:[#allocation1 + $0x584] ss:$16 sm:%s8535_s29]   ;;  %s8545_s13 = smov 192  ;;  %s8555_s11 = smov 3 }
 0x346   :  { %v8880_v7 = vld [vmem:[#allocation1 + $0x383] ss:$16 sm:%s8879_s6]   ;;  %v8541_v22 = vld [vmem:[#allocation1 + $0x584] ss:$16 sm:%s8540_s14]   ;;  %v8538_v24 = vsel %vm3846_vm0, %v8536_v38, %v8533_v18  ;;  %s8558_s9 = smov 12  ;;  %s8563_s3 = smov 48 }
 0x347   :  { %v8882_v19 = vsel %vm3846_vm0, %v8880_v7, %v8877_v55  ;;  %v8885_v20 = vld [vmem:[#allocation1 + $0x383] ss:$16 sm:%s8884_s0]   ;;  %v8546_v51 = vld [vmem:[#allocation1 + $0x584] ss:$16 sm:%s8545_s13]   ;;  %v8543_v29 = vsel %vm3850_vm1, %v8541_v22, %v8538_v24  ;;  %s8568_s22 = smov 192  ;;  %s8990_s7 = smov 3 }
 0x348   :  { %v8887_v21 = vsel %vm3850_vm1, %v8885_v20, %v8882_v19  ;;  %v8890_v56 = vld [vmem:[#allocation1 + $0x383] ss:$16 sm:%s8889_s16]   ;;  %v8556_v47 = vld [vmem:[#allocation1 + $0x784] ss:$16 sm:%s8555_s11]   ;;  %v8548_v30 = vsel %vm3854_vm2, %v8546_v51, %v8543_v29  ;;  %v8991_v34 = vld [vmem:[#allocation1 + $0x402] ss:$16 sm:%s8990_s7]   ;;  %v11084_v51 = vunpack.i.l.bf16 %v14748_v28  ;;  %v11085_v28 = vunpack.i.h.bf16 %v14748_v28  ;;  %v14822_v29 = vpop.permute.xlu1 %11112 }
 0x349   :  { %v8900_v58 = vld [vmem:[#allocation1 + $0x583] ss:$16 sm:%s8899_s30]   ;;  %v8892_v62 = vsel %vm3854_vm2, %v8890_v56, %v8887_v21  ;;  %v8559_v6 = vld [vmem:[#allocation1 + $0x784] ss:$16 sm:%s8558_s9]   ;;  %s8993_s24 = smov 12  ;;  %s8998_s26 = smov 48 }
 0x34a   :  { %v8903_v63 = vld [vmem:[#allocation1 + $0x583] ss:$16 sm:%s8902_s17]   ;;  %v11271_v39 = vpack.i.bf16 %v8892_v62, %v8869_v5  ;;  %v8564_v54 = vld [vmem:[#allocation1 + $0x784] ss:$16 sm:%s8563_s3]   ;;  %v8561_v3 = vsel %vm3846_vm0, %v8559_v6, %v8556_v47  ;;  %v8994_v37 = vld [vmem:[#allocation1 + $0x402] ss:$16 sm:%s8993_s24]  }
 0x34b   :  { %v8908_v13 = vld [vmem:[#allocation1 + $0x583] ss:$16 sm:%s8907_s28]   ;;  %v8905_v0 = vsel %vm3846_vm0, %v8903_v63, %v8900_v58  ;;  %v8569_v59 = vld [vmem:[#allocation1 + $0x784] ss:$16 sm:%s8568_s22]   ;;  %v8566_v45 = vsel %vm3850_vm1, %v8564_v54, %v8561_v3  ;;  %v8999_v12 = vld [vmem:[#allocation1 + $0x402] ss:$16 sm:%s8998_s26]   ;;  %v8996_v61 = vsel %vm3846_vm0, %v8994_v37, %v8991_v34 }
 0x34c   :  { %v8913_v43 = vld [vmem:[#allocation1 + $0x583] ss:$16 sm:%s8912_s18]   ;;  %v8910_v2 = vsel %vm3850_vm1, %v8908_v13, %v8905_v0  ;;  %11272 = vrot.lane.b32.xlu0 %v11271_v39, %s11453_s20  ;;  %v8571_v1 = vsel %vm3854_vm2, %v8569_v59, %v8566_v45  ;;  %s9003_s23 = smov 192  ;;  %7016 = vst.msk [vmem:[#allocation0 + $0x70] sm:$0xff] %vm6762_vm11, %v11070_v57   ;;  %s9013_s5 = smov 3  ;;  %v9001_v26 = vsel %vm3850_vm1, %v8999_v12, %v8996_v61 }
 0x34d   :  { %v8923_v32 = vld [vmem:[#allocation1 + $0x783] ss:$16 sm:%s8922_s15]   ;;  %v8915_v4 = vsel %vm3854_vm2, %v8913_v43, %v8910_v2  ;;  %v11236_v15 = vpack.i.bf16 %v8571_v1, %v8548_v30  ;;  %v9004_v53 = vld [vmem:[#allocation1 + $0x402] ss:$16 sm:%s9003_s23]   ;;  %s9016_s27 = smov 12  ;;  %s9021_s21 = smov 48  ;;  %v11089_v43 = vunpack.i.l.bf16 %v14740_v10  ;;  %v11090_v10 = vunpack.i.h.bf16 %v14740_v10  ;;  %v14826_v30 = vpop.permute.xlu2 %11117 }
 0x34e   :  { %v8926_v8 = vld [vmem:[#allocation1 + $0x783] ss:$16 sm:%s8925_s1]   ;;  %v9014_v41 = vld [vmem:[#allocation1 + $0x602] ss:$16 sm:%s9013_s5]   ;;  %s9026_s10 = smov 192  ;;  %v9006_v42 = vsel %vm3854_vm2, %v9004_v53, %v9001_v26  ;;  %s9039_s8 = smov 12 }
 0x34f   :  { %v8931_v35 = vld [vmem:[#allocation1 + $0x783] ss:$16 sm:%s8930_s4]   ;;  %v8928_v23 = vsel %vm3846_vm0, %v8926_v8, %v8923_v32  ;;  %v9017_v46 = vld [vmem:[#allocation1 + $0x602] ss:$16 sm:%s9016_s27]   ;;  %11237 = vrot.lane.b32.xlu2 %v11236_v15, %s11452_s19  ;;  %s9036_s19 = smov 3  ;;  %s9044_s25 = smov 48 }
 0x350   :  { %v8936_v11 = vld [vmem:[#allocation1 + $0x783] ss:$16 sm:%s8935_s12]   ;;  %v8933_v44 = vsel %vm3850_vm1, %v8931_v35, %v8928_v23  ;;  %v9019_v36 = vsel %vm3846_vm0, %v9017_v46, %v9014_v41  ;;  %v9022_v9 = vld [vmem:[#allocation1 + $0x602] ss:$16 sm:%s9021_s21]   ;;  %s9049_s6 = smov 192  ;;  %s9059_s0 = smov 3 }
 0x351   :  { %v8938_v17 = vsel %vm3854_vm2, %v8936_v11, %v8933_v44  ;;  %v9027_v48 = vld [vmem:[#allocation1 + $0x602] ss:$16 sm:%s9026_s10]   ;;  %v9024_v49 = vsel %vm3850_vm1, %v9022_v9, %v9019_v36  ;;  %s9062_s16 = smov 12  ;;  %s9067_s30 = smov 48  ;;  %v11079_v11 = vunpack.i.l.bf16 %v14742_v40  ;;  %v11080_v40 = vunpack.i.h.bf16 %v14742_v40  ;;  %7176 = vst.msk [vmem:[#allocation0 + $0x40] sm:$0xff] %vm7129_vm12, %v11089_v43  }
 0x352   :  { %v11276_v27 = vpack.i.bf16 %v8938_v17, %v8915_v4  ;;  %v9037_v16 = vld [vmem:[#allocation1 + $0x82] ss:$16 sm:%s9036_s19]   ;;  %v9029_v7 = vsel %vm3854_vm2, %v9027_v48, %v9024_v49  ;;  %s9072_s17 = smov 192  ;;  %s8669_s28 = smov 3  ;;  %7199 = vst.msk [vmem:[#allocation0 + $0x60] sm:$0xff] %vm7129_vm12, %v11090_v10  }
 0x353   :  { %v9040_v55 = vld [vmem:[#allocation1 + $0x82] ss:$16 sm:%s9039_s8]   ;;  %v11286_v21 = vpack.i.bf16 %v9029_v7, %v9006_v42  ;;  %s8672_s18 = smov 12  ;;  %s11454_s15 = smov 16   ;;  %v8670_v2 = vld [vmem:[#allocation1 + $0x83] ss:$16 sm:%s8669_s28]  }
 0x354   :  { %11277 = vrot.lane.b32.xlu1 %v11276_v27, %s11453_s20  ;;  %v9042_v5 = vsel %vm3846_vm0, %v9040_v55, %v9037_v16  ;;  %v9045_v19 = vld [vmem:[#allocation1 + $0x82] ss:$16 sm:%s9044_s25]   ;;  %v8673_v8 = vld [vmem:[#allocation1 + $0x83] ss:$16 sm:%s8672_s18]   ;;  %s8677_s1 = smov 48  ;;  %s8682_s4 = smov 192  ;;  %v14820_v27 = vpop.permute.xlu0 %11107 }
 0x355   :  { %v9050_v20 = vld [vmem:[#allocation1 + $0x82] ss:$16 sm:%s9049_s6]   ;;  %v9047_v56 = vsel %vm3850_vm1, %v9045_v19, %v9042_v5  ;;  %11287 = vrot.lane.b32.xlu0 %v11286_v21, %s11454_s15  ;;  %v8675_v60 = vsel %vm3846_vm0, %v8673_v8, %v8670_v2  ;;  %v8678_v4 = vld [vmem:[#allocation1 + $0x83] ss:$16 sm:%s8677_s1]   ;;  %s8692_s12 = smov 3  ;;  %s8695_s2 = smov 12  ;;  %v11104_v19 = vunpack.i.l.bf16 %v14780_v31  ;;  %v11105_v31 = vunpack.i.h.bf16 %v14780_v31 }
 0x356   :  { %v9060_v58 = vld [vmem:[#allocation1 + $0x282] ss:$16 sm:%s9059_s0]   ;;  %v9052_v63 = vsel %vm3854_vm2, %v9050_v20, %v9047_v56  ;;  %v8683_v23 = vld [vmem:[#allocation1 + $0x83] ss:$16 sm:%s8682_s4]   ;;  %v8680_v14 = vsel %vm3850_vm1, %v8678_v4, %v8675_v60  ;;  %s8700_s29 = smov 48  ;;  %s8705_s14 = smov 192  ;;  %v11099_v4 = vunpack.i.l.bf16 %v14787_v52  ;;  %v11100_v52 = vunpack.i.h.bf16 %v14787_v52 }
 0x357   :  { %v9063_v62 = vld [vmem:[#allocation1 + $0x282] ss:$16 sm:%s9062_s16]   ;;  %v8693_v44 = vld [vmem:[#allocation1 + $0x283] ss:$16 sm:%s8692_s12]   ;;  %v8685_v22 = vsel %vm3854_vm2, %v8683_v23, %v8680_v14  ;;  %s9128_s13 = smov 3  ;;  %s9131_s11 = smov 12 }
 0x358   :  { %v9065_v13 = vsel %vm3846_vm0, %v9063_v62, %v9060_v58  ;;  %v9068_v39 = vld [vmem:[#allocation1 + $0x282] ss:$16 sm:%s9067_s30]   ;;  %v8696_v38 = vld [vmem:[#allocation1 + $0x283] ss:$16 sm:%s8695_s2]   ;;  %s9136_s9 = smov 48  ;;  %7085 = vst.msk [vmem:[#allocation0 + $0x58] sm:$0xff] %vm6762_vm11, %v11079_v11  }
 0x359   :  { %v9073_v0 = vld [vmem:[#allocation1 + $0x282] ss:$16 sm:%s9072_s17]   ;;  %v9070_v32 = vsel %vm3850_vm1, %v9068_v39, %v9065_v13  ;;  %v8698_v50 = vsel %vm3846_vm0, %v8696_v38, %v8693_v44  ;;  %v8701_v17 = vld [vmem:[#allocation1 + $0x283] ss:$16 sm:%s8700_s29]   ;;  %s9141_s3 = smov 192  ;;  %7108 = vst.msk [vmem:[#allocation0 + $0x78] sm:$0xff] %vm6762_vm11, %v11080_v40   ;;  %v11094_v39 = vunpack.i.l.bf16 %v14782_v33  ;;  %v11095_v33 = vunpack.i.h.bf16 %v14782_v33  ;;  %v14859_v44 = vpop.permute.xlu1 %11127 }
 0x35a   :  { %v9075_v35 = vsel %vm3854_vm2, %v9073_v0, %v9070_v32  ;;  %v8706_v24 = vld [vmem:[#allocation1 + $0x283] ss:$16 sm:%s8705_s14]   ;;  %v8703_v47 = vsel %vm3850_vm1, %v8701_v17, %v8698_v50  ;;  %v9129_v25 = vld [vmem:[#allocation1 + $0x102] ss:$16 sm:%s9128_s13]   ;;  %s9151_s22 = smov 3  ;;  %s9154_s7 = smov 12  ;;  %v14864_v50 = vpop.permute.xlu2 %11132 }
 0x35b   :  { %v11291_v18 = vpack.i.bf16 %v9075_v35, %v9052_v63  ;;  %v8708_v6 = vsel %vm3854_vm2, %v8706_v24, %v8703_v47  ;;  %v9132_v54 = vld [vmem:[#allocation1 + $0x102] ss:$16 sm:%s9131_s11]   ;;  %7130 = vst.msk [vmem:[#allocation0] sm:$0xff] %vm7129_vm12, %v11084_v51   ;;  %s9159_s24 = smov 48  ;;  %s9164_s26 = smov 192 }
 0x35c   :  { %v9137_v57 = vld [vmem:[#allocation1 + $0x102] ss:$16 sm:%s9136_s9]   ;;  %v11251_v3 = vpack.i.bf16 %v8708_v6, %v8685_v22  ;;  %v9134_v59 = vsel %vm3846_vm0, %v9132_v54, %v9129_v25  ;;  %7153 = vst.msk [vmem:[#allocation0 + $0x20] sm:$0xff] %vm7129_vm12, %v11085_v28   ;;  %s9174_s23 = smov 3  ;;  %s9177_s5 = smov 12  ;;  %v14857_v14 = vpop.permute.xlu0 %11122 }
 0x35d   :  { %11292 = vrot.lane.b32.xlu1 %v11291_v18, %s11454_s15  ;;  %v9142_v45 = vld [vmem:[#allocation1 + $0x102] ss:$16 sm:%s9141_s3]   ;;  %v9139_v34 = vsel %vm3850_vm1, %v9137_v57, %v9134_v59  ;;  %s9182_s27 = smov 48  ;;  %s9187_s21 = smov 192  ;;  %7314 = vst.msk [vmem:[#allocation0 + $0x10] sm:$0xff] %vm7129_vm12, %v11104_v19   ;;  %v11109_v57 = vunpack.i.l.bf16 %v14820_v27  ;;  %v11110_v27 = vunpack.i.h.bf16 %v14820_v27 }
 0x35e   :  { %v9152_v1 = vld [vmem:[#allocation1 + $0x302] ss:$16 sm:%s9151_s22]   ;;  %11252 = vrot.lane.b32.xlu2 %v11251_v3, %s11453_s20  ;;  %v9144_v12 = vsel %vm3854_vm2, %v9142_v45, %v9139_v34  ;;  %s9197_s10 = smov 3  ;;  %s9200_s19 = smov 12  ;;  %7337 = vst.msk [vmem:[#allocation0 + $0x30] sm:$0xff] %vm7129_vm12, %v11105_v31  }
 0x35f   :  { %v9155_v37 = vld [vmem:[#allocation1 + $0x302] ss:$16 sm:%s9154_s7]   ;;  %s9205_s8 = smov 48  ;;  %s9210_s25 = smov 192  ;;  %7222 = vst.msk [vmem:[#allocation0 + $0x8] sm:$0xff] %vm7129_vm12, %v11094_v39  }
 0x360   :  { %v9157_v15 = vsel %vm3846_vm0, %v9155_v37, %v9152_v1  ;;  %v9160_v61 = vld [vmem:[#allocation1 + $0x302] ss:$16 sm:%s9159_s24]   ;;  %s8807_s6 = smov 3  ;;  %s8810_s0 = smov 12  ;;  %7245 = vst.msk [vmem:[#allocation0 + $0x28] sm:$0xff] %vm7129_vm12, %v11095_v33   ;;  %v11124_v33 = vunpack.i.l.bf16 %v14857_v14  ;;  %v11125_v14 = vunpack.i.h.bf16 %v14857_v14 }
 0x361   :  { %v9162_v53 = vsel %vm3850_vm1, %v9160_v61, %v9157_v15  ;;  %v9165_v26 = vld [vmem:[#allocation1 + $0x302] ss:$16 sm:%s9164_s26]   ;;  %v8808_v58 = vld [vmem:[#allocation1 + $0x503] ss:$16 sm:%s8807_s6]   ;;  %s8815_s16 = smov 48  ;;  %s8820_s30 = smov 192 }
 0x362   :  { %v9175_v41 = vld [vmem:[#allocation1 + $0x502] ss:$16 sm:%s9174_s23]   ;;  %v9167_v46 = vsel %vm3854_vm2, %v9165_v26, %v9162_v53  ;;  %v8811_v63 = vld [vmem:[#allocation1 + $0x503] ss:$16 sm:%s8810_s0]   ;;  %s8830_s17 = smov 3  ;;  %s8833_s28 = smov 12 }
 0x363   :  { %v9178_v42 = vld [vmem:[#allocation1 + $0x502] ss:$16 sm:%s9177_s5]   ;;  %v11301_v9 = vpack.i.bf16 %v9167_v46, %v9144_v12  ;;  %v8816_v13 = vld [vmem:[#allocation1 + $0x503] ss:$16 sm:%s8815_s16]   ;;  %v8813_v43 = vsel %vm3846_vm0, %v8811_v63, %v8808_v58  ;;  %s8838_s18 = smov 48  ;;  %s8843_s1 = smov 192 }
 0x364   :  { %v9183_v36 = vld [vmem:[#allocation1 + $0x502] ss:$16 sm:%s9182_s27]   ;;  %v9180_v48 = vsel %vm3846_vm0, %v9178_v42, %v9175_v41  ;;  %v8821_v32 = vld [vmem:[#allocation1 + $0x503] ss:$16 sm:%s8820_s30]   ;;  %v8818_v10 = vsel %vm3850_vm1, %v8816_v13, %v8813_v43  ;;  %s9266_s4 = smov 3  ;;  %s9269_s12 = smov 12 }
 0x365   :  { %v9188_v49 = vld [vmem:[#allocation1 + $0x502] ss:$16 sm:%s9187_s21]   ;;  %v9185_v55 = vsel %vm3850_vm1, %v9183_v36, %v9180_v48  ;;  %11302 = vrot.lane.b32.xlu0 %v11301_v9, %s11454_s15  ;;  %v8831_v2 = vld [vmem:[#allocation1 + $0x703] ss:$16 sm:%s8830_s17]   ;;  %v8823_v23 = vsel %vm3854_vm2, %v8821_v32, %v8818_v10  ;;  %s9274_s2 = smov 48  ;;  %s9279_s29 = smov 192  ;;  %v14900_v10 = vpop.permute.xlu1 %11142 }
 0x366   :  { %v9198_v16 = vld [vmem:[#allocation1 + $0x702] ss:$16 sm:%s9197_s10]   ;;  %v9190_v20 = vsel %vm3854_vm2, %v9188_v49, %v9185_v55  ;;  %v8834_v35 = vld [vmem:[#allocation1 + $0x703] ss:$16 sm:%s8833_s28]   ;;  %s9289_s14 = smov 3  ;;  %7268 = vst.msk [vmem:[#allocation0 + $0x48] sm:$0xff] %vm7129_vm12, %v11099_v4  }
 0x367   :  { %v9201_v7 = vld [vmem:[#allocation1 + $0x702] ss:$16 sm:%s9200_s19]   ;;  %v8839_v60 = vld [vmem:[#allocation1 + $0x703] ss:$16 sm:%s8838_s18]   ;;  %v8836_v11 = vsel %vm3846_vm0, %v8834_v35, %v8831_v2  ;;  %s9292_s13 = smov 12  ;;  %7291 = vst.msk [vmem:[#allocation0 + $0x68] sm:$0xff] %vm7129_vm12, %v11100_v52  }
 0x368   :  { %v9206_v5 = vld [vmem:[#allocation1 + $0x702] ss:$16 sm:%s9205_s8]   ;;  %v9203_v21 = vsel %vm3846_vm0, %v9201_v7, %v9198_v16  ;;  %v8844_v18 = vld [vmem:[#allocation1 + $0x703] ss:$16 sm:%s8843_s1]   ;;  %v8841_v38 = vsel %vm3850_vm1, %v8839_v60, %v8836_v11  ;;  %s9297_s11 = smov 48  ;;  %s9302_s9 = smov 192  ;;  %v11114_v7 = vunpack.i.l.bf16 %v14822_v29  ;;  %v11115_v29 = vunpack.i.h.bf16 %v14822_v29 }
 0x369   :  { %v9211_v56 = vld [vmem:[#allocation1 + $0x702] ss:$16 sm:%s9210_s25]   ;;  %v9208_v62 = vsel %vm3850_vm1, %v9206_v5, %v9203_v21  ;;  %v8846_v17 = vsel %vm3854_vm2, %v8844_v18, %v8841_v38  ;;  %s9315_s3 = smov 12  ;;  %s9320_s22 = smov 48  ;;  %7360 = vst.msk [vmem:[#allocation0 + $0x50] sm:$0xff] %vm7129_vm12, %v11109_v57  }
 0x36a   :  { %v9213_v0 = vsel %vm3854_vm2, %v9211_v56, %v9208_v62  ;;  %v9267_v40 = vld [vmem:[#allocation1 + $0x582] ss:$16 sm:%s9266_s4]   ;;  %v11266_v47 = vpack.i.bf16 %v8846_v17, %v8823_v23  ;;  %v9316_v12 = vld [vmem:[#allocation1 + $0x1] ss:$16 sm:%s9315_s3]   ;;  %s9325_s7 = smov 192  ;;  %s9334_s24 = smov 3  ;;  %v11119_v62 = vunpack.i.l.bf16 %v14826_v30  ;;  %v11120_v30 = vunpack.i.h.bf16 %v14826_v30  ;;  %v14905_v23 = vpop.permute.xlu2 %11147 }
 0x36b   :  { %v11306_v8 = vpack.i.bf16 %v9213_v0, %v9190_v20  ;;  %v9270_v22 = vld [vmem:[#allocation1 + $0x582] ss:$16 sm:%s9269_s12]   ;;  %v9321_v53 = vld [vmem:[#allocation1 + $0x1] ss:$16 sm:%s9320_s22]   ;;  %s9337_s26 = smov 12  ;;  %s9342_s23 = smov 48 }
 0x36c   :  { %v9272_v24 = vsel %vm3846_vm0, %v9270_v22, %v9267_v40  ;;  %v9275_v51 = vld [vmem:[#allocation1 + $0x582] ss:$16 sm:%s9274_s2]   ;;  %11267 = vrot.lane.b32.xlu2 %v11266_v47, %s11453_s20  ;;  %s9312_s20 = smov 3  ;;  %v9326_v26 = vld [vmem:[#allocation1 + $0x1] ss:$16 sm:%s9325_s7]   ;;  %s9347_s5 = smov 192 }
 0x36d   :  { %11307 = vrot.lane.b32.xlu1 %v11306_v8, %s11454_s15  ;;  %v9277_v28 = vsel %vm3850_vm1, %v9275_v51, %v9272_v24  ;;  %v9280_v25 = vld [vmem:[#allocation1 + $0x582] ss:$16 sm:%s9279_s29]   ;;  %v9313_v37 = vld [vmem:[#allocation1 + $0x1] ss:$16 sm:%s9312_s20]   ;;  %s8945_s27 = smov 3  ;;  %s8948_s21 = smov 12  ;;  %v14898_v8 = vpop.permute.xlu0 %11137 }
 0x36e   :  { %v9290_v6 = vld [vmem:[#allocation1 + $0x782] ss:$16 sm:%s9289_s14]   ;;  %v9282_v3 = vsel %vm3854_vm2, %v9280_v25, %v9277_v28  ;;  %v9318_v61 = vsel %vm3846_vm0, %v9316_v12, %v9313_v37  ;;  %v9335_v42 = vld [vmem:[#allocation1 + $0x201] ss:$16 sm:%s9334_s24]   ;;  %s8953_s10 = smov 48  ;;  %s8958_s19 = smov 192 }
 0x36f   :  { %v9293_v54 = vld [vmem:[#allocation1 + $0x782] ss:$16 sm:%s9292_s13]   ;;  %v9323_v46 = vsel %vm3850_vm1, %v9321_v53, %v9318_v61  ;;  %v9338_v36 = vld [vmem:[#allocation1 + $0x201] ss:$16 sm:%s9337_s26]   ;;  %s8967_s8 = smov 3  ;;  %s8970_s25 = smov 12  ;;  %v14922_v53 = vpop.permute.xlu1 %11157 }
 0x370   :  { %v9295_v59 = vsel %vm3846_vm0, %v9293_v54, %v9290_v6  ;;  %v9298_v45 = vld [vmem:[#allocation1 + $0x782] ss:$16 sm:%s9297_s11]   ;;  %v9343_v9 = vld [vmem:[#allocation1 + $0x201] ss:$16 sm:%s9342_s23]   ;;  %v9328_v48 = vsel %vm3854_vm2, %v9326_v26, %v9323_v46  ;;  %v9340_v49 = vsel %vm3846_vm0, %v9338_v36, %v9335_v42  ;;  %s8975_s6 = smov 48  ;;  %s8980_s0 = smov 192 }
 0x371   :  { %v9303_v34 = vld [vmem:[#allocation1 + $0x782] ss:$16 sm:%s9302_s9]   ;;  %v9300_v1 = vsel %vm3850_vm1, %v9298_v45, %v9295_v59  ;;  %v9348_v16 = vld [vmem:[#allocation1 + $0x201] ss:$16 sm:%s9347_s5]   ;;  %v9345_v5 = vsel %vm3850_vm1, %v9343_v9, %v9340_v49  ;;  %7383 = vst.msk [vmem:[#allocation0 + $0x70] sm:$0xff] %vm7129_vm12, %v11110_v27   ;;  %s9403_s16 = smov 3  ;;  %v11129_v49 = vunpack.i.l.bf16 %v14859_v44  ;;  %v11130_v44 = vunpack.i.h.bf16 %v14859_v44 }
 0x372   :  { %v9305_v15 = vsel %vm3854_vm2, %v9303_v34, %v9300_v1  ;;  %v8946_v55 = vld [vmem:[#allocation1 + $0x2] ss:$16 sm:%s8945_s27]   ;;  %v9350_v21 = vsel %vm3854_vm2, %v9348_v16, %v9345_v5  ;;  %7406 = vst.msk [vmem:[#allocation0 + $0x18] sm:$0xff] %vm7129_vm12, %v11114_v7   ;;  %s9406_s30 = smov 12  ;;  %s11455_s17 = smov 8   ;;  %v14927_v36 = vpop.permute.xlu2 %11162 }
 0x373   :  { %v11316_v41 = vpack.i.bf16 %v9305_v15, %v9282_v3  ;;  %v8949_v19 = vld [vmem:[#allocation1 + $0x2] ss:$16 sm:%s8948_s21]   ;;  %v11321_v63 = vpack.i.bf16 %v9350_v21, %v9328_v48  ;;  %7429 = vst.msk [vmem:[#allocation0 + $0x38] sm:$0xff] %vm7129_vm12, %v11115_v29   ;;  %v9404_v60 = vld [vmem:[#allocation1 + $0x81] ss:$16 sm:%s9403_s16]   ;;  %s9411_s28 = smov 48 }
 0x374   :  { %v8954_v20 = vld [vmem:[#allocation1 + $0x2] ss:$16 sm:%s8953_s10]   ;;  %v8951_v56 = vsel %vm3846_vm0, %v8949_v19, %v8946_v55  ;;  %v9407_v4 = vld [vmem:[#allocation1 + $0x81] ss:$16 sm:%s9406_s30]   ;;  %7452 = vst.msk [vmem:[#allocation0 + $0x58] sm:$0xff] %vm7129_vm12, %v11119_v62   ;;  %s9416_s18 = smov 192 }
 0x375   :  { %11317 = vrot.lane.b32.xlu0 %v11316_v41, %s11454_s15  ;;  %v8959_v58 = vld [vmem:[#allocation1 + $0x2] ss:$16 sm:%s8958_s19]   ;;  %v8956_v13 = vsel %vm3850_vm1, %v8954_v20, %v8951_v56  ;;  %11322 = vrot.lane.b32.xlu1 %v11321_v63, %s11455_s17  ;;  %v9409_v18 = vsel %vm3846_vm0, %v9407_v4, %v9404_v60  ;;  %v9412_v52 = vld [vmem:[#allocation1 + $0x81] ss:$16 sm:%s9411_s28]   ;;  %s9426_s1 = smov 3  ;;  %7475 = vst.msk [vmem:[#allocation0 + $0x78] sm:$0xff] %vm7129_vm12, %v11120_v30   ;;  %v14920_v61 = vpop.permute.xlu0 %11152  ;;  %v11135_v56 = vunpack.i.h.bf16 %v14864_v50  ;;  %v11134_v50 = vunpack.i.l.bf16 %v14864_v50 }
 0x376   :  { %v8968_v31 = vld [vmem:[#allocation1 + $0x202] ss:$16 sm:%s8967_s8]   ;;  %v8961_v43 = vsel %vm3854_vm2, %v8959_v58, %v8956_v13  ;;  %v9414_v40 = vsel %vm3850_vm1, %v9412_v52, %v9409_v18  ;;  %v9417_v22 = vld [vmem:[#allocation1 + $0x81] ss:$16 sm:%s9416_s18]   ;;  %s9429_s4 = smov 12  ;;  %s9434_s12 = smov 48 }
 0x377   :  { %v8971_v39 = vld [vmem:[#allocation1 + $0x202] ss:$16 sm:%s8970_s25]   ;;  %v9427_v17 = vld [vmem:[#allocation1 + $0x281] ss:$16 sm:%s9426_s1]   ;;  %s9439_s2 = smov 192  ;;  %7497 = vst.msk [vmem:[#allocation0] sm:$0xff] %vm7496_vm13, %v11124_v33   ;;  %v9419_v51 = vsel %vm3854_vm2, %v9417_v22, %v9414_v40  ;;  %v14951_v4 = vpop.permute.xlu1 %11172 }
 0x378   :  { %v8976_v0 = vld [vmem:[#allocation1 + $0x202] ss:$16 sm:%s8975_s6]   ;;  %v8973_v32 = vsel %vm3846_vm0, %v8971_v39, %v8968_v31  ;;  %v9430_v24 = vld [vmem:[#allocation1 + $0x281] ss:$16 sm:%s9429_s4]   ;;  %s9449_s29 = smov 3  ;;  %s9452_s14 = smov 12 }
 0x379   :  { %v8981_v2 = vld [vmem:[#allocation1 + $0x202] ss:$16 sm:%s8980_s0]   ;;  %v8978_v35 = vsel %vm3850_vm1, %v8976_v0, %v8973_v32  ;;  %v9432_v47 = vsel %vm3846_vm0, %v9430_v24, %v9427_v17  ;;  %v9435_v28 = vld [vmem:[#allocation1 + $0x281] ss:$16 sm:%s9434_s12]   ;;  %s9457_s13 = smov 48  ;;  %s9462_s11 = smov 192  ;;  %v11139_v0 = vunpack.i.l.bf16 %v14898_v8  ;;  %v11140_v8 = vunpack.i.h.bf16 %v14898_v8 }
 0x37a   :  { %v8983_v11 = vsel %vm3854_vm2, %v8981_v2, %v8978_v35  ;;  %v9440_v25 = vld [vmem:[#allocation1 + $0x281] ss:$16 sm:%s9439_s2]   ;;  %v9437_v6 = vsel %vm3850_vm1, %v9435_v28, %v9432_v47  ;;  %s9472_s9 = smov 3  ;;  %s9475_s20 = smov 12  ;;  %7520 = vst.msk [vmem:[#allocation0 + $0x20] sm:$0xff] %vm7496_vm13, %v11125_v14  }
 0x37b   :  { %v11281_v38 = vpack.i.bf16 %v8983_v11, %v8961_v43  ;;  %v9450_v54 = vld [vmem:[#allocation1 + $0x481] ss:$16 sm:%s9449_s29]   ;;  %v9442_v3 = vsel %vm3854_vm2, %v9440_v25, %v9437_v6  ;;  %s9480_s3 = smov 48  ;;  %s9485_s22 = smov 192  ;;  %7543 = vst.msk [vmem:[#allocation0 + $0x40] sm:$0xff] %vm7496_vm13, %v11129_v49  }
 0x37c   :  { %v9453_v57 = vld [vmem:[#allocation1 + $0x481] ss:$16 sm:%s9452_s14]   ;;  %v11331_v1 = vpack.i.bf16 %v9442_v3, %v9419_v51  ;;  %s9082_s7 = smov 3  ;;  %s9085_s24 = smov 12  ;;  %7566 = vst.msk [vmem:[#allocation0 + $0x60] sm:$0xff] %vm7496_vm13, %v11130_v44  }
 0x37d   :  { %11282 = vrot.lane.b32.xlu2 %v11281_v38, %s11454_s15  ;;  %v9455_v59 = vsel %vm3846_vm0, %v9453_v57, %v9450_v54  ;;  %v9458_v45 = vld [vmem:[#allocation1 + $0x481] ss:$16 sm:%s9457_s13]   ;;  %v9083_v27 = vld [vmem:[#allocation1 + $0x482] ss:$16 sm:%s9082_s7]   ;;  %s9090_s26 = smov 48  ;;  %s9095_s23 = smov 192  ;;  %v14949_v60 = vpop.permute.xlu0 %11167  ;;  %v14955_v38 = vpop.permute.xlu2 %11177 }
 0x37e   :  { %v9463_v34 = vld [vmem:[#allocation1 + $0x481] ss:$16 sm:%s9462_s11]   ;;  %v9460_v37 = vsel %vm3850_vm1, %v9458_v45, %v9455_v59  ;;  %11332 = vrot.lane.b32.xlu0 %v11331_v1, %s11455_s17  ;;  %v9086_v48 = vld [vmem:[#allocation1 + $0x482] ss:$16 sm:%s9085_s24]   ;;  %s9105_s5 = smov 3  ;;  %s9108_s27 = smov 12 }
 0x37f   :  { %v9473_v12 = vld [vmem:[#allocation1 + $0x681] ss:$16 sm:%s9472_s9]   ;;  %v9465_v26 = vsel %vm3854_vm2, %v9463_v34, %v9460_v37  ;;  %v9088_v55 = vsel %vm3846_vm0, %v9086_v48, %v9083_v27  ;;  %v9091_v7 = vld [vmem:[#allocation1 + $0x482] ss:$16 sm:%s9090_s26]   ;;  %s9113_s21 = smov 48  ;;  %s9118_s10 = smov 192  ;;  %v14974_v27 = vpop.permute.xlu1 %11187 }
 0x380   :  { %v9476_v15 = vld [vmem:[#allocation1 + $0x681] ss:$16 sm:%s9475_s20]   ;;  %v9096_v5 = vld [vmem:[#allocation1 + $0x482] ss:$16 sm:%s9095_s23]   ;;  %v9093_v20 = vsel %vm3850_vm1, %v9091_v7, %v9088_v55  ;;  %s9541_s19 = smov 3  ;;  %s9544_s8 = smov 12  ;;  %v11150_v7 = vunpack.i.h.bf16 %v14905_v23  ;;  %v11149_v23 = vunpack.i.l.bf16 %v14905_v23 }
 0x381   :  { %v9478_v41 = vsel %vm3846_vm0, %v9476_v15, %v9473_v12  ;;  %v9481_v46 = vld [vmem:[#allocation1 + $0x681] ss:$16 sm:%s9480_s3]   ;;  %v9106_v29 = vld [vmem:[#allocation1 + $0x682] ss:$16 sm:%s9105_s5]   ;;  %v9098_v58 = vsel %vm3854_vm2, %v9096_v5, %v9093_v20  ;;  %s9549_s25 = smov 48  ;;  %s9554_s6 = smov 192 }
 0x382   :  { %v9486_v42 = vld [vmem:[#allocation1 + $0x681] ss:$16 sm:%s9485_s22]   ;;  %v9483_v9 = vsel %vm3850_vm1, %v9481_v46, %v9478_v41  ;;  %v9109_v21 = vld [vmem:[#allocation1 + $0x682] ss:$16 sm:%s9108_s27]   ;;  %7612 = vst.msk [vmem:[#allocation0 + $0x28] sm:$0xff] %vm7496_vm13, %v11135_v56   ;;  %s9564_s0 = smov 3  ;;  %v11144_v41 = vunpack.i.l.bf16 %v14900_v10  ;;  %v11145_v10 = vunpack.i.h.bf16 %v14900_v10 }
 0x383   :  { %v9488_v16 = vsel %vm3854_vm2, %v9486_v42, %v9483_v9  ;;  %v9111_v31 = vsel %vm3846_vm0, %v9109_v21, %v9106_v29  ;;  %v9114_v62 = vld [vmem:[#allocation1 + $0x682] ss:$16 sm:%s9113_s21]   ;;  %v9542_v39 = vld [vmem:[#allocation1 + $0x501] ss:$16 sm:%s9541_s19]   ;;  %s9567_s16 = smov 12  ;;  %7589 = vst.msk [vmem:[#allocation0 + $0x8] sm:$0xff] %vm7496_vm13, %v11134_v50  }
 0x384   :  { %v11336_v19 = vpack.i.bf16 %v9488_v16, %v9465_v26  ;;  %v9119_v63 = vld [vmem:[#allocation1 + $0x682] ss:$16 sm:%s9118_s10]   ;;  %v9116_v13 = vsel %vm3850_vm1, %v9114_v62, %v9111_v31  ;;  %v9545_v43 = vld [vmem:[#allocation1 + $0x501] ss:$16 sm:%s9544_s8]   ;;  %s9572_s30 = smov 48  ;;  %s9577_s28 = smov 192  ;;  %v11154_v31 = vunpack.i.l.bf16 %v14920_v61  ;;  %v11155_v61 = vunpack.i.h.bf16 %v14920_v61 }
 0x385   :  { %v9121_v30 = vsel %vm3854_vm2, %v9119_v63, %v9116_v13  ;;  %v9550_v32 = vld [vmem:[#allocation1 + $0x501] ss:$16 sm:%s9549_s25]   ;;  %v9547_v33 = vsel %vm3846_vm0, %v9545_v43, %v9542_v39  ;;  %s9587_s18 = smov 3  ;;  %7635 = vst.msk [vmem:[#allocation0 + $0x48] sm:$0xff] %vm7496_vm13, %v11139_v0   ;;  %s9590_s1 = smov 12  ;;  %v14972_v9 = vpop.permute.xlu0 %11182  ;;  %v14979_v5 = vpop.permute.xlu2 %11192 }
 0x386   :  { %11337 = vrot.lane.b32.xlu1 %v11336_v19, %s11455_s17  ;;  %v11296_v2 = vpack.i.bf16 %v9121_v30, %v9098_v58  ;;  %v9555_v35 = vld [vmem:[#allocation1 + $0x501] ss:$16 sm:%s9554_s6]   ;;  %v9552_v11 = vsel %vm3850_vm1, %v9550_v32, %v9547_v33  ;;  %s9595_s4 = smov 48  ;;  %s9600_s12 = smov 192  ;;  %7658 = vst.msk [vmem:[#allocation0 + $0x68] sm:$0xff] %vm7496_vm13, %v11140_v8   ;;  %v11159_v30 = vunpack.i.l.bf16 %v14922_v53  ;;  %v11160_v53 = vunpack.i.h.bf16 %v14922_v53 }
 0x387   :  { %v9565_v18 = vld [vmem:[#allocation1 + $0x701] ss:$16 sm:%s9564_s0]   ;;  %v9557_v40 = vsel %vm3854_vm2, %v9555_v35, %v9552_v11  ;;  %s9610_s2 = smov 3  ;;  %s9613_s29 = smov 12  ;;  %7681 = vst.msk [vmem:[#allocation0 + $0x10] sm:$0xff] %vm7496_vm13, %v11144_v41   ;;  %v11165_v11 = vunpack.i.h.bf16 %v14927_v36  ;;  %v11164_v36 = vunpack.i.l.bf16 %v14927_v36 }
 0x388   :  { %v9568_v52 = vld [vmem:[#allocation1 + $0x701] ss:$16 sm:%s9567_s16]   ;;  %11297 = vrot.lane.b32.xlu2 %v11296_v2, %s11454_s15  ;;  %s9618_s14 = smov 48  ;;  %s9623_s13 = smov 192  ;;  %7704 = vst.msk [vmem:[#allocation0 + $0x30] sm:$0xff] %vm7496_vm13, %v11145_v10  }
 0x389   :  { %v9570_v22 = vsel %vm3846_vm0, %v9568_v52, %v9565_v18  ;;  %v9573_v17 = vld [vmem:[#allocation1 + $0x701] ss:$16 sm:%s9572_s30]   ;;  %s9220_s11 = smov 3  ;;  %s9223_s9 = smov 12  ;;  %7750 = vst.msk [vmem:[#allocation0 + $0x70] sm:$0xff] %vm7496_vm13, %v11150_v7  }
 0x38a   :  { %v9575_v24 = vsel %vm3850_vm1, %v9573_v17, %v9570_v22  ;;  %v9578_v51 = vld [vmem:[#allocation1 + $0x701] ss:$16 sm:%s9577_s28]   ;;  %v9221_v26 = vld [vmem:[#allocation1 + $0x182] ss:$16 sm:%s9220_s11]   ;;  %s9228_s20 = smov 48  ;;  %s9233_s3 = smov 192  ;;  %v15007_v17 = vpop.permute.xlu1 %11202 }
 0x38b   :  { %v9588_v47 = vld [vmem:[#allocation1 + $0x181] ss:$16 sm:%s9587_s18]   ;;  %v9580_v28 = vsel %vm3854_vm2, %v9578_v51, %v9575_v24  ;;  %v9224_v42 = vld [vmem:[#allocation1 + $0x182] ss:$16 sm:%s9223_s9]   ;;  %s9243_s22 = smov 3  ;;  %s9246_s7 = smov 12 }
 0x38c   :  { %v9591_v25 = vld [vmem:[#allocation1 + $0x181] ss:$16 sm:%s9590_s1]   ;;  %v11346_v54 = vpack.i.bf16 %v9580_v28, %v9557_v40  ;;  %v9229_v14 = vld [vmem:[#allocation1 + $0x182] ss:$16 sm:%s9228_s20]   ;;  %v9226_v49 = vsel %vm3846_vm0, %v9224_v42, %v9221_v26  ;;  %s9251_s24 = smov 48  ;;  %s9256_s26 = smov 192  ;;  %v11169_v28 = vunpack.i.l.bf16 %v14949_v60  ;;  %v11170_v60 = vunpack.i.h.bf16 %v14949_v60 }
 0x38d   :  { %v9596_v6 = vld [vmem:[#allocation1 + $0x181] ss:$16 sm:%s9595_s4]   ;;  %v9593_v57 = vsel %vm3846_vm0, %v9591_v25, %v9588_v47  ;;  %v9234_v16 = vld [vmem:[#allocation1 + $0x182] ss:$16 sm:%s9233_s3]   ;;  %v9231_v19 = vsel %vm3850_vm1, %v9229_v14, %v9226_v49  ;;  %s9357_s23 = smov 3  ;;  %s9360_s5 = smov 12  ;;  %v15005_v22 = vpop.permute.xlu0 %11197  ;;  %v11184_v14 = vunpack.i.l.bf16 %v14972_v9  ;;  %v11185_v9 = vunpack.i.h.bf16 %v14972_v9 }
 0x38e   :  { %v9601_v3 = vld [vmem:[#allocation1 + $0x181] ss:$16 sm:%s9600_s12]   ;;  %v9598_v45 = vsel %vm3850_vm1, %v9596_v6, %v9593_v57  ;;  %11347 = vrot.lane.b32.xlu0 %v11346_v54, %s11455_s17  ;;  %v9244_v55 = vld [vmem:[#allocation1 + $0x382] ss:$16 sm:%s9243_s22]   ;;  %v9236_v21 = vsel %vm3854_vm2, %v9234_v16, %v9231_v19  ;;  %s9365_s27 = smov 48  ;;  %s9370_s21 = smov 192 }
 0x38f   :  { %v9611_v59 = vld [vmem:[#allocation1 + $0x381] ss:$16 sm:%s9610_s2]   ;;  %v9603_v37 = vsel %vm3854_vm2, %v9601_v3, %v9598_v45  ;;  %v9247_v20 = vld [vmem:[#allocation1 + $0x382] ss:$16 sm:%s9246_s7]   ;;  %s9380_s10 = smov 3  ;;  %7727 = vst.msk [vmem:[#allocation0 + $0x50] sm:$0xff] %vm7496_vm13, %v11149_v23  }
 0x390   :  { %v9614_v34 = vld [vmem:[#allocation1 + $0x381] ss:$16 sm:%s9613_s29]   ;;  %v9252_v29 = vld [vmem:[#allocation1 + $0x382] ss:$16 sm:%s9251_s24]   ;;  %v9249_v56 = vsel %vm3846_vm0, %v9247_v20, %v9244_v55  ;;  %s9383_s19 = smov 12  ;;  %s9388_s8 = smov 48  ;;  %v15013_v25 = vpop.permute.xlu2 %11207 }
 0x391   :  { %v9619_v1 = vld [vmem:[#allocation1 + $0x381] ss:$16 sm:%s9618_s14]   ;;  %v9616_v12 = vsel %vm3846_vm0, %v9614_v34, %v9611_v59  ;;  %v9257_v58 = vld [vmem:[#allocation1 + $0x382] ss:$16 sm:%s9256_s26]   ;;  %v9254_v62 = vsel %vm3850_vm1, %v9252_v29, %v9249_v56  ;;  %s9393_s25 = smov 192  ;;  %7773 = vst.msk [vmem:[#allocation0 + $0x18] sm:$0xff] %vm7496_vm13, %v11154_v31   ;;  %v11174_v59 = vunpack.i.l.bf16 %v14951_v4  ;;  %v11175_v4 = vunpack.i.h.bf16 %v14951_v4 }
 0x392   :  { %v9624_v15 = vld [vmem:[#allocation1 + $0x381] ss:$16 sm:%s9623_s13]   ;;  %v9621_v46 = vsel %vm3850_vm1, %v9619_v1, %v9616_v12  ;;  %v9259_v13 = vsel %vm3854_vm2, %v9257_v58, %v9254_v62  ;;  %7796 = vst.msk [vmem:[#allocation0 + $0x38] sm:$0xff] %vm7496_vm13, %v11155_v61   ;;  %s9498_s6 = smov 12  ;;  %s9503_s0 = smov 48  ;;  %v11180_v12 = vunpack.i.h.bf16 %v14955_v38  ;;  %v11179_v38 = vunpack.i.l.bf16 %v14955_v38  ;;  %v15035_v49 = vpop.permute.xlu1 %11217 }
 0x393   :  { %v9626_v48 = vsel %vm3854_vm2, %v9624_v15, %v9621_v46  ;;  %v9358_v63 = vld [vmem:[#allocation1 + $0x401] ss:$16 sm:%s9357_s23]   ;;  %v11311_v43 = vpack.i.bf16 %v9259_v13, %v9236_v21  ;;  %7819 = vst.msk [vmem:[#allocation0 + $0x58] sm:$0xff] %vm7496_vm13, %v11159_v30   ;;  %s9508_s16 = smov 192  ;;  %s9518_s30 = smov 3  ;;  %v11195_v58 = vunpack.i.h.bf16 %v14979_v5  ;;  %v11194_v5 = vunpack.i.l.bf16 %v14979_v5 }
 0x394   :  { %v11351_v44 = vpack.i.bf16 %v9626_v48, %v9603_v37  ;;  %v9361_v50 = vld [vmem:[#allocation1 + $0x401] ss:$16 sm:%s9360_s5]   ;;  %7842 = vst.msk [vmem:[#allocation0 + $0x78] sm:$0xff] %vm7496_vm13, %v11160_v53   ;;  %s9521_s28 = smov 12  ;;  %s9526_s18 = smov 48  ;;  %v11199_v62 = vunpack.i.l.bf16 %v15005_v22  ;;  %v11205_v30 = vunpack.i.h.bf16 %v15007_v17  ;;  %v11210_v53 = vunpack.i.h.bf16 %v15013_v25 }
 0x395   :  { %v9363_v39 = vsel %vm3846_vm0, %v9361_v50, %v9358_v63  ;;  %v9366_v0 = vld [vmem:[#allocation1 + $0x401] ss:$16 sm:%s9365_s27]   ;;  %11312 = vrot.lane.b32.xlu2 %v11311_v43, %s11454_s15  ;;  %s9495_s15 = smov 3  ;;  %7887 = vst.msk [vmem:[#allocation0 + $0x20] sm:$0xff] %vm7863_vm14, %v11165_v11   ;;  %s9531_s1 = smov 192  ;;  %v11213_v48 = vpop.permute.xlu0 %11212 }
 0x396   :  { %11352 = vrot.lane.b32.xlu1 %v11351_v44, %s11455_s17  ;;  %v9368_v32 = vsel %vm3850_vm1, %v9366_v0, %v9363_v39  ;;  %v9371_v2 = vld [vmem:[#allocation1 + $0x401] ss:$16 sm:%s9370_s21]   ;;  %7864 = vst.msk [vmem:[#allocation0] sm:$0xff] %vm7863_vm14, %v11164_v36   ;;  %s9633_s4 = smov 3  ;;  %s9636_s12 = smov 12  ;;  %v11189_v44 = vunpack.i.l.bf16 %v14974_v27  ;;  %v11190_v27 = vunpack.i.h.bf16 %v14974_v27  ;;  %v11200_v39 = vunpack.i.h.bf16 %v15005_v22 }
 0x397   :  { %v9381_v33 = vld [vmem:[#allocation1 + $0x601] ss:$16 sm:%s9380_s10]   ;;  %v9373_v24 = vsel %vm3854_vm2, %v9371_v2, %v9368_v32  ;;  %7910 = vst.msk [vmem:[#allocation0 + $0x40] sm:$0xff] %vm7863_vm14, %v11169_v28   ;;  %s9641_s2 = smov 48  ;;  %s9656_s29 = smov 3  ;;  %v11204_v0 = vunpack.i.l.bf16 %v15007_v17  ;;  %v11214_v11 = vunpack.i.l.bf16 %v11213_v48  ;;  %v11220_v36 = vunpack.i.h.bf16 %v15035_v49 }
 0x398   :  { %v9384_v35 = vld [vmem:[#allocation1 + $0x601] ss:$16 sm:%s9383_s19]   ;;  %7933 = vst.msk [vmem:[#allocation0 + $0x60] sm:$0xff] %vm7863_vm14, %v11170_v60   ;;  %s9659_s14 = smov 12  ;;  %s9664_s13 = smov 48 }
 0x399   :  { %v9386_v18 = vsel %vm3846_vm0, %v9384_v35, %v9381_v33  ;;  %v9389_v52 = vld [vmem:[#allocation1 + $0x601] ss:$16 sm:%s9388_s8]   ;;  %7956 = vst.msk [vmem:[#allocation0 + $0x8] sm:$0xff] %vm7863_vm14, %v11174_v59   ;;  %s9646_s11 = smov 192  ;;  %s9669_s9 = smov 192  ;;  %v11209_v35 = vunpack.i.l.bf16 %v15013_v25 }
 0x39a   :  { %v9394_v40 = vld [vmem:[#allocation1 + $0x601] ss:$16 sm:%s9393_s25]   ;;  %v9391_v51 = vsel %vm3850_vm1, %v9389_v52, %v9386_v18  ;;  %7979 = vst.msk [vmem:[#allocation0 + $0x28] sm:$0xff] %vm7863_vm14, %v11175_v4   ;;  %v11233_v32 = vpop.permute.xlu1 %11232  ;;  %v11215_v52 = vunpack.i.h.bf16 %v11213_v48  ;;  %s15675_s3 = sld [smem:[#allocation132_spill]] }
 0x39b   :  { %v9496_v47 = vld [vmem:[#allocation1 + $0x101] ss:$16 sm:%s9495_s15]   ;;  %v9396_v6 = vsel %vm3854_vm2, %v9394_v40, %v9391_v51  ;;  %8025 = vst.msk [vmem:[#allocation0 + $0x68] sm:$0xff] %vm7863_vm14, %v11180_v12   ;;  %v11219_v40 = vunpack.i.l.bf16 %v15035_v49 }
 0x39c   :  { %v9499_v54 = vld [vmem:[#allocation1 + $0x101] ss:$16 sm:%s9498_s6]   ;;  %v11326_v45 = vpack.i.bf16 %v9396_v6, %v9373_v24  ;;  %8002 = vst.msk [vmem:[#allocation0 + $0x48] sm:$0xff] %vm7863_vm14, %v11179_v38   ;;  %v11234_v6 = vunpack.i.l.bf16 %v11233_v32 }
 0x39d   :  { %v9501_v57 = vsel %vm3846_vm0, %v9499_v54, %v9496_v47  ;;  %v9504_v3 = vld [vmem:[#allocation1 + $0x101] ss:$16 sm:%s9503_s0]   ;;  %v11223_v19 = vpop.permute.xlu2 %11222  ;;  %8048 = vst.msk [vmem:[#allocation0 + $0x10] sm:$0xff] %vm7863_vm14, %v11184_v14   ;;  %v11228_v43 = vpop.permute.xlu0 %11227  ;;  %v11235_v54 = vunpack.i.h.bf16 %v11233_v32 }
 0x39e   :  { %v9519_v34 = vld [vmem:[#allocation1 + $0x301] ss:$16 sm:%s9518_s30]   ;;  %v9506_v15 = vsel %vm3850_vm1, %v9504_v3, %v9501_v57  ;;  %11327 = vrot.lane.b32.xlu2 %v11326_v45, %s11455_s17  ;;  %8071 = vst.msk [vmem:[#allocation0 + $0x30] sm:$0xff] %vm7863_vm14, %v11185_v9   ;;  %v11225_v17 = vunpack.i.h.bf16 %v11223_v19  ;;  %v11224_v24 = vunpack.i.l.bf16 %v11223_v19  ;;  %v11229_v28 = vunpack.i.l.bf16 %v11228_v43 }
 0x39f   :  { %v9522_v1 = vld [vmem:[#allocation1 + $0x301] ss:$16 sm:%s9521_s28]   ;;  %8094 = vst.msk [vmem:[#allocation0 + $0x50] sm:$0xff] %vm7863_vm14, %v11189_v44   ;;  %v11230_v25 = vunpack.i.h.bf16 %v11228_v43 }
 0x3a0   :  { %v9524_v8 = vsel %vm3846_vm0, %v9522_v1, %v9519_v34  ;;  %v9527_v37 = vld [vmem:[#allocation1 + $0x301] ss:$16 sm:%s9526_s18]   ;;  %8117 = vst.msk [vmem:[#allocation0 + $0x70] sm:$0xff] %vm7863_vm14, %v11190_v27  }
 0x3a1   :  { %v9509_v26 = vld [vmem:[#allocation1 + $0x101] ss:$16 sm:%s9508_s16]   ;;  %v9529_v41 = vsel %vm3850_vm1, %v9527_v37, %v9524_v8  ;;  %8163 = vst.msk [vmem:[#allocation0 + $0x38] sm:$0xff] %vm7863_vm14, %v11195_v58  }
 0x3a2   :  { %v9532_v46 = vld [vmem:[#allocation1 + $0x301] ss:$16 sm:%s9531_s1]   ;;  %v9511_v16 = vsel %vm3854_vm2, %v9509_v26, %v9506_v15  ;;  %8140 = vst.msk [vmem:[#allocation0 + $0x18] sm:$0xff] %vm7863_vm14, %v11194_v5  }
 0x3a3   :  { %v9634_v42 = vld [vmem:[#allocation1 + $0x581] ss:$16 sm:%s9633_s4]   ;;  %v9534_v55 = vsel %vm3854_vm2, %v9532_v46, %v9529_v41  ;;  %8186 = vst.msk [vmem:[#allocation0 + $0x58] sm:$0xff] %vm7863_vm14, %v11199_v62  }
 0x3a4   :  { %v9637_v10 = vld [vmem:[#allocation1 + $0x581] ss:$16 sm:%s9636_s12]   ;;  %v11341_v31 = vpack.i.bf16 %v9534_v55, %v9511_v16  ;;  %8209 = vst.msk [vmem:[#allocation0 + $0x78] sm:$0xff] %vm7863_vm14, %v11200_v39  }
 0x3a5   :  { %v9657_v7 = vld [vmem:[#allocation1 + $0x781] ss:$16 sm:%s9656_s29]   ;;  %v9639_v29 = vsel %vm3846_vm0, %v9637_v10, %v9634_v42  ;;  %8231 = vst.msk [vmem:[#allocation0] sm:$0xff] %vm8230_vm15, %v11204_v0   ;;  %v11243_v51 = vpop.permute.xlu0 %11242 }
 0x3a6   :  { %v9660_v20 = vld [vmem:[#allocation1 + $0x781] ss:$16 sm:%s9659_s14]   ;;  %11342 = vrot.lane.b32.xlu2 %v11341_v31, %s11455_s17  ;;  %8254 = vst.msk [vmem:[#allocation0 + $0x20] sm:$0xff] %vm8230_vm15, %v11205_v30   ;;  %v11248_v47 = vpop.permute.xlu1 %11247  ;;  %v11244_v3 = vunpack.i.l.bf16 %v11243_v51  ;;  %v11245_v59 = vunpack.i.h.bf16 %v11243_v51 }
 0x3a7   :  { %v9642_v23 = vld [vmem:[#allocation1 + $0x581] ss:$16 sm:%s9641_s2]   ;;  %v9662_v21 = vsel %vm3846_vm0, %v9660_v20, %v9657_v7  ;;  %8300 = vst.msk [vmem:[#allocation0 + $0x60] sm:$0xff] %vm8230_vm15, %v11210_v53   ;;  %vm8597_vm0 = vcmask 261312   ;;  %v11249_v1 = vunpack.i.l.bf16 %v11248_v47  ;;  %v11250_v4 = vunpack.i.h.bf16 %v11248_v47 }
 0x3a8   :  { %v9665_v56 = vld [vmem:[#allocation1 + $0x781] ss:$16 sm:%s9664_s13]   ;;  %v9644_v63 = vsel %vm3850_vm1, %v9642_v23, %v9639_v29  ;;  %8277 = vst.msk [vmem:[#allocation0 + $0x40] sm:$0xff] %vm8230_vm15, %v11209_v35  }
 0x3a9   :  { %v9647_v50 = vld [vmem:[#allocation1 + $0x581] ss:$16 sm:%s9646_s11]   ;;  %v9667_v61 = vsel %vm3850_vm1, %v9665_v56, %v9662_v21  ;;  %v11238_v22 = vpop.permute.xlu2 %11237  ;;  %8323 = vst.msk [vmem:[#allocation0 + $0x8] sm:$0xff] %vm8230_vm15, %v11214_v11   ;;  %vm8964_vm1 = vcmask 195712  }
 0x3aa   :  { %v9670_v13 = vld [vmem:[#allocation1 + $0x781] ss:$16 sm:%s9669_s9]   ;;  %v9649_v2 = vsel %vm3854_vm2, %v9647_v50, %v9644_v63  ;;  %8346 = vst.msk [vmem:[#allocation0 + $0x28] sm:$0xff] %vm8230_vm15, %v11215_v52   ;;  %v11239_v60 = vunpack.i.l.bf16 %v11238_v22  ;;  %v11240_v57 = vunpack.i.h.bf16 %v11238_v22 }
 0x3ab   :  { %v9672_v33 = vsel %vm3854_vm2, %v9670_v13, %v9667_v61  ;;  %8369 = vst.msk [vmem:[#allocation0 + $0x48] sm:$0xff] %vm8230_vm15, %v11219_v40   ;;  %vm9331_vm2 = vcmask 130112  }
 0x3ac   :  { %v11356_v18 = vpack.i.bf16 %v9672_v33, %v9649_v2  ;;  %8392 = vst.msk [vmem:[#allocation0 + $0x68] sm:$0xff] %vm8230_vm15, %v11220_v36  }
 0x3ad   :  { %8438 = vst.msk [vmem:[#allocation0 + $0x30] sm:$0xff] %vm8230_vm15, %v11225_v17  }
 0x3ae   :  { %11357 = vrot.lane.b32.xlu2 %v11356_v18, %s11455_s17  ;;  %8415 = vst.msk [vmem:[#allocation0 + $0x10] sm:$0xff] %vm8230_vm15, %v11224_v24   ;;  %v11258_v45 = vpop.permute.xlu0 %11257 }
 0x3af   :  { %8461 = vst.msk [vmem:[#allocation0 + $0x50] sm:$0xff] %vm8230_vm15, %v11229_v28   ;;  %v11259_v15 = vunpack.i.l.bf16 %v11258_v45  ;;  %v11260_v26 = vunpack.i.h.bf16 %v11258_v45 }
 0x3b0   :  { %8484 = vst.msk [vmem:[#allocation0 + $0x70] sm:$0xff] %vm8230_vm15, %v11230_v25  }
 0x3b1   :  { %8507 = vst.msk [vmem:[#allocation0 + $0x18] sm:$0xff] %vm8230_vm15, %v11234_v6  }
 0x3b2   :  { %8530 = vst.msk [vmem:[#allocation0 + $0x38] sm:$0xff] %vm8230_vm15, %v11235_v54  }
 0x3b3   :  { %8553 = vst.msk [vmem:[#allocation0 + $0x58] sm:$0xff] %vm8230_vm15, %v11239_v60  }
 0x3b4   :  { %8576 = vst.msk [vmem:[#allocation0 + $0x78] sm:$0xff] %vm8230_vm15, %v11240_v57  }
 0x3b5   :  { %8598 = vst.msk [vmem:[#allocation0] sm:$0xff] %vm8597_vm0, %v11244_v3  }
 0x3b6   :  { %v11263_v34 = vpop.permute.xlu1 %11262  ;;  %8621 = vst.msk [vmem:[#allocation0 + $0x20] sm:$0xff] %vm8597_vm0, %v11245_v59  }
 0x3b7   :  { %8644 = vst.msk [vmem:[#allocation0 + $0x40] sm:$0xff] %vm8597_vm0, %v11249_v1   ;;  %v11264_v41 = vunpack.i.l.bf16 %v11263_v34  ;;  %v11265_v46 = vunpack.i.h.bf16 %v11263_v34 }
 0x3b8   :  { %v11253_v8 = vpop.permute.xlu2 %11252  ;;  %8667 = vst.msk [vmem:[#allocation0 + $0x60] sm:$0xff] %vm8597_vm0, %v11250_v4  }
 0x3b9   :  { %v11255_v37 = vunpack.i.h.bf16 %v11253_v8  ;;  %v11254_v12 = vunpack.i.l.bf16 %v11253_v8  ;;  %8736 = vst.msk [vmem:[#allocation0 + $0x48] sm:$0xff] %vm8597_vm0, %v11259_v15  }
 0x3ba   :  { %8759 = vst.msk [vmem:[#allocation0 + $0x68] sm:$0xff] %vm8597_vm0, %v11260_v26  }
 0x3bb   :  { %8690 = vst.msk [vmem:[#allocation0 + $0x8] sm:$0xff] %vm8597_vm0, %v11254_v12  }
 0x3bc   :  { %8713 = vst.msk [vmem:[#allocation0 + $0x28] sm:$0xff] %vm8597_vm0, %v11255_v37  }
 0x3bd   :  { %8782 = vst.msk [vmem:[#allocation0 + $0x10] sm:$0xff] %vm8597_vm0, %v11264_v41  }
 0x3be   :  { %v11273_v38 = vpop.permute.xlu0 %11272  ;;  %8805 = vst.msk [vmem:[#allocation0 + $0x30] sm:$0xff] %vm8597_vm0, %v11265_v46  }
 0x3bf   :  { %v11274_v42 = vunpack.i.l.bf16 %v11273_v38  ;;  %v11275_v14 = vunpack.i.h.bf16 %v11273_v38 }
 0x3c1   :  { %8874 = vst.msk [vmem:[#allocation0 + $0x18] sm:$0xff] %vm8597_vm0, %v11274_v42  }
 0x3c2   :  { %8897 = vst.msk [vmem:[#allocation0 + $0x38] sm:$0xff] %vm8597_vm0, %v11275_v14  }
 0x3c6   :  { %v11278_v10 = vpop.permute.xlu1 %11277  ;;  %v11268_v49 = vpop.permute.xlu2 %11267 }
 0x3c7   :  { %v11279_v9 = vunpack.i.l.bf16 %v11278_v10  ;;  %v11280_v48 = vunpack.i.h.bf16 %v11278_v10  ;;  %v11270_v16 = vunpack.i.h.bf16 %v11268_v49  ;;  %v11269_v55 = vunpack.i.l.bf16 %v11268_v49  ;;  %v11288_v7 = vpop.permute.xlu0 %11287 }
 0x3c8   :  { %v11290_v44 = vunpack.i.h.bf16 %v11288_v7  ;;  %v11289_v19 = vunpack.i.l.bf16 %v11288_v7 }
 0x3c9   :  { %8920 = vst.msk [vmem:[#allocation0 + $0x58] sm:$0xff] %vm8597_vm0, %v11279_v9  }
 0x3ca   :  { %8943 = vst.msk [vmem:[#allocation0 + $0x78] sm:$0xff] %vm8597_vm0, %v11280_v48  }
 0x3cb   :  { %8828 = vst.msk [vmem:[#allocation0 + $0x50] sm:$0xff] %vm8597_vm0, %v11269_v55  }
 0x3cc   :  { %8851 = vst.msk [vmem:[#allocation0 + $0x70] sm:$0xff] %vm8597_vm0, %v11270_v16  }
 0x3cd   :  { %9011 = vst.msk [vmem:[#allocation0 + $0x40] sm:$0xff] %vm8964_vm1, %v11289_v19  }
 0x3ce   :  { %9034 = vst.msk [vmem:[#allocation0 + $0x60] sm:$0xff] %vm8964_vm1, %v11290_v44  }
 0x3cf   :  { %v11293_v20 = vpop.permute.xlu1 %11292 }
 0x3d0   :  { %v11295_v27 = vunpack.i.h.bf16 %v11293_v20  ;;  %v11294_v29 = vunpack.i.l.bf16 %v11293_v20 }
 0x3d2   :  { %9057 = vst.msk [vmem:[#allocation0 + $0x8] sm:$0xff] %vm8964_vm1, %v11294_v29  }
 0x3d3   :  { %9080 = vst.msk [vmem:[#allocation0 + $0x28] sm:$0xff] %vm8964_vm1, %v11295_v27  }
 0x3d7   :  { %v11283_v23 = vpop.permute.xlu2 %11282  ;;  %v11303_v58 = vpop.permute.xlu0 %11302 }
 0x3d8   :  { %v11285_v21 = vunpack.i.h.bf16 %v11283_v23  ;;  %v11284_v56 = vunpack.i.l.bf16 %v11283_v23  ;;  %v11305_v31 = vunpack.i.h.bf16 %v11303_v58  ;;  %v11304_v5 = vunpack.i.l.bf16 %v11303_v58 }
 0x3da   :  { %8965 = vst.msk [vmem:[#allocation0] sm:$0xff] %vm8964_vm1, %v11284_v56  }
 0x3db   :  { %8988 = vst.msk [vmem:[#allocation0 + $0x20] sm:$0xff] %vm8964_vm1, %v11285_v21  }
 0x3dc   :  { %9149 = vst.msk [vmem:[#allocation0 + $0x10] sm:$0xff] %vm8964_vm1, %v11304_v5  }
 0x3dd   :  { %9172 = vst.msk [vmem:[#allocation0 + $0x30] sm:$0xff] %vm8964_vm1, %v11305_v31  }
 0x3df   :  { %v11308_v62 = vpop.permute.xlu1 %11307 }
 0x3e0   :  { %v11310_v63 = vunpack.i.h.bf16 %v11308_v62  ;;  %v11309_v50 = vunpack.i.l.bf16 %v11308_v62 }
 0x3e2   :  { %9195 = vst.msk [vmem:[#allocation0 + $0x50] sm:$0xff] %vm8964_vm1, %v11309_v50   ;;  %v11298_v61 = vpop.permute.xlu2 %11297 }
 0x3e3   :  { %9218 = vst.msk [vmem:[#allocation0 + $0x70] sm:$0xff] %vm8964_vm1, %v11310_v63   ;;  %v11300_v13 = vunpack.i.h.bf16 %v11298_v61  ;;  %v11299_v39 = vunpack.i.l.bf16 %v11298_v61 }
 0x3e5   :  { %9103 = vst.msk [vmem:[#allocation0 + $0x48] sm:$0xff] %vm8964_vm1, %v11299_v39  }
 0x3e6   :  { %9126 = vst.msk [vmem:[#allocation0 + $0x68] sm:$0xff] %vm8964_vm1, %v11300_v13  }
 0x3e7   :  { %v11318_v0 = vpop.permute.xlu0 %11317  ;;  %v11323_v32 = vpop.permute.xlu1 %11322 }
 0x3e8   :  { %v11320_v30 = vunpack.i.h.bf16 %v11318_v0  ;;  %v11319_v43 = vunpack.i.l.bf16 %v11318_v0  ;;  %v11325_v2 = vunpack.i.h.bf16 %v11323_v32  ;;  %v11324_v33 = vunpack.i.l.bf16 %v11323_v32 }
 0x3ea   :  { %9287 = vst.msk [vmem:[#allocation0 + $0x58] sm:$0xff] %vm8964_vm1, %v11319_v43  }
 0x3eb   :  { %9310 = vst.msk [vmem:[#allocation0 + $0x78] sm:$0xff] %vm8964_vm1, %v11320_v30  }
 0x3ec   :  { %9332 = vst.msk [vmem:[#allocation0] sm:$0xff] %vm9331_vm2, %v11324_v33  }
 0x3ed   :  { %9355 = vst.msk [vmem:[#allocation0 + $0x20] sm:$0xff] %vm9331_vm2, %v11325_v2  }
 0x3ef   :  { %v11313_v53 = vpop.permute.xlu2 %11312 }
 0x3f0   :  { %v11315_v35 = vunpack.i.h.bf16 %v11313_v53  ;;  %v11314_v11 = vunpack.i.l.bf16 %v11313_v53  ;;  %v11333_v18 = vpop.permute.xlu0 %11332 }
 0x3f1   :  { %v11335_v52 = vunpack.i.h.bf16 %v11333_v18  ;;  %v11334_v40 = vunpack.i.l.bf16 %v11333_v18 }
 0x3f2   :  { %9241 = vst.msk [vmem:[#allocation0 + $0x18] sm:$0xff] %vm8964_vm1, %v11314_v11  }
 0x3f3   :  { %9264 = vst.msk [vmem:[#allocation0 + $0x38] sm:$0xff] %vm8964_vm1, %v11315_v35   ;;  %v9680_v28 = vld [vmem:[#allocation0] sm:$0xff] }
 0x3f4   :  { %9424 = vst.msk [vmem:[#allocation0 + $0x8] sm:$0xff] %vm9331_vm2, %v11334_v40   ;;  %v9707_v6 = vld [vmem:[#allocation0 + $0x20] sm:$0xff] }
 0x3f5   :  { %9447 = vst.msk [vmem:[#allocation0 + $0x28] sm:$0xff] %vm9331_vm2, %v11335_v52  }
 0x3f8   :  { %v11338_v36 = vpop.permute.xlu1 %11337  ;;  %v11328_v24 = vpop.permute.xlu2 %11327 }
 0x3f9   :  { %v11340_v22 = vunpack.i.h.bf16 %v11338_v36  ;;  %v11339_v17 = vunpack.i.l.bf16 %v11338_v36  ;;  %v11330_v51 = vunpack.i.h.bf16 %v11328_v24  ;;  %v11329_v47 = vunpack.i.l.bf16 %v11328_v24 }
 0x3fb   :  { %9470 = vst.msk [vmem:[#allocation0 + $0x48] sm:$0xff] %vm9331_vm2, %v11339_v17   ;;  %v9686_v25 = vld [vmem:[#allocation0 + $0x8] sm:$0xff] }
 0x3fc   :  { %9493 = vst.msk [vmem:[#allocation0 + $0x68] sm:$0xff] %vm9331_vm2, %v11340_v22   ;;  %v10575_v54 = vpack.c.bf16 %v9686_v25, %v9680_v28  ;;  %v9714_v60 = vld [vmem:[#allocation0 + $0x28] sm:$0xff] }
 0x3fd   :  { %9378 = vst.msk [vmem:[#allocation0 + $0x40] sm:$0xff] %vm9331_vm2, %v11329_v47   ;;  %v10585_v57 = vpack.c.bf16 %v9714_v60, %v9707_v6 }
 0x3fe   :  { %9401 = vst.msk [vmem:[#allocation0 + $0x60] sm:$0xff] %vm9331_vm2, %v11330_v51  }
 0x3ff   :  { %10576 = vst [vmem:[%s15675_s3] sm:$0xff] %v10575_v54  }
 0x400   :  { %v11348_v3 = vpop.permute.xlu0 %11347  ;;  %10740 = vst [vmem:[%s15675_s3 + $0x10] sm:$0xff] %v10585_v57   ;;  %v11343_v45 = vpop.permute.xlu2 %11342 }
 0x401   :  { %v11349_v34 = vunpack.i.l.bf16 %v11348_v3  ;;  %v11345_v4 = vunpack.i.h.bf16 %v11343_v45  ;;  %v11344_v8 = vunpack.i.l.bf16 %v11343_v45  ;;  %v11350_v26 = vunpack.i.h.bf16 %v11348_v3 }
 0x402   :  { %v9742_v59 = vld [vmem:[#allocation0 + $0x48] sm:$0xff] }
 0x403   :  { %v9770_v1 = vld [vmem:[#allocation0 + $0x68] sm:$0xff]  ;;  %9562 = vst.msk [vmem:[#allocation0 + $0x50] sm:$0xff] %vm9331_vm2, %v11349_v34  }
 0x404   :  { %v9735_v37 = vld [vmem:[#allocation0 + $0x40] sm:$0xff]  ;;  %9516 = vst.msk [vmem:[#allocation0 + $0x10] sm:$0xff] %vm9331_vm2, %v11344_v8  }
 0x405   :  { %v9763_v12 = vld [vmem:[#allocation0 + $0x60] sm:$0xff]  ;;  %v10595_v15 = vpack.c.bf16 %v9742_v59, %v9735_v37  ;;  %9539 = vst.msk [vmem:[#allocation0 + $0x30] sm:$0xff] %vm9331_vm2, %v11345_v4  }
 0x406   :  { %v10605_v41 = vpack.c.bf16 %v9770_v1, %v9763_v12  ;;  %9585 = vst.msk [vmem:[#allocation0 + $0x70] sm:$0xff] %vm9331_vm2, %v11350_v26  }
 0x407   :  { %10742 = vst [vmem:[%s15675_s3 + $0x20] sm:$0xff] %v10595_v15  }
 0x408   :  { %v11353_v46 = vpop.permute.xlu1 %11352  ;;  %10744 = vst [vmem:[%s15675_s3 + $0x30] sm:$0xff] %v10605_v41   ;;  %v11358_v14 = vpop.permute.xlu2 %11357 }
 0x409   :  { %v11355_v38 = vunpack.i.h.bf16 %v11353_v46  ;;  %v11354_v42 = vunpack.i.l.bf16 %v11353_v46  ;;  %v11360_v10 = vunpack.i.h.bf16 %v11358_v14  ;;  %v11359_v9 = vunpack.i.l.bf16 %v11358_v14 }
 0x40a   :  { %v9749_v55 = vld [vmem:[#allocation0 + $0x50] sm:$0xff] }
 0x40b   :  { %9608 = vst.msk [vmem:[#allocation0 + $0x18] sm:$0xff] %vm9331_vm2, %v11354_v42   ;;  %v9693_v48 = vld [vmem:[#allocation0 + $0x10] sm:$0xff] }
 0x40c   :  { %9631 = vst.msk [vmem:[#allocation0 + $0x38] sm:$0xff] %vm9331_vm2, %v11355_v38   ;;  %v9721_v16 = vld [vmem:[#allocation0 + $0x30] sm:$0xff] }
 0x40d   :  { %9654 = vst.msk [vmem:[#allocation0 + $0x58] sm:$0xff] %vm9331_vm2, %v11359_v9   ;;  %v9777_v19 = vld [vmem:[#allocation0 + $0x70] sm:$0xff] }
 0x40e   :  { %9677 = vst.msk [vmem:[#allocation0 + $0x78] sm:$0xff] %vm9331_vm2, %v11360_v10  }
 0x412   :  { %v9700_v49 = vld [vmem:[#allocation0 + $0x18] sm:$0xff] }
 0x413   :  { %v10580_v7 = vpack.c.bf16 %v9700_v49, %v9693_v48  ;;  %v9728_v44 = vld [vmem:[#allocation0 + $0x38] sm:$0xff] }
 0x414   :  { %v10590_v20 = vpack.c.bf16 %v9728_v44, %v9721_v16  ;;  %v9756_v27 = vld [vmem:[#allocation0 + $0x58] sm:$0xff] }
 0x415   :  { %10739 = vst [vmem:[%s15675_s3 + $0x8] sm:$0xff] %v10580_v7   ;;  %v10600_v29 = vpack.c.bf16 %v9756_v27, %v9749_v55  ;;  %v9784_v23 = vld [vmem:[#allocation0 + $0x78] sm:$0xff] }
 0x416   :  { %10741 = vst [vmem:[%s15675_s3 + $0x18] sm:$0xff] %v10590_v20   ;;  %v10610_v21 = vpack.c.bf16 %v9784_v23, %v9777_v19 }
 0x417   :  { %10743 = vst [vmem:[%s15675_s3 + $0x28] sm:$0xff] %v10600_v29  }
 0x418   :  { %10745 = vst [vmem:[%s15675_s3 + $0x38] sm:$0xff] %v10610_v21  }

// kernel: tile.34
= control target key start
LH: loop header
LB: loop body
LE: loop exit
PB: predicated region body
PF: predicated region fallthrough
CT: control target
= control target key end

     0   :  { %s28_s0 = inlined_call_operand.vmem [shape: f32[8], index: 0, kind: input, shape index: {}]   ;;  %s29_s1 = inlined_call_operand.vmem [shape: f32[16,8], index: 1, kind: output, shape index: {}]  }
   0x1   :  { %v4_v0 = vld [vmem:[%s28_s0] ss:$0 sm:$0xff] }
   0x2   :  { %5 = vst [vmem:[%s29_s1] sm:$0xff] %v4_v0 }
   0x3   :  { %8 = vst [vmem:[%s29_s1 + $0x8] sm:$0xff] %v4_v0 }

// kernel: tile.44
= control target key start
LH: loop header
LB: loop body
LE: loop exit
PB: predicated region body
PF: predicated region fallthrough
CT: control target
= control target key end

     0   :  { %s131_s10 = smov 120   ;;  %s132_s11 = smov 104   ;;  %vm3_vm0 = vcmask 64512   ;;  %vm9_vm1 = vcmask 1048512   ;;  %vm15_vm2 = vcmask 982912   ;;  %vm21_vm3 = vcmask 917312   ;;  %s207_s0 = inlined_call_operand.vmem [shape: f32[16,8], index: 0, kind: input, shape index: {}]   ;;  %s208_s1 = inlined_call_operand.vmem [shape: f32[1,1,128], index: 1, kind: output, shape index: {}]  }
   0x1   :  { %v101_v0 = vld [vmem:[%s207_s0 + $0xf] sm:$0x1]   ;;  %v103_v1 = vld [vmem:[%s207_s0 + $0xd] sm:$0x1]   ;;  %v105_v2 = vld [vmem:[%s207_s0 + $0xb] sm:$0x1]  }
   0x2   :  { %7 = vrot.lane.b32.xlu0 %v101_v0, %s131_s10  ;;  %19 = vrot.lane.b32.xlu1 %v103_v1, %s132_s11  ;;  %s133_s14 = smov 88   ;;  %v102_v3 = vld [vmem:[%s207_s0 + $0xe] sm:$0x1]   ;;  %v104_v4 = vld [vmem:[%s207_s0 + $0xc] sm:$0x1]   ;;  %s134_s19 = smov 112  }
   0x3   :  { %31 = vrot.lane.b32.xlu2 %v105_v2, %s133_s14  ;;  %s135_s20 = smov 96   ;;  %v106_v5 = vld [vmem:[%s207_s0 + $0xa] sm:$0x1]   ;;  %s136_s23 = smov 80   ;;  %v107_v6 = vld [vmem:[%s207_s0 + $0x9] sm:$0x1]  }
   0x4   :  { %v108_v7 = vld [vmem:[%s207_s0 + $0x8] sm:$0x1]   ;;  %s137_s28 = smov 72   ;;  %s138_s29 = smov 64   ;;  %v109_v8 = vld [vmem:[%s207_s0 + $0x7] sm:$0x1]  }
   0x5   :  { %s139_s3 = smov 56   ;;  %v110_v9 = vld [vmem:[%s207_s0 + $0x6] sm:$0x1]   ;;  %v111_v10 = vld [vmem:[%s207_s0 + $0x5] sm:$0x1]   ;;  %s140_s8 = smov 48  }
   0x6   :  { %s141_s9 = smov 40   ;;  %v112_v11 = vld [vmem:[%s207_s0 + $0x4] sm:$0x1]   ;;  %s142_s12 = smov 32   ;;  %v113_v12 = vld [vmem:[%s207_s0 + $0x3] sm:$0x1]  }
   0x7   :  { %v114_v13 = vld [vmem:[%s207_s0 + $0x2] sm:$0x1]   ;;  %s143_s17 = smov 24   ;;  %s144_s18 = smov 16   ;;  %v115_v14 = vld [vmem:[%s207_s0 + $0x1] sm:$0x1]  }
   0x8   :  { %s145_s21 = smov 8   ;;  %v2_v15 = vld [vmem:[%s207_s0] sm:$0x1]   ;;  %vm27_vm4 = vcmask 851712   ;;  %vm33_vm5 = vcmask 786112   ;;  %vm39_vm6 = vcmask 720512  }
   0x9   :  { %4 = vst.msk [vmem:[#allocation0] sm:$0x1] %vm3_vm0, %v2_v15   ;;  %vm45_vm7 = vcmask 654912   ;;  %vm51_vm8 = vcmask 589312   ;;  %vm57_vm9 = vcmask 523712   ;;  %vm63_vm10 = vcmask 458112  }
   0xa   :  { %13 = vrot.lane.b32.xlu0 %v102_v3, %s134_s19  ;;  %25 = vrot.lane.b32.xlu1 %v104_v4, %s135_s20  ;;  %vm69_vm11 = vcmask 392512   ;;  %vm75_vm12 = vcmask 326912   ;;  %vm81_vm13 = vcmask 261312   ;;  %vm87_vm14 = vcmask 195712  }
   0xb   :  { %37 = vrot.lane.b32.xlu2 %v106_v5, %s136_s23  ;;  %vm93_vm15 = vcmask 130112  }
  0x12   :  { %43 = vrot.lane.b32.xlu0 %v107_v6, %s137_s28  ;;  %49 = vrot.lane.b32.xlu1 %v108_v7, %s138_s29 }
  0x13   :  { %55 = vrot.lane.b32.xlu2 %v109_v8, %s139_s3 }
  0x1a   :  { %61 = vrot.lane.b32.xlu0 %v110_v9, %s140_s8  ;;  %67 = vrot.lane.b32.xlu1 %v111_v10, %s141_s9 }
  0x1b   :  { %73 = vrot.lane.b32.xlu2 %v112_v11, %s142_s12 }
  0x22   :  { %79 = vrot.lane.b32.xlu0 %v113_v12, %s143_s17  ;;  %85 = vrot.lane.b32.xlu1 %v114_v13, %s144_s18 }
  0x23   :  { %91 = vrot.lane.b32.xlu2 %v115_v14, %s145_s21 }
  0x5d   :  { %v32_v16 = vpop.permute.xlu2 %31  }
  0x65   :  { %v38_v17 = vpop.permute.xlu2 %37  }
  0x6d   :  { %v56_v18 = vpop.permute.xlu2 %55  }
  0x74   :  { %v8_v19 = vpop.permute.xlu0 %7   ;;  %v20_v20 = vpop.permute.xlu1 %19  }
  0x75   :  { %10 = vst.msk [vmem:[#allocation0] sm:$0x1] %vm9_vm1, %v8_v19   ;;  %v74_v21 = vpop.permute.xlu2 %73  }
  0x7c   :  { %v14_v22 = vpop.permute.xlu0 %13   ;;  %v26_v23 = vpop.permute.xlu1 %25  }
  0x7d   :  { %16 = vst.msk [vmem:[#allocation0] sm:$0x1] %vm15_vm2, %v14_v22   ;;  %v92_v24 = vpop.permute.xlu2 %91  }
  0x7e   :  { %22 = vst.msk [vmem:[#allocation0] sm:$0x1] %vm21_vm3, %v20_v20  }
  0x7f   :  { %28 = vst.msk [vmem:[#allocation0] sm:$0x1] %vm27_vm4, %v26_v23  }
  0x80   :  { %34 = vst.msk [vmem:[#allocation0] sm:$0x1] %vm33_vm5, %v32_v16  }
  0x81   :  { %40 = vst.msk [vmem:[#allocation0] sm:$0x1] %vm39_vm6, %v38_v17  }
  0x84   :  { %v44_v25 = vpop.permute.xlu0 %43   ;;  %v50_v26 = vpop.permute.xlu1 %49  }
  0x85   :  { %46 = vst.msk [vmem:[#allocation0] sm:$0x1] %vm45_vm7, %v44_v25  }
  0x86   :  { %52 = vst.msk [vmem:[#allocation0] sm:$0x1] %vm51_vm8, %v50_v26  }
  0x87   :  { %58 = vst.msk [vmem:[#allocation0] sm:$0x1] %vm57_vm9, %v56_v18  }
  0x8c   :  { %v62_v27 = vpop.permute.xlu0 %61   ;;  %v68_v28 = vpop.permute.xlu1 %67  }
  0x8d   :  { %64 = vst.msk [vmem:[#allocation0] sm:$0x1] %vm63_vm10, %v62_v27  }
  0x8e   :  { %70 = vst.msk [vmem:[#allocation0] sm:$0x1] %vm69_vm11, %v68_v28  }
  0x8f   :  { %76 = vst.msk [vmem:[#allocation0] sm:$0x1] %vm75_vm12, %v74_v21  }
  0x94   :  { %v80_v29 = vpop.permute.xlu0 %79   ;;  %v86_v30 = vpop.permute.xlu1 %85  }
  0x95   :  { %82 = vst.msk [vmem:[#allocation0] sm:$0x1] %vm81_vm13, %v80_v29  }
  0x96   :  { %88 = vst.msk [vmem:[#allocation0] sm:$0x1] %vm87_vm14, %v86_v30  }
  0x97   :  { %94 = vst.msk [vmem:[#allocation0] sm:$0x1] %vm93_vm15, %v92_v24  }
  0x9e   :  { %v97_v31 = vld [vmem:[#allocation0] sm:$0x1] }
  0x9f   :  { %100 = vst [vmem:[%s208_s1] sm:$0x1] %v97_v31 }

// kernel: res_conv_pure_2d_forward.1
= control target key start
LH: loop header
LB: loop body
LE: loop exit
PB: predicated region body
PF: predicated region fallthrough
CT: control target
= control target key end

     0   :  { %s2638_s21 = smov 0   ;;  %s3673_s0 = inlined_call_operand.vmem [shape: f32[2,16,128], index: 0, kind: input, shape index: {}]   ;;  %s3674_s1 = inlined_call_operand.vmem [shape: bf16[4,128,384], index: 1, kind: input, shape index: {}]   ;;  %s3675_s2 = inlined_call_operand.vmem [shape: f32[2,16,16], index: 2, kind: input, shape index: {}]   ;;  %s3676_s3 = inlined_call_operand.vmem [shape: f32[128,128], index: 3, kind: input, shape index: {}]   ;;  %s3677_s4 = inlined_call_operand.vmem [shape: f32[4,1,128], index: 4, kind: input, shape index: {}]   ;;  %s3678_s5 = inlined_call_operand.vmem [shape: f32[4,1,128], index: 5, kind: input, shape index: {}]   ;;  %s3679_s6 = inlined_call_operand.vmem [shape: f32[2,16,128], index: 6, kind: output, shape index: {}]  }
   0x1 LB: > { %s1914_s22 = sadd.s32 4294967295, %s2601_s21   ;;  %p1918_p0 = scmp.ge.s32.totalorder %s2601_s21, 1  ;;  %s2601_s21 = sphi %s2638_s21, %s16_s21  }
   0x2   : > { %p212_p1 = scmp.lt.s32.totalorder %s2601_s21, 3 }
   0x4   : > { %p213_p2 = pnand %p1918_p0, %p212_p1 }
   0x5   : > { %p242_p3 = scmp.lt.s32.totalorder (!%p213_p2), %s1914_s22, 1 }
   0x6   : > { %216 = sbr.rel (%p213_p2) target bundleno = 2115 (0x843), region = 44 }
   0xb   : > { %v2011_v0 = vld [vmem:[%s3674_s1 + $0xa8] sm:$0xf]  ;;  %v2453_v1 = vld [vmem:[%s3674_s1 + $0xb0] sm:$0xf0]  ;;  %v2019_v2 = vld [vmem:[%s3674_s1 + $0xb0] sm:$0xf] }
   0xc   : > { %v2012_v3 = vor.u32 %v2453_v1, %v2011_v0  ;;  %v2454_v4 = vld [vmem:[%s3674_s1 + $0xb8] sm:$0xf0]  ;;  %v1999_v5 = vld [vmem:[%s3674_s1 + $0x90] sm:$0xf]  ;;  %v2007_v8 = vld [vmem:[%s3674_s1 + $0x98] sm:$0xf] }
   0xd   : > { %v2450_v6 = vld [vmem:[%s3674_s1 + $0x98] sm:$0xf0]  ;;  %v2020_v7 = vor.u32 %v2454_v4, %v2019_v2  ;;  %v2451_v9 = vld [vmem:[%s3674_s1 + $0xa0] sm:$0xf0]  ;;  %v1987_v12 = vld [vmem:[%s3674_s1 + $0x78] sm:$0xf] }
   0xe   : > { %436 = vmatpush.bf16.msra.mxu0 %v2012_v3  ;;  %v2000_v10 = vor.u32 %v2450_v6, %v1999_v5  ;;  %v2008_v11 = vor.u32 %v2451_v9, %v2007_v8  ;;  %v2447_v13 = vld [vmem:[%s3674_s1 + $0x80] sm:$0xf0]  ;;  %v1995_v14 = vld [vmem:[%s3674_s1 + $0x80] sm:$0xf]  ;;  %v2448_v15 = vld [vmem:[%s3674_s1 + $0x88] sm:$0xf0] }
   0xf   : > { %464 = vmatpush.bf16.msra.mxu2 %v2020_v7  ;;  %v1988_v16 = vor.u32 %v2447_v13, %v1987_v12  ;;  %v1996_v17 = vor.u32 %v2448_v15, %v1995_v14  ;;  %v1975_v18 = vld [vmem:[%s3674_s1 + $0x60] sm:$0xf]  ;;  %v2444_v19 = vld [vmem:[%s3674_s1 + $0x68] sm:$0xf0]  ;;  %v1983_v20 = vld [vmem:[%s3674_s1 + $0x68] sm:$0xf] }
  0x10   : > { %v2445_v21 = vld [vmem:[%s3674_s1 + $0x70] sm:$0xf0]  ;;  %v1976_v22 = vor.u32 %v2444_v19, %v1975_v18  ;;  %v2452_v23 = vld [vmem:[%s3674_s1 + $0xac] sm:$0xf]  ;;  %v2013_v24 = vld [vmem:[%s3674_s1 + $0xb4] sm:$0xf0] }
  0x11   : > { %v2449_v25 = vld [vmem:[%s3674_s1 + $0x94] sm:$0xf]  ;;  %v1984_v26 = vor.u32 %v2445_v21, %v1983_v20  ;;  %v1963_v27 = vld [vmem:[%s3674_s1 + $0x48] sm:$0xf]  ;;  %v2016_v29 = vor.u32 %v2452_v23, %v2013_v24  ;;  %v2001_v30 = vld [vmem:[%s3674_s1 + $0x9c] sm:$0xf0] }
  0x12   : > { %437 = vmatpush.bf16.msra.mxu0 %v2000_v10  ;;  %v2441_v28 = vld [vmem:[%s3674_s1 + $0x50] sm:$0xf0]  ;;  %v1971_v31 = vld [vmem:[%s3674_s1 + $0x50] sm:$0xf]  ;;  %v2442_v32 = vld [vmem:[%s3674_s1 + $0x58] sm:$0xf0]  ;;  %v2004_v33 = vor.u32 %v2449_v25, %v2001_v30 }
  0x13   : > { %465 = vmatpush.bf16.msra.mxu2 %v2008_v11  ;;  %450 = vmatpush.bf16.msra.mxu1 %v2016_v29  ;;  %v1964_v34 = vor.u32 %v2441_v28, %v1963_v27  ;;  %v2446_v35 = vld [vmem:[%s3674_s1 + $0x7c] sm:$0xf]  ;;  %v1989_v36 = vld [vmem:[%s3674_s1 + $0x84] sm:$0xf0]  ;;  %v1972_v37 = vor.u32 %v2442_v32, %v1971_v31  ;;  %v1951_v38 = vld [vmem:[%s3674_s1 + $0x30] sm:$0xf] }
  0x14   : > { %v2438_v39 = vld [vmem:[%s3674_s1 + $0x38] sm:$0xf0]  ;;  %v1959_v40 = vld [vmem:[%s3674_s1 + $0x38] sm:$0xf]  ;;  %v2439_v41 = vld [vmem:[%s3674_s1 + $0x40] sm:$0xf0]  ;;  %v1992_v42 = vor.u32 %v2446_v35, %v1989_v36 }
  0x15   : > { %s3681_s22 = smov (!%p242_p3, %s1914_s22), 1  ;;  %v1952_v43 = vor.u32 %v2438_v39, %v1951_v38  ;;  %v2443_v44 = vld [vmem:[%s3674_s1 + $0x64] sm:$0xf]  ;;  %v1977_v45 = vld [vmem:[%s3674_s1 + $0x6c] sm:$0xf0]  ;;  %v1960_v46 = vor.u32 %v2439_v41, %v1959_v40  ;;  %vm478_vm0 = vcmask 130048  }
  0x16   : > { %438 = vmatpush.bf16.msra.mxu0 %v1988_v16  ;;  %v1939_v47 = vld [vmem:[%s3674_s1 + $0x18] sm:$0xf]  ;;  %v2435_v48 = vld [vmem:[%s3674_s1 + $0x20] sm:$0xf0]  ;;  %v1947_v49 = vld [vmem:[%s3674_s1 + $0x20] sm:$0xf]  ;;  %v1980_v51 = vor.u32 %v2443_v44, %v1977_v45 }
  0x17   : > { %466 = vmatpush.bf16.msra.mxu2 %v1996_v17  ;;  %451 = vmatpush.bf16.msra.mxu1 %v2004_v33  ;;  %v2436_v50 = vld [vmem:[%s3674_s1 + $0x28] sm:$0xf0]  ;;  %s2429_s29 = sshll.u32 %s3681_s22, 4  ;;  %v1940_v52 = vor.u32 %v2435_v48, %v1939_v47  ;;  %v1927_v54 = vld [vmem:[%s3674_s1] sm:$0xf]  ;;  %v2825_v17 = vld [vmem:[%s3675_s2 + $0x10] sm:$0xff] }
  0x18   : > { %v1948_v53 = vor.u32 %v2436_v50, %v1947_v49  ;;  %v2432_v55 = vld [vmem:[%s3674_s1 + $0x8] sm:$0xf0]  ;;  %s246_s12 = scalar_lea.vmem %s3673_s0, %s2429_s29  ;;  %v1935_v56 = vld [vmem:[%s3674_s1 + $0x8] sm:$0xf]  ;;  %v2433_v57 = vld [vmem:[%s3674_s1 + $0x10] sm:$0xf0]  ;;  %s251_s20 = scalar_lea.vmem %s3679_s6, %s2429_s29 }
  0x19   : > { %v1928_v58 = vor.u32 %v2432_v55, %v1927_v54  ;;  %v2778_v59 = vld [vmem:[%s246_s12] sm:$0xff]  ;;  %v2780_v60 = vld [vmem:[%s246_s12 + $0x8] sm:$0xff]  ;;  %v1936_v61 = vor.u32 %v2433_v57, %v1935_v56  ;;  %v1965_v0 = vld [vmem:[%s3674_s1 + $0x54] sm:$0xf0] }
  0x1a   : > { %439 = vmatpush.bf16.msra.mxu0 %v1976_v22  ;;  %v275_v62 = vpack.c.bf16 %v2780_v60, %v2778_v59  ;;  %v2440_v63 = vld [vmem:[%s3674_s1 + $0x4c] sm:$0xf]  ;;  %v2437_v2 = vld [vmem:[%s3674_s1 + $0x34] sm:$0xf]  ;;  %v1953_v3 = vld [vmem:[%s3674_s1 + $0x3c] sm:$0xf0] }
  0x1b   : > { %467 = vmatpush.bf16.msra.mxu2 %v1984_v26  ;;  %452 = vmatpush.bf16.msra.mxu1 %v1992_v42  ;;  %v1968_v1 = vor.u32 %v2440_v63, %v1965_v0  ;;  %v1956_v4 = vor.u32 %v2437_v2, %v1953_v3  ;;  %v2434_v5 = vld [vmem:[%s3674_s1 + $0x1c] sm:$0xf]  ;;  %v1941_v6 = vld [vmem:[%s3674_s1 + $0x24] sm:$0xf0]  ;;  %v2431_v8 = vld [vmem:[%s3674_s1 + $0x4] sm:$0xf] }
  0x1c   : > { %v1944_v7 = vor.u32 %v2434_v5, %v1941_v6  ;;  %v1929_v9 = vld [vmem:[%s3674_s1 + $0xc] sm:$0xf0]  ;;  %v2811_v14 = vld [vmem:[%s3675_s2] sm:$0xff]  ;;  %v2818_v16 = vld [vmem:[%s3675_s2 + $0x8] sm:$0xff] }
  0x1d   : > { %v1932_v10 = vor.u32 %v2431_v8, %v1929_v9  ;;  %v2832_v18 = vld [vmem:[%s3675_s2 + $0x18] sm:$0xff]  ;;  %v2844_v20 = vld [vmem:[%s3676_s3 + $0x70] sm:$0xff]  ;;  %v2851_v21 = vld [vmem:[%s3676_s3 + $0x68] sm:$0xff] }
  0x1e   : > { %440 = vmatpush.bf16.msra.mxu0 %v1964_v34  ;;  %v2839_v19 = vld [vmem:[%s3676_s3 + $0x78] sm:$0xff]  ;;  %v2860_v22 = vld [vmem:[%s3676_s3 + $0x60] sm:$0xff]  ;;  %v2873_v24 = vld [vmem:[%s3676_s3 + $0x50] sm:$0xff] }
  0x1f   : > { %468 = vmatpush.bf16.msra.mxu2 %v1972_v37  ;;  %453 = vmatpush.bf16.msra.mxu1 %v1980_v51  ;;  %v2867_v23 = vld [vmem:[%s3676_s3 + $0x58] sm:$0xff]  ;;  %v2879_v25 = vld [vmem:[%s3676_s3 + $0x48] sm:$0xff]  ;;  %v2888_v26 = vld [vmem:[%s3676_s3 + $0x40] sm:$0xff] }
  0x20   : > { %v2895_v27 = vld [vmem:[%s3676_s3 + $0x38] sm:$0xff]  ;;  %v2902_v28 = vld [vmem:[%s3676_s3 + $0x30] sm:$0xff]  ;;  %v2909_v29 = vld [vmem:[%s3676_s3 + $0x28] sm:$0xff] }
  0x21   : > { %v2916_v31 = vld [vmem:[%s3676_s3 + $0x20] sm:$0xff]  ;;  %v2923_v32 = vld [vmem:[%s3676_s3 + $0x18] sm:$0xff]  ;;  %v2929_v33 = vld [vmem:[%s3676_s3 + $0x10] sm:$0xff] }
  0x22   : > { %441 = vmatpush.bf16.msra.mxu0 %v1952_v43  ;;  %v2935_v34 = vld [vmem:[%s3676_s3 + $0x8] sm:$0xff]  ;;  %v2942_v35 = vld [vmem:[%s3676_s3] sm:$0xff] }
  0x23   : > { %469 = vmatpush.bf16.msra.mxu2 %v1960_v46  ;;  %454 = vmatpush.bf16.msra.mxu1 %v1968_v1  ;;  %v2143_v6 = vld [vmem:[%s3674_s1 + $0x168] sm:$0xf]  ;;  %v2476_v8 = vld [vmem:[%s3674_s1 + $0x16c] sm:$0xf] }
  0x26   : > { %442 = vmatpush.bf16.msra.mxu0 %v1940_v52 }
  0x27   : > { %470 = vmatpush.bf16.msra.mxu2 %v1948_v53  ;;  %455 = vmatpush.bf16.msra.mxu1 %v1956_v4 }
  0x2a   : > { %443 = vmatpush.bf16.msra.mxu0 %v1928_v58 }
  0x2b   : > { %471 = vmatpush.bf16.msra.mxu2 %v1936_v61  ;;  %456 = vmatpush.bf16.msra.mxu1 %v1944_v7  ;;  %v2477_v7 = vld [vmem:[%s3674_s1 + $0x170] sm:$0xf0] }
  0x2c   : > { %v2144_v9 = vor.u32 %v2477_v7, %v2143_v6  ;;  %v2469_v6 = vld [vmem:[%s3674_s1 + $0x130] sm:$0xf0] }
  0x2d   : > { %444 = vmatmul.bf16.vlgmr.msra.gmra.mxu0 %v275_v62 }
  0x2e   : > { %472 = vmatmul.bf16.vlgmr.msra.gmra.mxu2 %v275_v62  ;;  %577 = vmatpush.msrb.mxu0 %v2839_v19 }
  0x2f   : > { %457 = vmatpush.bf16.msra.mxu1 %v1932_v10  ;;  %v2145_v10 = vld [vmem:[%s3674_s1 + $0x174] sm:$0xf0] }
  0x30   : > { %578 = vmatpush.msrb.mxu0 %v2844_v20 }
  0x32   : > { %458 = vmatmul.bf16.vlgmr.msra.gmra.mxu1 %v275_v62  ;;  %579 = vmatpush.msrb.mxu0 %v2851_v21 }
  0x33   : > { %839 = vmatpush.bf16.msrb.mxu1 %v2144_v9  ;;  %v612_v9 = vld [vmem:[%s3678_s5] sm:$0x1] }
  0x34   : > { %580 = vmatpush.msrb.mxu0 %v2860_v22 }
  0x36   : > { %581 = vmatpush.msrb.mxu0 %v2867_v23 }
  0x38   : > { %582 = vmatpush.msrb.mxu0 %v2873_v24 }
  0x3a   : > { %583 = vmatpush.msrb.mxu0 %v2879_v25 }
  0x3c   : > { %584 = vmatpush.msrb.mxu0 %v2888_v26 }
  0x3e   : > { %585 = vmatpush.msrb.mxu0 %v2895_v27 }
  0x40   : > { %586 = vmatpush.msrb.mxu0 %v2902_v28 }
  0x42   : > { %587 = vmatpush.msrb.mxu0 %v2909_v29 }
  0x44   : > { %588 = vmatpush.msrb.mxu0 %v2916_v31 }
  0x46   : > { %589 = vmatpush.msrb.mxu0 %v2923_v32 }
  0x48   : > { %590 = vmatpush.msrb.mxu0 %v2929_v33 }
  0x4a   : > { %591 = vmatpush.msrb.mxu0 %v2935_v34 }
  0x4c   : > { %592 = vmatpush.msrb.mxu0 %v2942_v35 }
  0xaa   : > { %v445_v11 = vpop.f32.mrf.mxu0 }
  0xaf   : > { %v459_v37 = vpop.f32.mrf.mxu1 }
  0xb1   : > { %v473_v12 = vpop.f32.mrf.mxu2 }
  0xb2   : > { %v447_v13 = vpop.f32.mrf.mxu0 }
  0xb3   : > { %499 = vmatpush.msra.mxu3 %v447_v13  ;;  %v2148_v13 = vor.u32 %v2476_v8, %v2145_v10 }
  0xb5   : > { %500 = vmatpush.msra.mxu3 %v445_v11  ;;  %v2151_v11 = vld [vmem:[%s3674_s1 + $0x170] sm:$0xf]  ;;  %853 = vmatpush.bf16.msrb.mxu2 %v2148_v13 }
  0xb6   : > { %2021 = vmatmul.msk.f32.vlgmr.msra.gmra.mxu3 %vm478_vm0, %v2811_v14 }
  0xb7   : > { %v461_v39 = vpop.f32.mrf.mxu1 }
  0xb9   : > { %v475_v15 = vpop.f32.mrf.mxu2 }
  0xba   : > { %530 = vmatpush.msrb.mxu3 %v475_v15  ;;  %v2478_v15 = vld [vmem:[%s3674_s1 + $0x178] sm:$0xf0] }
  0xbc   : > { %531 = vmatpush.msrb.mxu3 %v473_v12 }
  0xbe   : > { %2022 = vmatmul.msk.f32.gmra.mxu3 %vm478_vm0, %v2818_v16 }
  0xbf   : > { %557 = vmatpush.msra.mxu3 %v2839_v19 }
  0xc1   : > { %558 = vmatpush.msra.mxu3 %v2844_v20 }
  0xc3   : > { %559 = vmatpush.msra.mxu3 %v2851_v21 }
  0xc5   : > { %560 = vmatpush.msra.mxu3 %v2860_v22 }
  0xc6   : > { %2023 = vmatmul.msk.f32.vlgmr.msrb.gmra.mxu3 %vm478_vm0, %v2825_v17 }
  0xc7   : > { %561 = vmatpush.msra.mxu3 %v2867_v23 }
  0xc9   : > { %562 = vmatpush.msra.mxu3 %v2873_v24 }
  0xcb   : > { %563 = vmatpush.msra.mxu3 %v2879_v25 }
  0xcd   : > { %564 = vmatpush.msra.mxu3 %v2888_v26 }
  0xce   : > { %2024 = vmatmul.msk.f32.gmra.mxu3 %vm478_vm0, %v2832_v18 }
  0xcf   : > { %565 = vmatpush.msra.mxu3 %v2895_v27 }
  0xd1   : > { %566 = vmatpush.msra.mxu3 %v2902_v28 }
  0xd3   : > { %567 = vmatpush.msra.mxu3 %v2909_v29 }
  0xd5   : > { %568 = vmatpush.msra.mxu3 %v2916_v31 }
  0xd7   : > { %569 = vmatpush.msra.mxu3 %v2923_v32 }
  0xd9   : > { %570 = vmatpush.msra.mxu3 %v2929_v33 }
  0xdb   : > { %571 = vmatpush.msra.mxu3 %v2935_v34 }
  0xdd   : > { %572 = vmatpush.msra.mxu3 %v2942_v35 }
 0x139   : > { %v502_v30 = vpop.f32.mrf.mxu3 }
 0x13a   : > { %v508_v40 = vadd.f32 %v502_v30, %v459_v37  ;;  %v2131_v30 = vld [vmem:[%s3674_s1 + $0x150] sm:$0xf]  ;;  %v2152_v37 = vor.u32 %v2478_v15, %v2151_v11  ;;  %v2465_v11 = vld [vmem:[%s3674_s1 + $0x110] sm:$0xf0] }
 0x13c   : > { %867 = vmatpush.bf16.msrb.mxu3 %v2152_v37  ;;  %v2103_v37 = vld [vmem:[%s3674_s1 + $0x110] sm:$0xf] }
 0x141   : > { %v505_v36 = vpop.f32.mrf.mxu3 }
 0x142   : > { %v509_v41 = vadd.f32 %v505_v36, %v461_v39  ;;  %v2474_v36 = vld [vmem:[%s3674_s1 + $0x158] sm:$0xf0]  ;;  %v2473_v39 = vld [vmem:[%s3674_s1 + $0x154] sm:$0xf] }
 0x149   : > { %v533_v38 = vpop.f32.mrf.mxu3 }
 0x14a   : > { %v2948_v42 = vadd.f32 %v533_v38, %v508_v40  ;;  %v2132_v38 = vor.u32 %v2474_v36, %v2131_v30  ;;  %v2133_v40 = vld [vmem:[%s3674_s1 + $0x15c] sm:$0xf0]  ;;  %v2464_v30 = vld [vmem:[%s3674_s1 + $0x10c] sm:$0xf]  ;;  %v2097_v36 = vld [vmem:[%s3674_s1 + $0x114] sm:$0xf0] }
 0x14c   : > { %v548_v45 = vmul.f32 %v2948_v42, %v2948_v42  ;;  %840 = vmatpush.bf16.msrb.mxu1 %v2132_v38  ;;  %v2466_v38 = vld [vmem:[%s3674_s1 + $0x118] sm:$0xf0] }
 0x151   : > { %v536_v43 = vpop.f32.mrf.mxu3 }
 0x152   : > { %v2950_v44 = vadd.f32 %v536_v43, %v509_v41  ;;  %v2139_v41 = vld [vmem:[%s3674_s1 + $0x158] sm:$0xf] }
 0x154   : > { %v541_v46 = vadd.f32 %v2950_v44, %v2948_v42  ;;  %v549_v47 = vmul.f32 %v2950_v44, %v2950_v44 }
 0x156   : > { %v542_v48 = vrot.slane %v541_v46, 4  ;;  %v550_v49 = vadd.f32 %v549_v47, %v548_v45  ;;  %v2136_v45 = vor.u32 %v2473_v39, %v2133_v40  ;;  %v2119_v47 = vld [vmem:[%s3674_s1 + $0x138] sm:$0xf]  ;;  %v2100_v40 = vor.u32 %v2464_v30, %v2097_v36  ;;  %v2457_v30 = vld [vmem:[%s3674_s1 + $0xd0] sm:$0xf0] }
 0x158   : > { %v543_v50 = vadd.f32 %v542_v48, %v541_v46  ;;  %v551_v51 = vrot.slane %v550_v49, 4  ;;  %v2475_v46 = vld [vmem:[%s3674_s1 + $0x160] sm:$0xf0]  ;;  %854 = vmatpush.bf16.msrb.mxu2 %v2136_v45 }
 0x159   : > { %v2140_v48 = vor.u32 %v2475_v46, %v2139_v41  ;;  %v2083_v41 = vld [vmem:[%s3674_s1 + $0xf0] sm:$0xf] }
 0x15a   : > { %v544_v52 = vrot.slane %v543_v50, 2  ;;  %v552_v53 = vadd.f32 %v551_v51, %v550_v49  ;;  %v2471_v49 = vld [vmem:[%s3674_s1 + $0x140] sm:$0xf0]  ;;  %v2121_v51 = vld [vmem:[%s3674_s1 + $0x144] sm:$0xf0] }
 0x15b   : > { %868 = vmatpush.bf16.msrb.mxu3 %v2140_v48  ;;  %v2104_v48 = vor.u32 %v2466_v38, %v2103_v37 }
 0x15c   : > { %v545_v54 = vadd.f32 %v544_v52, %v543_v50  ;;  %v553_v55 = vrot.slane %v552_v53, 2  ;;  %v2470_v50 = vld [vmem:[%s3674_s1 + $0x13c] sm:$0xf] }
 0x15e   : > { %v546_v56 = vrot.slane %v545_v54, 1  ;;  %v554_v57 = vadd.f32 %v553_v55, %v552_v53  ;;  %v2127_v53 = vld [vmem:[%s3674_s1 + $0x140] sm:$0xf]  ;;  %v2120_v55 = vor.u32 %v2471_v49, %v2119_v47  ;;  %v2461_v49 = vld [vmem:[%s3674_s1 + $0xf4] sm:$0xf] }
 0x160   : > { %v547_v58 = vadd.f32 %v546_v56, %v545_v54  ;;  %v555_v61 = vrot.slane %v554_v57, 1  ;;  %v2472_v54 = vld [vmem:[%s3674_s1 + $0x148] sm:$0xf0]  ;;  %v599_v56 = vld [vmem:[%s3677_s4] sm:$0x1]  ;;  %841 = vmatpush.bf16.msrb.mxu1 %v2120_v55 }
 0x161   : > { %v2071_v55 = vld [vmem:[%s3674_s1 + $0xd8] sm:$0xf] }
 0x162   : > { %573 = vmatmul.f32.vlgmr.msra.gmra.mxu3 %v547_v58  ;;  %v556_v62 = vadd.f32 %v555_v61, %v554_v57  ;;  %v2124_v58 = vor.u32 %v2470_v50, %v2121_v51  ;;  %v2107_v61 = vld [vmem:[%s3674_s1 + $0x120] sm:$0xf]  ;;  %v2091_v51 = vld [vmem:[%s3674_s1 + $0xf8] sm:$0xf] }
 0x163   : > { %v2085_v50 = vld [vmem:[%s3674_s1 + $0xfc] sm:$0xf0] }
 0x164   : > { %593 = vmatmul.f32.vlgmr.msrb.gmra.mxu0 %v556_v62  ;;  %v2468_v62 = vld [vmem:[%s3674_s1 + $0x128] sm:$0xf0]  ;;  %855 = vmatpush.bf16.msrb.mxu2 %v2124_v58 }
 0x165   : > { %v2108_v8 = vor.u32 %v2468_v62, %v2107_v61 }
 0x167   : > { %842 = vmatpush.bf16.msrb.mxu1 %v2108_v8  ;;  %v2059_v8 = vld [vmem:[%s3674_s1 + $0xc0] sm:$0xf] }
 0x1e1   : > { %v594_v1 = vpop.f32.mrf.mxu0 }
 0x1e5   : > { %v2958_v63 = vpop.f32.mrf.mxu3 }
 0x1e6   : > { %v597_v0 = vmul.f32 %v2958_v63, %v2958_v63 }
 0x1e8   : > { %v598_v2 = vsub.f32 %v594_v1, %v597_v0  ;;  %v2128_v0 = vor.u32 %v2472_v54, %v2127_v53  ;;  %v2467_v1 = vld [vmem:[%s3674_s1 + $0x124] sm:$0xf]  ;;  %v2088_v54 = vor.u32 %v2461_v49, %v2085_v50 }
 0x1ea   : > { %v600_v3 = vadd.f32 1e-05, %v598_v2  ;;  %v2109_v2 = vld [vmem:[%s3674_s1 + $0x12c] sm:$0xf0]  ;;  %869 = vmatpush.bf16.msrb.mxu3 %v2128_v0  ;;  %v2073_v0 = vld [vmem:[%s3674_s1 + $0xe4] sm:$0xf0] }
 0x1eb   : > { %v2112_v10 = vor.u32 %v2467_v1, %v2109_v2  ;;  %v2079_v1 = vld [vmem:[%s3674_s1 + $0xe0] sm:$0xf]  ;;  %v2460_v2 = vld [vmem:[%s3674_s1 + $0xe8] sm:$0xf0] }
 0x1ec   : > { %2535 = vrsqrt.f32 %v600_v3  ;;  %vm607_vm2 = vweird.f32 %v600_v3 }
 0x1ed   : > { %856 = vmatpush.bf16.msrb.mxu2 %v2112_v10  ;;  %v2455_v10 = vld [vmem:[%s3674_s1 + $0xc4] sm:$0xf] }
 0x1f1   : > { %857 = vmatpush.bf16.msrb.mxu2 %v2100_v40 }
 0x1f2   : > { %v2536_v4 = vpop.eup %2535 }
 0x1f3   : > { %v602_v5 = vmul.f32 %v2536_v4, %v600_v3  ;;  %vm608_vm1 = vweird.f32 %v2536_v4 }
 0x1f4   : > { %vm609_vm3 = vmor %vm607_vm2, %vm608_vm1 }
 0x1f5   : > { %v603_v12 = vmul.f32 %v2536_v4, %v602_v5  ;;  %v2115_v5 = vld [vmem:[%s3674_s1 + $0x128] sm:$0xf]  ;;  %858 = vmatpush.bf16.msrb.mxu2 %v2088_v54 }
 0x1f6   : > { %v2116_v15 = vor.u32 %v2469_v6, %v2115_v5 }
 0x1f7   : > { %v604_v43 = vmul.f32 0.5, %v603_v12 }
 0x1f8   : > { %870 = vmatpush.bf16.msrb.mxu3 %v2116_v15  ;;  %v2067_v15 = vld [vmem:[%s3674_s1 + $0xc8] sm:$0xf] }
 0x1f9   : > { %v605_v52 = vsub.f32 1.5, %v604_v43  ;;  %v2462_v43 = vld [vmem:[%s3674_s1 + $0xf8] sm:$0xf0] }
 0x1fa   : > { %v2084_v53 = vor.u32 %v2462_v43, %v2083_v41 }
 0x1fb   : > { %v606_v57 = vmul.f32 %v2536_v4, %v605_v52 }
 0x1fc   : > { %871 = vmatpush.bf16.msrb.mxu3 %v2104_v48 }
 0x1fd   : > { %v610_v3 = vsel %vm609_vm3, %v2536_v4, %v606_v57  ;;  %v2095_v4 = vld [vmem:[%s3674_s1 + $0x108] sm:$0xf]  ;;  %v2458_v57 = vld [vmem:[%s3674_s1 + $0xdc] sm:$0xf] }
 0x1fe   : > { %v611_v7 = vmul.f32 %v610_v3, %v599_v56  ;;  %v2096_v39 = vor.u32 %v2465_v11, %v2095_v4  ;;  %v2459_v56 = vld [vmem:[%s3674_s1 + $0xe0] sm:$0xf0] }
 0x1ff   : > { %v2072_v6 = vor.u32 %v2459_v56, %v2071_v55 }
 0x200   : > { %v613_v12 = vmul.f32 %v611_v7, %v2958_v63  ;;  %v616_v13 = vperm.slane %v611_v7, 0  ;;  %843 = vmatpush.bf16.msrb.mxu1 %v2096_v39  ;;  %v2076_v7 = vor.u32 %v2458_v57, %v2073_v0  ;;  %v2068_v39 = vor.u32 %v2457_v30, %v2067_v15 }
 0x202   : > { %v614_v63 = vsub.f32 %v612_v9, %v613_v12  ;;  %v618_v45 = vmul.f32 %v616_v13, %v2948_v42  ;;  %v619_v46 = vmul.f32 %v616_v13, %v2950_v44  ;;  %v2463_v42 = vld [vmem:[%s3674_s1 + $0x100] sm:$0xf0]  ;;  %v2456_v9 = vld [vmem:[%s3674_s1 + $0xc8] sm:$0xf0]  ;;  %v2080_v12 = vor.u32 %v2460_v2, %v2079_v1  ;;  %v2061_v13 = vld [vmem:[%s3674_s1 + $0xcc] sm:$0xf0]  ;;  %859 = vmatpush.bf16.msrb.mxu2 %v2076_v7 }
 0x203   : > { %v2092_v62 = vor.u32 %v2463_v42, %v2091_v51  ;;  %v2060_v38 = vor.u32 %v2456_v9, %v2059_v8 }
 0x204   : > { %v621_v47 = vperm.slane %v614_v63, 0  ;;  %844 = vmatpush.bf16.msrb.mxu1 %v2084_v53  ;;  %v2064_v63 = vor.u32 %v2455_v10, %v2061_v13 }
 0x205   : > { %872 = vmatpush.bf16.msrb.mxu3 %v2092_v62 }
 0x206   : > { %v3079_v44 = vadd.f32 %v621_v47, %v618_v45  ;;  %v3081_v52 = vadd.f32 %v621_v47, %v619_v46  ;;  %860 = vmatpush.bf16.msrb.mxu2 %v2064_v63 }
 0x208   : > { %v3093_v58 = vmul.f32 0.70710677, %v3079_v44  ;;  %v3096_v61 = vmul.f32 0.70710677, %v3081_v52  ;;  %845 = vmatpush.bf16.msrb.mxu1 %v2072_v6  ;;  %v671_v63 = vmul.f32 0.5, %v3079_v44 }
 0x209   : > { %873 = vmatpush.bf16.msrb.mxu3 %v2080_v12 }
 0x20a   : > { %v627_v3 = vand.u32 2147483647, %v3093_v58  ;;  %v628_v5 = vand.u32 2147483647, %v3096_v61  ;;  %947 = vmatpush.msra.mxu2 %v2839_v19  ;;  %vm665_vm4 = vcmp.lt.f32.partialorder %v3093_v58, 0.0  ;;  %vm666_vm5 = vcmp.lt.f32.partialorder %v3096_v61, 0.0 }
 0x20c   : > { %v629_v4 = vmul.f32 0.3275911, %v627_v3  ;;  %v630_v11 = vmul.f32 0.3275911, %v628_v5  ;;  %846 = vmatpush.bf16.msrb.mxu1 %v2060_v38  ;;  %v653_v41 = vsub.f32 0.0, %v627_v3  ;;  %948 = vmatpush.msra.mxu2 %v2844_v20  ;;  %v654_v45 = vsub.f32 0.0, %v628_v5 }
 0x20d   : > { %874 = vmatpush.bf16.msrb.mxu3 %v2068_v39 }
 0x20e   : > { %v631_v36 = vadd.f32 1.0, %v629_v4  ;;  %v632_v37 = vadd.f32 1.0, %v630_v11  ;;  %949 = vmatpush.msra.mxu2 %v2851_v21  ;;  %v655_v49 = vmul.f32 %v653_v41, %v627_v3  ;;  %v656_v51 = vmul.f32 %v654_v45, %v628_v5 }
 0x210   : > { %2537 = vrcp.f32 %v631_v36  ;;  %950 = vmatpush.msra.mxu2 %v2860_v22  ;;  %v657_v55 = vmul.f32 1.442695, %v655_v49  ;;  %v659_v57 = vmul.f32 1.442695, %v656_v51 }
 0x211   : > { %2539 = vrcp.f32 %v632_v37 }
 0x212   : > { %951 = vmatpush.msra.mxu2 %v2867_v23  ;;  %2541 = vpow2.f32 %v657_v55 }
 0x213   : > { %2543 = vpow2.f32 %v659_v57 }
 0x214   : > { %952 = vmatpush.msra.mxu2 %v2873_v24 }
 0x216   : > { %v2538_v40 = vpop.eup %2537  ;;  %953 = vmatpush.msra.mxu2 %v2879_v25 }
 0x217   : > { %v2540_v43 = vpop.eup %2539  ;;  %v635_v46 = vmul.f32 1.0614054, %v2538_v40 }
 0x218   : > { %v636_v47 = vmul.f32 1.0614054, %v2540_v43  ;;  %954 = vmatpush.msra.mxu2 %v2888_v26  ;;  %v2542_v9 = vpop.eup %2541 }
 0x219   : > { %v637_v48 = vadd.f32 -1.4531521, %v635_v46  ;;  %v2544_v4 = vpop.eup %2543 }
 0x21a   : > { %v638_v50 = vadd.f32 -1.4531521, %v636_v47  ;;  %955 = vmatpush.msra.mxu2 %v2895_v27 }
 0x21b   : > { %v639_v42 = vmul.f32 %v2538_v40, %v637_v48 }
 0x21c   : > { %v640_v53 = vmul.f32 %v2540_v43, %v638_v50  ;;  %956 = vmatpush.msra.mxu2 %v2902_v28 }
 0x21d   : > { %v641_v54 = vadd.f32 1.4214138, %v639_v42 }
 0x21e   : > { %v642_v56 = vadd.f32 1.4214138, %v640_v53  ;;  %957 = vmatpush.msra.mxu2 %v2909_v29 }
 0x21f   : > { %v643_v62 = vmul.f32 %v2538_v40, %v641_v54 }
 0x220   : > { %v644_v0 = vmul.f32 %v2540_v43, %v642_v56  ;;  %958 = vmatpush.msra.mxu2 %v2916_v31 }
 0x221   : > { %v645_v1 = vadd.f32 -0.28449672, %v643_v62 }
 0x222   : > { %v646_v2 = vadd.f32 -0.28449672, %v644_v0  ;;  %959 = vmatpush.msra.mxu2 %v2923_v32 }
 0x223   : > { %v647_v3 = vmul.f32 %v2538_v40, %v645_v1 }
 0x224   : > { %v648_v5 = vmul.f32 %v2540_v43, %v646_v2  ;;  %960 = vmatpush.msra.mxu2 %v2929_v33 }
 0x225   : > { %v649_v6 = vadd.f32 0.2548296, %v647_v3 }
 0x226   : > { %v650_v7 = vadd.f32 0.2548296, %v648_v5  ;;  %961 = vmatpush.msra.mxu2 %v2935_v34 }
 0x227   : > { %v651_v8 = vmul.f32 %v2538_v40, %v649_v6  ;;  %v672_v40 = vmul.f32 0.5, %v3081_v52 }
 0x228   : > { %v652_v10 = vmul.f32 %v2540_v43, %v650_v7  ;;  %962 = vmatpush.msra.mxu2 %v2942_v35 }
 0x229   : > { %v661_v11 = vmul.f32 %v2542_v9, %v651_v8 }
 0x22a   : > { %v662_v12 = vmul.f32 %v2544_v4, %v652_v10 }
 0x22b   : > { %v663_v13 = vsub.f32 1.0, %v661_v11 }
 0x22c   : > { %v664_v15 = vsub.f32 1.0, %v662_v12 }
 0x22d   : > { %v667_v30 = vsub.f32 0.0, %v663_v13 }
 0x22e   : > { %v668_v36 = vsub.f32 0.0, %v664_v15 }
 0x22f   : > { %v669_v37 = vsel %vm665_vm4, %v667_v30, %v663_v13 }
 0x230   : > { %v670_v38 = vsel %vm666_vm5, %v668_v36, %v664_v15  ;;  %v673_v39 = vadd.f32 1.0, %v669_v37 }
 0x231   : > { %v674_v41 = vadd.f32 1.0, %v670_v38  ;;  %v2277_v38 = vld [vmem:[%s3674_s1 + $0x228] sm:$0xf] }
 0x232   : > { %v675_v43 = vmul.f32 %v673_v39, %v671_v63  ;;  %v2501_v63 = vld [vmem:[%s3674_s1 + $0x230] sm:$0xf0]  ;;  %v2500_v39 = vld [vmem:[%s3674_s1 + $0x22c] sm:$0xf] }
 0x233   : > { %v676_v45 = vmul.f32 %v674_v41, %v672_v40  ;;  %v2278_v40 = vor.u32 %v2501_v63, %v2277_v38  ;;  %v2279_v41 = vld [vmem:[%s3674_s1 + $0x234] sm:$0xf0] }
 0x235   : > { %v677_v58 = vpack.c.bf16 %v676_v45, %v675_v43  ;;  %v2285_v43 = vld [vmem:[%s3674_s1 + $0x230] sm:$0xf]  ;;  %v2502_v45 = vld [vmem:[%s3674_s1 + $0x238] sm:$0xf0] }
 0x237   : > { %847 = vmatmul.bf16.vlgmr.msrb.gmra.mxu1 %v677_v58  ;;  %861 = vmatmul.bf16.vlgmr.msrb.gmra.mxu2 %v677_v58 }
 0x238   : > { %875 = vmatmul.bf16.vlgmr.msrb.gmra.mxu3 %v677_v58 }
 0x2b4   : > { %v848_v46 = vpop.f32.mrf.mxu1 }
 0x2bb   : > { %v876_v61 = vpop.f32.mrf.mxu3 }
 0x2bc   : > { %v850_v47 = vpop.f32.mrf.mxu1 }
 0x2bd   : > { %895 = vmatpush.msra.mxu0 %v850_v47  ;;  %v2265_v47 = vld [vmem:[%s3674_s1 + $0x210] sm:$0xf] }
 0x2bf   : > { %896 = vmatpush.msra.mxu0 %v848_v46  ;;  %v2282_v46 = vor.u32 %v2500_v39, %v2279_v41  ;;  %v2229_v39 = vld [vmem:[%s3674_s1 + $0x1c8] sm:$0xf]  ;;  %v2488_v41 = vld [vmem:[%s3674_s1 + $0x1cc] sm:$0xf] }
 0x2c0   : > { %2153 = vmatmul.msk.f32.vlgmr.msra.gmra.mxu0 %vm478_vm0, %v2811_v14 }
 0x2c1   : > { %967 = vmatpush.msrb.mxu0 %v2839_v19  ;;  %1247 = vmatpush.bf16.msra.mxu3 %v2282_v46 }
 0x2c3   : > { %v878_v44 = vpop.f32.mrf.mxu3  ;;  %968 = vmatpush.msrb.mxu0 %v2844_v20 }
 0x2c4   : > { %920 = vmatpush.msra.mxu1 %v878_v44  ;;  %v2498_v44 = vld [vmem:[%s3674_s1 + $0x218] sm:$0xf0] }
 0x2c5   : > { %969 = vmatpush.msrb.mxu0 %v2851_v21 }
 0x2c6   : > { %921 = vmatpush.msra.mxu1 %v876_v61  ;;  %v2286_v61 = vor.u32 %v2502_v45, %v2285_v43  ;;  %v2231_v43 = vld [vmem:[%s3674_s1 + $0x1d4] sm:$0xf0]  ;;  %v2237_v45 = vld [vmem:[%s3674_s1 + $0x1d0] sm:$0xf] }
 0x2c7   : > { %2155 = vmatmul.msk.f32.vlgmr.msra.gmra.mxu1 %vm478_vm0, %v2825_v17  ;;  %970 = vmatpush.msrb.mxu0 %v2860_v22 }
 0x2c8   : > { %2154 = vmatmul.msk.f32.gmra.mxu0 %vm478_vm0, %v2818_v16  ;;  %v862_v16 = vpop.f32.mrf.mxu2  ;;  %1233 = vmatpush.bf16.msrb.mxu1 %v2278_v40  ;;  %v2489_v40 = vld [vmem:[%s3674_s1 + $0x1d0] sm:$0xf0] }
 0x2c9   : > { %971 = vmatpush.msrb.mxu0 %v2867_v23  ;;  %1261 = vmatpush.bf16.msrb.mxu2 %v2286_v61 }
 0x2cb   : > { %972 = vmatpush.msrb.mxu0 %v2873_v24 }
 0x2cd   : > { %973 = vmatpush.msrb.mxu0 %v2879_v25 }
 0x2cf   : > { %2156 = vmatmul.msk.f32.gmra.mxu1 %vm478_vm0, %v2832_v18  ;;  %974 = vmatpush.msrb.mxu0 %v2888_v26 }
 0x2d0   : > { %v864_v48 = vpop.f32.mrf.mxu2 }
 0x2d1   : > { %975 = vmatpush.msrb.mxu0 %v2895_v27 }
 0x2d3   : > { %976 = vmatpush.msrb.mxu0 %v2902_v28 }
 0x2d5   : > { %977 = vmatpush.msrb.mxu0 %v2909_v29 }
 0x2d7   : > { %978 = vmatpush.msrb.mxu0 %v2916_v31 }
 0x2d9   : > { %979 = vmatpush.msrb.mxu0 %v2923_v32 }
 0x2db   : > { %980 = vmatpush.msrb.mxu0 %v2929_v33 }
 0x2dd   : > { %981 = vmatpush.msrb.mxu0 %v2935_v34 }
 0x2df   : > { %982 = vmatpush.msrb.mxu0 %v2942_v35 }
 0x33d   : > { %v898_v14 = vpop.f32.mrf.mxu0 }
 0x33e   : > { %v904_v52 = vadd.f32 %v898_v14, %v862_v16  ;;  %v2266_v14 = vor.u32 %v2498_v44, %v2265_v47  ;;  %v2497_v16 = vld [vmem:[%s3674_s1 + $0x214] sm:$0xf]  ;;  %v2230_v44 = vor.u32 %v2489_v40, %v2229_v39 }
 0x340   : > { %1234 = vmatpush.bf16.msrb.mxu1 %v2266_v14  ;;  %v2234_v14 = vor.u32 %v2488_v41, %v2231_v43 }
 0x344   : > { %v923_v17 = vpop.f32.mrf.mxu1 }
 0x345   : > { %v901_v18 = vpop.f32.mrf.mxu0  ;;  %v3171_v49 = vadd.f32 %v923_v17, %v904_v52  ;;  %v2267_v17 = vld [vmem:[%s3674_s1 + $0x21c] sm:$0xf0] }
 0x346   : > { %v905_v50 = vadd.f32 %v901_v18, %v864_v48  ;;  %v2273_v18 = vld [vmem:[%s3674_s1 + $0x218] sm:$0xf]  ;;  %v2270_v48 = vor.u32 %v2497_v16, %v2267_v17  ;;  %v2217_v17 = vld [vmem:[%s3674_s1 + $0x1b0] sm:$0xf] }
 0x347   : > { %v938_v53 = vmul.f32 %v3171_v49, %v3171_v49 }
 0x348   : > { %1248 = vmatpush.bf16.msra.mxu3 %v2270_v48  ;;  %v2219_v48 = vld [vmem:[%s3674_s1 + $0x1bc] sm:$0xf0] }
 0x34c   : > { %v926_v51 = vpop.f32.mrf.mxu1 }
 0x34d   : > { %v3173_v42 = vadd.f32 %v926_v51, %v905_v50  ;;  %v2499_v50 = vld [vmem:[%s3674_s1 + $0x220] sm:$0xf0]  ;;  %v2253_v51 = vld [vmem:[%s3674_s1 + $0x1f8] sm:$0xf] }
 0x34f   : > { %v931_v54 = vadd.f32 %v3173_v42, %v3171_v49  ;;  %v939_v55 = vmul.f32 %v3173_v42, %v3173_v42 }
 0x351   : > { %v932_v56 = vrot.slane %v931_v54, 4  ;;  %v940_v57 = vadd.f32 %v939_v55, %v938_v53  ;;  %v2274_v53 = vor.u32 %v2499_v50, %v2273_v18  ;;  %v2494_v55 = vld [vmem:[%s3674_s1 + $0x1fc] sm:$0xf]  ;;  %v2225_v50 = vld [vmem:[%s3674_s1 + $0x1b8] sm:$0xf] }
 0x352   : > { %v2486_v18 = vld [vmem:[%s3674_s1 + $0x1b8] sm:$0xf0] }
 0x353   : > { %v933_v62 = vadd.f32 %v932_v56, %v931_v54  ;;  %v941_v0 = vrot.slane %v940_v57, 4  ;;  %v2495_v54 = vld [vmem:[%s3674_s1 + $0x200] sm:$0xf0]  ;;  %v2255_v56 = vld [vmem:[%s3674_s1 + $0x204] sm:$0xf0]  ;;  %1262 = vmatpush.bf16.msrb.mxu2 %v2274_v53 }
 0x355   : > { %v934_v1 = vrot.slane %v933_v62, 2  ;;  %v942_v2 = vadd.f32 %v941_v0, %v940_v57  ;;  %v2157_v57 = vld [vmem:[%s3677_s4 + $0x1] sm:$0x1] }
 0x356   : > { %v2261_v0 = vld [vmem:[%s3674_s1 + $0x200] sm:$0xf] }
 0x357   : > { %v935_v3 = vadd.f32 %v934_v1, %v933_v62  ;;  %v943_v5 = vrot.slane %v942_v2, 2  ;;  %v2496_v1 = vld [vmem:[%s3674_s1 + $0x208] sm:$0xf0] }
 0x359   : > { %v936_v6 = vrot.slane %v935_v3, 1  ;;  %v944_v7 = vadd.f32 %v943_v5, %v942_v2  ;;  %v2254_v2 = vor.u32 %v2495_v54, %v2253_v51  ;;  %v2258_v5 = vor.u32 %v2494_v55, %v2255_v56  ;;  %v2487_v51 = vld [vmem:[%s3674_s1 + $0x1c0] sm:$0xf0]  ;;  %v2205_v56 = vld [vmem:[%s3674_s1 + $0x198] sm:$0xf] }
 0x35a   : > { %v2218_v55 = vor.u32 %v2486_v18, %v2217_v17 }
 0x35b   : > { %v937_v8 = vadd.f32 %v936_v6, %v935_v3  ;;  %v945_v9 = vrot.slane %v944_v7, 1  ;;  %v2262_v6 = vor.u32 %v2496_v1, %v2261_v0  ;;  %1235 = vmatpush.bf16.msrb.mxu1 %v2254_v2  ;;  %1249 = vmatpush.bf16.msra.mxu3 %v2258_v5  ;;  %v2226_v0 = vor.u32 %v2487_v51, %v2225_v50  ;;  %v2213_v1 = vld [vmem:[%s3674_s1 + $0x1a0] sm:$0xf]  ;;  %v2484_v5 = vld [vmem:[%s3674_s1 + $0x1a8] sm:$0xf0] }
 0x35d   : > { %963 = vmatmul.f32.vlgmr.msra.gmra.mxu2 %v937_v8  ;;  %v946_v10 = vadd.f32 %v945_v9, %v944_v7  ;;  %v2241_v7 = vld [vmem:[%s3674_s1 + $0x1e0] sm:$0xf]  ;;  %v2492_v8 = vld [vmem:[%s3674_s1 + $0x1e8] sm:$0xf0]  ;;  %v2491_v9 = vld [vmem:[%s3674_s1 + $0x1e4] sm:$0xf] }
 0x35e   : > { %1263 = vmatpush.bf16.msrb.mxu2 %v2262_v6  ;;  %v2193_v6 = vld [vmem:[%s3674_s1 + $0x180] sm:$0xf] }
 0x35f   : > { %983 = vmatmul.f32.vlgmr.msrb.gmra.mxu0 %v946_v10 }
 0x3dc   : > { %v984_v12 = vpop.f32.mrf.mxu0 }
 0x3e0   : > { %v964_v4 = vpop.f32.mrf.mxu2 }
 0x3e1   : > { %v987_v11 = vmul.f32 %v964_v4, %v964_v4 }
 0x3e3   : > { %v988_v13 = vsub.f32 %v984_v12, %v987_v11  ;;  %v2243_v11 = vld [vmem:[%s3674_s1 + $0x1ec] sm:$0xf0]  ;;  %v2249_v12 = vld [vmem:[%s3674_s1 + $0x1e8] sm:$0xf] }
 0x3e4   : > { %v2246_v38 = vor.u32 %v2491_v9, %v2243_v11 }
 0x3e5   : > { %v991_v15 = vadd.f32 1e-05, %v988_v13  ;;  %v2493_v13 = vld [vmem:[%s3674_s1 + $0x1f0] sm:$0xf0] }
 0x3e6   : > { %v2250_v63 = vor.u32 %v2493_v13, %v2249_v12  ;;  %1250 = vmatpush.bf16.msra.mxu3 %v2246_v38  ;;  %v2214_v12 = vor.u32 %v2484_v5, %v2213_v1  ;;  %v2479_v13 = vld [vmem:[%s3674_s1 + $0x184] sm:$0xf]  ;;  %v2481_v38 = vld [vmem:[%s3674_s1 + $0x190] sm:$0xf0] }
 0x3e7   : > { %2545 = vrsqrt.f32 %v991_v15  ;;  %vm998_vm7 = vweird.f32 %v991_v15 }
 0x3e8   : > { %1264 = vmatpush.bf16.msrb.mxu2 %v2250_v63 }
 0x3ea   : > { %1251 = vmatpush.bf16.msra.mxu3 %v2234_v14 }
 0x3ed   : > { %v2546_v30 = vpop.eup %2545 }
 0x3ee   : > { %v993_v36 = vmul.f32 %v2546_v30, %v991_v15  ;;  %vm999_vm6 = vweird.f32 %v2546_v30  ;;  %v2158_v15 = vld [vmem:[%s3678_s5 + $0x1] sm:$0x1] }
 0x3ef   : > { %vm1000_vm8 = vmor %vm998_vm7, %vm999_vm6 }
 0x3f0   : > { %v994_v37 = vmul.f32 %v2546_v30, %v993_v36 }
 0x3f2   : > { %v995_v58 = vmul.f32 0.5, %v994_v37  ;;  %v2242_v37 = vor.u32 %v2492_v8, %v2241_v7 }
 0x3f4   : > { %v996_v52 = vsub.f32 1.5, %v995_v58  ;;  %v2490_v58 = vld [vmem:[%s3674_s1 + $0x1d8] sm:$0xf0]  ;;  %1236 = vmatpush.bf16.msrb.mxu1 %v2242_v37 }
 0x3f5   : > { %v2238_v16 = vor.u32 %v2490_v58, %v2237_v45 }
 0x3f6   : > { %v997_v62 = vmul.f32 %v2546_v30, %v996_v52 }
 0x3f7   : > { %1265 = vmatpush.bf16.msrb.mxu2 %v2238_v16 }
 0x3f8   : > { %v1001_v3 = vsel %vm1000_vm8, %v2546_v30, %v997_v62  ;;  %1237 = vmatpush.bf16.msrb.mxu1 %v2230_v44 }
 0x3f9   : > { %v1002_v10 = vmul.f32 %v2157_v57, %v1001_v3  ;;  %v2483_v57 = vld [vmem:[%s3674_s1 + $0x1a0] sm:$0xf0] }
 0x3fa   : > { %v2206_v9 = vor.u32 %v2483_v57, %v2205_v56 }
 0x3fb   : > { %v1005_v30 = vmul.f32 %v1002_v10, %v964_v4  ;;  %v1008_v36 = vperm.slane %v1002_v10, 0  ;;  %v2480_v10 = vld [vmem:[%s3674_s1 + $0x188] sm:$0xf0]  ;;  %1266 = vmatpush.bf16.msrb.mxu2 %v2226_v0 }
 0x3fc   : > { %1238 = vmatpush.bf16.msrb.mxu1 %v2218_v55  ;;  %v2194_v40 = vor.u32 %v2480_v10, %v2193_v6  ;;  %v3414_v10 = vld [vmem:[%s3675_s2 + $0x18] sm:$0xff] }
 0x3fd   : > { %v1006_v4 = vsub.f32 %v2158_v15, %v1005_v30  ;;  %v1010_v46 = vmul.f32 %v1008_v36, %v3171_v49  ;;  %v1011_v61 = vmul.f32 %v1008_v36, %v3173_v42  ;;  %v2485_v49 = vld [vmem:[%s3674_s1 + $0x1b4] sm:$0xf]  ;;  %v2195_v15 = vld [vmem:[%s3674_s1 + $0x18c] sm:$0xf0]  ;;  %v2201_v30 = vld [vmem:[%s3674_s1 + $0x188] sm:$0xf] }
 0x3fe   : > { %v2222_v62 = vor.u32 %v2485_v49, %v2219_v48  ;;  %v2198_v41 = vor.u32 %v2479_v13, %v2195_v15 }
 0x3ff   : > { %v1013_v47 = vperm.slane %v1006_v4, 0  ;;  %1267 = vmatpush.bf16.msrb.mxu2 %v2214_v12  ;;  %v2202_v4 = vor.u32 %v2481_v38, %v2201_v30 }
 0x400   : > { %1252 = vmatpush.bf16.msra.mxu3 %v2222_v62  ;;  %1239 = vmatpush.bf16.msrb.mxu1 %v2206_v9  ;;  %v3407_v9 = vld [vmem:[%s3675_s2 + $0x10] sm:$0xff] }
 0x401   : > { %v1015_v42 = vadd.f32 %v1013_v47, %v1010_v46  ;;  %v1016_v52 = vadd.f32 %v1013_v47, %v1011_v61 }
 0x403   : > { %v3299_v53 = vadd.f32 %v1015_v42, %v2778_v59  ;;  %v3302_v54 = vadd.f32 %v1016_v52, %v2780_v60  ;;  %v2482_v59 = vld [vmem:[%s3674_s1 + $0x19c] sm:$0xf]  ;;  %v2207_v60 = vld [vmem:[%s3674_s1 + $0x1a4] sm:$0xf0]  ;;  %1268 = vmatpush.bf16.msrb.mxu2 %v2202_v4 }
 0x404   : > { %v2210_v11 = vor.u32 %v2482_v59, %v2207_v60  ;;  %1240 = vmatpush.bf16.msrb.mxu1 %v2194_v40 }
 0x405   : > { %v3320_v2 = vmul.f32 0.70710677, %v3299_v53  ;;  %v3323_v3 = vmul.f32 0.70710677, %v3302_v54  ;;  %v1065_v1 = vmul.f32 0.5, %v3299_v53 }
 0x406   : > { %1253 = vmatpush.bf16.msra.mxu3 %v2210_v11 }
 0x407   : > { %v1021_v7 = vand.u32 2147483647, %v3320_v2  ;;  %v1022_v8 = vand.u32 2147483647, %v3323_v3  ;;  %vm1059_vm9 = vcmp.lt.f32.partialorder %v3320_v2, 0.0  ;;  %vm1060_vm10 = vcmp.lt.f32.partialorder %v3323_v3, 0.0 }
 0x408   : > { %1341 = vmatpush.msra.mxu1 %v2839_v19 }
 0x409   : > { %v1023_v36 = vmul.f32 0.3275911, %v1021_v7  ;;  %v1024_v37 = vmul.f32 0.3275911, %v1022_v8  ;;  %v1047_v45 = vsub.f32 0.0, %v1021_v7  ;;  %v1048_v46 = vsub.f32 0.0, %v1022_v8 }
 0x40a   : > { %1254 = vmatpush.bf16.msra.mxu3 %v2198_v41  ;;  %1342 = vmatpush.msra.mxu1 %v2844_v20 }
 0x40b   : > { %v1025_v63 = vadd.f32 1.0, %v1023_v36  ;;  %v1026_v39 = vadd.f32 1.0, %v1024_v37  ;;  %v1049_v14 = vmul.f32 %v1047_v45, %v1021_v7 }
 0x40c   : > { %1343 = vmatpush.msra.mxu1 %v2851_v21 }
 0x40d   : > { %2547 = vrcp.f32 %v1025_v63  ;;  %v1051_v49 = vmul.f32 1.442695, %v1049_v14 }
 0x40e   : > { %2549 = vrcp.f32 %v1026_v39  ;;  %1361 = vmatpush.msrb.mxu3 %v2839_v19  ;;  %1344 = vmatpush.msra.mxu1 %v2860_v22  ;;  %v1050_v19 = vmul.f32 %v1048_v46, %v1022_v8  ;;  %v3400_v8 = vld [vmem:[%s3675_s2 + $0x8] sm:$0xff] }
 0x40f   : > { %2551 = vpow2.f32 %v1051_v49 }
 0x410   : > { %1362 = vmatpush.msrb.mxu3 %v2844_v20  ;;  %1345 = vmatpush.msra.mxu1 %v2867_v23 }
 0x412   : > { %1363 = vmatpush.msrb.mxu3 %v2851_v21  ;;  %1346 = vmatpush.msra.mxu1 %v2873_v24  ;;  %v1053_v21 = vmul.f32 1.442695, %v1050_v19 }
 0x413   : > { %v2548_v43 = vpop.eup %2547 }
 0x414   : > { %v2550_v58 = vpop.eup %2549  ;;  %v1029_v61 = vmul.f32 1.0614054, %v2548_v43  ;;  %1364 = vmatpush.msrb.mxu3 %v2860_v22  ;;  %1347 = vmatpush.msra.mxu1 %v2879_v25  ;;  %2553 = vpow2.f32 %v1053_v21  ;;  %v2525_v21 = vld [vmem:[%s3674_s1 + $0x2f0] sm:$0xf0] }
 0x415   : > { %v1030_v47 = vmul.f32 1.0614054, %v2550_v58  ;;  %v2552_v56 = vpop.eup %2551 }
 0x416   : > { %v1031_v44 = vadd.f32 -1.4531521, %v1029_v61  ;;  %1365 = vmatpush.msrb.mxu3 %v2867_v23  ;;  %1348 = vmatpush.msra.mxu1 %v2888_v26 }
 0x417   : > { %v1032_v16 = vadd.f32 -1.4531521, %v1030_v47 }
 0x418   : > { %v1033_v17 = vmul.f32 %v2548_v43, %v1031_v44  ;;  %1366 = vmatpush.msrb.mxu3 %v2873_v24  ;;  %1349 = vmatpush.msra.mxu1 %v2895_v27 }
 0x419   : > { %v1034_v18 = vmul.f32 %v2550_v58, %v1032_v16 }
 0x41a   : > { %v1035_v20 = vadd.f32 1.4214138, %v1033_v17  ;;  %1367 = vmatpush.msrb.mxu3 %v2879_v25  ;;  %1350 = vmatpush.msra.mxu1 %v2902_v28 }
 0x41b   : > { %v1036_v42 = vadd.f32 1.4214138, %v1034_v18 }
 0x41c   : > { %v1037_v52 = vmul.f32 %v2548_v43, %v1035_v20  ;;  %1368 = vmatpush.msrb.mxu3 %v2888_v26  ;;  %1351 = vmatpush.msra.mxu1 %v2909_v29  ;;  %v2554_v26 = vpop.eup %2553 }
 0x41d   : > { %v1038_v48 = vmul.f32 %v2550_v58, %v1036_v42  ;;  %v2411_v42 = vld [vmem:[%s3674_s1 + $0x2e8] sm:$0xf] }
 0x41e   : > { %v1039_v22 = vadd.f32 -0.28449672, %v1037_v52  ;;  %1369 = vmatpush.msrb.mxu3 %v2895_v27  ;;  %1352 = vmatpush.msra.mxu1 %v2916_v31  ;;  %v2524_v52 = vld [vmem:[%s3674_s1 + $0x2ec] sm:$0xf] }
 0x41f   : > { %v1040_v50 = vadd.f32 -0.28449672, %v1038_v48  ;;  %v2412_v48 = vor.u32 %v2525_v21, %v2411_v42  ;;  %v2353_v42 = vld [vmem:[%s3674_s1 + $0x27c] sm:$0xf0]  ;;  %v2359_v21 = vld [vmem:[%s3674_s1 + $0x278] sm:$0xf] }
 0x420   : > { %v1041_v23 = vmul.f32 %v2548_v43, %v1039_v22  ;;  %1370 = vmatpush.msrb.mxu3 %v2902_v28  ;;  %1353 = vmatpush.msra.mxu1 %v2923_v32  ;;  %v2413_v22 = vld [vmem:[%s3674_s1 + $0x2f4] sm:$0xf0] }
 0x421   : > { %v1042_v51 = vmul.f32 %v2550_v58, %v1040_v50  ;;  %v2419_v50 = vld [vmem:[%s3674_s1 + $0x2f0] sm:$0xf] }
 0x422   : > { %v1043_v24 = vadd.f32 0.2548296, %v1041_v23  ;;  %1371 = vmatpush.msrb.mxu3 %v2909_v29  ;;  %1354 = vmatpush.msra.mxu1 %v2929_v33  ;;  %v2526_v23 = vld [vmem:[%s3674_s1 + $0x2f8] sm:$0xf0] }
 0x423   : > { %v1044_v55 = vadd.f32 0.2548296, %v1042_v51 }
 0x424   : > { %v1045_v25 = vmul.f32 %v2548_v43, %v1043_v24  ;;  %1372 = vmatpush.msrb.mxu3 %v2916_v31  ;;  %1355 = vmatpush.msra.mxu1 %v2935_v34  ;;  %v2416_v24 = vor.u32 %v2524_v52, %v2413_v22  ;;  %v2511_v52 = vld [vmem:[%s3674_s1 + $0x280] sm:$0xf0] }
 0x425   : > { %v1046_v57 = vmul.f32 %v2550_v58, %v1044_v55  ;;  %v2420_v55 = vor.u32 %v2526_v23, %v2419_v50  ;;  %v2339_v50 = vld [vmem:[%s3674_s1 + $0x258] sm:$0xf] }
 0x426   : > { %v1055_v62 = vmul.f32 %v2552_v56, %v1045_v25  ;;  %1373 = vmatpush.msrb.mxu3 %v2923_v32  ;;  %v1066_v32 = vmul.f32 0.5, %v3302_v54  ;;  %1356 = vmatpush.msra.mxu1 %v2942_v35  ;;  %v3393_v54 = vld [vmem:[%s3675_s2] sm:$0xff]  ;;  %v2399_v25 = vld [vmem:[%s3674_s1 + $0x2d0] sm:$0xf]  ;;  %v2522_v56 = vld [vmem:[%s3674_s1 + $0x2d8] sm:$0xf0] }
 0x427   : > { %v1056_v0 = vmul.f32 %v2554_v26, %v1046_v57  ;;  %v2521_v57 = vld [vmem:[%s3674_s1 + $0x2d4] sm:$0xf]  ;;  %1639 = vmatpush.bf16.msra.mxu2 %v2416_v24  ;;  %v2507_v24 = vld [vmem:[%s3674_s1 + $0x260] sm:$0xf0] }
 0x428   : > { %v1057_v27 = vsub.f32 1.0, %v1055_v62  ;;  %1374 = vmatpush.msrb.mxu3 %v2929_v33  ;;  %v2400_v62 = vor.u32 %v2522_v56, %v2399_v25  ;;  %v2341_v25 = vld [vmem:[%s3674_s1 + $0x264] sm:$0xf0] }
 0x429   : > { %v1058_v59 = vsub.f32 1.0, %v1056_v0  ;;  %v2401_v0 = vld [vmem:[%s3674_s1 + $0x2dc] sm:$0xf0] }
 0x42a   : > { %v1061_v28 = vsub.f32 0.0, %v1057_v27  ;;  %1375 = vmatpush.msrb.mxu3 %v2935_v34 }
 0x42b   : > { %v1062_v60 = vsub.f32 0.0, %v1058_v59 }
 0x42c   : > { %v1063_v29 = vsel %vm1059_vm9, %v1061_v28, %v1057_v27  ;;  %1376 = vmatpush.msrb.mxu3 %v2942_v35  ;;  %v2407_v27 = vld [vmem:[%s3674_s1 + $0x2d8] sm:$0xf] }
 0x42d   : > { %v1064_v31 = vsel %vm1060_vm10, %v1062_v60, %v1058_v59  ;;  %v1067_v5 = vadd.f32 1.0, %v1063_v29  ;;  %v2523_v59 = vld [vmem:[%s3674_s1 + $0x2e0] sm:$0xf0]  ;;  %v2404_v60 = vor.u32 %v2521_v57, %v2401_v0  ;;  %v2347_v57 = vld [vmem:[%s3674_s1 + $0x260] sm:$0xf] }
 0x42e   : > { %v1068_v6 = vadd.f32 1.0, %v1064_v31  ;;  %v2408_v29 = vor.u32 %v2523_v59, %v2407_v27  ;;  %v2519_v31 = vld [vmem:[%s3674_s1 + $0x2c0] sm:$0xf0]  ;;  %v2340_v27 = vor.u32 %v2507_v24, %v2339_v50  ;;  %v2327_v59 = vld [vmem:[%s3674_s1 + $0x240] sm:$0xf] }
 0x42f   : > { %v3382_v2 = vmul.f32 %v1067_v5, %v1065_v1  ;;  %v2387_v1 = vld [vmem:[%s3674_s1 + $0x2b8] sm:$0xf]  ;;  %v2518_v5 = vld [vmem:[%s3674_s1 + $0x2bc] sm:$0xf]  ;;  %1640 = vmatpush.bf16.msra.mxu2 %v2404_v60 }
 0x430   : > { %v3386_v33 = vmul.f32 %v1068_v6, %v1066_v32  ;;  %v2389_v32 = vld [vmem:[%s3674_s1 + $0x2c4] sm:$0xf0]  ;;  %v2395_v6 = vld [vmem:[%s3674_s1 + $0x2c0] sm:$0xf] }
 0x432   : > { %v1071_v53 = vpack.c.bf16 %v3386_v33, %v3382_v2 }
 0x434   : > { %1241 = vmatmul.bf16.vlgmr.msrb.gmra.mxu1 %v1071_v53  ;;  %1255 = vmatmul.bf16.vlgmr.msra.gmra.mxu3 %v1071_v53 }
 0x435   : > { %1269 = vmatmul.bf16.vlgmr.msrb.gmra.mxu2 %v1071_v53  ;;  %1653 = vmatpush.bf16.msrb.mxu1 %v2420_v55  ;;  %v2520_v53 = vld [vmem:[%s3674_s1 + $0x2c8] sm:$0xf0]  ;;  %v2506_v55 = vld [vmem:[%s3674_s1 + $0x25c] sm:$0xf] }
 0x439   : > { %1654 = vmatpush.bf16.msrb.mxu1 %v2408_v29  ;;  %v2504_v29 = vld [vmem:[%s3674_s1 + $0x248] sm:$0xf0] }
 0x4b1   : > { %v1242_v3 = vpop.f32.mrf.mxu1 }
 0x4b7   : > { %v1256_v13 = vpop.f32.mrf.mxu3 }
 0x4b8   : > { %v1270_v7 = vpop.f32.mrf.mxu2 }
 0x4b9   : > { %v1244_v34 = vpop.f32.mrf.mxu1 }
 0x4ba   : > { %1289 = vmatpush.msra.mxu0 %v1244_v34  ;;  %v2392_v34 = vor.u32 %v2518_v5, %v2389_v32  ;;  %v2329_v5 = vld [vmem:[%s3674_s1 + $0x24c] sm:$0xf0]  ;;  %v2335_v32 = vld [vmem:[%s3674_s1 + $0x248] sm:$0xf] }
 0x4bc   : > { %1290 = vmatpush.msra.mxu0 %v1242_v3  ;;  %1641 = vmatpush.bf16.msra.mxu2 %v2392_v34 }
 0x4bd   : > { %2287 = vmatmul.msk.f32.vlgmr.msra.gmra.mxu0 %vm478_vm0, %v3393_v54 }
 0x4bf   : > { %v1258_v36 = vpop.f32.mrf.mxu3 }
 0x4c0   : > { %v1272_v35 = vpop.f32.mrf.mxu2 }
 0x4c1   : > { %1314 = vmatpush.msrb.mxu0 %v1272_v35  ;;  %v2396_v35 = vor.u32 %v2520_v53, %v2395_v6  ;;  %v2505_v6 = vld [vmem:[%s3674_s1 + $0x250] sm:$0xf0] }
 0x4c3   : > { %1315 = vmatpush.msrb.mxu0 %v1270_v7  ;;  %v2388_v7 = vor.u32 %v2519_v31, %v2387_v1  ;;  %1655 = vmatpush.bf16.msrb.mxu1 %v2396_v35  ;;  %v2503_v1 = vld [vmem:[%s3674_s1 + $0x244] sm:$0xf] }
 0x4c5   : > { %2288 = vmatmul.msk.f32.gmra.mxu0 %vm478_vm0, %v3400_v8 }
 0x4c6   : > { %1625 = vmatpush.bf16.msra.mxu0 %v2412_v48 }
 0x4ca   : > { %1626 = vmatpush.bf16.msra.mxu0 %v2400_v62  ;;  %v2291_v62 = vld [vmem:[%s3677_s4 + $0x2] sm:$0x1] }
 0x4cd   : > { %2289 = vmatmul.msk.f32.vlgmr.msrb.gmra.mxu0 %vm478_vm0, %v3407_v9 }
 0x4ce   : > { %1627 = vmatpush.bf16.msra.mxu0 %v2388_v7  ;;  %v2328_v7 = vor.u32 %v2504_v29, %v2327_v59 }
 0x4d5   : > { %2290 = vmatmul.msk.f32.gmra.mxu0 %vm478_vm0, %v3414_v10 }
 0x53a   : > { %v1292_v11 = vpop.f32.mrf.mxu0 }
 0x53b   : > { %v1298_v30 = vadd.f32 %v1292_v11, %v1256_v13  ;;  %v2375_v11 = vld [vmem:[%s3674_s1 + $0x2a0] sm:$0xf]  ;;  %v2515_v13 = vld [vmem:[%s3674_s1 + $0x2a4] sm:$0xf] }
 0x542   : > { %v1295_v12 = vpop.f32.mrf.mxu0 }
 0x543   : > { %v1299_v37 = vadd.f32 %v1295_v12, %v1258_v36  ;;  %v2516_v12 = vld [vmem:[%s3674_s1 + $0x2a8] sm:$0xf0]  ;;  %v2517_v36 = vld [vmem:[%s3674_s1 + $0x2b0] sm:$0xf0] }
 0x54a   : > { %v1317_v15 = vpop.f32.mrf.mxu0 }
 0x54b   : > { %v3418_v38 = vadd.f32 %v1317_v15, %v1298_v30  ;;  %v2377_v15 = vld [vmem:[%s3674_s1 + $0x2ac] sm:$0xf0]  ;;  %v2383_v30 = vld [vmem:[%s3674_s1 + $0x2a8] sm:$0xf] }
 0x54d   : > { %v1332_v40 = vmul.f32 %v3418_v38, %v3418_v38 }
 0x552   : > { %v1320_v63 = vpop.f32.mrf.mxu0 }
 0x553   : > { %v3420_v39 = vadd.f32 %v1320_v63, %v1299_v37  ;;  %v2376_v37 = vor.u32 %v2516_v12, %v2375_v11  ;;  %v2380_v63 = vor.u32 %v2515_v13, %v2377_v15  ;;  %v2332_v11 = vor.u32 %v2503_v1, %v2329_v5 }
 0x554   : > { %v2336_v12 = vor.u32 %v2505_v6, %v2335_v32  ;;  %v2594_v6 = vld [vmem:[%s3676_s3] sm:$0xff] }
 0x555   : > { %v1325_v41 = vadd.f32 %v3420_v39, %v3418_v38  ;;  %v1333_v4 = vmul.f32 %v3420_v39, %v3420_v39  ;;  %1628 = vmatpush.bf16.msra.mxu0 %v2376_v37  ;;  %1642 = vmatpush.bf16.msra.mxu2 %v2380_v63  ;;  %v2579_v37 = vld [vmem:[%s3676_s3 + $0x78] sm:$0xff] }
 0x557   : > { %v1326_v43 = vrot.slane %v1325_v41, 4  ;;  %v1334_v45 = vadd.f32 %v1333_v4, %v1332_v40  ;;  %v2384_v40 = vor.u32 %v2517_v36, %v2383_v30  ;;  %v2513_v4 = vld [vmem:[%s3674_s1 + $0x290] sm:$0xf0] }
 0x559   : > { %v1327_v58 = vadd.f32 %v1326_v43, %v1325_v41  ;;  %v1335_v46 = vrot.slane %v1334_v45, 4  ;;  %v2363_v41 = vld [vmem:[%s3674_s1 + $0x288] sm:$0xf]  ;;  %v2512_v43 = vld [vmem:[%s3674_s1 + $0x28c] sm:$0xf]  ;;  %1656 = vmatpush.bf16.msrb.mxu1 %v2384_v40  ;;  %v2580_v40 = vld [vmem:[%s3676_s3 + $0x70] sm:$0xff] }
 0x55b   : > { %v1328_v61 = vrot.slane %v1327_v58, 2  ;;  %v1336_v47 = vadd.f32 %v1335_v46, %v1334_v45  ;;  %v2365_v45 = vld [vmem:[%s3674_s1 + $0x294] sm:$0xf0]  ;;  %v2514_v46 = vld [vmem:[%s3674_s1 + $0x298] sm:$0xf0] }
 0x55d   : > { %v1329_v44 = vadd.f32 %v1328_v61, %v1327_v58  ;;  %v1337_v14 = vrot.slane %v1336_v47, 2  ;;  %v2371_v58 = vld [vmem:[%s3674_s1 + $0x290] sm:$0xf] }
 0x55f   : > { %v1330_v16 = vrot.slane %v1329_v44, 1  ;;  %v1338_v19 = vadd.f32 %v1337_v14, %v1336_v47  ;;  %v2368_v14 = vor.u32 %v2512_v43, %v2365_v45  ;;  %v2582_v45 = vld [vmem:[%s3676_s3 + $0x60] sm:$0xff] }
 0x561   : > { %v1331_v17 = vadd.f32 %v1330_v16, %v1329_v44  ;;  %v1339_v18 = vrot.slane %v1338_v19, 1  ;;  %v2364_v44 = vor.u32 %v2513_v4, %v2363_v41  ;;  %v2372_v16 = vor.u32 %v2514_v46, %v2371_v58  ;;  %1643 = vmatpush.bf16.msra.mxu2 %v2368_v14  ;;  %v2581_v41 = vld [vmem:[%s3676_s3 + $0x68] sm:$0xff]  ;;  %v2584_v14 = vld [vmem:[%s3676_s3 + $0x50] sm:$0xff] }
 0x563   : > { %1357 = vmatmul.f32.vlgmr.msra.gmra.mxu1 %v1331_v17  ;;  %v1340_v20 = vadd.f32 %v1339_v18, %v1338_v19  ;;  %v2351_v19 = vld [vmem:[%s3674_s1 + $0x270] sm:$0xf]  ;;  %v2510_v17 = vld [vmem:[%s3674_s1 + $0x278] sm:$0xf0]  ;;  %v2509_v18 = vld [vmem:[%s3674_s1 + $0x274] sm:$0xf]  ;;  %1629 = vmatpush.bf16.msra.mxu0 %v2364_v44 }
 0x564   : > { %v2352_v22 = vor.u32 %v2510_v17, %v2351_v19  ;;  %1657 = vmatpush.bf16.msrb.mxu1 %v2372_v16  ;;  %v2356_v23 = vor.u32 %v2509_v18, %v2353_v42  ;;  %v2585_v16 = vld [vmem:[%s3676_s3 + $0x48] sm:$0xff]  ;;  %v2586_v19 = vld [vmem:[%s3676_s3 + $0x40] sm:$0xff]  ;;  %v2587_v17 = vld [vmem:[%s3676_s3 + $0x38] sm:$0xff] }
 0x565   : > { %1377 = vmatmul.f32.vlgmr.msrb.gmra.mxu3 %v1340_v20 }
 0x566   : > { %1644 = vmatpush.bf16.msra.mxu2 %v2356_v23  ;;  %v2589_v23 = vld [vmem:[%s3676_s3 + $0x28] sm:$0xff] }
 0x567   : > { %1630 = vmatpush.bf16.msra.mxu0 %v2352_v22 }
 0x56b   : > { %1631 = vmatpush.bf16.msra.mxu0 %v2340_v27 }
 0x56f   : > { %1632 = vmatpush.bf16.msra.mxu0 %v2328_v7 }
 0x573   : > { %1733 = vmatpush.msrb.mxu0 %v2579_v37 }
 0x575   : > { %1734 = vmatpush.msrb.mxu0 %v2580_v40 }
 0x577   : > { %1735 = vmatpush.msrb.mxu0 %v2581_v41 }
 0x579   : > { %1736 = vmatpush.msrb.mxu0 %v2582_v45 }
 0x5e0   : > { %v3428_v49 = vpop.f32.mrf.mxu1 }
 0x5e1   : > { %v1381_v51 = vmul.f32 %v3428_v49, %v3428_v49 }
 0x5e8   : > { %v1378_v26 = vpop.f32.mrf.mxu3 }
 0x5e9   : > { %v1382_v28 = vsub.f32 %v1378_v26, %v1381_v51  ;;  %v2360_v51 = vor.u32 %v2511_v52, %v2359_v21  ;;  %v2508_v26 = vld [vmem:[%s3674_s1 + $0x268] sm:$0xf0] }
 0x5ea   : > { %v2348_v60 = vor.u32 %v2508_v26, %v2347_v57 }
 0x5eb   : > { %v1385_v3 = vadd.f32 1e-05, %v1382_v28  ;;  %1658 = vmatpush.bf16.msrb.mxu1 %v2360_v51  ;;  %v2344_v28 = vor.u32 %v2506_v55, %v2341_v25 }
 0x5ed   : > { %2555 = vrsqrt.f32 %v1385_v3  ;;  %vm1392_vm12 = vweird.f32 %v1385_v3  ;;  %1645 = vmatpush.bf16.msra.mxu2 %v2344_v28 }
 0x5ef   : > { %1659 = vmatpush.bf16.msrb.mxu1 %v2348_v60  ;;  %v2592_v60 = vld [vmem:[%s3676_s3 + $0x10] sm:$0xff] }
 0x5f1   : > { %1646 = vmatpush.bf16.msra.mxu2 %v2332_v11 }
 0x5f3   : > { %v2556_v61 = vpop.eup %2555  ;;  %1660 = vmatpush.bf16.msrb.mxu1 %v2336_v12 }
 0x5f4   : > { %v1387_v47 = vmul.f32 %v2556_v61, %v1385_v3  ;;  %vm1393_vm11 = vweird.f32 %v2556_v61  ;;  %v2292_v3 = vld [vmem:[%s3678_s5 + $0x2] sm:$0x1] }
 0x5f5   : > { %vm1394_vm13 = vmor %vm1392_vm12, %vm1393_vm11  ;;  %1753 = vmatpush.msrb.mxu2 %v2579_v37 }
 0x5f6   : > { %v1388_v20 = vmul.f32 %v2556_v61, %v1387_v47 }
 0x5f7   : > { %1754 = vmatpush.msrb.mxu2 %v2580_v40 }
 0x5f8   : > { %v1389_v48 = vmul.f32 0.5, %v1388_v20 }
 0x5f9   : > { %1755 = vmatpush.msrb.mxu2 %v2581_v41 }
 0x5fa   : > { %v1390_v56 = vsub.f32 1.5, %v1389_v48  ;;  %v2588_v48 = vld [vmem:[%s3676_s3 + $0x30] sm:$0xff] }
 0x5fb   : > { %1756 = vmatpush.msrb.mxu2 %v2582_v45 }
 0x5fc   : > { %v1391_v0 = vmul.f32 %v2556_v61, %v1390_v56  ;;  %v2590_v56 = vld [vmem:[%s3676_s3 + $0x20] sm:$0xff] }
 0x5fe   : > { %v1395_v31 = vsel %vm1394_vm13, %v2556_v61, %v1391_v0  ;;  %v2583_v61 = vld [vmem:[%s3676_s3 + $0x58] sm:$0xff] }
 0x5ff   : > { %v1396_v53 = vmul.f32 %v2291_v62, %v1395_v31  ;;  %1737 = vmatpush.msrb.mxu0 %v2583_v61  ;;  %1757 = vmatpush.msrb.mxu2 %v2583_v61  ;;  %v2591_v62 = vld [vmem:[%s3676_s3 + $0x18] sm:$0xff]  ;;  %v2593_v31 = vld [vmem:[%s3676_s3 + $0x8] sm:$0xff] }
 0x601   : > { %v1399_v34 = vmul.f32 %v1396_v53, %v3428_v49  ;;  %v1402_v35 = vperm.slane %v1396_v53, 0  ;;  %1738 = vmatpush.msrb.mxu0 %v2584_v14  ;;  %1758 = vmatpush.msrb.mxu2 %v2584_v14 }
 0x603   : > { %v1400_v13 = vsub.f32 %v2292_v3, %v1399_v34  ;;  %v1404_v15 = vmul.f32 %v1402_v35, %v3418_v38  ;;  %v1405_v30 = vmul.f32 %v1402_v35, %v3420_v39  ;;  %1739 = vmatpush.msrb.mxu0 %v2585_v16  ;;  %1759 = vmatpush.msrb.mxu2 %v2585_v16 }
 0x605   : > { %v1407_v36 = vperm.slane %v1400_v13, 0  ;;  %1740 = vmatpush.msrb.mxu0 %v2586_v19  ;;  %1760 = vmatpush.msrb.mxu2 %v2586_v19 }
 0x607   : > { %v3588_v49 = vadd.f32 %v1407_v36, %v1404_v15  ;;  %v3590_v63 = vadd.f32 %v1407_v36, %v1405_v30  ;;  %1741 = vmatpush.msrb.mxu0 %v2587_v17  ;;  %1761 = vmatpush.msrb.mxu2 %v2587_v17 }
 0x609   : > { %v3596_v38 = vmul.f32 0.70710677, %v3588_v49  ;;  %v3599_v39 = vmul.f32 0.70710677, %v3590_v63  ;;  %1742 = vmatpush.msrb.mxu0 %v2588_v48  ;;  %1762 = vmatpush.msrb.mxu2 %v2588_v48 }
 0x60b   : > { %v1413_v4 = vand.u32 2147483647, %v3596_v38  ;;  %v1414_v43 = vand.u32 2147483647, %v3599_v39  ;;  %1743 = vmatpush.msrb.mxu0 %v2589_v23  ;;  %1763 = vmatpush.msrb.mxu2 %v2589_v23  ;;  %vm1451_vm14 = vcmp.lt.f32.partialorder %v3596_v38, 0.0  ;;  %vm1452_vm15 = vcmp.lt.f32.partialorder %v3599_v39, 0.0 }
 0x60d   : > { %v1415_v58 = vmul.f32 0.3275911, %v1413_v4  ;;  %v1416_v46 = vmul.f32 0.3275911, %v1414_v43  ;;  %v1439_v20 = vsub.f32 0.0, %v1413_v4  ;;  %v1440_v52 = vsub.f32 0.0, %v1414_v43  ;;  %1744 = vmatpush.msrb.mxu0 %v2590_v56  ;;  %1764 = vmatpush.msrb.mxu2 %v2590_v56 }
 0x60f   : > { %v1417_v47 = vadd.f32 1.0, %v1415_v58  ;;  %v1418_v44 = vadd.f32 1.0, %v1416_v46  ;;  %v1441_v24 = vmul.f32 %v1439_v20, %v1413_v4  ;;  %v1442_v25 = vmul.f32 %v1440_v52, %v1414_v43  ;;  %1745 = vmatpush.msrb.mxu0 %v2591_v62  ;;  %1765 = vmatpush.msrb.mxu2 %v2591_v62 }
 0x610   : > { %v1457_v43 = vmul.f32 0.5, %v3588_v49  ;;  %v1458_v58 = vmul.f32 0.5, %v3590_v63 }
 0x611   : > { %2557 = vrcp.f32 %v1417_v47  ;;  %v1443_v27 = vmul.f32 1.442695, %v1441_v24  ;;  %v1445_v28 = vmul.f32 1.442695, %v1442_v25  ;;  %1746 = vmatpush.msrb.mxu0 %v2592_v60  ;;  %1766 = vmatpush.msrb.mxu2 %v2592_v60 }
 0x612   : > { %2559 = vrcp.f32 %v1418_v44 }
 0x613   : > { %1747 = vmatpush.msrb.mxu0 %v2593_v31  ;;  %1767 = vmatpush.msrb.mxu2 %v2593_v31  ;;  %2561 = vpow2.f32 %v1443_v27 }
 0x614   : > { %2563 = vpow2.f32 %v1445_v28 }
 0x615   : > { %1748 = vmatpush.msrb.mxu0 %v2594_v6  ;;  %1768 = vmatpush.msrb.mxu2 %v2594_v6 }
 0x617   : > { %v2558_v18 = vpop.eup %2557 }
 0x618   : > { %v2560_v42 = vpop.eup %2559  ;;  %v1421_v21 = vmul.f32 1.0614054, %v2558_v18 }
 0x619   : > { %v1422_v22 = vmul.f32 1.0614054, %v2560_v42  ;;  %v2562_v35 = vpop.eup %2561 }
 0x61a   : > { %v1423_v50 = vadd.f32 -1.4531521, %v1421_v21  ;;  %v2564_v12 = vpop.eup %2563 }
 0x61b   : > { %v1424_v51 = vadd.f32 -1.4531521, %v1422_v22 }
 0x61c   : > { %v1425_v55 = vmul.f32 %v2558_v18, %v1423_v50 }
 0x61d   : > { %v1426_v57 = vmul.f32 %v2560_v42, %v1424_v51 }
 0x61e   : > { %v1427_v26 = vadd.f32 1.4214138, %v1425_v55 }
 0x61f   : > { %v1428_v0 = vadd.f32 1.4214138, %v1426_v57 }
 0x620   : > { %v1429_v59 = vmul.f32 %v2558_v18, %v1427_v26 }
 0x621   : > { %v1430_v29 = vmul.f32 %v2560_v42, %v1428_v0 }
 0x622   : > { %v1431_v1 = vadd.f32 -0.28449672, %v1429_v59 }
 0x623   : > { %v1432_v5 = vadd.f32 -0.28449672, %v1430_v29 }
 0x624   : > { %v1433_v32 = vmul.f32 %v2558_v18, %v1431_v1 }
 0x625   : > { %v1434_v53 = vmul.f32 %v2560_v42, %v1432_v5 }
 0x626   : > { %v1435_v3 = vadd.f32 0.2548296, %v1433_v32 }
 0x627   : > { %v1436_v7 = vadd.f32 0.2548296, %v1434_v53  ;;  %v2425_v53 = vld [vmem:[%s3677_s4 + $0x3] sm:$0x1] }
 0x628   : > { %v1437_v34 = vmul.f32 %v2558_v18, %v1435_v3 }
 0x629   : > { %v1438_v11 = vmul.f32 %v2560_v42, %v1436_v7 }
 0x62a   : > { %v1447_v13 = vmul.f32 %v2562_v35, %v1437_v34  ;;  %v2426_v35 = vld [vmem:[%s3678_s5 + $0x3] sm:$0x1] }
 0x62b   : > { %v1448_v15 = vmul.f32 %v2564_v12, %v1438_v11 }
 0x62c   : > { %v1449_v30 = vsub.f32 1.0, %v1447_v13 }
 0x62d   : > { %v1450_v36 = vsub.f32 1.0, %v1448_v15 }
 0x62e   : > { %v1453_v37 = vsub.f32 0.0, %v1449_v30 }
 0x62f   : > { %v1454_v40 = vsub.f32 0.0, %v1450_v36 }
 0x630   : > { %v1455_v41 = vsel %vm1451_vm14, %v1453_v37, %v1449_v30 }
 0x631   : > { %v1456_v4 = vsel %vm1452_vm15, %v1454_v40, %v1450_v36  ;;  %v1459_v45 = vadd.f32 1.0, %v1455_v41 }
 0x632   : > { %v1460_v46 = vadd.f32 1.0, %v1456_v4 }
 0x633   : > { %v1461_v61 = vmul.f32 %v1459_v45, %v1457_v43 }
 0x634   : > { %v1462_v47 = vmul.f32 %v1460_v46, %v1458_v58 }
 0x636   : > { %v1463_v44 = vpack.c.bf16 %v1462_v47, %v1461_v61 }
 0x638   : > { %1633 = vmatmul.bf16.vlgmr.msra.gmra.mxu0 %v1463_v44  ;;  %1647 = vmatmul.bf16.vlgmr.msra.gmra.mxu2 %v1463_v44 }
 0x639   : > { %1661 = vmatmul.bf16.vlgmr.msrb.gmra.mxu1 %v1463_v44 }
 0x6b5   : > { %v1634_v14 = vpop.f32.mrf.mxu0 }
 0x6b6   : > { %v1662_v16 = vpop.f32.mrf.mxu1 }
 0x6bb   : > { %v1648_v19 = vpop.f32.mrf.mxu2 }
 0x6bd   : > { %v1636_v38 = vpop.f32.mrf.mxu0 }
 0x6be   : > { %1681 = vmatpush.msra.mxu3 %v1636_v38  ;;  %v1664_v39 = vpop.f32.mrf.mxu1 }
 0x6c0   : > { %1682 = vmatpush.msra.mxu3 %v1634_v14 }
 0x6c1   : > { %2421 = vmatmul.msk.f32.vlgmr.msra.gmra.mxu3 %vm478_vm0, %v3393_v54 }
 0x6c2   : > { %1706 = vmatpush.msrb.mxu3 %v1664_v39 }
 0x6c3   : > { %v1650_v20 = vpop.f32.mrf.mxu2 }
 0x6c4   : > { %1707 = vmatpush.msrb.mxu3 %v1662_v16 }
 0x6c9   : > { %2422 = vmatmul.msk.f32.gmra.mxu3 %vm478_vm0, %v3400_v8 }
 0x6d1   : > { %2423 = vmatmul.msk.f32.vlgmr.msrb.gmra.mxu3 %vm478_vm0, %v3407_v9 }
 0x6d9   : > { %2424 = vmatmul.msk.f32.gmra.mxu3 %vm478_vm0, %v3414_v10 }
 0x744   : > { %v1684_v49 = vpop.f32.mrf.mxu3 }
 0x745   : > { %v1690_v18 = vadd.f32 %v1684_v49, %v1648_v19 }
 0x74c   : > { %v1687_v63 = vpop.f32.mrf.mxu3 }
 0x74d   : > { %v1691_v42 = vadd.f32 %v1687_v63, %v1650_v20 }
 0x754   : > { %v1709_v17 = vpop.f32.mrf.mxu3 }
 0x755   : > { %v1715_v21 = vadd.f32 %v1709_v17, %v1690_v18 }
 0x757   : > { %v1724_v48 = vmul.f32 %v1715_v21, %v1715_v21 }
 0x75c   : > { %v1712_v54 = vpop.f32.mrf.mxu3 }
 0x75d   : > { %v1716_v52 = vadd.f32 %v1712_v54, %v1691_v42 }
 0x75f   : > { %v1717_v22 = vadd.f32 %v1716_v52, %v1715_v21  ;;  %v1725_v50 = vmul.f32 %v1716_v52, %v1716_v52 }
 0x761   : > { %v1718_v8 = vrot.slane %v1717_v22, 4  ;;  %v1726_v23 = vadd.f32 %v1725_v50, %v1724_v48 }
 0x763   : > { %v1719_v51 = vadd.f32 %v1718_v8, %v1717_v22  ;;  %v1727_v9 = vrot.slane %v1726_v23, 4 }
 0x765   : > { %v1720_v24 = vrot.slane %v1719_v51, 2  ;;  %v1728_v55 = vadd.f32 %v1727_v9, %v1726_v23 }
 0x767   : > { %v1721_v10 = vadd.f32 %v1720_v24, %v1719_v51  ;;  %v1729_v25 = vrot.slane %v1728_v55, 2 }
 0x769   : > { %v1722_v56 = vrot.slane %v1721_v10, 1  ;;  %v1730_v57 = vadd.f32 %v1729_v25, %v1728_v55 }
 0x76b   : > { %v1723_v26 = vadd.f32 %v1722_v56, %v1721_v10  ;;  %v1731_v62 = vrot.slane %v1730_v57, 1 }
 0x76d   : > { %1749 = vmatmul.f32.vlgmr.msrb.gmra.mxu0 %v1723_v26  ;;  %v1732_v0 = vadd.f32 %v1731_v62, %v1730_v57 }
 0x76f   : > { %1769 = vmatmul.f32.vlgmr.msrb.gmra.mxu2 %v1732_v0 }
 0x7ea   : > { %v1750_v27 = vpop.f32.mrf.mxu0 }
 0x7eb   : > { %v1773_v59 = vmul.f32 %v1750_v27, %v1750_v27 }
 0x7f2   : > { %v1770_v28 = vpop.f32.mrf.mxu2 }
 0x7f3   : > { %v1774_v60 = vsub.f32 %v1770_v28, %v1773_v59 }
 0x7f5   : > { %v1777_v29 = vadd.f32 1e-05, %v1774_v60 }
 0x7f7   : > { %2565 = vrsqrt.f32 %v1777_v29  ;;  %vm1784_vm1 = vweird.f32 %v1777_v29 }
 0x7fd   : > { %v2566_v1 = vpop.eup %2565 }
 0x7fe   : > { %v1779_v31 = vmul.f32 %v2566_v1, %v1777_v29  ;;  %vm1785_vm0 = vweird.f32 %v2566_v1 }
 0x7ff   : > { %vm1786_vm2 = vmor %vm1784_vm1, %vm1785_vm0 }
 0x800   : > { %v1780_v5 = vmul.f32 %v2566_v1, %v1779_v31 }
 0x802   : > { %v1781_v32 = vmul.f32 0.5, %v1780_v5 }
 0x804   : > { %v1782_v6 = vsub.f32 1.5, %v1781_v32 }
 0x806   : > { %v1783_v3 = vmul.f32 %v2566_v1, %v1782_v6 }
 0x808   : > { %v1787_v7 = vsel %vm1786_vm2, %v2566_v1, %v1783_v3 }
 0x809   : > { %v1788_v34 = vmul.f32 %v2425_v53, %v1787_v7 }
 0x80b   : > { %v1791_v11 = vmul.f32 %v1788_v34, %v1750_v27  ;;  %v1794_v12 = vperm.slane %v1788_v34, 0 }
 0x80d   : > { %v1792_v13 = vsub.f32 %v2426_v35, %v1791_v11  ;;  %v1796_v15 = vmul.f32 %v1794_v12, %v1715_v21  ;;  %v1797_v30 = vmul.f32 %v1794_v12, %v1716_v52 }
 0x80f   : > { %v1799_v36 = vperm.slane %v1792_v13, 0 }
 0x811   : > { %v1801_v37 = vadd.f32 %v1799_v36, %v1796_v15  ;;  %v1802_v40 = vadd.f32 %v1799_v36, %v1797_v30 }
 0x813   : > { %v1803_v41 = vadd.f32 %v1801_v37, %v3382_v2  ;;  %v1804_v4 = vadd.f32 %v1802_v40, %v3386_v33 }
 0x815   : > { %v1805_v43 = vmul.f32 0.70710677, %v1803_v41  ;;  %v1806_v45 = vmul.f32 0.70710677, %v1804_v4  ;;  %v1851_v1 = vmul.f32 0.5, %v1803_v41  ;;  %v1852_v5 = vmul.f32 0.5, %v1804_v4 }
 0x817   : > { %v1807_v58 = vand.u32 2147483647, %v1805_v43  ;;  %v1808_v46 = vand.u32 2147483647, %v1806_v45  ;;  %vm1845_vm3 = vcmp.lt.f32.partialorder %v1805_v43, 0.0  ;;  %vm1846_vm4 = vcmp.lt.f32.partialorder %v1806_v45, 0.0 }
 0x819   : > { %v1809_v61 = vmul.f32 0.3275911, %v1807_v58  ;;  %v1810_v47 = vmul.f32 0.3275911, %v1808_v46  ;;  %v1833_v38 = vsub.f32 0.0, %v1807_v58  ;;  %v1834_v63 = vsub.f32 0.0, %v1808_v46 }
 0x81b   : > { %v1811_v44 = vadd.f32 1.0, %v1809_v61  ;;  %v1812_v14 = vadd.f32 1.0, %v1810_v47  ;;  %v1835_v18 = vmul.f32 %v1833_v38, %v1807_v58  ;;  %v1836_v20 = vmul.f32 %v1834_v63, %v1808_v46 }
 0x81d   : > { %2567 = vrcp.f32 %v1811_v44  ;;  %v1837_v52 = vmul.f32 1.442695, %v1835_v18  ;;  %v1839_v22 = vmul.f32 1.442695, %v1836_v20 }
 0x81e   : > { %2569 = vrcp.f32 %v1812_v14 }
 0x81f   : > { %2571 = vpow2.f32 %v1837_v52 }
 0x820   : > { %2573 = vpow2.f32 %v1839_v22 }
 0x823   : > { %v2568_v16 = vpop.eup %2567 }
 0x824   : > { %v2570_v39 = vpop.eup %2569  ;;  %v1815_v49 = vmul.f32 1.0614054, %v2568_v16 }
 0x825   : > { %v1816_v19 = vmul.f32 1.0614054, %v2570_v39  ;;  %v2572_v25 = vpop.eup %2571 }
 0x826   : > { %v1817_v17 = vadd.f32 -1.4531521, %v1815_v49  ;;  %v2574_v57 = vpop.eup %2573 }
 0x827   : > { %v1818_v2 = vadd.f32 -1.4531521, %v1816_v19 }
 0x828   : > { %v1819_v33 = vmul.f32 %v2568_v16, %v1817_v17 }
 0x829   : > { %v1820_v42 = vmul.f32 %v2570_v39, %v1818_v2 }
 0x82a   : > { %v1821_v21 = vadd.f32 1.4214138, %v1819_v33 }
 0x82b   : > { %v1822_v54 = vadd.f32 1.4214138, %v1820_v42 }
 0x82c   : > { %v1823_v48 = vmul.f32 %v2568_v16, %v1821_v21 }
 0x82d   : > { %v1824_v50 = vmul.f32 %v2570_v39, %v1822_v54 }
 0x82e   : > { %v1825_v8 = vadd.f32 -0.28449672, %v1823_v48 }
 0x82f   : > { %v1826_v23 = vadd.f32 -0.28449672, %v1824_v50 }
 0x830   : > { %v1827_v51 = vmul.f32 %v2568_v16, %v1825_v8 }
 0x831   : > { %v1828_v9 = vmul.f32 %v2570_v39, %v1826_v23 }
 0x832   : > { %v1829_v24 = vadd.f32 0.2548296, %v1827_v51 }
 0x833   : > { %v1830_v55 = vadd.f32 0.2548296, %v1828_v9 }
 0x834   : > { %v1831_v10 = vmul.f32 %v2568_v16, %v1829_v24 }
 0x835   : > { %v1832_v56 = vmul.f32 %v2570_v39, %v1830_v55 }
 0x836   : > { %v1841_v26 = vmul.f32 %v2572_v25, %v1831_v10 }
 0x837   : > { %v1842_v62 = vmul.f32 %v2574_v57, %v1832_v56 }
 0x838   : > { %v1843_v0 = vsub.f32 1.0, %v1841_v26 }
 0x839   : > { %v1844_v27 = vsub.f32 1.0, %v1842_v62 }
 0x83a   : > { %v1847_v59 = vsub.f32 0.0, %v1843_v0 }
 0x83b   : > { %v1848_v28 = vsub.f32 0.0, %v1844_v27 }
 0x83c   : > { %v1849_v60 = vsel %vm1845_vm3, %v1847_v59, %v1843_v0 }
 0x83d   : > { %v1850_v29 = vsel %vm1846_vm4, %v1848_v28, %v1844_v27  ;;  %v1853_v31 = vadd.f32 1.0, %v1849_v60 }
 0x83e   : > { %v1854_v32 = vadd.f32 1.0, %v1850_v29 }
 0x83f   : > { %v1855_v6 = vmul.f32 %v1853_v31, %v1851_v1 }
 0x840   : > { %v1856_v53 = vmul.f32 %v1854_v32, %v1852_v5 }
 0x841   : > { %1857 = vst [vmem:[%s251_s20] sm:$0xff] %v1855_v6 }
 0x842   : > { %1858 = vst [vmem:[%s251_s20 + $0x8] sm:$0xff] %v1856_v53 }
 0x843 PF: > { %s16_s21 = sadd.s32 1, %s2601_s21  }
 0x844   : > { %p13_p4 = scmp.ge.s32.totalorder %s16_s21, 4  }
 0x846   :  { %15 = sbr.rel (!%p13_p4) target bundleno = 1 (0x1), region = 84 }

</bundles_post_ra>
